<compile_context>
chip_gen: v6e
topology: v6e:2x2x1
jax: 0.10.0
libtpu: 0.0.40
codegen_flags: <defaults>
</compile_context>

<pallas_src>
import math

import jax
import jax.numpy as jnp
from jax.experimental import pallas as pl
from jax.experimental.pallas import tpu as pltpu

BN_EPS = 1e-5
VMEM_SPEC = pl.BlockSpec(memory_space=pltpu.MemorySpace.VMEM)


# ------------------------------ Pallas kernel ------------------------------ #

def _make_block_kernel(N, Ho, Wo, Cin, planes, gather_conv1, has_down):
    """Fully fused BasicBlock kernel.

    Ref order:
      conv1_in : (N, Ho+2, Wo+2, Cin) f32  padded relu(bn1-shifted x)      [gather_conv1]
                 (M, 9*Cin)           bf16 im2col patches (stride-2 path)  [otherwise]
      w1       : (9*Cin, planes) bf16   -- BN1 scale folded into the rows
      g2, b2   : (1, planes) f32        -- bn2 gamma / beta
      w2       : (9*planes, planes) bf16
      residual : (M, Cin) bf16 + (Cin, planes) bf16   [has_down: 1x1-conv path]
                 (M, planes) f32                      [identity path]
      out      : (M, planes) f32
      pad2     : VMEM scratch (N, Ho+2, Wo+2, planes) f32
    """
    M = N * Ho * Wo
    f32 = jnp.float32
    bf16 = jnp.bfloat16

    def kernel(*refs):
        it = iter(refs)
        c1_ref = next(it)
        w1_ref = next(it)
        g2_ref = next(it)
        b2_ref = next(it)
        w2_ref = next(it)
        if has_down:
            rp_ref = next(it)
            wd_ref = next(it)
        else:
            res_ref = next(it)
        out_ref = next(it)
        pad2_ref = next(it)

        # ---- conv1: BN1 + ReLU already folded into the input glue / weight rows ----
        if gather_conv1:
            acc1 = jnp.zeros((M, planes), f32)
            for t in range(9):
                dy, dx = divmod(t, 3)
                win = c1_ref[:, dy:dy + Ho, dx:dx + Wo, :].reshape(M, Cin)
                acc1 = acc1 + jnp.dot(win.astype(bf16),
                                      w1_ref[t * Cin:(t + 1) * Cin, :],
                                      preferred_element_type=f32)
        else:
            acc1 = jnp.dot(c1_ref[...], w1_ref[...], preferred_element_type=f32)

        # ---- BN2 (training-mode batch statistics) + ReLU, all in f32 ----
        mean = jnp.sum(acc1, axis=0, keepdims=True) * (1.0 / M)
        var = jnp.sum(acc1 * acc1, axis=0, keepdims=True) * (1.0 / M) - mean * mean
        a2 = g2_ref[...] * jax.lax.rsqrt(var + BN_EPS)
        b2 = b2_ref[...] - a2 * mean
        act2 = jnp.maximum(acc1 * a2 + b2, 0.0)

        # ---- conv2: zero-pad act2 into the VMEM scratch, 9-tap gather + matmul ----
        pad2_ref[...] = jnp.zeros(pad2_ref.shape, pad2_ref.dtype)
        pad2_ref[:, 1:Ho + 1, 1:Wo + 1, :] = act2.reshape(N, Ho, Wo, planes)
        acc2 = jnp.zeros((M, planes), f32)
        for t in range(9):
            dy, dx = divmod(t, 3)
            win = pad2_ref[:, dy:dy + Ho, dx:dx + Wo, :].reshape(M, planes)
            acc2 = acc2 + jnp.dot(win.astype(bf16),
                                  w2_ref[t * planes:(t + 1) * planes, :],
                                  preferred_element_type=f32)

        # ---- residual add (1x1-conv downsample on the MXU, or identity) ----
        if has_down:
            res = jnp.dot(rp_ref[...], wd_ref[...], preferred_element_type=f32)
        else:
            res = res_ref[...]
        out_ref[...] = acc2 + res

    return kernel


# ------------------------------ wrapper / glue ------------------------------ #

def _weight_matrix(w_oihw):
    """(Cout, Cin, kh, kw) -> (kh*kw*Cin, Cout); rows tap-major (matches gather order)."""
    cout, cin, kh, kw = w_oihw.shape
    return jnp.transpose(w_oihw, (2, 3, 1, 0)).reshape(kh * kw * cin, cout)


def basic_block_forward(params, x_nchw, stride=1):
    """Pre-activation BasicBlock forward (PyTorch semantics, training-mode BN),
    realized as ONE fused Pallas TPU kernel."""
    x = jnp.transpose(x_nchw, (0, 2, 3, 1)).astype(jnp.float32)        # NCHW -> NHWC
    N, H, W, Cin = x.shape
    planes = params["conv1_w"].shape[0]
    has_down = "down_w" in params
    if not has_down:
        assert stride == 1 and Cin == planes, "identity residual needs matching shapes"
    Ho = (H + 2 - 3) // stride + 1
    Wo = (W + 2 - 3) // stride + 1
    M = N * Ho * Wo

    # BN1 batch stats: shift + ReLU live in the XLA glue, scale is folded into W1 rows
    # (requires a1 > 0, true for the fresh gamma == 1 init).
    mean1 = jnp.mean(x, axis=(0, 1, 2))
    var1 = jnp.mean(x * x, axis=(0, 1, 2)) - mean1 * mean1
    a1 = params["bn1_g"] * jax.lax.rsqrt(var1 + BN_EPS)
    b1 = params["bn1_b"] - a1 * mean1
    act1 = jnp.maximum(x + b1 / a1, 0.0)                     # a1 * act1 == relu(bn1(x))
    act1p = jnp.pad(act1, ((0, 0), (1, 1), (1, 1), (0, 0)))  # zero pad, matches PyTorch
    w1s = (_weight_matrix(params["conv1_w"]) * jnp.tile(a1, 9)[:, None]).astype(jnp.bfloat16)
    w2m = _weight_matrix(params["conv2_w"]).astype(jnp.bfloat16)

    gather_conv1 = stride == 1
    if gather_conv1:
        conv1_in = act1p                                     # gathered in-kernel (no im2col)
    else:
        # TODO(synk): stride-2 windows are not static VMEM slices; keep wrapper-side
        # bf16 im2col for this (rare) path, as recommended by the perf review.
        cols = [act1p[:, dy:dy + stride * (Ho - 1) + 1:stride,
                      dx:dx + stride * (Wo - 1) + 1:stride, :]
                for dy in range(3) for dx in range(3)]
        conv1_in = jnp.concatenate(cols, axis=-1).reshape(M, 9 * Cin).astype(jnp.bfloat16)

    args = [conv1_in, w1s,
            params["bn2_g"].reshape(1, planes).astype(jnp.float32),
            params["bn2_b"].reshape(1, planes).astype(jnp.float32),
            w2m]
    if has_down:
        rp = x[:, ::stride, ::stride, :].reshape(M, Cin).astype(jnp.bfloat16)
        args += [rp, _weight_matrix(params["down_w"]).astype(jnp.bfloat16)]
    else:
        args += [x.reshape(M, Cin)]

    kernel = _make_block_kernel(N, Ho, Wo, Cin, planes, gather_conv1, has_down)
    # TODO(synk): for large N*H*W, add an M-grid with halo'd gathers ("parallel" so
    # v7x's two TensorCores split it); at this scale a gridless fused call is faster.
    out = pl.pallas_call(
        kernel,
        out_shape=jax.ShapeDtypeStruct((M, planes), jnp.float32),
        in_specs=[VMEM_SPEC] * len(args),
        out_specs=VMEM_SPEC,
        scratch_shapes=[pltpu.VMEM((N, Ho + 2, Wo + 2, planes), jnp.float32)],
    )(*args)

    return jnp.transpose(out.reshape(N, Ho, Wo, planes), (0, 3, 1, 2))   # NHWC -> NCHW


# ------------------------------ reference / init ---------------------------- #

def _reference_forward(params, x_nchw, stride=1):
    """Pure-XLA f32 reference with exact PyTorch BasicBlock (training-mode BN) semantics."""
    def bn(t, g, b):
        m = jnp.mean(t, axis=(0, 2, 3), keepdims=True)
        v = jnp.mean(jnp.square(t - m), axis=(0, 2, 3), keepdims=True)
        return (t - m) * jax.lax.rsqrt(v + BN_EPS) * g.reshape(1, -1, 1, 1) \
               + b.reshape(1, -1, 1, 1)

    def conv(t, w, s, pad):
        return jax.lax.conv_general_dilated(
            t, w, (s, s), [(pad, pad), (pad, pad)],
            dimension_numbers=("NCHW", "OIHW", "NCHW"))

    out = jax.nn.relu(bn(x_nchw, params["bn1_g"], params["bn1_b"]))
    out = conv(out, params["conv1_w"], stride, 1)
    out = jax.nn.relu(bn(out, params["bn2_g"], params["bn2_b"]))
    out = conv(out, params["conv2_w"], 1, 1)
    res = conv(x_nchw, params["down_w"], stride, 0) if "down_w" in params else x_nchw
    return out + res


def _conv_init(key, cout, cin, k):
    std = math.sqrt(2.0 / (k * k * cout))
    return std * jax.random.normal(key, (cout, cin, k, k), dtype=jnp.float32)


def init_block_params(key, inplanes, planes, stride):
    k1, k2, k3 = jax.random.split(key, 3)
    p = {"bn1_g": jnp.ones((inplanes,), jnp.float32),
         "bn1_b": jnp.zeros((inplanes,), jnp.float32),
         "conv1_w": _conv_init(k1, planes, inplanes, 3),
         "bn2_g": jnp.ones((planes,), jnp.float32),
         "bn2_b": jnp.zeros((planes,), jnp.float32),
         "conv2_w": _conv_init(k2, planes, planes, 3)}
    if stride != 1 or inplanes != planes:
        p["down_w"] = _conv_init(k3, planes, inplanes, 1)
    return p


# ----------------------------------- main ----------------------------------- #

if __name__ == "__main__":
    key = jax.random.PRNGKey(0)
    kp1, kp2, kx = jax.random.split(key, 3)
    x = jax.random.normal(kx, (2, 16, 16, 16), dtype=jnp.float32)       # NCHW, like PyTorch

    # 1) BasicBlock(16, 16, stride=1, downsample=None): identity residual.
    p_id = init_block_params(kp1, 16, 16, 1)
    fwd_id = jax.jit(lambda p, xx: basic_block_forward(p, xx, stride=1))
    out_id = fwd_id(p_id, x)
    jax.block_until_ready(out_id)
    assert out_id.shape == (2, 16, 16, 16) and out_id.dtype == jnp.float32

    # 2) BasicBlock(16, 32, stride=2, downsample=1x1 stride-2 conv): projection residual.
    p_dn = init_block_params(kp2, 16, 32, 2)
    fwd_dn = jax.jit(lambda p, xx: basic_block_forward(p, xx, stride=2))
    out_dn = fwd_dn(p_dn, x)
    jax.block_until_ready(out_dn)
    assert out_dn.shape == (2, 32, 8, 8) and out_dn.dtype == jnp.float32

    # Loose-tolerance check vs. the pure-XLA f32 reference (kernel feeds bf16 to the MXU).
    for out, p, s in ((out_id, p_id, 1), (out_dn, p_dn, 2)):
        ref = _reference_forward(p, x, stride=s)
        err = float(jnp.max(jnp.abs(out - ref)))
        scale = float(jnp.max(jnp.abs(ref)))
        assert bool(jnp.all(jnp.isfinite(out))), "non-finite output"
        assert err <= 0.05 * scale + 1e-2, (err, scale)

    print("KERNEL_OK")
</pallas_src>

<mosaic_0001>
module attributes {stable_mosaic.version = 11 : i64} {
  func.func @kernel(%arg0: memref<2x18x18x16xf32, #tpu.memory_space<vmem>>, %arg1: memref<144x16xbf16, #tpu.memory_space<vmem>>, %arg2: memref<1x16xf32, #tpu.memory_space<vmem>>, %arg3: memref<1x16xf32, #tpu.memory_space<vmem>>, %arg4: memref<144x16xbf16, #tpu.memory_space<vmem>>, %arg5: memref<512x16xf32, #tpu.memory_space<vmem>>, %arg6: memref<512x16xf32, #tpu.memory_space<vmem>>, %arg7: memref<2x18x18x16xf32, #tpu.memory_space<vmem>>) attributes {dimension_semantics = [], scalar_prefetch = 0 : i64, scratch_operands = 1 : i64, tpu.core_type = #tpu.core_type<tc>} {
    %cst = arith.constant 0.000000e+00 : f32
    %0 = vector.broadcast %cst : f32 to vector<512x16xf32>
    %c0 = arith.constant 0 : index
    %c0_0 = arith.constant 0 : index
    %c0_1 = arith.constant 0 : index
    %c0_2 = arith.constant 0 : index
    %1 = vector.load %arg0[%c0, %c0_0, %c0_1, %c0_2] : memref<2x18x18x16xf32, #tpu.memory_space<vmem>>, vector<2x16x16x16xf32>
    %2 = vector.shape_cast %1 : vector<2x16x16x16xf32> to vector<512x16xf32>
    %3 = arith.truncf %2 : vector<512x16xf32> to vector<512x16xbf16>
    %c0_3 = arith.constant 0 : index
    %c0_4 = arith.constant 0 : index
    %4 = vector.load %arg1[%c0_3, %c0_4] : memref<144x16xbf16, #tpu.memory_space<vmem>>, vector<16x16xbf16>
    %cst_5 = arith.constant dense<0.000000e+00> : vector<512x16xf32>
    %5 = tpu.matmul %3, %4, %cst_5 {dimension_numbers = #tpu.dot_dimension_numbers<[1], [0], [0], [1], [0, 0, 1, 1], [], []>} : vector<512x16xbf16>, vector<16x16xbf16>, vector<512x16xf32> -> vector<512x16xf32>
    %6 = arith.addf %0, %5 : vector<512x16xf32>
    %c0_6 = arith.constant 0 : index
    %c0_7 = arith.constant 0 : index
    %c1 = arith.constant 1 : index
    %c0_8 = arith.constant 0 : index
    %7 = vector.load %arg0[%c0_6, %c0_7, %c1, %c0_8] : memref<2x18x18x16xf32, #tpu.memory_space<vmem>>, vector<2x16x16x16xf32>
    %8 = vector.shape_cast %7 : vector<2x16x16x16xf32> to vector<512x16xf32>
    %9 = arith.truncf %8 : vector<512x16xf32> to vector<512x16xbf16>
    %c16 = arith.constant 16 : index
    %c0_9 = arith.constant 0 : index
    %10 = vector.load %arg1[%c16, %c0_9] : memref<144x16xbf16, #tpu.memory_space<vmem>>, vector<16x16xbf16>
    %cst_10 = arith.constant dense<0.000000e+00> : vector<512x16xf32>
    %11 = tpu.matmul %9, %10, %cst_10 {dimension_numbers = #tpu.dot_dimension_numbers<[1], [0], [0], [1], [0, 0, 1, 1], [], []>} : vector<512x16xbf16>, vector<16x16xbf16>, vector<512x16xf32> -> vector<512x16xf32>
    %12 = arith.addf %6, %11 : vector<512x16xf32>
    %c0_11 = arith.constant 0 : index
    %c0_12 = arith.constant 0 : index
    %c2 = arith.constant 2 : index
    %c0_13 = arith.constant 0 : index
    %13 = vector.load %arg0[%c0_11, %c0_12, %c2, %c0_13] : memref<2x18x18x16xf32, #tpu.memory_space<vmem>>, vector<2x16x16x16xf32>
    %14 = vector.shape_cast %13 : vector<2x16x16x16xf32> to vector<512x16xf32>
    %15 = arith.truncf %14 : vector<512x16xf32> to vector<512x16xbf16>
    %c32 = arith.constant 32 : index
    %c0_14 = arith.constant 0 : index
    %16 = vector.load %arg1[%c32, %c0_14] : memref<144x16xbf16, #tpu.memory_space<vmem>>, vector<16x16xbf16>
    %cst_15 = arith.constant dense<0.000000e+00> : vector<512x16xf32>
    %17 = tpu.matmul %15, %16, %cst_15 {dimension_numbers = #tpu.dot_dimension_numbers<[1], [0], [0], [1], [0, 0, 1, 1], [], []>} : vector<512x16xbf16>, vector<16x16xbf16>, vector<512x16xf32> -> vector<512x16xf32>
    %18 = arith.addf %12, %17 : vector<512x16xf32>
    %c0_16 = arith.constant 0 : index
    %c1_17 = arith.constant 1 : index
    %c0_18 = arith.constant 0 : index
    %c0_19 = arith.constant 0 : index
    %19 = vector.load %arg0[%c0_16, %c1_17, %c0_18, %c0_19] : memref<2x18x18x16xf32, #tpu.memory_space<vmem>>, vector<2x16x16x16xf32>
    %20 = vector.shape_cast %19 : vector<2x16x16x16xf32> to vector<512x16xf32>
    %21 = arith.truncf %20 : vector<512x16xf32> to vector<512x16xbf16>
    %c48 = arith.constant 48 : index
    %c0_20 = arith.constant 0 : index
    %22 = vector.load %arg1[%c48, %c0_20] : memref<144x16xbf16, #tpu.memory_space<vmem>>, vector<16x16xbf16>
    %cst_21 = arith.constant dense<0.000000e+00> : vector<512x16xf32>
    %23 = tpu.matmul %21, %22, %cst_21 {dimension_numbers = #tpu.dot_dimension_numbers<[1], [0], [0], [1], [0, 0, 1, 1], [], []>} : vector<512x16xbf16>, vector<16x16xbf16>, vector<512x16xf32> -> vector<512x16xf32>
    %24 = arith.addf %18, %23 : vector<512x16xf32>
    %c0_22 = arith.constant 0 : index
    %c1_23 = arith.constant 1 : index
    %c1_24 = arith.constant 1 : index
    %c0_25 = arith.constant 0 : index
    %25 = vector.load %arg0[%c0_22, %c1_23, %c1_24, %c0_25] : memref<2x18x18x16xf32, #tpu.memory_space<vmem>>, vector<2x16x16x16xf32>
    %26 = vector.shape_cast %25 : vector<2x16x16x16xf32> to vector<512x16xf32>
    %27 = arith.truncf %26 : vector<512x16xf32> to vector<512x16xbf16>
    %c64 = arith.constant 64 : index
    %c0_26 = arith.constant 0 : index
    %28 = vector.load %arg1[%c64, %c0_26] : memref<144x16xbf16, #tpu.memory_space<vmem>>, vector<16x16xbf16>
    %cst_27 = arith.constant dense<0.000000e+00> : vector<512x16xf32>
    %29 = tpu.matmul %27, %28, %cst_27 {dimension_numbers = #tpu.dot_dimension_numbers<[1], [0], [0], [1], [0, 0, 1, 1], [], []>} : vector<512x16xbf16>, vector<16x16xbf16>, vector<512x16xf32> -> vector<512x16xf32>
    %30 = arith.addf %24, %29 : vector<512x16xf32>
    %c0_28 = arith.constant 0 : index
    %c1_29 = arith.constant 1 : index
    %c2_30 = arith.constant 2 : index
    %c0_31 = arith.constant 0 : index
    %31 = vector.load %arg0[%c0_28, %c1_29, %c2_30, %c0_31] : memref<2x18x18x16xf32, #tpu.memory_space<vmem>>, vector<2x16x16x16xf32>
    %32 = vector.shape_cast %31 : vector<2x16x16x16xf32> to vector<512x16xf32>
    %33 = arith.truncf %32 : vector<512x16xf32> to vector<512x16xbf16>
    %c80 = arith.constant 80 : index
    %c0_32 = arith.constant 0 : index
    %34 = vector.load %arg1[%c80, %c0_32] : memref<144x16xbf16, #tpu.memory_space<vmem>>, vector<16x16xbf16>
    %cst_33 = arith.constant dense<0.000000e+00> : vector<512x16xf32>
    %35 = tpu.matmul %33, %34, %cst_33 {dimension_numbers = #tpu.dot_dimension_numbers<[1], [0], [0], [1], [0, 0, 1, 1], [], []>} : vector<512x16xbf16>, vector<16x16xbf16>, vector<512x16xf32> -> vector<512x16xf32>
    %36 = arith.addf %30, %35 : vector<512x16xf32>
    %c0_34 = arith.constant 0 : index
    %c2_35 = arith.constant 2 : index
    %c0_36 = arith.constant 0 : index
    %c0_37 = arith.constant 0 : index
    %37 = vector.load %arg0[%c0_34, %c2_35, %c0_36, %c0_37] : memref<2x18x18x16xf32, #tpu.memory_space<vmem>>, vector<2x16x16x16xf32>
    %38 = vector.shape_cast %37 : vector<2x16x16x16xf32> to vector<512x16xf32>
    %39 = arith.truncf %38 : vector<512x16xf32> to vector<512x16xbf16>
    %c96 = arith.constant 96 : index
    %c0_38 = arith.constant 0 : index
    %40 = vector.load %arg1[%c96, %c0_38] : memref<144x16xbf16, #tpu.memory_space<vmem>>, vector<16x16xbf16>
    %cst_39 = arith.constant dense<0.000000e+00> : vector<512x16xf32>
    %41 = tpu.matmul %39, %40, %cst_39 {dimension_numbers = #tpu.dot_dimension_numbers<[1], [0], [0], [1], [0, 0, 1, 1], [], []>} : vector<512x16xbf16>, vector<16x16xbf16>, vector<512x16xf32> -> vector<512x16xf32>
    %42 = arith.addf %36, %41 : vector<512x16xf32>
    %c0_40 = arith.constant 0 : index
    %c2_41 = arith.constant 2 : index
    %c1_42 = arith.constant 1 : index
    %c0_43 = arith.constant 0 : index
    %43 = vector.load %arg0[%c0_40, %c2_41, %c1_42, %c0_43] : memref<2x18x18x16xf32, #tpu.memory_space<vmem>>, vector<2x16x16x16xf32>
    %44 = vector.shape_cast %43 : vector<2x16x16x16xf32> to vector<512x16xf32>
    %45 = arith.truncf %44 : vector<512x16xf32> to vector<512x16xbf16>
    %c112 = arith.constant 112 : index
    %c0_44 = arith.constant 0 : index
    %46 = vector.load %arg1[%c112, %c0_44] : memref<144x16xbf16, #tpu.memory_space<vmem>>, vector<16x16xbf16>
    %cst_45 = arith.constant dense<0.000000e+00> : vector<512x16xf32>
    %47 = tpu.matmul %45, %46, %cst_45 {dimension_numbers = #tpu.dot_dimension_numbers<[1], [0], [0], [1], [0, 0, 1, 1], [], []>} : vector<512x16xbf16>, vector<16x16xbf16>, vector<512x16xf32> -> vector<512x16xf32>
    %48 = arith.addf %42, %47 : vector<512x16xf32>
    %c0_46 = arith.constant 0 : index
    %c2_47 = arith.constant 2 : index
    %c2_48 = arith.constant 2 : index
    %c0_49 = arith.constant 0 : index
    %49 = vector.load %arg0[%c0_46, %c2_47, %c2_48, %c0_49] : memref<2x18x18x16xf32, #tpu.memory_space<vmem>>, vector<2x16x16x16xf32>
    %50 = vector.shape_cast %49 : vector<2x16x16x16xf32> to vector<512x16xf32>
    %51 = arith.truncf %50 : vector<512x16xf32> to vector<512x16xbf16>
    %c128 = arith.constant 128 : index
    %c0_50 = arith.constant 0 : index
    %52 = vector.load %arg1[%c128, %c0_50] : memref<144x16xbf16, #tpu.memory_space<vmem>>, vector<16x16xbf16>
    %cst_51 = arith.constant dense<0.000000e+00> : vector<512x16xf32>
    %53 = tpu.matmul %51, %52, %cst_51 {dimension_numbers = #tpu.dot_dimension_numbers<[1], [0], [0], [1], [0, 0, 1, 1], [], []>} : vector<512x16xbf16>, vector<16x16xbf16>, vector<512x16xf32> -> vector<512x16xf32>
    %54 = arith.addf %48, %53 : vector<512x16xf32>
    %cst_52 = arith.constant dense<0.000000e+00> : vector<16xf32>
    %55 = vector.multi_reduction <add>, %54, %cst_52 [0] : vector<512x16xf32> to vector<16xf32>
    %56 = vector.shape_cast %55 : vector<16xf32> to vector<1x16xf32>
    %cst_53 = arith.constant 0.001953125 : f32
    %57 = vector.broadcast %cst_53 : f32 to vector<1x16xf32>
    %58 = arith.mulf %56, %57 : vector<1x16xf32>
    %59 = arith.mulf %54, %54 : vector<512x16xf32>
    %cst_54 = arith.constant dense<0.000000e+00> : vector<16xf32>
    %60 = vector.multi_reduction <add>, %59, %cst_54 [0] : vector<512x16xf32> to vector<16xf32>
    %61 = vector.shape_cast %60 : vector<16xf32> to vector<1x16xf32>
    %cst_55 = arith.constant 0.001953125 : f32
    %62 = vector.broadcast %cst_55 : f32 to vector<1x16xf32>
    %63 = arith.mulf %61, %62 : vector<1x16xf32>
    %64 = arith.mulf %58, %58 : vector<1x16xf32>
    %65 = arith.subf %63, %64 : vector<1x16xf32>
    %c0_56 = arith.constant 0 : index
    %c0_57 = arith.constant 0 : index
    %66 = vector.load %arg2[%c0_56, %c0_57] : memref<1x16xf32, #tpu.memory_space<vmem>>, vector<1x16xf32>
    %cst_58 = arith.constant 9.99999974E-6 : f32
    %67 = vector.broadcast %cst_58 : f32 to vector<1x16xf32>
    %68 = arith.addf %65, %67 : vector<1x16xf32>
    %69 = math.rsqrt %68 : vector<1x16xf32>
    %70 = arith.mulf %66, %69 : vector<1x16xf32>
    %c0_59 = arith.constant 0 : index
    %c0_60 = arith.constant 0 : index
    %71 = vector.load %arg3[%c0_59, %c0_60] : memref<1x16xf32, #tpu.memory_space<vmem>>, vector<1x16xf32>
    %72 = arith.mulf %70, %58 : vector<1x16xf32>
    %73 = arith.subf %71, %72 : vector<1x16xf32>
    %74 = vector.broadcast %70 : vector<1x16xf32> to vector<512x16xf32>
    %75 = arith.mulf %54, %74 : vector<512x16xf32>
    %76 = vector.broadcast %73 : vector<1x16xf32> to vector<512x16xf32>
    %77 = arith.addf %75, %76 : vector<512x16xf32>
    %cst_61 = arith.constant 0.000000e+00 : f32
    %78 = vector.broadcast %cst_61 : f32 to vector<512x16xf32>
    %79 = arith.maximumf %77, %78 : vector<512x16xf32>
    %cst_62 = arith.constant 0.000000e+00 : f32
    %80 = vector.broadcast %cst_62 : f32 to vector<2x18x18x16xf32>
    %c0_63 = arith.constant 0 : index
    %c0_64 = arith.constant 0 : index
    %c0_65 = arith.constant 0 : index
    %c0_66 = arith.constant 0 : index
    %81 = vector.load %arg7[%c0_63, %c0_64, %c0_65, %c0_66] : memref<2x18x18x16xf32, #tpu.memory_space<vmem>>, vector<2x18x18x16xf32>
    tpu.vector_store %arg7[%c0_63, %c0_64, %c0_65, %c0_66], %80 {strides = array<i32>} : memref<2x18x18x16xf32, #tpu.memory_space<vmem>>, vector<2x18x18x16xf32>,
    %82 = vector.shape_cast %79 : vector<512x16xf32> to vector<2x16x16x16xf32>
    %c0_67 = arith.constant 0 : index
    %c1_68 = arith.constant 1 : index
    %c1_69 = arith.constant 1 : index
    %c0_70 = arith.constant 0 : index
    %83 = vector.load %arg7[%c0_67, %c1_68, %c1_69, %c0_70] : memref<2x18x18x16xf32, #tpu.memory_space<vmem>>, vector<2x16x16x16xf32>
    tpu.vector_store %arg7[%c0_67, %c1_68, %c1_69, %c0_70], %82 {strides = array<i32>} : memref<2x18x18x16xf32, #tpu.memory_space<vmem>>, vector<2x16x16x16xf32>,
    %cst_71 = arith.constant 0.000000e+00 : f32
    %84 = vector.broadcast %cst_71 : f32 to vector<512x16xf32>
    %c0_72 = arith.constant 0 : index
    %c0_73 = arith.constant 0 : index
    %c0_74 = arith.constant 0 : index
    %c0_75 = arith.constant 0 : index
    %85 = vector.load %arg7[%c0_72, %c0_73, %c0_74, %c0_75] : memref<2x18x18x16xf32, #tpu.memory_space<vmem>>, vector<2x16x16x16xf32>
    %86 = vector.shape_cast %85 : vector<2x16x16x16xf32> to vector<512x16xf32>
    %87 = arith.truncf %86 : vector<512x16xf32> to vector<512x16xbf16>
    %c0_76 = arith.constant 0 : index
    %c0_77 = arith.constant 0 : index
    %88 = vector.load %arg4[%c0_76, %c0_77] : memref<144x16xbf16, #tpu.memory_space<vmem>>, vector<16x16xbf16>
    %cst_78 = arith.constant dense<0.000000e+00> : vector<512x16xf32>
    %89 = tpu.matmul %87, %88, %cst_78 {dimension_numbers = #tpu.dot_dimension_numbers<[1], [0], [0], [1], [0, 0, 1, 1], [], []>} : vector<512x16xbf16>, vector<16x16xbf16>, vector<512x16xf32> -> vector<512x16xf32>
    %90 = arith.addf %84, %89 : vector<512x16xf32>
    %c0_79 = arith.constant 0 : index
    %c0_80 = arith.constant 0 : index
    %c1_81 = arith.constant 1 : index
    %c0_82 = arith.constant 0 : index
    %91 = vector.load %arg7[%c0_79, %c0_80, %c1_81, %c0_82] : memref<2x18x18x16xf32, #tpu.memory_space<vmem>>, vector<2x16x16x16xf32>
    %92 = vector.shape_cast %91 : vector<2x16x16x16xf32> to vector<512x16xf32>
    %93 = arith.truncf %92 : vector<512x16xf32> to vector<512x16xbf16>
    %c16_83 = arith.constant 16 : index
    %c0_84 = arith.constant 0 : index
    %94 = vector.load %arg4[%c16_83, %c0_84] : memref<144x16xbf16, #tpu.memory_space<vmem>>, vector<16x16xbf16>
    %cst_85 = arith.constant dense<0.000000e+00> : vector<512x16xf32>
    %95 = tpu.matmul %93, %94, %cst_85 {dimension_numbers = #tpu.dot_dimension_numbers<[1], [0], [0], [1], [0, 0, 1, 1], [], []>} : vector<512x16xbf16>, vector<16x16xbf16>, vector<512x16xf32> -> vector<512x16xf32>
    %96 = arith.addf %90, %95 : vector<512x16xf32>
    %c0_86 = arith.constant 0 : index
    %c0_87 = arith.constant 0 : index
    %c2_88 = arith.constant 2 : index
    %c0_89 = arith.constant 0 : index
    %97 = vector.load %arg7[%c0_86, %c0_87, %c2_88, %c0_89] : memref<2x18x18x16xf32, #tpu.memory_space<vmem>>, vector<2x16x16x16xf32>
    %98 = vector.shape_cast %97 : vector<2x16x16x16xf32> to vector<512x16xf32>
    %99 = arith.truncf %98 : vector<512x16xf32> to vector<512x16xbf16>
    %c32_90 = arith.constant 32 : index
    %c0_91 = arith.constant 0 : index
    %100 = vector.load %arg4[%c32_90, %c0_91] : memref<144x16xbf16, #tpu.memory_space<vmem>>, vector<16x16xbf16>
    %cst_92 = arith.constant dense<0.000000e+00> : vector<512x16xf32>
    %101 = tpu.matmul %99, %100, %cst_92 {dimension_numbers = #tpu.dot_dimension_numbers<[1], [0], [0], [1], [0, 0, 1, 1], [], []>} : vector<512x16xbf16>, vector<16x16xbf16>, vector<512x16xf32> -> vector<512x16xf32>
    %102 = arith.addf %96, %101 : vector<512x16xf32>
    %c0_93 = arith.constant 0 : index
    %c1_94 = arith.constant 1 : index
    %c0_95 = arith.constant 0 : index
    %c0_96 = arith.constant 0 : index
    %103 = vector.load %arg7[%c0_93, %c1_94, %c0_95, %c0_96] : memref<2x18x18x16xf32, #tpu.memory_space<vmem>>, vector<2x16x16x16xf32>
    %104 = vector.shape_cast %103 : vector<2x16x16x16xf32> to vector<512x16xf32>
    %105 = arith.truncf %104 : vector<512x16xf32> to vector<512x16xbf16>
    %c48_97 = arith.constant 48 : index
    %c0_98 = arith.constant 0 : index
    %106 = vector.load %arg4[%c48_97, %c0_98] : memref<144x16xbf16, #tpu.memory_space<vmem>>, vector<16x16xbf16>
    %cst_99 = arith.constant dense<0.000000e+00> : vector<512x16xf32>
    %107 = tpu.matmul %105, %106, %cst_99 {dimension_numbers = #tpu.dot_dimension_numbers<[1], [0], [0], [1], [0, 0, 1, 1], [], []>} : vector<512x16xbf16>, vector<16x16xbf16>, vector<512x16xf32> -> vector<512x16xf32>
    %108 = arith.addf %102, %107 : vector<512x16xf32>
    %c0_100 = arith.constant 0 : index
    %c1_101 = arith.constant 1 : index
    %c1_102 = arith.constant 1 : index
    %c0_103 = arith.constant 0 : index
    %109 = vector.load %arg7[%c0_100, %c1_101, %c1_102, %c0_103] : memref<2x18x18x16xf32, #tpu.memory_space<vmem>>, vector<2x16x16x16xf32>
    %110 = vector.shape_cast %109 : vector<2x16x16x16xf32> to vector<512x16xf32>
    %111 = arith.truncf %110 : vector<512x16xf32> to vector<512x16xbf16>
    %c64_104 = arith.constant 64 : index
    %c0_105 = arith.constant 0 : index
    %112 = vector.load %arg4[%c64_104, %c0_105] : memref<144x16xbf16, #tpu.memory_space<vmem>>, vector<16x16xbf16>
    %cst_106 = arith.constant dense<0.000000e+00> : vector<512x16xf32>
    %113 = tpu.matmul %111, %112, %cst_106 {dimension_numbers = #tpu.dot_dimension_numbers<[1], [0], [0], [1], [0, 0, 1, 1], [], []>} : vector<512x16xbf16>, vector<16x16xbf16>, vector<512x16xf32> -> vector<512x16xf32>
    %114 = arith.addf %108, %113 : vector<512x16xf32>
    %c0_107 = arith.constant 0 : index
    %c1_108 = arith.constant 1 : index
    %c2_109 = arith.constant 2 : index
    %c0_110 = arith.constant 0 : index
    %115 = vector.load %arg7[%c0_107, %c1_108, %c2_109, %c0_110] : memref<2x18x18x16xf32, #tpu.memory_space<vmem>>, vector<2x16x16x16xf32>
    %116 = vector.shape_cast %115 : vector<2x16x16x16xf32> to vector<512x16xf32>
    %117 = arith.truncf %116 : vector<512x16xf32> to vector<512x16xbf16>
    %c80_111 = arith.constant 80 : index
    %c0_112 = arith.constant 0 : index
    %118 = vector.load %arg4[%c80_111, %c0_112] : memref<144x16xbf16, #tpu.memory_space<vmem>>, vector<16x16xbf16>
    %cst_113 = arith.constant dense<0.000000e+00> : vector<512x16xf32>
    %119 = tpu.matmul %117, %118, %cst_113 {dimension_numbers = #tpu.dot_dimension_numbers<[1], [0], [0], [1], [0, 0, 1, 1], [], []>} : vector<512x16xbf16>, vector<16x16xbf16>, vector<512x16xf32> -> vector<512x16xf32>
    %120 = arith.addf %114, %119 : vector<512x16xf32>
    %c0_114 = arith.constant 0 : index
    %c2_115 = arith.constant 2 : index
    %c0_116 = arith.constant 0 : index
    %c0_117 = arith.constant 0 : index
    %121 = vector.load %arg7[%c0_114, %c2_115, %c0_116, %c0_117] : memref<2x18x18x16xf32, #tpu.memory_space<vmem>>, vector<2x16x16x16xf32>
    %122 = vector.shape_cast %121 : vector<2x16x16x16xf32> to vector<512x16xf32>
    %123 = arith.truncf %122 : vector<512x16xf32> to vector<512x16xbf16>
    %c96_118 = arith.constant 96 : index
    %c0_119 = arith.constant 0 : index
    %124 = vector.load %arg4[%c96_118, %c0_119] : memref<144x16xbf16, #tpu.memory_space<vmem>>, vector<16x16xbf16>
    %cst_120 = arith.constant dense<0.000000e+00> : vector<512x16xf32>
    %125 = tpu.matmul %123, %124, %cst_120 {dimension_numbers = #tpu.dot_dimension_numbers<[1], [0], [0], [1], [0, 0, 1, 1], [], []>} : vector<512x16xbf16>, vector<16x16xbf16>, vector<512x16xf32> -> vector<512x16xf32>
    %126 = arith.addf %120, %125 : vector<512x16xf32>
    %c0_121 = arith.constant 0 : index
    %c2_122 = arith.constant 2 : index
    %c1_123 = arith.constant 1 : index
    %c0_124 = arith.constant 0 : index
    %127 = vector.load %arg7[%c0_121, %c2_122, %c1_123, %c0_124] : memref<2x18x18x16xf32, #tpu.memory_space<vmem>>, vector<2x16x16x16xf32>
    %128 = vector.shape_cast %127 : vector<2x16x16x16xf32> to vector<512x16xf32>
    %129 = arith.truncf %128 : vector<512x16xf32> to vector<512x16xbf16>
    %c112_125 = arith.constant 112 : index
    %c0_126 = arith.constant 0 : index
    %130 = vector.load %arg4[%c112_125, %c0_126] : memref<144x16xbf16, #tpu.memory_space<vmem>>, vector<16x16xbf16>
    %cst_127 = arith.constant dense<0.000000e+00> : vector<512x16xf32>
    %131 = tpu.matmul %129, %130, %cst_127 {dimension_numbers = #tpu.dot_dimension_numbers<[1], [0], [0], [1], [0, 0, 1, 1], [], []>} : vector<512x16xbf16>, vector<16x16xbf16>, vector<512x16xf32> -> vector<512x16xf32>
    %132 = arith.addf %126, %131 : vector<512x16xf32>
    %c0_128 = arith.constant 0 : index
    %c2_129 = arith.constant 2 : index
    %c2_130 = arith.constant 2 : index
    %c0_131 = arith.constant 0 : index
    %133 = vector.load %arg7[%c0_128, %c2_129, %c2_130, %c0_131] : memref<2x18x18x16xf32, #tpu.memory_space<vmem>>, vector<2x16x16x16xf32>
    %134 = vector.shape_cast %133 : vector<2x16x16x16xf32> to vector<512x16xf32>
    %135 = arith.truncf %134 : vector<512x16xf32> to vector<512x16xbf16>
    %c128_132 = arith.constant 128 : index
    %c0_133 = arith.constant 0 : index
    %136 = vector.load %arg4[%c128_132, %c0_133] : memref<144x16xbf16, #tpu.memory_space<vmem>>, vector<16x16xbf16>
    %cst_134 = arith.constant dense<0.000000e+00> : vector<512x16xf32>
    %137 = tpu.matmul %135, %136, %cst_134 {dimension_numbers = #tpu.dot_dimension_numbers<[1], [0], [0], [1], [0, 0, 1, 1], [], []>} : vector<512x16xbf16>, vector<16x16xbf16>, vector<512x16xf32> -> vector<512x16xf32>
    %138 = arith.addf %132, %137 : vector<512x16xf32>
    %c0_135 = arith.constant 0 : index
    %c0_136 = arith.constant 0 : index
    %139 = vector.load %arg5[%c0_135, %c0_136] : memref<512x16xf32, #tpu.memory_space<vmem>>, vector<512x16xf32>
    %140 = arith.addf %138, %139 : vector<512x16xf32>
    %c0_137 = arith.constant 0 : index
    %c0_138 = arith.constant 0 : index
    %141 = vector.load %arg6[%c0_137, %c0_138] : memref<512x16xf32, #tpu.memory_space<vmem>>, vector<512x16xf32>
    tpu.vector_store %arg6[%c0_137, %c0_138], %140 {strides = array<i32>} : memref<512x16xf32, #tpu.memory_space<vmem>>, vector<512x16xf32>,
    return
  }
}

</mosaic_0001>

<bundles_post_ra>
// kernel: tile.8
= control target key start
LH: loop header
LB: loop body
LE: loop exit
PB: predicated region body
PF: predicated region fallthrough
CT: control target
= control target key end

     0   :  { %s28_s0 = inlined_call_operand.vmem [shape: f32[16], index: 0, kind: input, shape index: {}]   ;;  %s29_s1 = inlined_call_operand.vmem [shape: f32[9,16], index: 1, kind: output, shape index: {}]  }
   0x1   :  { %v4_v0 = vld [vmem:[%s28_s0] ss:$0 sm:$0xff] }
   0x2   :  { %5 = vst [vmem:[%s29_s1] sm:$0xff] %v4_v0  ;;  %8 = vst [vmem:[%s29_s1 + $0x8] sm:$0xff] %v4_v0 }

// kernel: mul.13
= control target key start
LH: loop header
LB: loop body
LE: loop exit
PB: predicated region body
PF: predicated region fallthrough
CT: control target
= control target key end

     0   :  { %s70_s10 = smov 112   ;;  %s71_s11 = smov 80   ;;  %vm4_vm0 = vcmask 130048   ;;  %vm10_vm1 = vcmask 1048448   ;;  %vm16_vm2 = vcmask 917248   ;;  %vm22_vm3 = vcmask 786048   ;;  %s114_s0 = inlined_call_operand.vmem [shape: f32[9,16], index: 0, kind: input, shape index: {}]   ;;  %s115_s1 = inlined_call_operand.vmem [shape: f32[144], index: 1, kind: output, shape index: {}]  }
   0x1   :  { %v56_v0 = vld [vmem:[%s114_s0 + $0x7] sm:$0x1]   ;;  %v58_v1 = vld [vmem:[%s114_s0 + $0x5] sm:$0x1]   ;;  %v57_v2 = vld [vmem:[%s114_s0 + $0x6] sm:$0x1]  }
   0x2   :  { %8 = vrot.lane.b32.xlu0 %v56_v0, %s70_s10  ;;  %20 = vrot.lane.b32.xlu1 %v58_v1, %s71_s11  ;;  %v59_v3 = vld [vmem:[%s114_s0 + $0x4] sm:$0x1]   ;;  %s2_s16 = smov 3  ;;  %s72_s19 = smov 96   ;;  %v60_v5 = vld [vmem:[%s114_s0 + $0x3] sm:$0x1]  }
   0x3   :  { %v3_v4 = vld [vmem:[%s114_s0] ss:$8 sm:%s2_s16]   ;;  %s73_s20 = smov 64   ;;  %v61_v6 = vld [vmem:[%s114_s0 + $0x2] sm:$0x1]   ;;  %s74_s25 = smov 48  }
   0x4   :  { %5 = vst.msk [vmem:[#allocation0] sm:$0x3] %vm4_vm0, %v3_v4   ;;  %s75_s26 = smov 32   ;;  %v62_v7 = vld [vmem:[%s114_s0 + $0x1] sm:$0x1]   ;;  %s76_s0 = smov 16  }
   0x5   :  { %vm28_vm4 = vcmask 654848   ;;  %vm34_vm5 = vcmask 523648   ;;  %vm40_vm6 = vcmask 392448   ;;  %vm46_vm7 = vcmask 261248  }
   0x6   :  { %14 = vrot.lane.b32.xlu0 %v57_v2, %s72_s19  ;;  %26 = vrot.lane.b32.xlu1 %v59_v3, %s73_s20 }
   0xa   :  { %32 = vrot.lane.b32.xlu0 %v60_v5, %s74_s25  ;;  %38 = vrot.lane.b32.xlu1 %v61_v6, %s75_s26 }
   0xe   :  { %44 = vrot.lane.b32.xlu0 %v62_v7, %s76_s0 }
  0x74   :  { %v9_v8 = vpop.permute.xlu0 %8   ;;  %v21_v9 = vpop.permute.xlu1 %20  }
  0x75   :  { %11 = vst.msk [vmem:[#allocation0] sm:$0x1] %vm10_vm1, %v9_v8  }
  0x78   :  { %v15_v10 = vpop.permute.xlu0 %14   ;;  %v27_v11 = vpop.permute.xlu1 %26  }
  0x79   :  { %17 = vst.msk [vmem:[#allocation0] sm:$0x1] %vm16_vm2, %v15_v10  }
  0x7a   :  { %23 = vst.msk [vmem:[#allocation0] sm:$0x1] %vm22_vm3, %v21_v9  }
  0x7b   :  { %29 = vst.msk [vmem:[#allocation0] sm:$0x1] %vm28_vm4, %v27_v11  }
  0x7c   :  { %v33_v12 = vpop.permute.xlu0 %32   ;;  %v39_v13 = vpop.permute.xlu1 %38  }
  0x7d   :  { %35 = vst.msk [vmem:[#allocation0] sm:$0x1] %vm34_vm5, %v33_v12  }
  0x7e   :  { %41 = vst.msk [vmem:[#allocation0] sm:$0x1] %vm40_vm6, %v39_v13  }
  0x80   :  { %v45_v14 = vpop.permute.xlu0 %44  }
  0x81   :  { %47 = vst.msk [vmem:[#allocation0] sm:$0x1] %vm46_vm7, %v45_v14  }
  0x88   :  { %v52_v15 = vld [vmem:[#allocation0] sm:$0x3] }
  0x89   :  { %55 = vst [vmem:[%s115_s1] sm:$0x3] %v52_v15 }

// kernel: _lambda_.1
= control target key start
LH: loop header
LB: loop body
LE: loop exit
PB: predicated region body
PF: predicated region fallthrough
CT: control target
= control target key end

     0   :  { %vm226_vm0 = vcmask 130048   ;;  %vm5423_vm1 = vcmask 123904   ;;  %s19700_s1 = inlined_call_operand.vmem [shape: bf16[144,16], index: 1, kind: input, shape index: {}]   ;;  %s19701_s0 = inlined_call_operand.vmem [shape: f32[2,18,18,16], index: 0, kind: input, shape index: {}]   ;;  %s19702_s4 = inlined_call_operand.vmem [shape: bf16[144,16], index: 4, kind: input, shape index: {}]   ;;  %s19703_s2 = inlined_call_operand.vmem [shape: f32[1,16], index: 2, kind: input, shape index: {}]   ;;  %s19704_s3 = inlined_call_operand.vmem [shape: f32[1,16], index: 3, kind: input, shape index: {}]   ;;  %s19705_s5 = inlined_call_operand.vmem [shape: f32[512,16], index: 5, kind: input, shape index: {}]   ;;  %s19706_s6 = inlined_call_operand.vmem [shape: f32[512,16], index: 6, kind: output, shape index: {}]  }
   0x1   :  { %v13402_v0 = vld [vmem:[%s19700_s1 + $0x8] sm:$0xff]   ;;  %v13403_v1 = vld [vmem:[%s19700_s1] sm:$0xff]   ;;  %v26_v11 = vld [vmem:[%s19701_s0 + $0x18] sm:$0xff] }
   0x2   :  { %12213 = vmatprep.subr.bf16.mxu0 %v13402_v0  ;;  %v122_v2 = vld [vmem:[%s19701_s0 + $0x1] sm:$0xff]  ;;  %v123_v3 = vld [vmem:[%s19701_s0 + $0x9] sm:$0xff]  ;;  %12279 = vmatprep.subr.bf16.mxu1 %v13403_v1  ;;  %v124_v7 = vld [vmem:[%s19701_s0 + $0x19] sm:$0xff] }
   0x3   :  { %v24_v4 = vld [vmem:[%s19701_s0] sm:$0xff]  ;;  %12214 = vmatpush3.bf16.msra.mxu0 %v13402_v0  ;;  %v186_v5 = vpack.c.bf16 %v123_v3, %v122_v2  ;;  %v25_v6 = vld [vmem:[%s19701_s0 + $0x8] sm:$0xff]  ;;  %12280 = vmatpush3.bf16.msra.mxu1 %v13403_v1  ;;  %v13404_v14 = vld [vmem:[%s19700_s1 + $0x10] sm:$0xff]  }
   0x4   :  { %v125_v8 = vld [vmem:[%s19701_s0 + $0x21] sm:$0xff]  ;;  %v88_v9 = vpack.c.bf16 %v25_v6, %v24_v4  ;;  %v126_v15 = vld [vmem:[%s19701_s0 + $0x31] sm:$0xff]  ;;  %v127_v16 = vld [vmem:[%s19701_s0 + $0x39] sm:$0xff]  ;;  %12345 = vmatprep.subr.bf16.mxu0 %v13404_v14 }
   0x5   :  { %v187_v10 = vpack.c.bf16 %v125_v8, %v124_v7  ;;  %v27_v12 = vld [vmem:[%s19701_s0 + $0x20] sm:$0xff]  ;;  %12215 = vmatprep.mubr.msk.bf16.mxu0 %vm226_vm0, %v186_v5  ;;  %v28_v17 = vld [vmem:[%s19701_s0 + $0x30] sm:$0xff]  ;;  %v29_v18 = vld [vmem:[%s19701_s0 + $0x38] sm:$0xff]  ;;  %v188_v19 = vpack.c.bf16 %v127_v16, %v126_v15 }
   0x6   :  { %v13489_v13 = vpack.c.bf16 %v27_v12, %v26_v11  ;;  %12281 = vmatprep.mubr.msk.bf16.mxu1 %vm226_vm0, %v88_v9  ;;  %v13510_v20 = vpack.c.bf16 %v29_v18, %v28_v17  ;;  %v128_v21 = vld [vmem:[%s19701_s0 + $0x49] sm:$0xff]  ;;  %v129_v22 = vld [vmem:[%s19701_s0 + $0x51] sm:$0xff]  ;;  %v130_v25 = vld [vmem:[%s19701_s0 + $0x61] sm:$0xff] }
   0x7   :  { %12216 = vmatmul.mubr.msk.bf16.vlgmr.msra.gmra.mxu0 %vm226_vm0, %v187_v10  ;;  %v30_v23 = vld [vmem:[%s19701_s0 + $0x48] sm:$0xff]  ;;  %v31_v24 = vld [vmem:[%s19701_s0 + $0x50] sm:$0xff]  ;;  %v32_v27 = vld [vmem:[%s19701_s0 + $0x60] sm:$0xff]  ;;  %v189_v29 = vpack.c.bf16 %v129_v22, %v128_v21 }
   0x8   :  { %12282 = vmatmul.mubr.msk.bf16.vlgmr.msra.gmra.mxu1 %vm226_vm0, %v13489_v13  ;;  %12346 = vmatpush3.bf16.msra.mxu0 %v13404_v14  ;;  %v131_v26 = vld [vmem:[%s19701_s0 + $0x69] sm:$0xff]  ;;  %v13539_v30 = vpack.c.bf16 %v31_v24, %v30_v23  ;;  %v132_v33 = vld [vmem:[%s19701_s0 + $0x79] sm:$0xff]  ;;  %v133_v34 = vld [vmem:[%s19701_s0 + $0x81] sm:$0xff] }
   0x9   :  { %12219 = vmatprep.mubr.msk.bf16.mxu0 %vm226_vm0, %v188_v19  ;;  %12285 = vmatprep.mubr.msk.bf16.mxu1 %vm226_vm0, %v13510_v20  ;;  %v33_v28 = vld [vmem:[%s19701_s0 + $0x68] sm:$0xff]  ;;  %v190_v31 = vpack.c.bf16 %v131_v26, %v130_v25  ;;  %v34_v35 = vld [vmem:[%s19701_s0 + $0x78] sm:$0xff]  ;;  %v35_v36 = vld [vmem:[%s19701_s0 + $0x80] sm:$0xff]  ;;  %v191_v41 = vpack.c.bf16 %v133_v34, %v132_v33 }
   0xa   :  { %v13541_v32 = vpack.c.bf16 %v33_v28, %v32_v27  ;;  %v134_v37 = vld [vmem:[%s19701_s0 + $0x91] sm:$0xff]  ;;  %v135_v38 = vld [vmem:[%s19701_s0 + $0x99] sm:$0xff]  ;;  %v13573_v42 = vpack.c.bf16 %v35_v36, %v34_v35  ;;  %v136_v45 = vld [vmem:[%s19701_s0 + $0xa9] sm:$0xff] }
   0xb   :  { %v36_v39 = vld [vmem:[%s19701_s0 + $0x90] sm:$0xff]  ;;  %v37_v40 = vld [vmem:[%s19701_s0 + $0x98] sm:$0xff]  ;;  %v192_v43 = vpack.c.bf16 %v135_v38, %v134_v37  ;;  %v38_v47 = vld [vmem:[%s19701_s0 + $0xa8] sm:$0xff] }
   0xc   :  { %v13575_v44 = vpack.c.bf16 %v37_v40, %v36_v39  ;;  %v137_v46 = vld [vmem:[%s19701_s0 + $0xb1] sm:$0xff]  ;;  %v138_v49 = vld [vmem:[%s19701_s0 + $0xc1] sm:$0xff]  ;;  %v139_v50 = vld [vmem:[%s19701_s0 + $0xc9] sm:$0xff] }
   0xd   :  { %v39_v48 = vld [vmem:[%s19701_s0 + $0xb0] sm:$0xff]  ;;  %v40_v51 = vld [vmem:[%s19701_s0 + $0xc0] sm:$0xff]  ;;  %v41_v52 = vld [vmem:[%s19701_s0 + $0xc8] sm:$0xff]  ;;  %v193_v53 = vpack.c.bf16 %v137_v46, %v136_v45  ;;  %v194_v55 = vpack.c.bf16 %v139_v50, %v138_v49 }
   0xe   :  { %v13607_v54 = vpack.c.bf16 %v39_v48, %v38_v47  ;;  %v13609_v56 = vpack.c.bf16 %v41_v52, %v40_v51  ;;  %v140_v57 = vld [vmem:[%s19701_s0 + $0xd9] sm:$0xff]  ;;  %v141_v58 = vld [vmem:[%s19701_s0 + $0xe1] sm:$0xff]  ;;  %v142_v61 = vld [vmem:[%s19701_s0 + $0xf1] sm:$0xff] }
   0xf   :  { %12220 = vmatmul.mubr.msk.bf16.gmra.mxu0 %vm226_vm0, %v189_v29  ;;  %v42_v59 = vld [vmem:[%s19701_s0 + $0xd8] sm:$0xff]  ;;  %v43_v60 = vld [vmem:[%s19701_s0 + $0xe0] sm:$0xff]  ;;  %v44_v63 = vld [vmem:[%s19701_s0 + $0xf0] sm:$0xff]  ;;  %v195_v1 = vpack.c.bf16 %v141_v58, %v140_v57 }
  0x10   :  { %12286 = vmatmul.mubr.msk.bf16.gmra.mxu1 %vm226_vm0, %v13539_v30  ;;  %12223 = vmatprep.mubr.msk.bf16.mxu0 %vm226_vm0, %v190_v31  ;;  %v143_v62 = vld [vmem:[%s19701_s0 + $0xf9] sm:$0xff]  ;;  %v13641_v2 = vpack.c.bf16 %v43_v60, %v42_v59  ;;  %v144_v5 = vld [vmem:[%s19701_s0 + $0x109] sm:$0xff]  ;;  %v145_v6 = vld [vmem:[%s19701_s0 + $0x111] sm:$0xff] }
  0x11   :  { %12289 = vmatprep.mubr.msk.bf16.mxu1 %vm226_vm0, %v13541_v32  ;;  %v45_v0 = vld [vmem:[%s19701_s0 + $0xf8] sm:$0xff]  ;;  %v196_v3 = vpack.c.bf16 %v143_v62, %v142_v61  ;;  %v46_v7 = vld [vmem:[%s19701_s0 + $0x108] sm:$0xff]  ;;  %v47_v8 = vld [vmem:[%s19701_s0 + $0x110] sm:$0xff]  ;;  %v197_v14 = vpack.c.bf16 %v145_v6, %v144_v5 }
  0x12   :  { %v13643_v4 = vpack.c.bf16 %v45_v0, %v44_v63  ;;  %v146_v9 = vld [vmem:[%s19701_s0 + $0x121] sm:$0xff]  ;;  %v147_v10 = vld [vmem:[%s19701_s0 + $0x129] sm:$0xff]  ;;  %v13675_v15 = vpack.c.bf16 %v47_v8, %v46_v7  ;;  %v148_v18 = vld [vmem:[%s19701_s0 + $0x139] sm:$0xff] }
  0x13   :  { %v48_v11 = vld [vmem:[%s19701_s0 + $0x120] sm:$0xff]  ;;  %v49_v12 = vld [vmem:[%s19701_s0 + $0x128] sm:$0xff]  ;;  %v198_v16 = vpack.c.bf16 %v147_v10, %v146_v9  ;;  %v50_v21 = vld [vmem:[%s19701_s0 + $0x138] sm:$0xff] }
  0x14   :  { %v13677_v17 = vpack.c.bf16 %v49_v12, %v48_v11  ;;  %v149_v19 = vld [vmem:[%s19701_s0 + $0x141] sm:$0xff]  ;;  %v13405_v22 = vld [vmem:[%s19700_s1 + $0x18] sm:$0xff]   ;;  %v52_v27 = vld [vmem:[%s19701_s0 + $0x150] sm:$0xff] }
  0x15   :  { %v51_v23 = vld [vmem:[%s19701_s0 + $0x140] sm:$0xff]  ;;  %v150_v24 = vld [vmem:[%s19701_s0 + $0x151] sm:$0xff]  ;;  %12411 = vmatprep.subr.bf16.mxu1 %v13405_v22  ;;  %v199_v29 = vpack.c.bf16 %v149_v19, %v148_v18  ;;  %v152_v35 = vld [vmem:[%s19701_s0 + $0x169] sm:$0xff] }
  0x16   :  { %v151_v25 = vld [vmem:[%s19701_s0 + $0x159] sm:$0xff]  ;;  %12412 = vmatpush3.bf16.msra.mxu1 %v13405_v22  ;;  %v13718_v31 = vpack.c.bf16 %v51_v23, %v50_v21  ;;  %v153_v36 = vld [vmem:[%s19701_s0 + $0x171] sm:$0xff]  ;;  %v54_v37 = vld [vmem:[%s19701_s0 + $0x168] sm:$0xff] }
  0x17   :  { %12224 = vmatmul.mubr.msk.bf16.gmra.mxu0 %vm226_vm0, %v191_v41  ;;  %v13709_v26 = vld [vmem:[%s19700_s1 + $0x20] sm:$0xff]   ;;  %v53_v28 = vld [vmem:[%s19701_s0 + $0x158] sm:$0xff]  ;;  %v200_v33 = vpack.c.bf16 %v151_v25, %v150_v24  ;;  %v55_v38 = vld [vmem:[%s19701_s0 + $0x170] sm:$0xff]  ;;  %v201_v45 = vpack.c.bf16 %v153_v36, %v152_v35 }
  0x18   :  { %12290 = vmatmul.mubr.msk.bf16.gmra.mxu1 %vm226_vm0, %v13573_v42  ;;  %12227 = vmatprep.mubr.msk.bf16.mxu0 %vm226_vm0, %v192_v43  ;;  %v13720_v34 = vpack.c.bf16 %v53_v28, %v52_v27  ;;  %v154_v39 = vld [vmem:[%s19701_s0 + $0x1b1] sm:$0xff]  ;;  %v155_v40 = vld [vmem:[%s19701_s0 + $0x1b9] sm:$0xff]  ;;  %v13752_v46 = vpack.c.bf16 %v55_v38, %v54_v37  ;;  %v156_v49 = vld [vmem:[%s19701_s0 + $0x1c9] sm:$0xff] }
  0x19   :  { %12293 = vmatprep.mubr.msk.bf16.mxu1 %vm226_vm0, %v13575_v44  ;;  %12477 = vmatprep.subr.bf16.mxu0 %v13709_v26  ;;  %v56_v41 = vld [vmem:[%s19701_s0 + $0x1b0] sm:$0xff]  ;;  %v57_v43 = vld [vmem:[%s19701_s0 + $0x1b8] sm:$0xff]  ;;  %v202_v47 = vpack.c.bf16 %v155_v40, %v154_v39  ;;  %v58_v51 = vld [vmem:[%s19701_s0 + $0x1c8] sm:$0xff] }
  0x1a   :  { %v104_v48 = vpack.c.bf16 %v57_v43, %v56_v41  ;;  %v157_v50 = vld [vmem:[%s19701_s0 + $0x1d1] sm:$0xff]  ;;  %v60_v57 = vld [vmem:[%s19701_s0 + $0x1e0] sm:$0xff]  ;;  %v61_v58 = vld [vmem:[%s19701_s0 + $0x1e8] sm:$0xff] }
  0x1b   :  { %v59_v52 = vld [vmem:[%s19701_s0 + $0x1d0] sm:$0xff]  ;;  %v203_v59 = vpack.c.bf16 %v157_v50, %v156_v49  ;;  %v13785_v62 = vpack.c.bf16 %v61_v58, %v60_v57  ;;  %v160_v63 = vld [vmem:[%s19701_s0 + $0x1f9] sm:$0xff]  ;;  %v161_v0 = vld [vmem:[%s19701_s0 + $0x201] sm:$0xff] }
  0x1c   :  { %v13783_v60 = vpack.c.bf16 %v59_v52, %v58_v51  ;;  %v162_v5 = vld [vmem:[%s19701_s0 + $0x211] sm:$0xff]  ;;  %v163_v6 = vld [vmem:[%s19701_s0 + $0x219] sm:$0xff]  ;;  %v205_v9 = vpack.c.bf16 %v161_v0, %v160_v63  ;;  %v66_v18 = vld [vmem:[%s19701_s0 + $0x228] sm:$0xff] }
  0x1d   :  { %v64_v7 = vld [vmem:[%s19701_s0 + $0x210] sm:$0xff]  ;;  %v65_v8 = vld [vmem:[%s19701_s0 + $0x218] sm:$0xff]  ;;  %v206_v11 = vpack.c.bf16 %v163_v6, %v162_v5  ;;  %v166_v21 = vld [vmem:[%s19701_s0 + $0x241] sm:$0xff] }
  0x1e   :  { %v13819_v12 = vpack.c.bf16 %v65_v8, %v64_v7  ;;  %v67_v19 = vld [vmem:[%s19701_s0 + $0x230] sm:$0xff]  ;;  %v68_v23 = vld [vmem:[%s19701_s0 + $0x240] sm:$0xff]  ;;  %v69_v24 = vld [vmem:[%s19701_s0 + $0x248] sm:$0xff] }
  0x1f   :  { %12228 = vmatmul.mubr.msk.bf16.gmra.mxu0 %vm226_vm0, %v193_v53  ;;  %v158_v53 = vld [vmem:[%s19701_s0 + $0x1e1] sm:$0xff]  ;;  %v167_v22 = vld [vmem:[%s19701_s0 + $0x249] sm:$0xff]  ;;  %v13851_v27 = vpack.c.bf16 %v67_v19, %v66_v18  ;;  %v70_v36 = vld [vmem:[%s19701_s0 + $0x258] sm:$0xff] }
  0x20   :  { %12294 = vmatmul.mubr.msk.bf16.gmra.mxu1 %vm226_vm0, %v13607_v54  ;;  %12231 = vmatprep.mubr.msk.bf16.mxu0 %vm226_vm0, %v194_v55  ;;  %v159_v55 = vld [vmem:[%s19701_s0 + $0x1e9] sm:$0xff]  ;;  %v208_v28 = vpack.c.bf16 %v167_v22, %v166_v21  ;;  %v169_v35 = vld [vmem:[%s19701_s0 + $0x261] sm:$0xff]  ;;  %v170_v38 = vld [vmem:[%s19701_s0 + $0x271] sm:$0xff] }
  0x21   :  { %12297 = vmatprep.mubr.msk.bf16.mxu1 %vm226_vm0, %v13609_v56  ;;  %v204_v61 = vpack.c.bf16 %v159_v55, %v158_v53  ;;  %v71_v37 = vld [vmem:[%s19701_s0 + $0x260] sm:$0xff]  ;;  %v72_v40 = vld [vmem:[%s19701_s0 + $0x270] sm:$0xff]  ;;  %v73_v41 = vld [vmem:[%s19701_s0 + $0x278] sm:$0xff] }
  0x22   :  { %v171_v39 = vld [vmem:[%s19701_s0 + $0x279] sm:$0xff]  ;;  %v172_v49 = vld [vmem:[%s19701_s0 + $0x289] sm:$0xff]  ;;  %v173_v50 = vld [vmem:[%s19701_s0 + $0x291] sm:$0xff] }
  0x23   :  { %v74_v51 = vld [vmem:[%s19701_s0 + $0x288] sm:$0xff]  ;;  %v75_v52 = vld [vmem:[%s19701_s0 + $0x290] sm:$0xff]  ;;  %v76_v57 = vld [vmem:[%s19701_s0 + $0x2a0] sm:$0xff] }
  0x24   :  { %v174_v53 = vld [vmem:[%s19701_s0 + $0x2a1] sm:$0xff]  ;;  %v175_v55 = vld [vmem:[%s19701_s0 + $0x2a9] sm:$0xff]  ;;  %v78_v5 = vld [vmem:[%s19701_s0 + $0x2b8] sm:$0xff] }
  0x25   :  { %v77_v58 = vld [vmem:[%s19701_s0 + $0x2a8] sm:$0xff]  ;;  %v212_v63 = vpack.c.bf16 %v175_v55, %v174_v53  ;;  %v79_v6 = vld [vmem:[%s19701_s0 + $0x2c0] sm:$0xff]  ;;  %v178_v7 = vld [vmem:[%s19701_s0 + $0x2d1] sm:$0xff] }
  0x26   :  { %v13921_v0 = vpack.c.bf16 %v77_v58, %v76_v57  ;;  %v179_v8 = vld [vmem:[%s19701_s0 + $0x2d9] sm:$0xff]  ;;  %v180_v21 = vld [vmem:[%s19701_s0 + $0x2e9] sm:$0xff]  ;;  %v181_v22 = vld [vmem:[%s19701_s0 + $0x2f1] sm:$0xff] }
  0x27   :  { %12232 = vmatmul.mubr.msk.bf16.gmra.mxu0 %vm226_vm0, %v195_v1  ;;  %v62_v1 = vld [vmem:[%s19701_s0 + $0x1f8] sm:$0xff]  ;;  %v214_v18 = vpack.c.bf16 %v179_v8, %v178_v7  ;;  %v1006_v57 = vld [vmem:[%s19701_s0 + $0x22] sm:$0xff] }
  0x28   :  { %12298 = vmatmul.mubr.msk.bf16.gmra.mxu1 %vm226_vm0, %v13641_v2  ;;  %12235 = vmatprep.mubr.msk.bf16.mxu0 %vm226_vm0, %v196_v3  ;;  %v63_v3 = vld [vmem:[%s19701_s0 + $0x200] sm:$0xff]  ;;  %v1007_v58 = vld [vmem:[%s19701_s0 + $0x32] sm:$0xff] }
  0x29   :  { %12301 = vmatprep.mubr.msk.bf16.mxu1 %vm226_vm0, %v13643_v4  ;;  %v13817_v10 = vpack.c.bf16 %v63_v3, %v62_v1  ;;  %v176_v1 = vld [vmem:[%s19701_s0 + $0x2b9] sm:$0xff]  ;;  %v177_v3 = vld [vmem:[%s19701_s0 + $0x2c1] sm:$0xff] }
  0x2a   :  { %v1005_v55 = vld [vmem:[%s19701_s0 + $0x1a] sm:$0xff] }
  0x2f   :  { %12236 = vmatmul.mubr.msk.bf16.gmra.mxu0 %vm226_vm0, %v197_v14  ;;  %v164_v14 = vld [vmem:[%s19701_s0 + $0x229] sm:$0xff] }
  0x30   :  { %12302 = vmatmul.mubr.msk.bf16.gmra.mxu1 %vm226_vm0, %v13675_v15  ;;  %12239 = vmatprep.mubr.msk.bf16.mxu0 %vm226_vm0, %v198_v16  ;;  %v165_v16 = vld [vmem:[%s19701_s0 + $0x231] sm:$0xff] }
  0x31   :  { %12305 = vmatprep.mubr.msk.bf16.mxu1 %vm226_vm0, %v13677_v17  ;;  %v207_v25 = vpack.c.bf16 %v165_v16, %v164_v14  ;;  %v213_v14 = vpack.c.bf16 %v177_v3, %v176_v1  ;;  %v13953_v16 = vpack.c.bf16 %v79_v6, %v78_v5  ;;  %v13407_v1 = vld [vmem:[%s19700_s1 + $0x28] sm:$0xff]   ;;  %v1010_v5 = vld [vmem:[%s19701_s0 + $0x52] sm:$0xff] }
  0x32   :  { %12543 = vmatprep.subr.bf16.mxu1 %v13407_v1  ;;  %v14066_v6 = vld [vmem:[%s19700_s1 + $0x30] sm:$0xff]  }
  0x37   :  { %12240 = vmatmul.mubr.msk.bf16.gmra.mxu0 %vm226_vm0, %v199_v29  ;;  %v13853_v29 = vpack.c.bf16 %v69_v24, %v68_v23  ;;  %v82_v23 = vld [vmem:[%s19701_s0 + $0x2e8] sm:$0xff]  ;;  %v83_v24 = vld [vmem:[%s19701_s0 + $0x2f0] sm:$0xff] }
  0x38   :  { %12306 = vmatmul.mubr.msk.bf16.gmra.mxu1 %vm226_vm0, %v13718_v31  ;;  %12243 = vmatprep.mubr.msk.bf16.mxu0 %vm226_vm0, %v200_v33  ;;  %v168_v33 = vld [vmem:[%s19701_s0 + $0x259] sm:$0xff] }
  0x39   :  { %12309 = vmatprep.mubr.msk.bf16.mxu1 %vm226_vm0, %v13720_v34  ;;  %v209_v43 = vpack.c.bf16 %v169_v35, %v168_v33  ;;  %v84_v33 = vld [vmem:[%s19701_s0 + $0x300] sm:$0xff]  ;;  %v85_v35 = vld [vmem:[%s19701_s0 + $0x308] sm:$0xff] }
  0x3f   :  { %12244 = vmatmul.mubr.msk.bf16.gmra.mxu0 %vm226_vm0, %v201_v45  ;;  %v13885_v45 = vpack.c.bf16 %v71_v37, %v70_v36  ;;  %v215_v36 = vpack.c.bf16 %v181_v22, %v180_v21  ;;  %v13987_v37 = vpack.c.bf16 %v83_v24, %v82_v23  ;;  %v1018_v21 = vld [vmem:[%s19701_s0 + $0xb2] sm:$0xff]  ;;  %v1019_v22 = vld [vmem:[%s19701_s0 + $0xc2] sm:$0xff] }
  0x40   :  { %12310 = vmatmul.mubr.msk.bf16.gmra.mxu1 %vm226_vm0, %v13752_v46  ;;  %12247 = vmatprep.mubr.msk.bf16.mxu0 %vm226_vm0, %v202_v47  ;;  %v210_v47 = vpack.c.bf16 %v171_v39, %v170_v38  ;;  %v13989_v39 = vpack.c.bf16 %v85_v35, %v84_v33 }
  0x41   :  { %12313 = vmatprep.mubr.msk.bf16.mxu1 %vm226_vm0, %v104_v48  ;;  %v13887_v48 = vpack.c.bf16 %v73_v41, %v72_v40  ;;  %v184_v40 = vld [vmem:[%s19701_s0 + $0x319] sm:$0xff]  ;;  %v185_v41 = vld [vmem:[%s19701_s0 + $0x321] sm:$0xff] }
  0x47   :  { %12248 = vmatmul.mubr.msk.bf16.gmra.mxu0 %vm226_vm0, %v203_v59  ;;  %v211_v59 = vpack.c.bf16 %v173_v50, %v172_v49  ;;  %v1003_v49 = vld [vmem:[%s19701_s0 + $0x2] sm:$0xff]  ;;  %v1004_v50 = vld [vmem:[%s19701_s0 + $0xa] sm:$0xff] }
  0x48   :  { %12314 = vmatmul.mubr.msk.bf16.gmra.mxu1 %vm226_vm0, %v13783_v60  ;;  %12251 = vmatprep.mubr.msk.bf16.mxu0 %vm226_vm0, %v204_v61  ;;  %v13919_v61 = vpack.c.bf16 %v75_v52, %v74_v51  ;;  %v217_v51 = vpack.c.bf16 %v185_v41, %v184_v40  ;;  %v1067_v53 = vpack.c.bf16 %v1004_v50, %v1003_v49 }
  0x49   :  { %12317 = vmatprep.mubr.msk.bf16.mxu1 %vm226_vm0, %v13785_v62 }
  0x4f   :  { %12252 = vmatmul.mubr.msk.bf16.gmra.mxu0 %vm226_vm0, %v205_v9  ;;  %v80_v9 = vld [vmem:[%s19701_s0 + $0x2d0] sm:$0xff] }
  0x50   :  { %12318 = vmatmul.mubr.msk.bf16.gmra.mxu1 %vm226_vm0, %v13817_v10  ;;  %12255 = vmatprep.mubr.msk.bf16.mxu0 %vm226_vm0, %v206_v11  ;;  %v81_v11 = vld [vmem:[%s19701_s0 + $0x2d8] sm:$0xff] }
  0x51   :  { %12321 = vmatprep.mubr.msk.bf16.mxu1 %vm226_vm0, %v13819_v12  ;;  %v13955_v19 = vpack.c.bf16 %v81_v11, %v80_v9  ;;  %v1014_v9 = vld [vmem:[%s19701_s0 + $0x82] sm:$0xff]  ;;  %v1015_v11 = vld [vmem:[%s19701_s0 + $0x92] sm:$0xff] }
  0x57   :  { %12256 = vmatmul.mubr.msk.bf16.gmra.mxu0 %vm226_vm0, %v207_v25  ;;  %v182_v25 = vld [vmem:[%s19701_s0 + $0x301] sm:$0xff] }
  0x58   :  { %12322 = vmatmul.mubr.msk.bf16.gmra.mxu1 %vm226_vm0, %v13851_v27  ;;  %12259 = vmatprep.mubr.msk.bf16.mxu0 %vm226_vm0, %v208_v28  ;;  %v183_v28 = vld [vmem:[%s19701_s0 + $0x309] sm:$0xff] }
  0x59   :  { %12325 = vmatprep.mubr.msk.bf16.mxu1 %vm226_vm0, %v13853_v29  ;;  %v216_v38 = vpack.c.bf16 %v183_v28, %v182_v25  ;;  %v1022_v25 = vld [vmem:[%s19701_s0 + $0xe2] sm:$0xff]  ;;  %v1023_v28 = vld [vmem:[%s19701_s0 + $0xf2] sm:$0xff] }
  0x5f   :  { %12260 = vmatmul.mubr.msk.bf16.gmra.mxu0 %vm226_vm0, %v209_v43  ;;  %v86_v43 = vld [vmem:[%s19701_s0 + $0x318] sm:$0xff] }
  0x60   :  { %12326 = vmatmul.mubr.msk.bf16.gmra.mxu1 %vm226_vm0, %v13885_v45  ;;  %12263 = vmatprep.mubr.msk.bf16.mxu0 %vm226_vm0, %v210_v47  ;;  %v87_v47 = vld [vmem:[%s19701_s0 + $0x320] sm:$0xff] }
  0x61   :  { %12329 = vmatprep.mubr.msk.bf16.mxu1 %vm226_vm0, %v13887_v48  ;;  %v14015_v52 = vpack.c.bf16 %v87_v47, %v86_v43  ;;  %v1030_v43 = vld [vmem:[%s19701_s0 + $0x142] sm:$0xff]  ;;  %v1031_v47 = vld [vmem:[%s19701_s0 + $0x152] sm:$0xff] }
  0x67   :  { %12264 = vmatmul.mubr.msk.bf16.gmra.mxu0 %vm226_vm0, %v211_v59  ;;  %v1008_v59 = vld [vmem:[%s19701_s0 + $0x3a] sm:$0xff] }
  0x68   :  { %12330 = vmatmul.mubr.msk.bf16.gmra.mxu1 %vm226_vm0, %v13919_v61  ;;  %12267 = vmatprep.mubr.msk.bf16.mxu0 %vm226_vm0, %v212_v63  ;;  %v14035_v63 = vpack.c.bf16 %v1006_v57, %v1005_v55  ;;  %v14040_v3 = vpack.c.bf16 %v1008_v59, %v1007_v58  ;;  %v1035_v55 = vld [vmem:[%s19701_s0 + $0x1b2] sm:$0xff]  ;;  %v1036_v57 = vld [vmem:[%s19701_s0 + $0x1ba] sm:$0xff] }
  0x69   :  { %12333 = vmatprep.mubr.msk.bf16.mxu1 %vm226_vm0, %v13921_v0 }
  0x6f   :  { %12268 = vmatmul.mubr.msk.bf16.gmra.mxu0 %vm226_vm0, %v213_v14 }
  0x70   :  { %12334 = vmatmul.mubr.msk.bf16.gmra.mxu1 %vm226_vm0, %v13953_v16  ;;  %12271 = vmatprep.mubr.msk.bf16.mxu0 %vm226_vm0, %v214_v18 }
  0x71   :  { %12337 = vmatprep.mubr.msk.bf16.mxu1 %vm226_vm0, %v13955_v19 }
  0x77   :  { %12272 = vmatmul.mubr.msk.bf16.gmra.mxu0 %vm226_vm0, %v215_v36  ;;  %v1026_v36 = vld [vmem:[%s19701_s0 + $0x112] sm:$0xff] }
  0x78   :  { %12338 = vmatmul.mubr.msk.bf16.gmra.mxu1 %vm226_vm0, %v13987_v37  ;;  %12275 = vmatprep.mubr.msk.bf16.mxu0 %vm226_vm0, %v216_v38  ;;  %v1027_v38 = vld [vmem:[%s19701_s0 + $0x122] sm:$0xff] }
  0x79   :  { %12341 = vmatprep.mubr.msk.bf16.mxu1 %vm226_vm0, %v13989_v39 }
  0x7f   :  { %12276 = vmatmul.mubr.msk.bf16.gmra.mxu0 %vm226_vm0, %v217_v51  ;;  %v1034_v51 = vld [vmem:[%s19701_s0 + $0x172] sm:$0xff] }
  0x80   :  { %12342 = vmatmul.mubr.msk.bf16.gmra.mxu1 %vm226_vm0, %v14015_v52  ;;  %12347 = vmatprep.mubr.msk.bf16.mxu0 %vm226_vm0, %v1067_v53  ;;  %v10770_v53 = vld [vmem:[%s19701_s0 + $0x180] sm:$0xff] }
  0x81   :  { %12413 = vmatprep.mubr.msk.bf16.mxu1 %vm226_vm0, %v13489_v13  ;;  %v1009_v13 = vld [vmem:[%s19701_s0 + $0x4a] sm:$0xff] }
  0x82   :  { %v14068_v7 = vpack.c.bf16 %v1010_v5, %v1009_v13  ;;  %v1038_v13 = vld [vmem:[%s19701_s0 + $0x1d2] sm:$0xff]  ;;  %v1039_v5 = vld [vmem:[%s19701_s0 + $0x1e2] sm:$0xff] }
  0x87   :  { %12348 = vmatmul.mubr.msk.bf16.vlgmr.msra.gmra.mxu0 %vm226_vm0, %v14035_v63 }
  0x88   :  { %12478 = vmatpush3.bf16.msra.mxu0 %v13709_v26  ;;  %12414 = vmatmul.mubr.msk.bf16.vlgmr.msra.gmra.mxu1 %vm226_vm0, %v13510_v20  ;;  %v1011_v26 = vld [vmem:[%s19701_s0 + $0x62] sm:$0xff]  ;;  %v1012_v20 = vld [vmem:[%s19701_s0 + $0x6a] sm:$0xff] }
  0x89   :  { %12351 = vmatprep.mubr.msk.bf16.mxu0 %vm226_vm0, %v14040_v3  ;;  %12417 = vmatprep.mubr.msk.bf16.mxu1 %vm226_vm0, %v13539_v30  ;;  %v14071_v8 = vpack.c.bf16 %v1012_v20, %v1011_v26  ;;  %v1013_v30 = vld [vmem:[%s19701_s0 + $0x7a] sm:$0xff]  ;;  %v1040_v26 = vld [vmem:[%s19701_s0 + $0x1ea] sm:$0xff] }
  0x8a   :  { %12544 = vmatpush3.bf16.msra.mxu1 %v13407_v1  ;;  %12609 = vmatprep.subr.bf16.mxu0 %v14066_v6  ;;  %v14093_v14 = vpack.c.bf16 %v1014_v9, %v1013_v30  ;;  %v1083_v1 = vpack.c.bf16 %v1036_v57, %v1035_v55  ;;  %v14241_v30 = vpack.c.bf16 %v1040_v26, %v1039_v5 }
  0x8f   :  { %12352 = vmatmul.mubr.msk.bf16.gmra.mxu0 %vm226_vm0, %v14068_v7 }
  0x90   :  { %12418 = vmatmul.mubr.msk.bf16.gmra.mxu1 %vm226_vm0, %v13541_v32  ;;  %12355 = vmatprep.mubr.msk.bf16.mxu0 %vm226_vm0, %v14071_v8  ;;  %v1016_v32 = vld [vmem:[%s19701_s0 + $0x9a] sm:$0xff] }
  0x91   :  { %12421 = vmatprep.mubr.msk.bf16.mxu1 %vm226_vm0, %v13573_v42  ;;  %v14095_v18 = vpack.c.bf16 %v1016_v32, %v1015_v11  ;;  %v1017_v42 = vld [vmem:[%s19701_s0 + $0xaa] sm:$0xff]  ;;  %v1042_v32 = vld [vmem:[%s19701_s0 + $0x202] sm:$0xff] }
  0x92   :  { %v14117_v23 = vpack.c.bf16 %v1018_v21, %v1017_v42 }
  0x97   :  { %12356 = vmatmul.mubr.msk.bf16.gmra.mxu0 %vm226_vm0, %v14093_v14 }
  0x98   :  { %12422 = vmatmul.mubr.msk.bf16.gmra.mxu1 %vm226_vm0, %v13575_v44  ;;  %12359 = vmatprep.mubr.msk.bf16.mxu0 %vm226_vm0, %v14095_v18  ;;  %v1020_v44 = vld [vmem:[%s19701_s0 + $0xca] sm:$0xff] }
  0x99   :  { %12425 = vmatprep.mubr.msk.bf16.mxu1 %vm226_vm0, %v13607_v54  ;;  %v14119_v24 = vpack.c.bf16 %v1020_v44, %v1019_v22  ;;  %v1021_v54 = vld [vmem:[%s19701_s0 + $0xda] sm:$0xff] }
  0x9a   :  { %v14141_v33 = vpack.c.bf16 %v1022_v25, %v1021_v54  ;;  %v1044_v22 = vld [vmem:[%s19701_s0 + $0x21a] sm:$0xff] }
  0x9f   :  { %12360 = vmatmul.mubr.msk.bf16.gmra.mxu0 %vm226_vm0, %v14117_v23 }
  0xa0   :  { %12426 = vmatmul.mubr.msk.bf16.gmra.mxu1 %vm226_vm0, %v13609_v56  ;;  %12363 = vmatprep.mubr.msk.bf16.mxu0 %vm226_vm0, %v14119_v24  ;;  %v1024_v56 = vld [vmem:[%s19701_s0 + $0xfa] sm:$0xff] }
  0xa1   :  { %12429 = vmatprep.mubr.msk.bf16.mxu1 %vm226_vm0, %v13641_v2  ;;  %v14143_v35 = vpack.c.bf16 %v1024_v56, %v1023_v28  ;;  %v1025_v2 = vld [vmem:[%s19701_s0 + $0x10a] sm:$0xff] }
  0xa2   :  { %v14165_v40 = vpack.c.bf16 %v1026_v36, %v1025_v2 }
  0xa7   :  { %12364 = vmatmul.mubr.msk.bf16.gmra.mxu0 %vm226_vm0, %v14141_v33 }
  0xa8   :  { %12430 = vmatmul.mubr.msk.bf16.gmra.mxu1 %vm226_vm0, %v13643_v4  ;;  %12367 = vmatprep.mubr.msk.bf16.mxu0 %vm226_vm0, %v14143_v35  ;;  %v1028_v4 = vld [vmem:[%s19701_s0 + $0x12a] sm:$0xff] }
  0xa9   :  { %12433 = vmatprep.mubr.msk.bf16.mxu1 %vm226_vm0, %v13675_v15  ;;  %v14167_v41 = vpack.c.bf16 %v1028_v4, %v1027_v38  ;;  %v1029_v15 = vld [vmem:[%s19701_s0 + $0x13a] sm:$0xff] }
  0xaa   :  { %v14189_v49 = vpack.c.bf16 %v1030_v43, %v1029_v15 }
  0xaf   :  { %12368 = vmatmul.mubr.msk.bf16.gmra.mxu0 %vm226_vm0, %v14165_v40 }
  0xb0   :  { %12434 = vmatmul.mubr.msk.bf16.gmra.mxu1 %vm226_vm0, %v13677_v17  ;;  %12371 = vmatprep.mubr.msk.bf16.mxu0 %vm226_vm0, %v14167_v41  ;;  %v1032_v17 = vld [vmem:[%s19701_s0 + $0x15a] sm:$0xff] }
  0xb1   :  { %12437 = vmatprep.mubr.msk.bf16.mxu1 %vm226_vm0, %v13718_v31  ;;  %v14191_v50 = vpack.c.bf16 %v1032_v17, %v1031_v47  ;;  %v1033_v31 = vld [vmem:[%s19701_s0 + $0x16a] sm:$0xff]  ;;  %v1046_v17 = vld [vmem:[%s19701_s0 + $0x232] sm:$0xff] }
  0xb2   :  { %v14219_v58 = vpack.c.bf16 %v1034_v51, %v1033_v31  ;;  %v1045_v47 = vld [vmem:[%s19701_s0 + $0x22a] sm:$0xff] }
  0xb7   :  { %12372 = vmatmul.mubr.msk.bf16.gmra.mxu0 %vm226_vm0, %v14189_v49 }
  0xb8   :  { %12438 = vmatmul.mubr.msk.bf16.gmra.mxu1 %vm226_vm0, %v13720_v34  ;;  %12375 = vmatprep.mubr.msk.bf16.mxu0 %vm226_vm0, %v14191_v50  ;;  %v10771_v34 = vld [vmem:[%s19701_s0 + $0x188] sm:$0xff] }
  0xb9   :  { %12441 = vmatprep.mubr.msk.bf16.mxu1 %vm226_vm0, %v13752_v46  ;;  %v1636_v59 = vpack.c.bf16 %v10771_v34, %v10770_v53  ;;  %v1037_v46 = vld [vmem:[%s19701_s0 + $0x1ca] sm:$0xff] }
  0xba   :  { %v14239_v20 = vpack.c.bf16 %v1038_v13, %v1037_v46  ;;  %v1048_v53 = vld [vmem:[%s19701_s0 + $0x24a] sm:$0xff] }
  0xbf   :  { %12376 = vmatmul.mubr.msk.bf16.gmra.mxu0 %vm226_vm0, %v14219_v58 }
  0xc0   :  { %12442 = vmatmul.mubr.msk.bf16.gmra.mxu1 %vm226_vm0, %v1636_v59  ;;  %12379 = vmatprep.mubr.msk.bf16.mxu0 %vm226_vm0, %v1083_v1  ;;  %v14299_v59 = vpack.c.bf16 %v1046_v17, %v1045_v47 }
  0xc1   :  { %12445 = vmatprep.mubr.msk.bf16.mxu1 %vm226_vm0, %v13783_v60  ;;  %v1041_v60 = vld [vmem:[%s19701_s0 + $0x1fa] sm:$0xff] }
  0xc2   :  { %v14267_v28 = vpack.c.bf16 %v1042_v32, %v1041_v60  ;;  %v1049_v60 = vld [vmem:[%s19701_s0 + $0x25a] sm:$0xff]  ;;  %v1050_v32 = vld [vmem:[%s19701_s0 + $0x262] sm:$0xff] }
  0xc7   :  { %v12217_v9 = vpop.f32.mrf.mxu0  ;;  %12380 = vmatmul.mubr.msk.bf16.gmra.mxu0 %vm226_vm0, %v14239_v20 }
  0xc8   :  { %v12283_v11 = vpop.f32.mrf.mxu1  ;;  %12446 = vmatmul.mubr.msk.bf16.gmra.mxu1 %vm226_vm0, %v13785_v62  ;;  %12383 = vmatprep.mubr.msk.bf16.mxu0 %vm226_vm0, %v14241_v30  ;;  %v1043_v62 = vld [vmem:[%s19701_s0 + $0x212] sm:$0xff] }
  0xc9   :  { %v14255_v42 = vadd.f32 %v12283_v11, %v12217_v9  ;;  %v357_v21 = vpop.f32.mrf.mxu0  ;;  %12449 = vmatprep.mubr.msk.bf16.mxu1 %vm226_vm0, %v13817_v10  ;;  %v14269_v2 = vpack.c.bf16 %v1044_v22, %v1043_v62  ;;  %v1052_v22 = vld [vmem:[%s19701_s0 + $0x27a] sm:$0xff] }
  0xca   :  { %v748_v44 = vpop.f32.mrf.mxu1 }
  0xcb   :  { %v14265_v54 = vadd.f32 %v748_v44, %v357_v21  ;;  %v12218_v25 = vpop.f32.mrf.mxu0 }
  0xcc   :  { %v12284_v56 = vpop.f32.mrf.mxu1 }
  0xcd   :  { %v14271_v36 = vadd.f32 %v12284_v56, %v12218_v25  ;;  %v360_v10 = vpop.f32.mrf.mxu0 }
  0xce   :  { %v751_v38 = vpop.f32.mrf.mxu1 }
  0xcf   :  { %v14273_v4 = vadd.f32 %v751_v38, %v360_v10  ;;  %v12221_v15 = vpop.f32.mrf.mxu0  ;;  %12384 = vmatmul.mubr.msk.bf16.gmra.mxu0 %vm226_vm0, %v14267_v28  ;;  %v14331_v10 = vpack.c.bf16 %v1050_v32, %v1049_v60 }
  0xd0   :  { %v12287_v43 = vpop.f32.mrf.mxu1  ;;  %12450 = vmatmul.mubr.msk.bf16.gmra.mxu1 %vm226_vm0, %v13819_v12  ;;  %12387 = vmatprep.mubr.msk.bf16.mxu0 %vm226_vm0, %v14269_v2  ;;  %v1047_v12 = vld [vmem:[%s19701_s0 + $0x242] sm:$0xff] }
  0xd1   :  { %v14287_v31 = vadd.f32 %v12287_v43, %v12221_v15  ;;  %v373_v51 = vpop.f32.mrf.mxu0  ;;  %12453 = vmatprep.mubr.msk.bf16.mxu1 %vm226_vm0, %v13851_v27  ;;  %v14301_v46 = vpack.c.bf16 %v1048_v53, %v1047_v12  ;;  %v1053_v53 = vld [vmem:[%s19701_s0 + $0x28a] sm:$0xff] }
  0xd2   :  { %v764_v34 = vpop.f32.mrf.mxu1 }
  0xd3   :  { %v14297_v55 = vadd.f32 %v764_v34, %v373_v51  ;;  %v12222_v57 = vpop.f32.mrf.mxu0  ;;  %v1054_v34 = vld [vmem:[%s19701_s0 + $0x292] sm:$0xff] }
  0xd4   :  { %v12288_v1 = vpop.f32.mrf.mxu1  ;;  %v14363_v60 = vpack.c.bf16 %v1054_v34, %v1053_v53  ;;  %v1060_v53 = vld [vmem:[%s19701_s0 + $0x2da] sm:$0xff] }
  0xd5   :  { %v14303_v13 = vadd.f32 %v12288_v1, %v12222_v57  ;;  %v376_v27 = vpop.f32.mrf.mxu0 }
  0xd6   :  { %v767_v5 = vpop.f32.mrf.mxu1 }
  0xd7   :  { %v14305_v26 = vadd.f32 %v767_v5, %v376_v27  ;;  %v12225_v9 = vpop.f32.mrf.mxu0  ;;  %12388 = vmatmul.mubr.msk.bf16.gmra.mxu0 %vm226_vm0, %v14299_v59  ;;  %v1056_v27 = vld [vmem:[%s19701_s0 + $0x2aa] sm:$0xff] }
  0xd8   :  { %v12291_v11 = vpop.f32.mrf.mxu1  ;;  %12454 = vmatmul.mubr.msk.bf16.gmra.mxu1 %vm226_vm0, %v13853_v29  ;;  %12391 = vmatprep.mubr.msk.bf16.mxu0 %vm226_vm0, %v14301_v46  ;;  %v1051_v29 = vld [vmem:[%s19701_s0 + $0x272] sm:$0xff] }
  0xd9   :  { %v14319_v21 = vadd.f32 %v12291_v11, %v12225_v9  ;;  %v389_v62 = vpop.f32.mrf.mxu0  ;;  %12457 = vmatprep.mubr.msk.bf16.mxu1 %vm226_vm0, %v13885_v45  ;;  %v14333_v15 = vpack.c.bf16 %v1052_v22, %v1051_v29 }
  0xda   :  { %v780_v44 = vpop.f32.mrf.mxu1 }
  0xdb   :  { %v14329_v25 = vadd.f32 %v780_v44, %v389_v62  ;;  %v12226_v56 = vpop.f32.mrf.mxu0 }
  0xdc   :  { %v12292_v38 = vpop.f32.mrf.mxu1 }
  0xdd   :  { %v14335_v43 = vadd.f32 %v12292_v38, %v12226_v56  ;;  %v392_v45 = vpop.f32.mrf.mxu0 }
  0xde   :  { %v783_v47 = vpop.f32.mrf.mxu1 }
  0xdf   :  { %v14337_v17 = vadd.f32 %v783_v47, %v392_v45  ;;  %v12229_v51 = vpop.f32.mrf.mxu0  ;;  %12392 = vmatmul.mubr.msk.bf16.gmra.mxu0 %vm226_vm0, %v14331_v10  ;;  %v1057_v45 = vld [vmem:[%s19701_s0 + $0x2ba] sm:$0xff]  ;;  %v1058_v47 = vld [vmem:[%s19701_s0 + $0x2c2] sm:$0xff] }
  0xe0   :  { %v12295_v12 = vpop.f32.mrf.mxu1  ;;  %12458 = vmatmul.mubr.msk.bf16.gmra.mxu1 %vm226_vm0, %v13887_v48  ;;  %12395 = vmatprep.mubr.msk.bf16.mxu0 %vm226_vm0, %v14333_v15  ;;  %v1055_v48 = vld [vmem:[%s19701_s0 + $0x2a2] sm:$0xff] }
  0xe1   :  { %v14351_v57 = vadd.f32 %v12295_v12, %v12229_v51  ;;  %v405_v1 = vpop.f32.mrf.mxu0  ;;  %12461 = vmatprep.mubr.msk.bf16.mxu1 %vm226_vm0, %v13919_v61  ;;  %v14365_v62 = vpack.c.bf16 %v1056_v27, %v1055_v48  ;;  %v14395_v27 = vpack.c.bf16 %v1058_v47, %v1057_v45  ;;  %v1061_v45 = vld [vmem:[%s19701_s0 + $0x2ea] sm:$0xff]  ;;  %v1062_v47 = vld [vmem:[%s19701_s0 + $0x2f2] sm:$0xff] }
  0xe2   :  { %v796_v5 = vpop.f32.mrf.mxu1 }
  0xe3   :  { %v14361_v9 = vadd.f32 %v796_v5, %v405_v1  ;;  %v12230_v11 = vpop.f32.mrf.mxu0 }
  0xe4   :  { %v12296_v32 = vpop.f32.mrf.mxu1 }
  0xe5   :  { %v14367_v29 = vadd.f32 %v12296_v32, %v12230_v11  ;;  %v408_v61 = vpop.f32.mrf.mxu0 }
  0xe6   :  { %v799_v22 = vpop.f32.mrf.mxu1 }
  0xe7   :  { %v14369_v44 = vadd.f32 %v799_v22, %v408_v61  ;;  %v12233_v56 = vpop.f32.mrf.mxu0  ;;  %12396 = vmatmul.mubr.msk.bf16.gmra.mxu0 %vm226_vm0, %v14363_v60 }
  0xe8   :  { %v12299_v38 = vpop.f32.mrf.mxu1  ;;  %12462 = vmatmul.mubr.msk.bf16.gmra.mxu1 %vm226_vm0, %v13921_v0  ;;  %12399 = vmatprep.mubr.msk.bf16.mxu0 %vm226_vm0, %v14365_v62  ;;  %v1059_v0 = vld [vmem:[%s19701_s0 + $0x2d2] sm:$0xff] }
  0xe9   :  { %v14383_v51 = vadd.f32 %v12299_v38, %v12233_v56  ;;  %v421_v12 = vpop.f32.mrf.mxu0  ;;  %12465 = vmatprep.mubr.msk.bf16.mxu1 %vm226_vm0, %v13953_v16  ;;  %v14397_v11 = vpack.c.bf16 %v1060_v53, %v1059_v0  ;;  %v1064_v53 = vld [vmem:[%s19701_s0 + $0x30a] sm:$0xff] }
  0xea   :  { %v812_v34 = vpop.f32.mrf.mxu1 }
  0xeb   :  { %v14393_v1 = vadd.f32 %v812_v34, %v421_v12  ;;  %v12234_v48 = vpop.f32.mrf.mxu0  ;;  %19759 = vst [vmem:[#allocation4_spill] sm:$0xff] %v14397_v11 }
  0xec   :  { %v12300_v5 = vpop.f32.mrf.mxu1 }
  0xed   :  { %19758 = vst [vmem:[#allocation3_spill] sm:$0xff] %v14393_v1  ;;  %v14399_v32 = vadd.f32 %v12300_v5, %v12234_v48  ;;  %v424_v16 = vpop.f32.mrf.mxu0 }
  0xee   :  { %v815_v61 = vpop.f32.mrf.mxu1 }
  0xef   :  { %19760 = vst [vmem:[#allocation5_spill] sm:$0xff] %v14399_v32  ;;  %v14401_v22 = vadd.f32 %v815_v61, %v424_v16  ;;  %v12237_v56 = vpop.f32.mrf.mxu0  ;;  %12400 = vmatmul.mubr.msk.bf16.gmra.mxu0 %vm226_vm0, %v14395_v27  ;;  %v14427_v16 = vpack.c.bf16 %v1062_v47, %v1061_v45  ;;  %v1065_v45 = vld [vmem:[%s19701_s0 + $0x31a] sm:$0xff]  ;;  %v10802_v47 = vld [vmem:[%s19701_s0 + $0x330] sm:$0xff] }
  0xf0   :  { %v12303_v38 = vpop.f32.mrf.mxu1  ;;  %12466 = vmatmul.mubr.msk.bf16.gmra.mxu1 %vm226_vm0, %v13955_v19  ;;  %12403 = vmatprep.mubr.msk.bf16.mxu0 %vm226_vm0, %v14397_v11  ;;  %v1063_v19 = vld [vmem:[%s19701_s0 + $0x302] sm:$0xff] }
  0xf1   :  { %19761 = vst [vmem:[#allocation6_spill] sm:$0xff] %v14401_v22  ;;  %v14415_v12 = vadd.f32 %v12303_v38, %v12237_v56  ;;  %v437_v0 = vpop.f32.mrf.mxu0  ;;  %12469 = vmatprep.mubr.msk.bf16.mxu1 %vm226_vm0, %v13987_v37  ;;  %19764 = vst [vmem:[#allocation9_spill] sm:$0xff] %v14427_v16  ;;  %v14429_v56 = vpack.c.bf16 %v1064_v53, %v1063_v19  ;;  %v10837_v53 = vld [vmem:[%s19701_s0 + $0x19] sm:$0xff] }
  0xf2   :  { %v828_v34 = vpop.f32.mrf.mxu1 }
  0xf3   :  { %19762 = vst [vmem:[#allocation7_spill] sm:$0xff] %v14415_v12  ;;  %v14425_v48 = vadd.f32 %v828_v34, %v437_v0  ;;  %v12238_v5 = vpop.f32.mrf.mxu0  ;;  %19765 = vst [vmem:[#allocation10_spill] sm:$0xff] %v14429_v56  ;;  %v10838_v34 = vld [vmem:[%s19701_s0 + $0x21] sm:$0xff] }
  0xf4   :  { %v12304_v61 = vpop.f32.mrf.mxu1 }
  0xf5   :  { %19763 = vst [vmem:[#allocation8_spill] sm:$0xff] %v14425_v48  ;;  %v14431_v38 = vadd.f32 %v12304_v61, %v12238_v5  ;;  %v440_v37 = vpop.f32.mrf.mxu0 }
  0xf6   :  { %v831_v11 = vpop.f32.mrf.mxu1 }
  0xf7   :  { %19766 = vst [vmem:[#allocation11_spill] sm:$0xff] %v14431_v38  ;;  %v14433_v12 = vadd.f32 %v831_v11, %v440_v37  ;;  %v12241_v22 = vpop.f32.mrf.mxu0  ;;  %12404 = vmatmul.mubr.msk.bf16.gmra.mxu0 %vm226_vm0, %v14427_v16  ;;  %v1066_v11 = vld [vmem:[%s19701_s0 + $0x322] sm:$0xff] }
  0xf8   :  { %v12307_v32 = vpop.f32.mrf.mxu1  ;;  %12470 = vmatmul.mubr.msk.bf16.gmra.mxu1 %vm226_vm0, %v13989_v39  ;;  %12407 = vmatprep.mubr.msk.bf16.mxu0 %vm226_vm0, %v14429_v56  ;;  %v10803_v39 = vld [vmem:[%s19701_s0 + $0x338] sm:$0xff]  ;;  %v2174_v56 = vpack.c.bf16 %v10838_v34, %v10837_v53 }
  0xf9   :  { %19767 = vst [vmem:[#allocation12_spill] sm:$0xff] %v14433_v12  ;;  %v14450_v0 = vadd.f32 %v12307_v32, %v12241_v22  ;;  %v453_v19 = vpop.f32.mrf.mxu0  ;;  %12473 = vmatprep.mubr.msk.bf16.mxu1 %vm226_vm0, %v14015_v52  ;;  %v14465_v22 = vpack.c.bf16 %v1066_v11, %v1065_v45  ;;  %v1652_v52 = vpack.c.bf16 %v10803_v39, %v10802_v47  ;;  %v10839_v45 = vld [vmem:[%s19701_s0 + $0x31] sm:$0xff]  ;;  %v10840_v11 = vld [vmem:[%s19701_s0 + $0x39] sm:$0xff] }
  0xfa   :  { %v844_v5 = vpop.f32.mrf.mxu1  ;;  %v14493_v34 = vpack.c.bf16 %v10840_v11, %v10839_v45  ;;  %v10843_v11 = vld [vmem:[%s19701_s0 + $0x61] sm:$0xff] }
  0xfb   :  { %19768 = vst [vmem:[#allocation13_spill] sm:$0xff] %v14450_v0  ;;  %v14463_v61 = vadd.f32 %v844_v5, %v453_v19  ;;  %v12242_v32 = vpop.f32.mrf.mxu0  ;;  %v10841_v19 = vld [vmem:[%s19701_s0 + $0x49] sm:$0xff] }
  0xfc   :  { %v12308_v37 = vpop.f32.mrf.mxu1 }
  0xfd   :  { %v14467_v0 = vadd.f32 %v12308_v37, %v12242_v32  ;;  %v456_v12 = vpop.f32.mrf.mxu0 }
  0xfe   :  { %v847_v38 = vpop.f32.mrf.mxu1 }
  0xff   :  { %v14469_v48 = vadd.f32 %v847_v38, %v456_v12  ;;  %v12245_v16 = vpop.f32.mrf.mxu0  ;;  %12408 = vmatmul.mubr.msk.bf16.gmra.mxu0 %vm226_vm0, %v14465_v22 }
 0x100   :  { %v12311_v1 = vpop.f32.mrf.mxu1  ;;  %12474 = vmatmul.mubr.msk.bf16.gmra.mxu1 %vm226_vm0, %v1652_v52  ;;  %12479 = vmatprep.mubr.msk.bf16.mxu0 %vm226_vm0, %v2174_v56  ;;  %v10842_v56 = vld [vmem:[%s19701_s0 + $0x51] sm:$0xff] }
 0x101   :  { %v14481_v47 = vadd.f32 %v12311_v1, %v12245_v16  ;;  %v469_v12 = vpop.f32.mrf.mxu0  ;;  %12545 = vmatprep.mubr.msk.bf16.mxu1 %vm226_vm0, %v14035_v63  ;;  %v13409_v16 = vld [vmem:[%s19700_s1 + $0x38] sm:$0xff]   ;;  %v14500_v32 = vpack.c.bf16 %v10842_v56, %v10841_v19 }
 0x102   :  { %v860_v38 = vpop.f32.mrf.mxu1  ;;  %12675 = vmatprep.subr.bf16.mxu1 %v13409_v16 }
 0x103   :  { %19769 = vst [vmem:[#allocation14_spill] sm:$0xff] %v14481_v47  ;;  %v14491_v39 = vadd.f32 %v860_v38, %v469_v12  ;;  %v12246_v53 = vpop.f32.mrf.mxu0  ;;  %19771 = vst [vmem:[#allocation16_spill] sm:$0xff] %v14500_v32  ;;  %v10844_v12 = vld [vmem:[%s19701_s0 + $0x69] sm:$0xff]  ;;  %v14518_v38 = vld [vmem:[%s19700_s1 + $0x40] sm:$0xff]  }
 0x104   :  { %v12312_v1 = vpop.f32.mrf.mxu1 }
 0x105   :  { %v14498_v63 = vadd.f32 %v12312_v1, %v12246_v53  ;;  %v472_v5 = vpop.f32.mrf.mxu0 }
 0x106   :  { %v863_v37 = vpop.f32.mrf.mxu1 }
 0x107   :  { %19770 = vst [vmem:[#allocation15_spill] sm:$0xff] %v14498_v63  ;;  %v14502_v52 = vadd.f32 %v863_v37, %v472_v5  ;;  %v12249_v47 = vpop.f32.mrf.mxu0  ;;  %12480 = vmatmul.mubr.msk.bf16.vlgmr.msra.gmra.mxu0 %vm226_vm0, %v14493_v34  ;;  %v14535_v5 = vpack.c.bf16 %v10844_v12, %v10843_v11  ;;  %v10847_v11 = vld [vmem:[%s19701_s0 + $0x91] sm:$0xff] }
 0x108   :  { %v12315_v45 = vpop.f32.mrf.mxu1  ;;  %12610 = vmatpush3.bf16.msra.mxu0 %v14066_v6  ;;  %12546 = vmatmul.mubr.msk.bf16.vlgmr.msra.gmra.mxu1 %vm226_vm0, %v14040_v3  ;;  %v10845_v3 = vld [vmem:[%s19701_s0 + $0x79] sm:$0xff]  ;;  %v10846_v6 = vld [vmem:[%s19701_s0 + $0x81] sm:$0xff] }
 0x109   :  { %19772 = vst [vmem:[#allocation17_spill] sm:$0xff] %v14502_v52  ;;  %v14520_v19 = vadd.f32 %v12315_v45, %v12249_v47  ;;  %v485_v56 = vpop.f32.mrf.mxu0  ;;  %12483 = vmatprep.mubr.msk.bf16.mxu0 %vm226_vm0, %v14500_v32  ;;  %12549 = vmatprep.mubr.msk.bf16.mxu1 %vm226_vm0, %v14068_v7  ;;  %v14537_v45 = vpack.c.bf16 %v10846_v6, %v10845_v3 }
 0x10a   :  { %v876_v53 = vpop.f32.mrf.mxu1  ;;  %12676 = vmatpush3.bf16.msra.mxu1 %v13409_v16  ;;  %12741 = vmatprep.subr.bf16.mxu0 %v14518_v38 }
 0x10b   :  { %19773 = vst [vmem:[#allocation18_spill] sm:$0xff] %v14520_v19  ;;  %v14533_v47 = vadd.f32 %v876_v53, %v485_v56  ;;  %v12250_v1 = vpop.f32.mrf.mxu0  ;;  %19774 = vst [vmem:[#allocation19_spill] sm:$0xff] %v14537_v45  ;;  %v10850_v56 = vld [vmem:[%s19701_s0 + $0xb1] sm:$0xff] }
 0x10c   :  { %v12316_v37 = vpop.f32.mrf.mxu1 }
 0x10d   :  { %v14539_v7 = vadd.f32 %v12316_v37, %v12250_v1  ;;  %v488_v32 = vpop.f32.mrf.mxu0 }
 0x10e   :  { %v879_v19 = vpop.f32.mrf.mxu1 }
 0x10f   :  { %19775 = vst [vmem:[#allocation20_spill] sm:$0xff] %v14539_v7  ;;  %v14541_v52 = vadd.f32 %v879_v19, %v488_v32  ;;  %v12253_v63 = vpop.f32.mrf.mxu0  ;;  %12484 = vmatmul.mubr.msk.bf16.gmra.mxu0 %vm226_vm0, %v14535_v5  ;;  %v10848_v32 = vld [vmem:[%s19701_s0 + $0x99] sm:$0xff] }
 0x110   :  { %v12319_v16 = vpop.f32.mrf.mxu1  ;;  %12550 = vmatmul.mubr.msk.bf16.gmra.mxu1 %vm226_vm0, %v14071_v8  ;;  %12487 = vmatprep.mubr.msk.bf16.mxu0 %vm226_vm0, %v14537_v45  ;;  %v10849_v8 = vld [vmem:[%s19701_s0 + $0xa9] sm:$0xff]  ;;  %v14567_v1 = vpack.c.bf16 %v10848_v32, %v10847_v11  ;;  %v10851_v11 = vld [vmem:[%s19701_s0 + $0xc1] sm:$0xff] }
 0x111   :  { %19776 = vst [vmem:[#allocation21_spill] sm:$0xff] %v14541_v52  ;;  %v14555_v12 = vadd.f32 %v12319_v16, %v12253_v63  ;;  %v501_v19 = vpop.f32.mrf.mxu0  ;;  %12553 = vmatprep.mubr.msk.bf16.mxu1 %vm226_vm0, %v14093_v14  ;;  %v14569_v37 = vpack.c.bf16 %v10850_v56, %v10849_v8  ;;  %v10854_v8 = vld [vmem:[%s19701_s0 + $0xe1] sm:$0xff] }
 0x112   :  { %v892_v3 = vpop.f32.mrf.mxu1 }
 0x113   :  { %19777 = vst [vmem:[#allocation22_spill] sm:$0xff] %v14555_v12  ;;  %v14565_v6 = vadd.f32 %v892_v3, %v501_v19  ;;  %v12254_v53 = vpop.f32.mrf.mxu0  ;;  %19778 = vst [vmem:[#allocation23_spill] sm:$0xff] %v14569_v37 }
 0x114   :  { %v12320_v63 = vpop.f32.mrf.mxu1 }
 0x115   :  { %v14571_v16 = vadd.f32 %v12320_v63, %v12254_v53  ;;  %v504_v14 = vpop.f32.mrf.mxu0 }
 0x116   :  { %v895_v45 = vpop.f32.mrf.mxu1 }
 0x117   :  { %19779 = vst [vmem:[#allocation24_spill] sm:$0xff] %v14571_v16  ;;  %v14573_v12 = vadd.f32 %v895_v45, %v504_v14  ;;  %v12257_v52 = vpop.f32.mrf.mxu0  ;;  %12488 = vmatmul.mubr.msk.bf16.gmra.mxu0 %vm226_vm0, %v14567_v1  ;;  %v10852_v45 = vld [vmem:[%s19701_s0 + $0xc9] sm:$0xff] }
 0x118   :  { %v12323_v7 = vpop.f32.mrf.mxu1  ;;  %12554 = vmatmul.mubr.msk.bf16.gmra.mxu1 %vm226_vm0, %v14095_v18  ;;  %12491 = vmatprep.mubr.msk.bf16.mxu0 %vm226_vm0, %v14569_v37  ;;  %v10853_v18 = vld [vmem:[%s19701_s0 + $0xd9] sm:$0xff]  ;;  %v14599_v63 = vpack.c.bf16 %v10852_v45, %v10851_v11  ;;  %v10855_v11 = vld [vmem:[%s19701_s0 + $0xf1] sm:$0xff] }
 0x119   :  { %19780 = vst [vmem:[#allocation25_spill] sm:$0xff] %v14573_v12  ;;  %v14587_v32 = vadd.f32 %v12323_v7, %v12257_v52  ;;  %v517_v19 = vpop.f32.mrf.mxu0  ;;  %12557 = vmatprep.mubr.msk.bf16.mxu1 %vm226_vm0, %v14117_v23  ;;  %v14601_v7 = vpack.c.bf16 %v10854_v8, %v10853_v18  ;;  %v10858_v18 = vld [vmem:[%s19701_s0 + $0x111] sm:$0xff] }
 0x11a   :  { %v908_v56 = vpop.f32.mrf.mxu1 }
 0x11b   :  { %19781 = vst [vmem:[#allocation26_spill] sm:$0xff] %v14587_v32  ;;  %v14597_v3 = vadd.f32 %v908_v56, %v517_v19  ;;  %v12258_v53 = vpop.f32.mrf.mxu0  ;;  %19782 = vst [vmem:[#allocation27_spill] sm:$0xff] %v14601_v7 }
 0x11c   :  { %v12324_v52 = vpop.f32.mrf.mxu1 }
 0x11d   :  { %v14603_v14 = vadd.f32 %v12324_v52, %v12258_v53  ;;  %v520_v23 = vpop.f32.mrf.mxu0 }
 0x11e   :  { %v911_v37 = vpop.f32.mrf.mxu1 }
 0x11f   :  { %19783 = vst [vmem:[#allocation28_spill] sm:$0xff] %v14603_v14  ;;  %v14605_v32 = vadd.f32 %v911_v37, %v520_v23  ;;  %v12261_v12 = vpop.f32.mrf.mxu0  ;;  %12492 = vmatmul.mubr.msk.bf16.gmra.mxu0 %vm226_vm0, %v14599_v63  ;;  %v10856_v37 = vld [vmem:[%s19701_s0 + $0xf9] sm:$0xff] }
 0x120   :  { %v12327_v16 = vpop.f32.mrf.mxu1  ;;  %12558 = vmatmul.mubr.msk.bf16.gmra.mxu1 %vm226_vm0, %v14119_v24  ;;  %12495 = vmatprep.mubr.msk.bf16.mxu0 %vm226_vm0, %v14601_v7  ;;  %v10857_v24 = vld [vmem:[%s19701_s0 + $0x109] sm:$0xff]  ;;  %v14631_v52 = vpack.c.bf16 %v10856_v37, %v10855_v11  ;;  %v10859_v11 = vld [vmem:[%s19701_s0 + $0x121] sm:$0xff] }
 0x121   :  { %19784 = vst [vmem:[#allocation29_spill] sm:$0xff] %v14605_v32  ;;  %v14619_v45 = vadd.f32 %v12327_v16, %v12261_v12  ;;  %v533_v19 = vpop.f32.mrf.mxu0  ;;  %12561 = vmatprep.mubr.msk.bf16.mxu1 %vm226_vm0, %v14141_v33  ;;  %v14633_v16 = vpack.c.bf16 %v10858_v18, %v10857_v24  ;;  %v10862_v24 = vld [vmem:[%s19701_s0 + $0x141] sm:$0xff] }
 0x122   :  { %v924_v8 = vpop.f32.mrf.mxu1 }
 0x123   :  { %19785 = vst [vmem:[#allocation30_spill] sm:$0xff] %v14619_v45  ;;  %v14629_v56 = vadd.f32 %v924_v8, %v533_v19  ;;  %v12262_v53 = vpop.f32.mrf.mxu0  ;;  %19786 = vst [vmem:[#allocation31_spill] sm:$0xff] %v14633_v16 }
 0x124   :  { %v12328_v12 = vpop.f32.mrf.mxu1 }
 0x125   :  { %v14635_v23 = vadd.f32 %v12328_v12, %v12262_v53  ;;  %v536_v33 = vpop.f32.mrf.mxu0 }
 0x126   :  { %v927_v7 = vpop.f32.mrf.mxu1 }
 0x127   :  { %19787 = vst [vmem:[#allocation32_spill] sm:$0xff] %v14635_v23  ;;  %v14637_v45 = vadd.f32 %v927_v7, %v536_v33  ;;  %v12265_v32 = vpop.f32.mrf.mxu0  ;;  %12496 = vmatmul.mubr.msk.bf16.gmra.mxu0 %vm226_vm0, %v14631_v52  ;;  %v10860_v7 = vld [vmem:[%s19701_s0 + $0x129] sm:$0xff] }
 0x128   :  { %v12331_v14 = vpop.f32.mrf.mxu1  ;;  %12562 = vmatmul.mubr.msk.bf16.gmra.mxu1 %vm226_vm0, %v14143_v35  ;;  %12499 = vmatprep.mubr.msk.bf16.mxu0 %vm226_vm0, %v14633_v16  ;;  %v10861_v35 = vld [vmem:[%s19701_s0 + $0x139] sm:$0xff]  ;;  %v2185_v12 = vpack.c.bf16 %v10860_v7, %v10859_v11  ;;  %v10863_v11 = vld [vmem:[%s19701_s0 + $0x151] sm:$0xff] }
 0x129   :  { %19788 = vst [vmem:[#allocation33_spill] sm:$0xff] %v14637_v45  ;;  %v14651_v37 = vadd.f32 %v12331_v14, %v12265_v32  ;;  %v549_v19 = vpop.f32.mrf.mxu0  ;;  %12565 = vmatprep.mubr.msk.bf16.mxu1 %vm226_vm0, %v14165_v40  ;;  %v14663_v32 = vpack.c.bf16 %v10862_v24, %v10861_v35  ;;  %v10864_v7 = vld [vmem:[%s19701_s0 + $0x159] sm:$0xff]  ;;  %v10866_v35 = vld [vmem:[%s19701_s0 + $0x171] sm:$0xff] }
 0x12a   :  { %v940_v18 = vpop.f32.mrf.mxu1 }
 0x12b   :  { %19789 = vst [vmem:[#allocation34_spill] sm:$0xff] %v14651_v37  ;;  %v14661_v8 = vadd.f32 %v940_v18, %v549_v19  ;;  %v12266_v53 = vpop.f32.mrf.mxu0  ;;  %19790 = vst [vmem:[#allocation35_spill] sm:$0xff] %v14663_v32 }
 0x12c   :  { %v12332_v33 = vpop.f32.mrf.mxu1 }
 0x12d   :  { %v14665_v14 = vadd.f32 %v12332_v33, %v12266_v53  ;;  %v552_v16 = vpop.f32.mrf.mxu0 }
 0x12e   :  { %v943_v40 = vpop.f32.mrf.mxu1 }
 0x12f   :  { %19791 = vst [vmem:[#allocation36_spill] sm:$0xff] %v14665_v14  ;;  %v14667_v37 = vadd.f32 %v943_v40, %v552_v16  ;;  %v12269_v45 = vpop.f32.mrf.mxu0  ;;  %12500 = vmatmul.mubr.msk.bf16.gmra.mxu0 %vm226_vm0, %v2185_v12  ;;  %v2187_v12 = vpack.c.bf16 %v10864_v7, %v10863_v11  ;;  %v10867_v11 = vld [vmem:[%s19701_s0 + $0x181] sm:$0xff]  ;;  %v10868_v7 = vld [vmem:[%s19701_s0 + $0x189] sm:$0xff] }
 0x130   :  { %v12335_v23 = vpop.f32.mrf.mxu1  ;;  %12566 = vmatmul.mubr.msk.bf16.gmra.mxu1 %vm226_vm0, %v14167_v41  ;;  %12503 = vmatprep.mubr.msk.bf16.mxu0 %vm226_vm0, %v14663_v32  ;;  %v10865_v41 = vld [vmem:[%s19701_s0 + $0x169] sm:$0xff] }
 0x131   :  { %19792 = vst [vmem:[#allocation37_spill] sm:$0xff] %v14667_v37  ;;  %v14680_v16 = vadd.f32 %v12335_v23, %v12269_v45  ;;  %v565_v19 = vpop.f32.mrf.mxu0  ;;  %12569 = vmatprep.mubr.msk.bf16.mxu1 %vm226_vm0, %v14189_v49  ;;  %v14692_v45 = vpack.c.bf16 %v10866_v35, %v10865_v41 }
 0x132   :  { %v956_v24 = vpop.f32.mrf.mxu1 }
 0x133   :  { %19793 = vst [vmem:[#allocation38_spill] sm:$0xff] %v14680_v16  ;;  %v14690_v18 = vadd.f32 %v956_v24, %v565_v19  ;;  %v12270_v53 = vpop.f32.mrf.mxu0  ;;  %19795 = vst [vmem:[#allocation40_spill] sm:$0xff] %v14692_v45  ;;  %v10964_v19 = vld [vmem:[%s19701_s0 + $0x182] sm:$0xff] }
 0x134   :  { %v12336_v33 = vpop.f32.mrf.mxu1  ;;  %v10869_v24 = vld [vmem:[%s19701_s0 + $0x1c9] sm:$0xff] }
 0x135   :  { %19794 = vst [vmem:[#allocation39_spill] sm:$0xff] %v14690_v18  ;;  %v14694_v23 = vadd.f32 %v12336_v33, %v12270_v53  ;;  %v568_v40 = vpop.f32.mrf.mxu0  ;;  %v10870_v53 = vld [vmem:[%s19701_s0 + $0x1d1] sm:$0xff] }
 0x136   :  { %v959_v49 = vpop.f32.mrf.mxu1 }
 0x137   :  { %19796 = vst [vmem:[#allocation41_spill] sm:$0xff] %v14694_v23  ;;  %v14696_v32 = vadd.f32 %v959_v49, %v568_v40  ;;  %v12273_v16 = vpop.f32.mrf.mxu0  ;;  %12504 = vmatmul.mubr.msk.bf16.gmra.mxu0 %vm226_vm0, %v2187_v12 }
 0x138   :  { %v12339_v37 = vpop.f32.mrf.mxu1  ;;  %12570 = vmatmul.mubr.msk.bf16.gmra.mxu1 %vm226_vm0, %v14191_v50  ;;  %12507 = vmatprep.mubr.msk.bf16.mxu0 %vm226_vm0, %v14692_v45  ;;  %v10965_v50 = vld [vmem:[%s19701_s0 + $0x18a] sm:$0xff] }
 0x139   :  { %19797 = vst [vmem:[#allocation42_spill] sm:$0xff] %v14696_v32  ;;  %v14712_v41 = vadd.f32 %v12339_v37, %v12273_v16  ;;  %v581_v35 = vpop.f32.mrf.mxu0  ;;  %12573 = vmatprep.mubr.msk.bf16.mxu1 %vm226_vm0, %v14219_v58  ;;  %v2189_v16 = vpack.c.bf16 %v10868_v7, %v10867_v11  ;;  %v2742_v49 = vpack.c.bf16 %v10965_v50, %v10964_v19  ;;  %v10871_v11 = vld [vmem:[%s19701_s0 + $0x1e1] sm:$0xff]  ;;  %v10872_v7 = vld [vmem:[%s19701_s0 + $0x1e9] sm:$0xff] }
 0x13a   :  { %v972_v12 = vpop.f32.mrf.mxu1  ;;  %v2190_v58 = vpack.c.bf16 %v10870_v53, %v10869_v24 }
 0x13b   :  { %19798 = vst [vmem:[#allocation43_spill] sm:$0xff] %v14712_v41  ;;  %v14725_v33 = vadd.f32 %v972_v12, %v581_v35  ;;  %v12274_v37 = vpop.f32.mrf.mxu0  ;;  %v10874_v35 = vld [vmem:[%s19701_s0 + $0x201] sm:$0xff]  ;;  %v2191_v12 = vpack.c.bf16 %v10872_v7, %v10871_v11  ;;  %v10875_v11 = vld [vmem:[%s19701_s0 + $0x211] sm:$0xff]  ;;  %v10876_v7 = vld [vmem:[%s19701_s0 + $0x219] sm:$0xff] }
 0x13c   :  { %v12340_v40 = vpop.f32.mrf.mxu1 }
 0x13d   :  { %v14727_v45 = vadd.f32 %v12340_v40, %v12274_v37  ;;  %v584_v41 = vpop.f32.mrf.mxu0 }
 0x13e   :  { %v975_v32 = vpop.f32.mrf.mxu1 }
 0x13f   :  { %v14729_v23 = vadd.f32 %v975_v32, %v584_v41  ;;  %v12277_v18 = vpop.f32.mrf.mxu0  ;;  %12508 = vmatmul.mubr.msk.bf16.gmra.mxu0 %vm226_vm0, %v2189_v16  ;;  %v10873_v41 = vld [vmem:[%s19701_s0 + $0x1f9] sm:$0xff] }
 0x140   :  { %v12343_v14 = vpop.f32.mrf.mxu1  ;;  %12574 = vmatmul.mubr.msk.bf16.gmra.mxu1 %vm226_vm0, %v2742_v49  ;;  %12511 = vmatprep.mubr.msk.bf16.mxu0 %vm226_vm0, %v2190_v58 }
 0x141   :  { %v14740_v19 = vadd.f32 %v12343_v14, %v12277_v18  ;;  %v597_v32 = vpop.f32.mrf.mxu0  ;;  %12577 = vmatprep.mubr.msk.bf16.mxu1 %vm226_vm0, %v14239_v20  ;;  %v14752_v14 = vpack.c.bf16 %v10874_v35, %v10873_v41 }
 0x142   :  { %v988_v50 = vpop.f32.mrf.mxu1 }
 0x143   :  { %19799 = vst [vmem:[#allocation44_spill] sm:$0xff] %v14740_v19  ;;  %v14750_v24 = vadd.f32 %v988_v50, %v597_v32  ;;  %v12278_v53 = vpop.f32.mrf.mxu0  ;;  %19801 = vst [vmem:[#allocation46_spill] sm:$0xff] %v14752_v14 }
 0x144   :  { %v12344_v37 = vpop.f32.mrf.mxu1 }
 0x145   :  { %19800 = vst [vmem:[#allocation45_spill] sm:$0xff] %v14750_v24  ;;  %v14754_v18 = vadd.f32 %v12344_v37, %v12278_v53  ;;  %v600_v16 = vpop.f32.mrf.mxu0 }
 0x146   :  { %v991_v20 = vpop.f32.mrf.mxu1 }
 0x147   :  { %19802 = vst [vmem:[#allocation47_spill] sm:$0xff] %v14754_v18  ;;  %v14756_v40 = vadd.f32 %v991_v20, %v600_v16  ;;  %v12349_v49 = vpop.f32.mrf.mxu0  ;;  %12512 = vmatmul.mubr.msk.bf16.gmra.mxu0 %vm226_vm0, %v2191_v12  ;;  %v2193_v12 = vpack.c.bf16 %v10876_v7, %v10875_v11 }
 0x148   :  { %v1494_v58 = vadd.f32 %v12349_v49, %v14255_v42  ;;  %v12415_v19 = vpop.f32.mrf.mxu1  ;;  %12578 = vmatmul.mubr.msk.bf16.gmra.mxu1 %vm226_vm0, %v14241_v30  ;;  %12515 = vmatprep.mubr.msk.bf16.mxu0 %vm226_vm0, %v14752_v14  ;;  %v10877_v42 = vld [vmem:[%s19701_s0 + $0x229] sm:$0xff]  ;;  %v10878_v30 = vld [vmem:[%s19701_s0 + $0x231] sm:$0xff] }
 0x149   :  { %19803 = vst [vmem:[#allocation48_spill] sm:$0xff] %v14756_v40  ;;  %v1237_v32 = vpop.f32.mrf.mxu0  ;;  %12581 = vmatprep.mubr.msk.bf16.mxu1 %vm226_vm0, %v14267_v28  ;;  %v14784_v20 = vpack.c.bf16 %v10878_v30, %v10877_v42 }
 0x14a   :  { %v1492_v41 = vadd.f32 %v1237_v32, %v14265_v54  ;;  %v14779_v35 = vadd.f32 %v12415_v19, %v1494_v58  ;;  %v1791_v50 = vpop.f32.mrf.mxu1 }
 0x14b   :  { %v12350_v53 = vpop.f32.mrf.mxu0 }
 0x14c   :  { %v1495_v37 = vadd.f32 %v12350_v53, %v14271_v36  ;;  %v14782_v16 = vadd.f32 %v1791_v50, %v1492_v41  ;;  %v12416_v28 = vpop.f32.mrf.mxu1  ;;  %v10879_v36 = vld [vmem:[%s19701_s0 + $0x241] sm:$0xff] }
 0x14d   :  { %v1240_v49 = vpop.f32.mrf.mxu0 }
 0x14e   :  { %v1493_v14 = vadd.f32 %v1240_v49, %v14273_v4  ;;  %v14787_v40 = vadd.f32 %v12416_v28, %v1495_v37  ;;  %v1794_v18 = vpop.f32.mrf.mxu1  ;;  %v10880_v4 = vld [vmem:[%s19701_s0 + $0x249] sm:$0xff] }
 0x14f   :  { %v12353_v24 = vpop.f32.mrf.mxu0  ;;  %12516 = vmatmul.mubr.msk.bf16.gmra.mxu0 %vm226_vm0, %v2193_v12  ;;  %v2195_v32 = vpack.c.bf16 %v10880_v4, %v10879_v36 }
 0x150   :  { %v1498_v54 = vadd.f32 %v12353_v24, %v14287_v31  ;;  %v14791_v19 = vadd.f32 %v1794_v18, %v1493_v14  ;;  %v12419_v58 = vpop.f32.mrf.mxu1  ;;  %12582 = vmatmul.mubr.msk.bf16.gmra.mxu1 %vm226_vm0, %v14269_v2  ;;  %12519 = vmatprep.mubr.msk.bf16.mxu0 %vm226_vm0, %v14784_v20  ;;  %v10881_v31 = vld [vmem:[%s19701_s0 + $0x259] sm:$0xff]  ;;  %v10882_v2 = vld [vmem:[%s19701_s0 + $0x261] sm:$0xff] }
 0x151   :  { %v1253_v11 = vpop.f32.mrf.mxu0  ;;  %12585 = vmatprep.mubr.msk.bf16.mxu1 %vm226_vm0, %v14299_v59  ;;  %v14817_v41 = vpack.c.bf16 %v10882_v2, %v10881_v31 }
 0x152   :  { %v1496_v24 = vadd.f32 %v1253_v11, %v14297_v55  ;;  %v14812_v14 = vadd.f32 %v12419_v58, %v1498_v54  ;;  %v1807_v18 = vpop.f32.mrf.mxu1 }
 0x153   :  { %v12354_v7 = vpop.f32.mrf.mxu0 }
 0x154   :  { %v1499_v42 = vadd.f32 %v12354_v7, %v14303_v13  ;;  %v14815_v30 = vadd.f32 %v1807_v18, %v1496_v24  ;;  %v12420_v59 = vpop.f32.mrf.mxu1  ;;  %v10883_v13 = vld [vmem:[%s19701_s0 + $0x271] sm:$0xff] }
 0x155   :  { %v1256_v50 = vpop.f32.mrf.mxu0 }
 0x156   :  { %v1497_v53 = vadd.f32 %v1256_v50, %v14305_v26  ;;  %v14820_v12 = vadd.f32 %v12420_v59, %v1499_v42  ;;  %v1810_v37 = vpop.f32.mrf.mxu1  ;;  %v10884_v26 = vld [vmem:[%s19701_s0 + $0x279] sm:$0xff] }
 0x157   :  { %v12357_v28 = vpop.f32.mrf.mxu0  ;;  %12520 = vmatmul.mubr.msk.bf16.gmra.mxu0 %vm226_vm0, %v2195_v32  ;;  %v2197_v2 = vpack.c.bf16 %v10884_v26, %v10883_v13 }
 0x158   :  { %v1502_v55 = vadd.f32 %v12357_v28, %v14319_v21  ;;  %v14824_v49 = vadd.f32 %v1810_v37, %v1497_v53  ;;  %v12423_v54 = vpop.f32.mrf.mxu1  ;;  %12586 = vmatmul.mubr.msk.bf16.gmra.mxu1 %vm226_vm0, %v14301_v46  ;;  %12523 = vmatprep.mubr.msk.bf16.mxu0 %vm226_vm0, %v14817_v41  ;;  %v10885_v21 = vld [vmem:[%s19701_s0 + $0x289] sm:$0xff]  ;;  %v10886_v46 = vld [vmem:[%s19701_s0 + $0x291] sm:$0xff] }
 0x159   :  { %v1269_v58 = vpop.f32.mrf.mxu0  ;;  %12589 = vmatprep.mubr.msk.bf16.mxu1 %vm226_vm0, %v14331_v10  ;;  %v14850_v7 = vpack.c.bf16 %v10886_v46, %v10885_v21 }
 0x15a   :  { %v1500_v36 = vadd.f32 %v1269_v58, %v14329_v25  ;;  %v14845_v4 = vadd.f32 %v12423_v54, %v1502_v55  ;;  %v1823_v11 = vpop.f32.mrf.mxu1 }
 0x15b   :  { %v12358_v31 = vpop.f32.mrf.mxu0 }
 0x15c   :  { %v1503_v24 = vadd.f32 %v12358_v31, %v14335_v43  ;;  %v14848_v18 = vadd.f32 %v1823_v11, %v1500_v36  ;;  %v12424_v10 = vpop.f32.mrf.mxu1  ;;  %v10887_v43 = vld [vmem:[%s19701_s0 + $0x2a1] sm:$0xff] }
 0x15d   :  { %v1272_v32 = vpop.f32.mrf.mxu0 }
 0x15e   :  { %v1501_v42 = vadd.f32 %v1272_v32, %v14337_v17  ;;  %v14853_v59 = vadd.f32 %v12424_v10, %v1503_v24  ;;  %v1826_v50 = vpop.f32.mrf.mxu1  ;;  %v10888_v17 = vld [vmem:[%s19701_s0 + $0x2a9] sm:$0xff] }
 0x15f   :  { %v12361_v53 = vpop.f32.mrf.mxu0  ;;  %12524 = vmatmul.mubr.msk.bf16.gmra.mxu0 %vm226_vm0, %v2197_v2  ;;  %v2199_v21 = vpack.c.bf16 %v10888_v17, %v10887_v43 }
 0x160   :  { %v1506_v25 = vadd.f32 %v12361_v53, %v14351_v57  ;;  %v14857_v37 = vadd.f32 %v1826_v50, %v1501_v42  ;;  %v12427_v28 = vpop.f32.mrf.mxu1  ;;  %12590 = vmatmul.mubr.msk.bf16.gmra.mxu1 %vm226_vm0, %v14333_v15  ;;  %12527 = vmatprep.mubr.msk.bf16.mxu0 %vm226_vm0, %v14850_v7  ;;  %v10889_v57 = vld [vmem:[%s19701_s0 + $0x2b9] sm:$0xff]  ;;  %v10890_v15 = vld [vmem:[%s19701_s0 + $0x2c1] sm:$0xff] }
 0x161   :  { %v1285_v55 = vpop.f32.mrf.mxu0  ;;  %12593 = vmatprep.mubr.msk.bf16.mxu1 %vm226_vm0, %v14363_v60  ;;  %v14883_v11 = vpack.c.bf16 %v10890_v15, %v10889_v57  ;;  %v19805_v15 = vld [vmem:[#allocation5_spill] sm:$0xff] }
 0x162   :  { %v1504_v54 = vadd.f32 %v1285_v55, %v14361_v9  ;;  %v14878_v13 = vadd.f32 %v12427_v28, %v1506_v25  ;;  %v1839_v26 = vpop.f32.mrf.mxu1  ;;  %v19804_v25 = vld [vmem:[#allocation3_spill] sm:$0xff] }
 0x163   :  { %v12362_v58 = vpop.f32.mrf.mxu0 }
 0x164   :  { %v1507_v46 = vadd.f32 %v12362_v58, %v14367_v29  ;;  %v14881_v36 = vadd.f32 %v1839_v26, %v1504_v54  ;;  %v12428_v60 = vpop.f32.mrf.mxu1  ;;  %v10891_v29 = vld [vmem:[%s19701_s0 + $0x2d1] sm:$0xff] }
 0x165   :  { %v1288_v31 = vpop.f32.mrf.mxu0 }
 0x166   :  { %v1505_v2 = vadd.f32 %v1288_v31, %v14369_v44  ;;  %v14886_v24 = vadd.f32 %v12428_v60, %v1507_v46  ;;  %v1842_v10 = vpop.f32.mrf.mxu1  ;;  %v10892_v44 = vld [vmem:[%s19701_s0 + $0x2d9] sm:$0xff] }
 0x167   :  { %v12365_v32 = vpop.f32.mrf.mxu0  ;;  %12528 = vmatmul.mubr.msk.bf16.gmra.mxu0 %vm226_vm0, %v2199_v21  ;;  %v2201_v57 = vpack.c.bf16 %v10892_v44, %v10891_v29  ;;  %v19808_v46 = vld [vmem:[#allocation6_spill] sm:$0xff]  ;;  %v19812_v44 = vld [vmem:[#allocation4_spill] sm:$0xff] }
 0x168   :  { %v1510_v9 = vadd.f32 %v12365_v32, %v14383_v51  ;;  %v14890_v42 = vadd.f32 %v1842_v10, %v1505_v2  ;;  %v12431_v50 = vpop.f32.mrf.mxu1  ;;  %12594 = vmatmul.mubr.msk.bf16.gmra.mxu1 %vm226_vm0, %v14365_v62  ;;  %12531 = vmatprep.mubr.msk.bf16.mxu0 %vm226_vm0, %v14883_v11  ;;  %v10893_v51 = vld [vmem:[%s19701_s0 + $0x2e9] sm:$0xff]  ;;  %v10894_v62 = vld [vmem:[%s19701_s0 + $0x2f1] sm:$0xff]  ;;  %v19810_v32 = vld [vmem:[#allocation7_spill] sm:$0xff] }
 0x169   :  { %v1301_v53 = vpop.f32.mrf.mxu0  ;;  %12597 = vmatprep.mubr.msk.bf16.mxu1 %vm226_vm0, %v14395_v27  ;;  %v14916_v58 = vpack.c.bf16 %v10894_v62, %v10893_v51  ;;  %v10896_v51 = vld [vmem:[%s19701_s0 + $0x309] sm:$0xff] }
 0x16a   :  { %v1508_v28 = vadd.f32 %v1301_v53, %v19804_v25  ;;  %v14911_v43 = vadd.f32 %v12431_v50, %v1510_v9  ;;  %v1855_v17 = vpop.f32.mrf.mxu1  ;;  %v10895_v53 = vld [vmem:[%s19701_s0 + $0x301] sm:$0xff]  ;;  %v19813_v25 = vld [vmem:[#allocation9_spill] sm:$0xff] }
 0x16b   :  { %v12366_v55 = vpop.f32.mrf.mxu0  ;;  %19807 = vst [vmem:[#allocation5_spill] sm:$0xff] %v14916_v58 }
 0x16c   :  { %v1511_v54 = vadd.f32 %v12366_v55, %v19805_v15  ;;  %v14914_v26 = vadd.f32 %v1855_v17, %v1508_v28  ;;  %v12432_v27 = vpop.f32.mrf.mxu1  ;;  %v10897_v28 = vld [vmem:[%s19701_s0 + $0x319] sm:$0xff]  ;;  %v10898_v17 = vld [vmem:[%s19701_s0 + $0x321] sm:$0xff] }
 0x16d   :  { %v1304_v21 = vpop.f32.mrf.mxu0  ;;  %v19814_v55 = vld [vmem:[#allocation8_spill] sm:$0xff] }
 0x16e   :  { %19806 = vst [vmem:[#allocation3_spill] sm:$0xff] %v14914_v26  ;;  %v1509_v60 = vadd.f32 %v1304_v21, %v19808_v46  ;;  %v14919_v31 = vadd.f32 %v12432_v27, %v1511_v54  ;;  %v1858_v2 = vpop.f32.mrf.mxu1  ;;  %v2203_v21 = vpack.c.bf16 %v10896_v51, %v10895_v53  ;;  %v19815_v46 = vld [vmem:[#allocation11_spill] sm:$0xff]  ;;  %v19822_v51 = vld [vmem:[#allocation10_spill] sm:$0xff] }
 0x16f   :  { %v12369_v10 = vpop.f32.mrf.mxu0  ;;  %12532 = vmatmul.mubr.msk.bf16.gmra.mxu0 %vm226_vm0, %v2201_v57 }
 0x170   :  { %19809 = vst [vmem:[#allocation6_spill] sm:$0xff] %v14919_v31  ;;  %v1514_v9 = vadd.f32 %v12369_v10, %v19810_v32  ;;  %v14923_v50 = vadd.f32 %v1858_v2, %v1509_v60  ;;  %v12435_v29 = vpop.f32.mrf.mxu1  ;;  %12598 = vmatmul.mubr.msk.bf16.gmra.mxu1 %vm226_vm0, %v19812_v44  ;;  %12535 = vmatprep.mubr.msk.bf16.mxu0 %vm226_vm0, %v14916_v58 }
 0x171   :  { %v1317_v62 = vpop.f32.mrf.mxu0  ;;  %12601 = vmatprep.mubr.msk.bf16.mxu1 %vm226_vm0, %v19813_v25  ;;  %v14949_v32 = vpack.c.bf16 %v10898_v17, %v10897_v28  ;;  %v19818_v25 = vld [vmem:[#allocation12_spill] sm:$0xff]  ;;  %v10899_v28 = vld [vmem:[%s19701_s0 + $0x331] sm:$0xff]  ;;  %v10900_v17 = vld [vmem:[%s19701_s0 + $0x339] sm:$0xff] }
 0x172   :  { %19811 = vst [vmem:[#allocation7_spill] sm:$0xff] %v14923_v50  ;;  %v1512_v57 = vadd.f32 %v1317_v62, %v19814_v55  ;;  %v14944_v15 = vadd.f32 %v12435_v29, %v1514_v9  ;;  %v1871_v54 = vpop.f32.mrf.mxu1  ;;  %v19820_v9 = vld [vmem:[#allocation13_spill] sm:$0xff] }
 0x173   :  { %v12370_v27 = vpop.f32.mrf.mxu0  ;;  %19817 = vst [vmem:[#allocation9_spill] sm:$0xff] %v14949_v32  ;;  %v11031_v55 = vld [vmem:[%s19701_s0 + $0x30] sm:$0xff] }
 0x174   :  { %v1515_v60 = vadd.f32 %v12370_v27, %v19815_v46  ;;  %v14947_v2 = vadd.f32 %v1871_v54, %v1512_v57  ;;  %v12436_v10 = vpop.f32.mrf.mxu1  ;;  %v11032_v57 = vld [vmem:[%s19701_s0 + $0x38] sm:$0xff] }
 0x175   :  { %v1320_v44 = vpop.f32.mrf.mxu0 }
 0x176   :  { %19816 = vst [vmem:[#allocation4_spill] sm:$0xff] %v14947_v2  ;;  %v1513_v58 = vadd.f32 %v1320_v44, %v19818_v25  ;;  %v14952_v50 = vadd.f32 %v12436_v10, %v1515_v60  ;;  %v1874_v31 = vpop.f32.mrf.mxu1  ;;  %v2205_v60 = vpack.c.bf16 %v10900_v17, %v10899_v28 }
 0x177   :  { %v12373_v26 = vpop.f32.mrf.mxu0  ;;  %12536 = vmatmul.mubr.msk.bf16.gmra.mxu0 %vm226_vm0, %v2203_v21 }
 0x178   :  { %19819 = vst [vmem:[#allocation8_spill] sm:$0xff] %v14952_v50  ;;  %v1518_v29 = vadd.f32 %v12373_v26, %v19820_v9  ;;  %v14956_v62 = vadd.f32 %v1874_v31, %v1513_v58  ;;  %v12439_v53 = vpop.f32.mrf.mxu1  ;;  %12602 = vmatmul.mubr.msk.bf16.gmra.mxu1 %vm226_vm0, %v19822_v51  ;;  %12539 = vmatprep.mubr.msk.bf16.mxu0 %vm226_vm0, %v14949_v32  ;;  %v10996_v26 = vld [vmem:[%s19701_s0 + $0x332] sm:$0xff]  ;;  %v10997_v31 = vld [vmem:[%s19701_s0 + $0x33a] sm:$0xff] }
 0x179   :  { %v1333_v58 = vpop.f32.mrf.mxu0  ;;  %12605 = vmatprep.mubr.msk.bf16.mxu1 %vm226_vm0, %v14465_v22  ;;  %v2758_v25 = vpack.c.bf16 %v10997_v31, %v10996_v26  ;;  %v3281_v9 = vpack.c.bf16 %v11032_v57, %v11031_v55  ;;  %v11035_v26 = vld [vmem:[%s19701_s0 + $0x60] sm:$0xff] }
 0x17a   :  { %19821 = vst [vmem:[#allocation11_spill] sm:$0xff] %v14956_v62  ;;  %v1516_v54 = vadd.f32 %v1333_v58, %v14463_v61  ;;  %v14983_v27 = vadd.f32 %v12439_v53, %v1518_v29  ;;  %v1887_v21 = vpop.f32.mrf.mxu1  ;;  %v19823_v61 = vld [vmem:[#allocation14_spill] sm:$0xff]  ;;  %v11036_v58 = vld [vmem:[%s19701_s0 + $0x68] sm:$0xff]  ;;  %v19824_v57 = vld [vmem:[#allocation15_spill] sm:$0xff] }
 0x17b   :  { %v12374_v46 = vpop.f32.mrf.mxu0 }
 0x17c   :  { %v1519_v22 = vadd.f32 %v12374_v46, %v14467_v0  ;;  %v14986_v10 = vadd.f32 %v1887_v21, %v1516_v54  ;;  %v12440_v44 = vpop.f32.mrf.mxu1  ;;  %v11033_v0 = vld [vmem:[%s19701_s0 + $0x48] sm:$0xff] }
 0x17d   :  { %v1336_v51 = vpop.f32.mrf.mxu0 }
 0x17e   :  { %v1517_v32 = vadd.f32 %v1336_v51, %v14469_v48  ;;  %v14989_v62 = vadd.f32 %v12440_v44, %v1519_v22  ;;  %v1890_v50 = vpop.f32.mrf.mxu1  ;;  %v11034_v48 = vld [vmem:[%s19701_s0 + $0x50] sm:$0xff]  ;;  %v19826_v51 = vld [vmem:[#allocation18_spill] sm:$0xff] }
 0x17f   :  { %v12377_v2 = vpop.f32.mrf.mxu0  ;;  %12540 = vmatmul.mubr.msk.bf16.gmra.mxu0 %vm226_vm0, %v2205_v60  ;;  %v3282_v55 = vpack.c.bf16 %v11034_v48, %v11033_v0  ;;  %v19825_v60 = vld [vmem:[#allocation17_spill] sm:$0xff]  ;;  %v19827_v0 = vld [vmem:[#allocation16_spill] sm:$0xff]  ;;  %v11037_v48 = vld [vmem:[%s19701_s0 + $0x78] sm:$0xff] }
 0x180   :  { %v1522_v29 = vadd.f32 %v12377_v2, %v19823_v61  ;;  %v14993_v53 = vadd.f32 %v1890_v50, %v1517_v32  ;;  %v12443_v28 = vpop.f32.mrf.mxu1  ;;  %12606 = vmatmul.mubr.msk.bf16.gmra.mxu1 %vm226_vm0, %v2758_v25  ;;  %12611 = vmatprep.mubr.msk.bf16.mxu0 %vm226_vm0, %v3281_v9 }
 0x181   :  { %v1349_v17 = vpop.f32.mrf.mxu0  ;;  %12677 = vmatprep.mubr.msk.bf16.mxu1 %vm226_vm0, %v14493_v34 }
 0x182   :  { %v1520_v50 = vadd.f32 %v1349_v17, %v14491_v39  ;;  %v15006_v2 = vadd.f32 %v12443_v28, %v1522_v29  ;;  %v1903_v32 = vpop.f32.mrf.mxu1  ;;  %v3283_v39 = vpack.c.bf16 %v11036_v58, %v11035_v26  ;;  %v11038_v17 = vld [vmem:[%s19701_s0 + $0x80] sm:$0xff] }
 0x183   :  { %v12378_v31 = vpop.f32.mrf.mxu0 }
 0x184   :  { %v1523_v54 = vadd.f32 %v12378_v31, %v19824_v57  ;;  %v15015_v21 = vadd.f32 %v1903_v32, %v1520_v50  ;;  %v12444_v34 = vpop.f32.mrf.mxu1  ;;  %v11040_v32 = vld [vmem:[%s19701_s0 + $0x98] sm:$0xff]  ;;  %v3284_v57 = vpack.c.bf16 %v11038_v17, %v11037_v48  ;;  %v19833_v17 = vld [vmem:[#allocation19_spill] sm:$0xff] }
 0x185   :  { %v1352_v46 = vpop.f32.mrf.mxu0 }
 0x186   :  { %v1521_v22 = vadd.f32 %v1352_v46, %v19825_v60  ;;  %v15018_v44 = vadd.f32 %v12444_v34, %v1523_v54  ;;  %v1906_v25 = vpop.f32.mrf.mxu1  ;;  %v19828_v54 = vld [vmem:[#allocation20_spill] sm:$0xff] }
 0x187   :  { %v12381_v9 = vpop.f32.mrf.mxu0  ;;  %12612 = vmatmul.mubr.msk.bf16.vlgmr.msra.gmra.mxu0 %vm226_vm0, %v3282_v55 }
 0x188   :  { %v1526_v61 = vadd.f32 %v12381_v9, %v19826_v51  ;;  %v15022_v29 = vadd.f32 %v1906_v25, %v1521_v22  ;;  %12742 = vmatpush3.bf16.msra.mxu0 %v14518_v38  ;;  %v12447_v28 = vpop.f32.mrf.mxu1  ;;  %12678 = vmatmul.mubr.msk.bf16.vlgmr.msra.gmra.mxu1 %vm226_vm0, %v19827_v0  ;;  %v11039_v38 = vld [vmem:[%s19701_s0 + $0x90] sm:$0xff] }
 0x189   :  { %v1365_v50 = vpop.f32.mrf.mxu0  ;;  %12615 = vmatprep.mubr.msk.bf16.mxu0 %vm226_vm0, %v3283_v39  ;;  %12681 = vmatprep.mubr.msk.bf16.mxu1 %vm226_vm0, %v14535_v5  ;;  %v3285_v39 = vpack.c.bf16 %v11040_v32, %v11039_v38  ;;  %v19829_v22 = vld [vmem:[#allocation21_spill] sm:$0xff] }
 0x18a   :  { %v1524_v26 = vadd.f32 %v1365_v50, %v14533_v47  ;;  %v15043_v58 = vadd.f32 %v12447_v28, %v1526_v61  ;;  %v1919_v31 = vpop.f32.mrf.mxu1  ;;  %v19831_v47 = vld [vmem:[#allocation22_spill] sm:$0xff]  ;;  %v11041_v50 = vld [vmem:[%s19701_s0 + $0xa8] sm:$0xff]  ;;  %v11042_v38 = vld [vmem:[%s19701_s0 + $0xb0] sm:$0xff] }
 0x18b   :  { %v12382_v55 = vpop.f32.mrf.mxu0 }
 0x18c   :  { %v1527_v34 = vadd.f32 %v12382_v55, %v19828_v54  ;;  %v15046_v46 = vadd.f32 %v1919_v31, %v1524_v26  ;;  %v12448_v5 = vpop.f32.mrf.mxu1  ;;  %v11043_v26 = vld [vmem:[%s19701_s0 + $0xc0] sm:$0xff]  ;;  %v11044_v31 = vld [vmem:[%s19701_s0 + $0xc8] sm:$0xff] }
 0x18d   :  { %v1368_v60 = vpop.f32.mrf.mxu0 }
 0x18e   :  { %v1525_v25 = vadd.f32 %v1368_v60, %v19829_v22  ;;  %v15049_v9 = vadd.f32 %v12448_v5, %v1527_v34  ;;  %v1922_v51 = vpop.f32.mrf.mxu1  ;;  %v3286_v5 = vpack.c.bf16 %v11042_v38, %v11041_v50  ;;  %v19839_v38 = vld [vmem:[#allocation23_spill] sm:$0xff] }
 0x18f   :  { %v12385_v0 = vpop.f32.mrf.mxu0  ;;  %12616 = vmatmul.mubr.msk.bf16.gmra.mxu0 %vm226_vm0, %v3284_v57 }
 0x190   :  { %19830 = vst [vmem:[#allocation12_spill] sm:$0xff] %v15049_v9  ;;  %v1530_v61 = vadd.f32 %v12385_v0, %v19831_v47  ;;  %v15053_v28 = vadd.f32 %v1922_v51, %v1525_v25  ;;  %v12451_v48 = vpop.f32.mrf.mxu1  ;;  %12682 = vmatmul.mubr.msk.bf16.gmra.mxu1 %vm226_vm0, %v19833_v17  ;;  %12619 = vmatprep.mubr.msk.bf16.mxu0 %vm226_vm0, %v3285_v39  ;;  %v19834_v39 = vld [vmem:[#allocation24_spill] sm:$0xff]  ;;  %v19835_v0 = vld [vmem:[#allocation25_spill] sm:$0xff] }
 0x191   :  { %v1381_v32 = vpop.f32.mrf.mxu0  ;;  %12685 = vmatprep.mubr.msk.bf16.mxu1 %vm226_vm0, %v14567_v1  ;;  %v3287_v25 = vpack.c.bf16 %v11044_v31, %v11043_v26  ;;  %v11046_v26 = vld [vmem:[%s19701_s0 + $0xe0] sm:$0xff] }
 0x192   :  { %19832 = vst [vmem:[#allocation13_spill] sm:$0xff] %v15053_v28  ;;  %v1528_v55 = vadd.f32 %v1381_v32, %v14565_v6  ;;  %v15073_v57 = vadd.f32 %v12451_v48, %v1530_v61  ;;  %v1935_v54 = vpop.f32.mrf.mxu1  ;;  %v19837_v6 = vld [vmem:[#allocation26_spill] sm:$0xff] }
 0x193   :  { %v12386_v34 = vpop.f32.mrf.mxu0  ;;  %v11045_v32 = vld [vmem:[%s19701_s0 + $0xd8] sm:$0xff] }
 0x194   :  { %v1531_v60 = vadd.f32 %v12386_v34, %v19834_v39  ;;  %v15076_v22 = vadd.f32 %v1935_v54, %v1528_v55  ;;  %v12452_v1 = vpop.f32.mrf.mxu1  ;;  %v3288_v39 = vpack.c.bf16 %v11046_v26, %v11045_v32  ;;  %v19846_v26 = vld [vmem:[#allocation27_spill] sm:$0xff] }
 0x195   :  { %v1384_v51 = vpop.f32.mrf.mxu0 }
 0x196   :  { %v1529_v47 = vadd.f32 %v1384_v51, %v19835_v0  ;;  %v15079_v17 = vadd.f32 %v12452_v1, %v1531_v60  ;;  %v1938_v28 = vpop.f32.mrf.mxu1  ;;  %v19840_v60 = vld [vmem:[#allocation28_spill] sm:$0xff] }
 0x197   :  { %v12389_v9 = vpop.f32.mrf.mxu0  ;;  %12620 = vmatmul.mubr.msk.bf16.gmra.mxu0 %vm226_vm0, %v3286_v5 }
 0x198   :  { %19836 = vst [vmem:[#allocation10_spill] sm:$0xff] %v15079_v17  ;;  %v1534_v61 = vadd.f32 %v12389_v9, %v19837_v6  ;;  %v15083_v48 = vadd.f32 %v1938_v28, %v1529_v47  ;;  %v12455_v50 = vpop.f32.mrf.mxu1  ;;  %12686 = vmatmul.mubr.msk.bf16.gmra.mxu1 %vm226_vm0, %v19839_v38  ;;  %12623 = vmatprep.mubr.msk.bf16.mxu0 %vm226_vm0, %v3287_v25  ;;  %v11047_v9 = vld [vmem:[%s19701_s0 + $0xf0] sm:$0xff]  ;;  %v11048_v28 = vld [vmem:[%s19701_s0 + $0xf8] sm:$0xff] }
 0x199   :  { %v1397_v31 = vpop.f32.mrf.mxu0  ;;  %12689 = vmatprep.mubr.msk.bf16.mxu1 %vm226_vm0, %v14599_v63  ;;  %v3289_v51 = vpack.c.bf16 %v11048_v28, %v11047_v9  ;;  %v19842_v47 = vld [vmem:[#allocation29_spill] sm:$0xff] }
 0x19a   :  { %19838 = vst [vmem:[#allocation14_spill] sm:$0xff] %v15083_v48  ;;  %v1532_v55 = vadd.f32 %v1397_v31, %v14597_v3  ;;  %v15103_v54 = vadd.f32 %v12455_v50, %v1534_v61  ;;  %v1951_v34 = vpop.f32.mrf.mxu1  ;;  %v19844_v3 = vld [vmem:[#allocation30_spill] sm:$0xff]  ;;  %v11049_v31 = vld [vmem:[%s19701_s0 + $0x108] sm:$0xff]  ;;  %v11050_v9 = vld [vmem:[%s19701_s0 + $0x110] sm:$0xff] }
 0x19b   :  { %v12390_v5 = vpop.f32.mrf.mxu0 }
 0x19c   :  { %v1535_v1 = vadd.f32 %v12390_v5, %v19840_v60  ;;  %v15106_v25 = vadd.f32 %v1951_v34, %v1532_v55  ;;  %v12456_v63 = vpop.f32.mrf.mxu1 }
 0x19d   :  { %v1400_v0 = vpop.f32.mrf.mxu0 }
 0x19e   :  { %19841 = vst [vmem:[#allocation15_spill] sm:$0xff] %v15106_v25  ;;  %v1533_v6 = vadd.f32 %v1400_v0, %v19842_v47  ;;  %v15109_v38 = vadd.f32 %v12456_v63, %v1535_v1  ;;  %v1954_v48 = vpop.f32.mrf.mxu1  ;;  %v3290_v1 = vpack.c.bf16 %v11050_v9, %v11049_v31  ;;  %v19848_v63 = vld [vmem:[#allocation32_spill] sm:$0xff]  ;;  %v19853_v9 = vld [vmem:[#allocation31_spill] sm:$0xff] }
 0x19f   :  { %v12393_v17 = vpop.f32.mrf.mxu0  ;;  %12624 = vmatmul.mubr.msk.bf16.gmra.mxu0 %vm226_vm0, %v3288_v39  ;;  %v11148_v39 = vld [vmem:[%s19701_s0 + $0x121] sm:$0xff] }
 0x1a0   :  { %19843 = vst [vmem:[#allocation17_spill] sm:$0xff] %v15109_v38  ;;  %v1538_v61 = vadd.f32 %v12393_v17, %v19844_v3  ;;  %v15113_v50 = vadd.f32 %v1954_v48, %v1533_v6  ;;  %v12459_v32 = vpop.f32.mrf.mxu1  ;;  %12690 = vmatmul.mubr.msk.bf16.gmra.mxu1 %vm226_vm0, %v19846_v26  ;;  %12627 = vmatprep.mubr.msk.bf16.mxu0 %vm226_vm0, %v3289_v51  ;;  %v11051_v17 = vld [vmem:[%s19701_s0 + $0x120] sm:$0xff]  ;;  %v11052_v48 = vld [vmem:[%s19701_s0 + $0x128] sm:$0xff] }
 0x1a1   :  { %v1413_v28 = vpop.f32.mrf.mxu0  ;;  %12693 = vmatprep.mubr.msk.bf16.mxu1 %vm226_vm0, %v14631_v52  ;;  %v11149_v52 = vld [vmem:[%s19701_s0 + $0x129] sm:$0xff]  ;;  %v3291_v6 = vpack.c.bf16 %v11052_v48, %v11051_v17  ;;  %v11053_v17 = vld [vmem:[%s19701_s0 + $0x138] sm:$0xff]  ;;  %v11054_v48 = vld [vmem:[%s19701_s0 + $0x140] sm:$0xff] }
 0x1a2   :  { %19845 = vst [vmem:[#allocation18_spill] sm:$0xff] %v15113_v50  ;;  %v1536_v55 = vadd.f32 %v1413_v28, %v14629_v56  ;;  %v15133_v34 = vadd.f32 %v12459_v32, %v1538_v61  ;;  %v1967_v5 = vpop.f32.mrf.mxu1  ;;  %v3844_v3 = vpack.c.bf16 %v11149_v52, %v11148_v39  ;;  %v19849_v61 = vld [vmem:[#allocation33_spill] sm:$0xff]  ;;  %v19851_v50 = vld [vmem:[#allocation34_spill] sm:$0xff] }
 0x1a3   :  { %v12394_v60 = vpop.f32.mrf.mxu0 }
 0x1a4   :  { %19847 = vst [vmem:[#allocation16_spill] sm:$0xff] %v15133_v34  ;;  %v1539_v51 = vadd.f32 %v12394_v60, %v19848_v63  ;;  %v15142_v0 = vadd.f32 %v1967_v5, %v1536_v55  ;;  %v12460_v47 = vpop.f32.mrf.mxu1  ;;  %v11152_v60 = vld [vmem:[%s19701_s0 + $0x151] sm:$0xff] }
 0x1a5   :  { %v1416_v56 = vpop.f32.mrf.mxu0 }
 0x1a6   :  { %v1537_v32 = vadd.f32 %v1416_v56, %v19849_v61  ;;  %v15145_v26 = vadd.f32 %v12460_v47, %v1539_v51  ;;  %v1970_v28 = vpop.f32.mrf.mxu1  ;;  %v3292_v51 = vpack.c.bf16 %v11054_v48, %v11053_v17  ;;  %v19855_v47 = vld [vmem:[#allocation36_spill] sm:$0xff]  ;;  %v19861_v48 = vld [vmem:[#allocation35_spill] sm:$0xff] }
 0x1a7   :  { %v12397_v34 = vpop.f32.mrf.mxu0  ;;  %12628 = vmatmul.mubr.msk.bf16.gmra.mxu0 %vm226_vm0, %v3290_v1  ;;  %v11153_v1 = vld [vmem:[%s19701_s0 + $0x159] sm:$0xff] }
 0x1a8   :  { %19850 = vst [vmem:[#allocation20_spill] sm:$0xff] %v15145_v26  ;;  %v1542_v38 = vadd.f32 %v12397_v34, %v19851_v50  ;;  %v15149_v25 = vadd.f32 %v1970_v28, %v1537_v32  ;;  %v12463_v31 = vpop.f32.mrf.mxu1  ;;  %12694 = vmatmul.mubr.msk.bf16.gmra.mxu1 %vm226_vm0, %v19853_v9  ;;  %12631 = vmatprep.mubr.msk.bf16.mxu0 %vm226_vm0, %v3291_v6  ;;  %v11055_v50 = vld [vmem:[%s19701_s0 + $0x150] sm:$0xff]  ;;  %v11056_v34 = vld [vmem:[%s19701_s0 + $0x158] sm:$0xff] }
 0x1a9   :  { %v1429_v55 = vpop.f32.mrf.mxu0  ;;  %12697 = vmatprep.mubr.msk.bf16.mxu1 %vm226_vm0, %v3844_v3  ;;  %v3293_v61 = vpack.c.bf16 %v11056_v34, %v11055_v50  ;;  %v19857_v32 = vld [vmem:[#allocation37_spill] sm:$0xff]  ;;  %v11057_v50 = vld [vmem:[%s19701_s0 + $0x168] sm:$0xff] }
 0x1aa   :  { %19852 = vst [vmem:[#allocation21_spill] sm:$0xff] %v15149_v25  ;;  %v1540_v5 = vadd.f32 %v1429_v55, %v14661_v8  ;;  %v15168_v39 = vadd.f32 %v12463_v31, %v1542_v38  ;;  %v1983_v52 = vpop.f32.mrf.mxu1  ;;  %v3846_v38 = vpack.c.bf16 %v11153_v1, %v11152_v60  ;;  %v11058_v34 = vld [vmem:[%s19701_s0 + $0x170] sm:$0xff]  ;;  %v19862_v60 = vld [vmem:[#allocation39_spill] sm:$0xff] }
 0x1ab   :  { %v12398_v63 = vpop.f32.mrf.mxu0 }
 0x1ac   :  { %19854 = vst [vmem:[#allocation22_spill] sm:$0xff] %v15168_v39  ;;  %v1543_v6 = vadd.f32 %v12398_v63, %v19855_v47  ;;  %v15177_v56 = vadd.f32 %v1983_v52, %v1540_v5  ;;  %v12464_v3 = vpop.f32.mrf.mxu1  ;;  %v19859_v39 = vld [vmem:[#allocation38_spill] sm:$0xff]  ;;  %v11060_v52 = vld [vmem:[%s19701_s0 + $0x188] sm:$0xff] }
 0x1ad   :  { %v1432_v8 = vpop.f32.mrf.mxu0  ;;  %v11156_v47 = vld [vmem:[%s19701_s0 + $0x181] sm:$0xff] }
 0x1ae   :  { %19856 = vst [vmem:[#allocation19_spill] sm:$0xff] %v15177_v56  ;;  %v1541_v28 = vadd.f32 %v1432_v8, %v19857_v32  ;;  %v15180_v31 = vadd.f32 %v12464_v3, %v1543_v6  ;;  %v1986_v9 = vpop.f32.mrf.mxu1  ;;  %v11157_v6 = vld [vmem:[%s19701_s0 + $0x189] sm:$0xff] }
 0x1af   :  { %v12401_v55 = vpop.f32.mrf.mxu0  ;;  %12632 = vmatmul.mubr.msk.bf16.gmra.mxu0 %vm226_vm0, %v3292_v51  ;;  %v19864_v8 = vld [vmem:[#allocation41_spill] sm:$0xff] }
 0x1b0   :  { %19858 = vst [vmem:[#allocation24_spill] sm:$0xff] %v15180_v31  ;;  %v1546_v25 = vadd.f32 %v12401_v55, %v19859_v39  ;;  %v15184_v26 = vadd.f32 %v1986_v9, %v1541_v28  ;;  %v12467_v17 = vpop.f32.mrf.mxu1  ;;  %12698 = vmatmul.mubr.msk.bf16.gmra.mxu1 %vm226_vm0, %v19861_v48  ;;  %12635 = vmatprep.mubr.msk.bf16.mxu0 %vm226_vm0, %v3293_v61  ;;  %v11059_v39 = vld [vmem:[%s19701_s0 + $0x180] sm:$0xff] }
 0x1b1   :  { %v1445_v5 = vpop.f32.mrf.mxu0  ;;  %12701 = vmatprep.mubr.msk.bf16.mxu1 %vm226_vm0, %v3846_v38  ;;  %v3294_v61 = vpack.c.bf16 %v11058_v34, %v11057_v50  ;;  %v3295_v9 = vpack.c.bf16 %v11060_v52, %v11059_v39  ;;  %v19869_v34 = vld [vmem:[#allocation40_spill] sm:$0xff]  ;;  %v11061_v39 = vld [vmem:[%s19701_s0 + $0x198] sm:$0xff]  ;;  %v11062_v52 = vld [vmem:[%s19701_s0 + $0x1a0] sm:$0xff] }
 0x1b2   :  { %19860 = vst [vmem:[#allocation25_spill] sm:$0xff] %v15184_v26  ;;  %v1544_v1 = vadd.f32 %v1445_v5, %v19862_v60  ;;  %v15203_v63 = vadd.f32 %v12467_v17, %v1546_v25  ;;  %v1999_v51 = vpop.f32.mrf.mxu1  ;;  %v3848_v25 = vpack.c.bf16 %v11157_v6, %v11156_v47  ;;  %v19865_v17 = vld [vmem:[#allocation42_spill] sm:$0xff]  ;;  %v19867_v26 = vld [vmem:[#allocation43_spill] sm:$0xff]  ;;  %v11064_v47 = vld [vmem:[%s19701_s0 + $0x1e8] sm:$0xff] }
 0x1b3   :  { %v12402_v3 = vpop.f32.mrf.mxu0 }
 0x1b4   :  { %19863 = vst [vmem:[#allocation26_spill] sm:$0xff] %v15203_v63  ;;  %v1547_v38 = vadd.f32 %v12402_v3, %v19864_v8  ;;  %v15212_v32 = vadd.f32 %v1999_v51, %v1544_v1  ;;  %v12468_v28 = vpop.f32.mrf.mxu1  ;;  %v11063_v51 = vld [vmem:[%s19701_s0 + $0x1e0] sm:$0xff] }
 0x1b5   :  { %v1448_v55 = vpop.f32.mrf.mxu0  ;;  %v11160_v8 = vld [vmem:[%s19701_s0 + $0x1e1] sm:$0xff] }
 0x1b6   :  { %v1545_v48 = vadd.f32 %v1448_v55, %v19865_v17  ;;  %v15215_v5 = vadd.f32 %v12468_v28, %v1547_v38  ;;  %v2002_v60 = vpop.f32.mrf.mxu1  ;;  %v11161_v38 = vld [vmem:[%s19701_s0 + $0x1e9] sm:$0xff] }
 0x1b7   :  { %v12405_v63 = vpop.f32.mrf.mxu0  ;;  %12636 = vmatmul.mubr.msk.bf16.gmra.mxu0 %vm226_vm0, %v3294_v61 }
 0x1b8   :  { %19866 = vst [vmem:[#allocation23_spill] sm:$0xff] %v15215_v5  ;;  %v1550_v31 = vadd.f32 %v12405_v63, %v19867_v26  ;;  %v15219_v56 = vadd.f32 %v2002_v60, %v1545_v48  ;;  %v12471_v50 = vpop.f32.mrf.mxu1  ;;  %12702 = vmatmul.mubr.msk.bf16.gmra.mxu1 %vm226_vm0, %v19869_v34  ;;  %12639 = vmatprep.mubr.msk.bf16.mxu0 %vm226_vm0, %v3295_v9  ;;  %v11158_v26 = vld [vmem:[%s19701_s0 + $0x199] sm:$0xff]  ;;  %v11159_v63 = vld [vmem:[%s19701_s0 + $0x1a1] sm:$0xff] }
 0x1b9   :  { %v1461_v1 = vpop.f32.mrf.mxu0  ;;  %12705 = vmatprep.mubr.msk.bf16.mxu1 %vm226_vm0, %v3848_v25  ;;  %v3296_v9 = vpack.c.bf16 %v11062_v52, %v11061_v39  ;;  %v3849_v48 = vpack.c.bf16 %v11159_v63, %v11158_v26  ;;  %v3850_v60 = vpack.c.bf16 %v11161_v38, %v11160_v8  ;;  %v11065_v52 = vld [vmem:[%s19701_s0 + $0x1f8] sm:$0xff] }
 0x1ba   :  { %19868 = vst [vmem:[#allocation28_spill] sm:$0xff] %v15219_v56  ;;  %v1548_v6 = vadd.f32 %v1461_v1, %v14725_v33  ;;  %v15244_v3 = vadd.f32 %v12471_v50, %v1550_v31  ;;  %v2015_v61 = vpop.f32.mrf.mxu1  ;;  %v3297_v33 = vpack.c.bf16 %v11064_v47, %v11063_v51  ;;  %v19871_v56 = vld [vmem:[#allocation44_spill] sm:$0xff]  ;;  %v11068_v63 = vld [vmem:[%s19701_s0 + $0x218] sm:$0xff]  ;;  %v19872_v51 = vld [vmem:[#allocation45_spill] sm:$0xff] }
 0x1bb   :  { %v12406_v28 = vpop.f32.mrf.mxu0  ;;  %v11165_v8 = vld [vmem:[%s19701_s0 + $0x219] sm:$0xff] }
 0x1bc   :  { %19870 = vst [vmem:[#allocation29_spill] sm:$0xff] %v15244_v3  ;;  %v1551_v55 = vadd.f32 %v12406_v28, %v14727_v45  ;;  %v15253_v25 = vadd.f32 %v2015_v61, %v1548_v6  ;;  %v12472_v17 = vpop.f32.mrf.mxu1  ;;  %v11164_v61 = vld [vmem:[%s19701_s0 + $0x211] sm:$0xff] }
 0x1bd   :  { %v1464_v31 = vpop.f32.mrf.mxu0 }
 0x1be   :  { %v1549_v50 = vadd.f32 %v1464_v31, %v14729_v23  ;;  %v15256_v34 = vadd.f32 %v12472_v17, %v1551_v55  ;;  %v2018_v1 = vpop.f32.mrf.mxu1  ;;  %v11066_v23 = vld [vmem:[%s19701_s0 + $0x200] sm:$0xff] }
 0x1bf   :  { %v12409_v3 = vpop.f32.mrf.mxu0  ;;  %12640 = vmatmul.mubr.msk.bf16.gmra.mxu0 %vm226_vm0, %v3296_v9  ;;  %v3298_v28 = vpack.c.bf16 %v11066_v23, %v11065_v52  ;;  %v19873_v9 = vld [vmem:[#allocation47_spill] sm:$0xff] }
 0x1c0   :  { %v1554_v5 = vadd.f32 %v12409_v3, %v19871_v56  ;;  %v15260_v39 = vadd.f32 %v2018_v1, %v1549_v50  ;;  %v12475_v45 = vpop.f32.mrf.mxu1  ;;  %12706 = vmatmul.mubr.msk.bf16.gmra.mxu1 %vm226_vm0, %v3849_v48  ;;  %12643 = vmatprep.mubr.msk.bf16.mxu0 %vm226_vm0, %v3297_v33  ;;  %v11067_v56 = vld [vmem:[%s19701_s0 + $0x210] sm:$0xff] }
 0x1c1   :  { %v1477_v26 = vpop.f32.mrf.mxu0  ;;  %12709 = vmatprep.mubr.msk.bf16.mxu1 %vm226_vm0, %v3850_v60  ;;  %v3299_v33 = vpack.c.bf16 %v11068_v63, %v11067_v56  ;;  %v19874_v60 = vld [vmem:[#allocation48_spill] sm:$0xff]  ;;  %v11070_v63 = vld [vmem:[%s19701_s0 + $0x230] sm:$0xff] }
 0x1c2   :  { %v1552_v47 = vadd.f32 %v1477_v26, %v19872_v51  ;;  %v15278_v6 = vadd.f32 %v12475_v45, %v1554_v5  ;;  %v2031_v3 = vpop.f32.mrf.mxu1  ;;  %v3852_v5 = vpack.c.bf16 %v11165_v8, %v11164_v61  ;;  %v11069_v56 = vld [vmem:[%s19701_s0 + $0x228] sm:$0xff] }
 0x1c3   :  { %v12410_v38 = vpop.f32.mrf.mxu0 }
 0x1c4   :  { %v1555_v55 = vadd.f32 %v12410_v38, %v19873_v9  ;;  %v15287_v17 = vadd.f32 %v2031_v3, %v1552_v47  ;;  %v12476_v48 = vpop.f32.mrf.mxu1  ;;  %v19875_v38 = vld [vmem:[#allocation46_spill] sm:$0xff]  ;;  %v11072_v3 = vld [vmem:[%s19701_s0 + $0x248] sm:$0xff] }
 0x1c5   :  { %v1480_v31 = vpop.f32.mrf.mxu0  ;;  %v11168_v9 = vld [vmem:[%s19701_s0 + $0x241] sm:$0xff] }
 0x1c6   :  { %v1553_v50 = vadd.f32 %v1480_v31, %v19874_v60  ;;  %v15290_v1 = vadd.f32 %v12476_v48, %v1555_v55  ;;  %v2034_v45 = vpop.f32.mrf.mxu1  ;;  %v11169_v55 = vld [vmem:[%s19701_s0 + $0x249] sm:$0xff] }
 0x1c7   :  { %v12481_v26 = vpop.f32.mrf.mxu0  ;;  %12644 = vmatmul.mubr.msk.bf16.gmra.mxu0 %vm226_vm0, %v3298_v28 }
 0x1c8   :  { %v15293_v51 = vadd.f32 %v2034_v45, %v1553_v50  ;;  %v2601_v52 = vadd.f32 %v12481_v26, %v14779_v35  ;;  %v12547_v23 = vpop.f32.mrf.mxu1  ;;  %12710 = vmatmul.mubr.msk.bf16.gmra.mxu1 %vm226_vm0, %v19875_v38  ;;  %12647 = vmatprep.mubr.msk.bf16.mxu0 %vm226_vm0, %v3299_v33  ;;  %v11071_v35 = vld [vmem:[%s19701_s0 + $0x240] sm:$0xff]  ;;  %v3300_v33 = vpack.c.bf16 %v11070_v63, %v11069_v56 }
 0x1c9   :  { %v2344_v47 = vpop.f32.mrf.mxu0  ;;  %12713 = vmatprep.mubr.msk.bf16.mxu1 %vm226_vm0, %v3852_v5  ;;  %v3301_v50 = vpack.c.bf16 %v11072_v3, %v11071_v35  ;;  %v3854_v45 = vpack.c.bf16 %v11169_v55, %v11168_v9  ;;  %v11173_v9 = vld [vmem:[%s19701_s0 + $0x279] sm:$0xff] }
 0x1ca   :  { %v2599_v61 = vadd.f32 %v2344_v47, %v14782_v16  ;;  %v15313_v8 = vadd.f32 %v12547_v23, %v2601_v52  ;;  %v2897_v28 = vpop.f32.mrf.mxu1 }
 0x1cb   :  { %v12482_v48 = vpop.f32.mrf.mxu0 }
 0x1cc   :  { %19876 = vst [vmem:[#allocation30_spill] sm:$0xff] %v15313_v8  ;;  %v2602_v31 = vadd.f32 %v12482_v48, %v14787_v40  ;;  %v15322_v5 = vadd.f32 %v2897_v28, %v2599_v61  ;;  %v12548_v60 = vpop.f32.mrf.mxu1  ;;  %v11073_v40 = vld [vmem:[%s19701_s0 + $0x258] sm:$0xff] }
 0x1cd   :  { %v2347_v16 = vpop.f32.mrf.mxu0  ;;  %v11172_v28 = vld [vmem:[%s19701_s0 + $0x271] sm:$0xff] }
 0x1ce   :  { %v2600_v26 = vadd.f32 %v2347_v16, %v14791_v19  ;;  %v15325_v52 = vadd.f32 %v12548_v60, %v2602_v31  ;;  %v2900_v23 = vpop.f32.mrf.mxu1  ;;  %v11074_v19 = vld [vmem:[%s19701_s0 + $0x260] sm:$0xff]  ;;  %v3856_v16 = vpack.c.bf16 %v11173_v9, %v11172_v28 }
 0x1cf   :  { %v12485_v38 = vpop.f32.mrf.mxu0  ;;  %12648 = vmatmul.mubr.msk.bf16.gmra.mxu0 %vm226_vm0, %v3300_v33  ;;  %v3302_v48 = vpack.c.bf16 %v11074_v19, %v11073_v40 }
 0x1d0   :  { %v2605_v47 = vadd.f32 %v12485_v38, %v14812_v14  ;;  %v15329_v8 = vadd.f32 %v2900_v23, %v2600_v26  ;;  %v12551_v56 = vpop.f32.mrf.mxu1  ;;  %12714 = vmatmul.mubr.msk.bf16.gmra.mxu1 %vm226_vm0, %v14784_v20  ;;  %12651 = vmatprep.mubr.msk.bf16.mxu0 %vm226_vm0, %v3301_v50  ;;  %v11075_v14 = vld [vmem:[%s19701_s0 + $0x270] sm:$0xff]  ;;  %v11076_v20 = vld [vmem:[%s19701_s0 + $0x278] sm:$0xff] }
 0x1d1   :  { %v2360_v63 = vpop.f32.mrf.mxu0  ;;  %12717 = vmatprep.mubr.msk.bf16.mxu1 %vm226_vm0, %v3854_v45  ;;  %v3303_v50 = vpack.c.bf16 %v11076_v20, %v11075_v14 }
 0x1d2   :  { %v2603_v35 = vadd.f32 %v2360_v63, %v14815_v30  ;;  %v15348_v3 = vadd.f32 %v12551_v56, %v2605_v47  ;;  %v2913_v61 = vpop.f32.mrf.mxu1 }
 0x1d3   :  { %v12486_v55 = vpop.f32.mrf.mxu0 }
 0x1d4   :  { %v2606_v33 = vadd.f32 %v12486_v55, %v14820_v12  ;;  %v15357_v31 = vadd.f32 %v2913_v61, %v2603_v35  ;;  %v12552_v60 = vpop.f32.mrf.mxu1  ;;  %v11077_v12 = vld [vmem:[%s19701_s0 + $0x288] sm:$0xff] }
 0x1d5   :  { %v2363_v30 = vpop.f32.mrf.mxu0  ;;  %v11176_v35 = vld [vmem:[%s19701_s0 + $0x2a1] sm:$0xff]  ;;  %v11177_v61 = vld [vmem:[%s19701_s0 + $0x2a9] sm:$0xff] }
 0x1d6   :  { %v2604_v45 = vadd.f32 %v2363_v30, %v14824_v49  ;;  %v15360_v26 = vadd.f32 %v12552_v60, %v2606_v33  ;;  %v2916_v23 = vpop.f32.mrf.mxu1  ;;  %v11078_v49 = vld [vmem:[%s19701_s0 + $0x290] sm:$0xff] }
 0x1d7   :  { %v12489_v38 = vpop.f32.mrf.mxu0  ;;  %12652 = vmatmul.mubr.msk.bf16.gmra.mxu0 %vm226_vm0, %v3302_v48  ;;  %v3304_v9 = vpack.c.bf16 %v11078_v49, %v11077_v12 }
 0x1d8   :  { %v2609_v47 = vadd.f32 %v12489_v38, %v14845_v4  ;;  %v15364_v56 = vadd.f32 %v2916_v23, %v2604_v45  ;;  %v12555_v40 = vpop.f32.mrf.mxu1  ;;  %12718 = vmatmul.mubr.msk.bf16.gmra.mxu1 %vm226_vm0, %v14817_v41  ;;  %12655 = vmatprep.mubr.msk.bf16.mxu0 %vm226_vm0, %v3303_v50  ;;  %v11079_v4 = vld [vmem:[%s19701_s0 + $0x2a0] sm:$0xff]  ;;  %v11080_v41 = vld [vmem:[%s19701_s0 + $0x2a8] sm:$0xff]  ;;  %v3858_v50 = vpack.c.bf16 %v11177_v61, %v11176_v35 }
 0x1d9   :  { %v2376_v19 = vpop.f32.mrf.mxu0  ;;  %12721 = vmatprep.mubr.msk.bf16.mxu1 %vm226_vm0, %v3856_v16  ;;  %v3305_v60 = vpack.c.bf16 %v11080_v41, %v11079_v4  ;;  %v11180_v41 = vld [vmem:[%s19701_s0 + $0x2d1] sm:$0xff] }
 0x1da   :  { %v2607_v63 = vadd.f32 %v2376_v19, %v14848_v18  ;;  %v15383_v14 = vadd.f32 %v12555_v40, %v2609_v47  ;;  %v2929_v20 = vpop.f32.mrf.mxu1 }
 0x1db   :  { %v12490_v28 = vpop.f32.mrf.mxu0 }
 0x1dc   :  { %v2610_v55 = vadd.f32 %v12490_v28, %v14853_v59  ;;  %v15392_v48 = vadd.f32 %v2929_v20, %v2607_v63  ;;  %v12556_v33 = vpop.f32.mrf.mxu1  ;;  %v11081_v59 = vld [vmem:[%s19701_s0 + $0x2b8] sm:$0xff] }
 0x1dd   :  { %v2379_v18 = vpop.f32.mrf.mxu0  ;;  %v11181_v63 = vld [vmem:[%s19701_s0 + $0x2d9] sm:$0xff] }
 0x1de   :  { %v2608_v30 = vadd.f32 %v2379_v18, %v14857_v37  ;;  %v15395_v16 = vadd.f32 %v12556_v33, %v2610_v55  ;;  %v2932_v45 = vpop.f32.mrf.mxu1  ;;  %v11082_v37 = vld [vmem:[%s19701_s0 + $0x2c0] sm:$0xff]  ;;  %v3860_v33 = vpack.c.bf16 %v11181_v63, %v11180_v41  ;;  %v19878_v63 = vld [vmem:[#allocation6_spill] sm:$0xff] }
 0x1df   :  { %v12493_v23 = vpop.f32.mrf.mxu0  ;;  %12656 = vmatmul.mubr.msk.bf16.gmra.mxu0 %vm226_vm0, %v3304_v9  ;;  %v3306_v35 = vpack.c.bf16 %v11082_v37, %v11081_v59  ;;  %v19877_v59 = vld [vmem:[#allocation3_spill] sm:$0xff] }
 0x1e0   :  { %v2613_v38 = vadd.f32 %v12493_v23, %v14878_v13  ;;  %v15399_v47 = vadd.f32 %v2932_v45, %v2608_v30  ;;  %v12559_v40 = vpop.f32.mrf.mxu1  ;;  %12722 = vmatmul.mubr.msk.bf16.gmra.mxu1 %vm226_vm0, %v14850_v7  ;;  %12659 = vmatprep.mubr.msk.bf16.mxu0 %vm226_vm0, %v3305_v60  ;;  %v11083_v13 = vld [vmem:[%s19701_s0 + $0x2d0] sm:$0xff]  ;;  %v11084_v7 = vld [vmem:[%s19701_s0 + $0x2d8] sm:$0xff] }
 0x1e1   :  { %v2392_v12 = vpop.f32.mrf.mxu0  ;;  %12725 = vmatprep.mubr.msk.bf16.mxu1 %vm226_vm0, %v3858_v50  ;;  %v3307_v55 = vpack.c.bf16 %v11084_v7, %v11083_v13  ;;  %v11184_v7 = vld [vmem:[%s19701_s0 + $0x301] sm:$0xff] }
 0x1e2   :  { %v2611_v49 = vadd.f32 %v2392_v12, %v14881_v36  ;;  %v15418_v19 = vadd.f32 %v12559_v40, %v2613_v38  ;;  %v2945_v4 = vpop.f32.mrf.mxu1 }
 0x1e3   :  { %v12494_v20 = vpop.f32.mrf.mxu0 }
 0x1e4   :  { %v2614_v61 = vadd.f32 %v12494_v20, %v14886_v24  ;;  %v15427_v28 = vadd.f32 %v2945_v4, %v2611_v49  ;;  %v12560_v9 = vpop.f32.mrf.mxu1  ;;  %v11085_v24 = vld [vmem:[%s19701_s0 + $0x2e8] sm:$0xff] }
 0x1e5   :  { %v2395_v36 = vpop.f32.mrf.mxu0  ;;  %v11185_v49 = vld [vmem:[%s19701_s0 + $0x309] sm:$0xff] }
 0x1e6   :  { %v2612_v60 = vadd.f32 %v2395_v36, %v14890_v42  ;;  %v15430_v18 = vadd.f32 %v12560_v9, %v2614_v61  ;;  %v2948_v50 = vpop.f32.mrf.mxu1  ;;  %v11086_v42 = vld [vmem:[%s19701_s0 + $0x2f0] sm:$0xff]  ;;  %v3862_v36 = vpack.c.bf16 %v11185_v49, %v11184_v7 }
 0x1e7   :  { %v12497_v30 = vpop.f32.mrf.mxu0  ;;  %12660 = vmatmul.mubr.msk.bf16.gmra.mxu0 %vm226_vm0, %v3306_v35  ;;  %v3308_v41 = vpack.c.bf16 %v11086_v42, %v11085_v24  ;;  %v19882_v42 = vld [vmem:[#allocation5_spill] sm:$0xff] }
 0x1e8   :  { %v2617_v45 = vadd.f32 %v12497_v30, %v14911_v43  ;;  %v15434_v23 = vadd.f32 %v2948_v50, %v2612_v60  ;;  %v12563_v38 = vpop.f32.mrf.mxu1  ;;  %12726 = vmatmul.mubr.msk.bf16.gmra.mxu1 %vm226_vm0, %v14883_v11  ;;  %12663 = vmatprep.mubr.msk.bf16.mxu0 %vm226_vm0, %v3307_v55  ;;  %v11087_v43 = vld [vmem:[%s19701_s0 + $0x300] sm:$0xff]  ;;  %v11088_v11 = vld [vmem:[%s19701_s0 + $0x308] sm:$0xff] }
 0x1e9   :  { %v2408_v40 = vpop.f32.mrf.mxu0  ;;  %12729 = vmatprep.mubr.msk.bf16.mxu1 %vm226_vm0, %v3860_v33  ;;  %v3309_v9 = vpack.c.bf16 %v11088_v11, %v11087_v43  ;;  %v19879_v33 = vld [vmem:[#allocation7_spill] sm:$0xff] }
 0x1ea   :  { %v2615_v37 = vadd.f32 %v2408_v40, %v19877_v59  ;;  %v15453_v12 = vadd.f32 %v12563_v38, %v2617_v45  ;;  %v2961_v13 = vpop.f32.mrf.mxu1  ;;  %v11089_v40 = vld [vmem:[%s19701_s0 + $0x318] sm:$0xff]  ;;  %v11090_v43 = vld [vmem:[%s19701_s0 + $0x320] sm:$0xff] }
 0x1eb   :  { %v12498_v4 = vpop.f32.mrf.mxu0  ;;  %v11092_v59 = vld [vmem:[%s19701_s0 + $0x338] sm:$0xff] }
 0x1ec   :  { %v2618_v20 = vadd.f32 %v12498_v4, %v19878_v63  ;;  %v15462_v35 = vadd.f32 %v2961_v13, %v2615_v37  ;;  %v12564_v61 = vpop.f32.mrf.mxu1  ;;  %v19883_v37 = vld [vmem:[#allocation4_spill] sm:$0xff]  ;;  %v11188_v4 = vld [vmem:[%s19701_s0 + $0x331] sm:$0xff] }
 0x1ed   :  { %v2411_v55 = vpop.f32.mrf.mxu0 }
 0x1ee   :  { %v15465_v60 = vadd.f32 %v2411_v55, %v19879_v33  ;;  %v15467_v50 = vadd.f32 %v12564_v61, %v2618_v20  ;;  %v15469_v30 = vpop.f32.mrf.mxu1  ;;  %v3310_v20 = vpack.c.bf16 %v11090_v43, %v11089_v40  ;;  %v19884_v61 = vld [vmem:[#allocation8_spill] sm:$0xff] }
 0x1ef   :  { %19881 = vst [vmem:[#allocation32_spill] sm:$0xff] %v15469_v30  ;;  %v12501_v45 = vpop.f32.mrf.mxu0  ;;  %12664 = vmatmul.mubr.msk.bf16.gmra.mxu0 %vm226_vm0, %v3308_v41  ;;  %v11189_v41 = vld [vmem:[%s19701_s0 + $0x339] sm:$0xff] }
 0x1f0   :  { %19880 = vst [vmem:[#allocation27_spill] sm:$0xff] %v15465_v60  ;;  %v2621_v38 = vadd.f32 %v12501_v45, %v14944_v15  ;;  %v12567_v24 = vpop.f32.mrf.mxu1  ;;  %12730 = vmatmul.mubr.msk.bf16.gmra.mxu1 %vm226_vm0, %v19882_v42  ;;  %12667 = vmatprep.mubr.msk.bf16.mxu0 %vm226_vm0, %v3309_v9  ;;  %v11091_v15 = vld [vmem:[%s19701_s0 + $0x330] sm:$0xff] }
 0x1f1   :  { %v2424_v11 = vpop.f32.mrf.mxu0  ;;  %12733 = vmatprep.mubr.msk.bf16.mxu1 %vm226_vm0, %v3862_v36  ;;  %v3311_v33 = vpack.c.bf16 %v11092_v59, %v11091_v15  ;;  %v11093_v15 = vld [vmem:[%s19701_s0 + $0x348] sm:$0xff]  ;;  %v11094_v59 = vld [vmem:[%s19701_s0 + $0x350] sm:$0xff] }
 0x1f2   :  { %v2619_v13 = vadd.f32 %v2424_v11, %v19883_v37  ;;  %v15490_v7 = vadd.f32 %v12567_v24, %v2621_v38  ;;  %v2977_v49 = vpop.f32.mrf.mxu1  ;;  %v3864_v38 = vpack.c.bf16 %v11189_v41, %v11188_v4  ;;  %v19885_v24 = vld [vmem:[#allocation11_spill] sm:$0xff] }
 0x1f3   :  { %v12502_v63 = vpop.f32.mrf.mxu0  ;;  %v11226_v4 = vld [vmem:[%s19701_s0 + $0x3a] sm:$0xff] }
 0x1f4   :  { %v2622_v9 = vadd.f32 %v12502_v63, %v19884_v61  ;;  %v15499_v55 = vadd.f32 %v2977_v49, %v2619_v13  ;;  %v12568_v36 = vpop.f32.mrf.mxu1  ;;  %v19889_v63 = vld [vmem:[#allocation9_spill] sm:$0xff] }
 0x1f5   :  { %v2427_v45 = vpop.f32.mrf.mxu0  ;;  %v11190_v13 = vld [vmem:[%s19701_s0 + $0x349] sm:$0xff] }
 0x1f6   :  { %v15502_v42 = vadd.f32 %v2427_v45, %v19885_v24  ;;  %v15504_v11 = vadd.f32 %v12568_v36, %v2622_v9  ;;  %v15506_v37 = vpop.f32.mrf.mxu1  ;;  %v3312_v36 = vpack.c.bf16 %v11094_v59, %v11093_v15  ;;  %v11229_v15 = vld [vmem:[%s19701_s0 + $0x62] sm:$0xff] }
 0x1f7   :  { %19888 = vst [vmem:[#allocation31_spill] sm:$0xff] %v15506_v37  ;;  %v12505_v30 = vpop.f32.mrf.mxu0  ;;  %12668 = vmatmul.mubr.msk.bf16.gmra.mxu0 %vm226_vm0, %v3310_v20 }
 0x1f8   :  { %19886 = vst [vmem:[#allocation33_spill] sm:$0xff] %v15502_v42  ;;  %19887 = vst [vmem:[#allocation34_spill] sm:$0xff] %v15504_v11  ;;  %v2625_v40 = vadd.f32 %v12505_v30, %v14983_v27  ;;  %v12571_v43 = vpop.f32.mrf.mxu1  ;;  %12734 = vmatmul.mubr.msk.bf16.gmra.mxu1 %vm226_vm0, %v19889_v63  ;;  %12671 = vmatprep.mubr.msk.bf16.mxu0 %vm226_vm0, %v3311_v33  ;;  %v11191_v27 = vld [vmem:[%s19701_s0 + $0x351] sm:$0xff] }
 0x1f9   :  { %v2440_v49 = vpop.f32.mrf.mxu0  ;;  %12737 = vmatprep.mubr.msk.bf16.mxu1 %vm226_vm0, %v3864_v38  ;;  %v11225_v30 = vld [vmem:[%s19701_s0 + $0x32] sm:$0xff]  ;;  %v3865_v24 = vpack.c.bf16 %v11191_v27, %v11190_v13 }
 0x1fa   :  { %v2623_v41 = vadd.f32 %v2440_v49, %v14986_v10  ;;  %v15533_v20 = vadd.f32 %v12571_v43, %v2625_v40  ;;  %v2993_v61 = vpop.f32.mrf.mxu1  ;;  %v4387_v63 = vpack.c.bf16 %v11226_v4, %v11225_v30 }
 0x1fb   :  { %v12506_v9 = vpop.f32.mrf.mxu0 }
 0x1fc   :  { %v2626_v33 = vadd.f32 %v12506_v9, %v14989_v62  ;;  %v15536_v45 = vadd.f32 %v2993_v61, %v2623_v41  ;;  %v12572_v38 = vpop.f32.mrf.mxu1  ;;  %v11227_v62 = vld [vmem:[%s19701_s0 + $0x4a] sm:$0xff] }
 0x1fd   :  { %v2443_v37 = vpop.f32.mrf.mxu0 }
 0x1fe   :  { %v15539_v42 = vadd.f32 %v2443_v37, %v14993_v53  ;;  %v15541_v60 = vadd.f32 %v12572_v38, %v2626_v33  ;;  %v15543_v11 = vpop.f32.mrf.mxu1  ;;  %v11228_v53 = vld [vmem:[%s19701_s0 + $0x52] sm:$0xff] }
 0x1ff   :  { %19891 = vst [vmem:[#allocation37_spill] sm:$0xff] %v15543_v11  ;;  %v12509_v10 = vpop.f32.mrf.mxu0  ;;  %12672 = vmatmul.mubr.msk.bf16.gmra.mxu0 %vm226_vm0, %v3312_v36  ;;  %v4388_v30 = vpack.c.bf16 %v11228_v53, %v11227_v62 }
 0x200   :  { %19890 = vst [vmem:[#allocation36_spill] sm:$0xff] %v15539_v42  ;;  %v2629_v40 = vadd.f32 %v12509_v10, %v15006_v2  ;;  %v12575_v43 = vpop.f32.mrf.mxu1  ;;  %12738 = vmatmul.mubr.msk.bf16.gmra.mxu1 %vm226_vm0, %v3865_v24  ;;  %12743 = vmatprep.mubr.msk.bf16.mxu0 %vm226_vm0, %v4387_v63  ;;  %v11230_v2 = vld [vmem:[%s19701_s0 + $0x6a] sm:$0xff] }
 0x201   :  { %v2456_v37 = vpop.f32.mrf.mxu0  ;;  %v4389_v9 = vpack.c.bf16 %v11230_v2, %v11229_v15 }
 0x202   :  { %v2627_v59 = vadd.f32 %v2456_v37, %v15015_v21  ;;  %v15562_v13 = vadd.f32 %v12575_v43, %v2629_v40  ;;  %v3009_v49 = vpop.f32.mrf.mxu1  ;;  %v11233_v43 = vld [vmem:[%s19701_s0 + $0x92] sm:$0xff] }
 0x203   :  { %v12510_v27 = vpop.f32.mrf.mxu0 }
 0x204   :  { %v2630_v4 = vadd.f32 %v12510_v27, %v15018_v44  ;;  %v15565_v41 = vadd.f32 %v3009_v49, %v2627_v59  ;;  %v12576_v61 = vpop.f32.mrf.mxu1  ;;  %v11231_v44 = vld [vmem:[%s19701_s0 + $0x7a] sm:$0xff]  ;;  %v19894_v59 = vld [vmem:[#allocation12_spill] sm:$0xff] }
 0x205   :  { %v2459_v36 = vpop.f32.mrf.mxu0 }
 0x206   :  { %v15568_v33 = vadd.f32 %v2459_v36, %v15022_v29  ;;  %v15570_v38 = vadd.f32 %v12576_v61, %v2630_v4  ;;  %v15572_v24 = vpop.f32.mrf.mxu1  ;;  %v11232_v29 = vld [vmem:[%s19701_s0 + $0x82] sm:$0xff] }
 0x207   :  { %19893 = vst [vmem:[#allocation35_spill] sm:$0xff] %v15572_v24  ;;  %v12513_v21 = vpop.f32.mrf.mxu0  ;;  %12744 = vmatmul.mubr.msk.bf16.vlgmr.msra.gmra.mxu0 %vm226_vm0, %v4388_v30  ;;  %v4390_v2 = vpack.c.bf16 %v11232_v29, %v11231_v44  ;;  %v11235_v44 = vld [vmem:[%s19701_s0 + $0xaa] sm:$0xff]  ;;  %v11236_v29 = vld [vmem:[%s19701_s0 + $0xb2] sm:$0xff] }
 0x208   :  { %19892 = vst [vmem:[#allocation38_spill] sm:$0xff] %v15568_v33  ;;  %v2633_v63 = vadd.f32 %v12513_v21, %v15043_v58  ;;  %v12579_v10 = vpop.f32.mrf.mxu1  ;;  %12747 = vmatprep.mubr.msk.bf16.mxu0 %vm226_vm0, %v4389_v9  ;;  %v11234_v58 = vld [vmem:[%s19701_s0 + $0x9a] sm:$0xff]  ;;  %v19895_v9 = vld [vmem:[#allocation13_spill] sm:$0xff] }
 0x209   :  { %v2472_v40 = vpop.f32.mrf.mxu0  ;;  %v4391_v4 = vpack.c.bf16 %v11234_v58, %v11233_v43  ;;  %v11237_v43 = vld [vmem:[%s19701_s0 + $0xc2] sm:$0xff] }
 0x20a   :  { %v2631_v62 = vadd.f32 %v2472_v40, %v15046_v46  ;;  %v15590_v53 = vadd.f32 %v12579_v10, %v2633_v63  ;;  %v3025_v37 = vpop.f32.mrf.mxu1 }
 0x20b   :  { %v12514_v15 = vpop.f32.mrf.mxu0 }
 0x20c   :  { %v2634_v49 = vadd.f32 %v12514_v15, %v19894_v59  ;;  %v15593_v27 = vadd.f32 %v3025_v37, %v2631_v62  ;;  %v12580_v30 = vpop.f32.mrf.mxu1  ;;  %v19898_v59 = vld [vmem:[#allocation10_spill] sm:$0xff] }
 0x20d   :  { %v2475_v61 = vpop.f32.mrf.mxu0 }
 0x20e   :  { %v15596_v36 = vadd.f32 %v2475_v61, %v19895_v9  ;;  %v15598_v21 = vadd.f32 %v12580_v30, %v2634_v49  ;;  %v15600_v24 = vpop.f32.mrf.mxu1 }
 0x20f   :  { %19897 = vst [vmem:[#allocation41_spill] sm:$0xff] %v15600_v24  ;;  %v12517_v46 = vpop.f32.mrf.mxu0  ;;  %12748 = vmatmul.mubr.msk.bf16.gmra.mxu0 %vm226_vm0, %v4390_v2  ;;  %v4392_v2 = vpack.c.bf16 %v11236_v29, %v11235_v44  ;;  %v11239_v44 = vld [vmem:[%s19701_s0 + $0xda] sm:$0xff]  ;;  %v11240_v29 = vld [vmem:[%s19701_s0 + $0xe2] sm:$0xff] }
 0x210   :  { %19896 = vst [vmem:[#allocation39_spill] sm:$0xff] %v15596_v36  ;;  %v2637_v63 = vadd.f32 %v12517_v46, %v15073_v57  ;;  %v12583_v10 = vpop.f32.mrf.mxu1  ;;  %12751 = vmatprep.mubr.msk.bf16.mxu0 %vm226_vm0, %v4391_v4  ;;  %v11238_v57 = vld [vmem:[%s19701_s0 + $0xca] sm:$0xff]  ;;  %v19899_v46 = vld [vmem:[#allocation14_spill] sm:$0xff] }
 0x211   :  { %v2488_v40 = vpop.f32.mrf.mxu0  ;;  %v4393_v61 = vpack.c.bf16 %v11238_v57, %v11237_v43  ;;  %v11241_v43 = vld [vmem:[%s19701_s0 + $0xf2] sm:$0xff]  ;;  %v19902_v57 = vld [vmem:[#allocation15_spill] sm:$0xff] }
 0x212   :  { %v2635_v58 = vadd.f32 %v2488_v40, %v15076_v22  ;;  %v15618_v62 = vadd.f32 %v12583_v10, %v2637_v63  ;;  %v3041_v37 = vpop.f32.mrf.mxu1 }
 0x213   :  { %v12518_v15 = vpop.f32.mrf.mxu0 }
 0x214   :  { %v2638_v49 = vadd.f32 %v12518_v15, %v19898_v59  ;;  %v15621_v30 = vadd.f32 %v3041_v37, %v2635_v58  ;;  %v12584_v4 = vpop.f32.mrf.mxu1  ;;  %v4394_v59 = vpack.c.bf16 %v11240_v29, %v11239_v44  ;;  %v11243_v29 = vld [vmem:[%s19701_s0 + $0x10a] sm:$0xff] }
 0x215   :  { %v2491_v9 = vpop.f32.mrf.mxu0 }
 0x216   :  { %v15624_v24 = vadd.f32 %v2491_v9, %v19899_v46  ;;  %v15626_v36 = vadd.f32 %v12584_v4, %v2638_v49  ;;  %v15628_v33 = vpop.f32.mrf.mxu1  ;;  %v19903_v49 = vld [vmem:[#allocation17_spill] sm:$0xff] }
 0x217   :  { %19901 = vst [vmem:[#allocation43_spill] sm:$0xff] %v15628_v33  ;;  %v12521_v22 = vpop.f32.mrf.mxu0  ;;  %12752 = vmatmul.mubr.msk.bf16.gmra.mxu0 %vm226_vm0, %v4392_v2  ;;  %v19905_v33 = vld [vmem:[#allocation18_spill] sm:$0xff] }
 0x218   :  { %19900 = vst [vmem:[#allocation42_spill] sm:$0xff] %v15624_v24  ;;  %v2641_v63 = vadd.f32 %v12521_v22, %v15103_v54  ;;  %v12587_v10 = vpop.f32.mrf.mxu1  ;;  %12755 = vmatprep.mubr.msk.bf16.mxu0 %vm226_vm0, %v4393_v61  ;;  %v11242_v54 = vld [vmem:[%s19701_s0 + $0xfa] sm:$0xff] }
 0x219   :  { %v2504_v40 = vpop.f32.mrf.mxu0  ;;  %v4395_v46 = vpack.c.bf16 %v11242_v54, %v11241_v43  ;;  %v11245_v54 = vld [vmem:[%s19701_s0 + $0x122] sm:$0xff] }
 0x21a   :  { %v2639_v58 = vadd.f32 %v2504_v40, %v19902_v57  ;;  %v15646_v37 = vadd.f32 %v12587_v10, %v2641_v63  ;;  %v3057_v15 = vpop.f32.mrf.mxu1  ;;  %v19909_v63 = vld [vmem:[#allocation16_spill] sm:$0xff] }
 0x21b   :  { %v12522_v2 = vpop.f32.mrf.mxu0  ;;  %v11246_v57 = vld [vmem:[%s19701_s0 + $0x12a] sm:$0xff] }
 0x21c   :  { %v2642_v4 = vadd.f32 %v12522_v2, %v19903_v49  ;;  %v15649_v61 = vadd.f32 %v3057_v15, %v2639_v58  ;;  %v12588_v9 = vpop.f32.mrf.mxu1 }
 0x21d   :  { %v2507_v22 = vpop.f32.mrf.mxu0 }
 0x21e   :  { %19904 = vst [vmem:[#allocation40_spill] sm:$0xff] %v15649_v61  ;;  %v15652_v24 = vadd.f32 %v2507_v22, %v19905_v33  ;;  %v15654_v11 = vadd.f32 %v12588_v9, %v2642_v4  ;;  %v15656_v42 = vpop.f32.mrf.mxu1  ;;  %v11244_v33 = vld [vmem:[%s19701_s0 + $0x112] sm:$0xff]  ;;  %v19911_v4 = vld [vmem:[#allocation20_spill] sm:$0xff] }
 0x21f   :  { %19908 = vst [vmem:[#allocation47_spill] sm:$0xff] %v15656_v42  ;;  %v12525_v40 = vpop.f32.mrf.mxu0  ;;  %12756 = vmatmul.mubr.msk.bf16.gmra.mxu0 %vm226_vm0, %v4394_v59  ;;  %v4396_v49 = vpack.c.bf16 %v11244_v33, %v11243_v29  ;;  %v19913_v42 = vld [vmem:[#allocation21_spill] sm:$0xff]  ;;  %v11247_v33 = vld [vmem:[%s19701_s0 + $0x13a] sm:$0xff] }
 0x220   :  { %19906 = vst [vmem:[#allocation44_spill] sm:$0xff] %v15652_v24  ;;  %19907 = vst [vmem:[#allocation45_spill] sm:$0xff] %v15654_v11  ;;  %v2645_v10 = vadd.f32 %v12525_v40, %v19909_v63  ;;  %v12591_v44 = vpop.f32.mrf.mxu1  ;;  %12759 = vmatprep.mubr.msk.bf16.mxu0 %vm226_vm0, %v4395_v46  ;;  %v4397_v40 = vpack.c.bf16 %v11246_v57, %v11245_v54  ;;  %v11249_v54 = vld [vmem:[%s19701_s0 + $0x152] sm:$0xff]  ;;  %v11250_v57 = vld [vmem:[%s19701_s0 + $0x15a] sm:$0xff] }
 0x221   :  { %v2520_v43 = vpop.f32.mrf.mxu0 }
 0x222   :  { %v2643_v58 = vadd.f32 %v2520_v43, %v15142_v0  ;;  %v15674_v15 = vadd.f32 %v12591_v44, %v2645_v10  ;;  %v3073_v2 = vpop.f32.mrf.mxu1  ;;  %v19917_v10 = vld [vmem:[#allocation22_spill] sm:$0xff] }
 0x223   :  { %v12526_v59 = vpop.f32.mrf.mxu0 }
 0x224   :  { %19910 = vst [vmem:[#allocation48_spill] sm:$0xff] %v15674_v15  ;;  %v2646_v9 = vadd.f32 %v12526_v59, %v19911_v4  ;;  %v15677_v46 = vadd.f32 %v3073_v2, %v2643_v58  ;;  %v12592_v22 = vpop.f32.mrf.mxu1  ;;  %v19918_v58 = vld [vmem:[#allocation19_spill] sm:$0xff] }
 0x225   :  { %v2523_v63 = vpop.f32.mrf.mxu0 }
 0x226   :  { %19912 = vst [vmem:[#allocation46_spill] sm:$0xff] %v15677_v46  ;;  %v15680_v24 = vadd.f32 %v2523_v63, %v19913_v42  ;;  %v15682_v11 = vadd.f32 %v12592_v22, %v2646_v9  ;;  %v15684_v61 = vpop.f32.mrf.mxu1  ;;  %v11248_v42 = vld [vmem:[%s19701_s0 + $0x142] sm:$0xff] }
 0x227   :  { %19916 = vst [vmem:[#allocation7_spill] sm:$0xff] %v15684_v61  ;;  %v12529_v0 = vpop.f32.mrf.mxu0  ;;  %12760 = vmatmul.mubr.msk.bf16.gmra.mxu0 %vm226_vm0, %v4396_v49  ;;  %v4398_v9 = vpack.c.bf16 %v11248_v42, %v11247_v33  ;;  %v19919_v22 = vld [vmem:[#allocation24_spill] sm:$0xff] }
 0x228   :  { %19914 = vst [vmem:[#allocation3_spill] sm:$0xff] %v15680_v24  ;;  %19915 = vst [vmem:[#allocation6_spill] sm:$0xff] %v15682_v11  ;;  %v2649_v44 = vadd.f32 %v12529_v0, %v19917_v10  ;;  %v12595_v29 = vpop.f32.mrf.mxu1  ;;  %12763 = vmatprep.mubr.msk.bf16.mxu0 %vm226_vm0, %v4397_v40  ;;  %v4399_v10 = vpack.c.bf16 %v11250_v57, %v11249_v54  ;;  %v19921_v24 = vld [vmem:[#allocation25_spill] sm:$0xff]  ;;  %v11253_v54 = vld [vmem:[%s19701_s0 + $0x182] sm:$0xff] }
 0x229   :  { %v2536_v43 = vpop.f32.mrf.mxu0  ;;  %v11251_v42 = vld [vmem:[%s19701_s0 + $0x16a] sm:$0xff] }
 0x22a   :  { %v2647_v2 = vadd.f32 %v2536_v43, %v19918_v58  ;;  %v15702_v59 = vadd.f32 %v12595_v29, %v2649_v44  ;;  %v3089_v49 = vpop.f32.mrf.mxu1  ;;  %v19925_v44 = vld [vmem:[#allocation26_spill] sm:$0xff]  ;;  %v11254_v57 = vld [vmem:[%s19701_s0 + $0x18a] sm:$0xff] }
 0x22b   :  { %v12530_v4 = vpop.f32.mrf.mxu0 }
 0x22c   :  { %v2650_v40 = vadd.f32 %v12530_v4, %v19919_v22  ;;  %v15705_v63 = vadd.f32 %v3089_v49, %v2647_v2  ;;  %v12596_v0 = vpop.f32.mrf.mxu1  ;;  %v19926_v22 = vld [vmem:[#allocation23_spill] sm:$0xff] }
 0x22d   :  { %v2539_v61 = vpop.f32.mrf.mxu0 }
 0x22e   :  { %19920 = vst [vmem:[#allocation5_spill] sm:$0xff] %v15705_v63  ;;  %v15708_v11 = vadd.f32 %v2539_v61, %v19921_v24  ;;  %v15710_v46 = vadd.f32 %v12596_v0, %v2650_v40  ;;  %v15712_v15 = vpop.f32.mrf.mxu1  ;;  %v11252_v24 = vld [vmem:[%s19701_s0 + $0x172] sm:$0xff] }
 0x22f   :  { %19924 = vst [vmem:[#allocation11_spill] sm:$0xff] %v15712_v15  ;;  %v12533_v43 = vpop.f32.mrf.mxu0  ;;  %12764 = vmatmul.mubr.msk.bf16.gmra.mxu0 %vm226_vm0, %v4398_v9  ;;  %v4400_v9 = vpack.c.bf16 %v11252_v24, %v11251_v42  ;;  %v19927_v15 = vld [vmem:[#allocation28_spill] sm:$0xff]  ;;  %v11255_v24 = vld [vmem:[%s19701_s0 + $0x19a] sm:$0xff] }
 0x230   :  { %19922 = vst [vmem:[#allocation4_spill] sm:$0xff] %v15708_v11  ;;  %19923 = vst [vmem:[#allocation8_spill] sm:$0xff] %v15710_v46  ;;  %v2653_v29 = vadd.f32 %v12533_v43, %v19925_v44  ;;  %v12599_v33 = vpop.f32.mrf.mxu1  ;;  %12767 = vmatprep.mubr.msk.bf16.mxu0 %vm226_vm0, %v4399_v10  ;;  %v4401_v43 = vpack.c.bf16 %v11254_v57, %v11253_v54  ;;  %v11257_v54 = vld [vmem:[%s19701_s0 + $0x1e2] sm:$0xff]  ;;  %v11258_v57 = vld [vmem:[%s19701_s0 + $0x1ea] sm:$0xff] }
 0x231   :  { %v2552_v61 = vpop.f32.mrf.mxu0 }
 0x232   :  { %v2651_v58 = vadd.f32 %v2552_v61, %v15212_v32  ;;  %v15730_v2 = vadd.f32 %v12599_v33, %v2653_v29  ;;  %v3105_v49 = vpop.f32.mrf.mxu1  ;;  %v19930_v29 = vld [vmem:[#allocation29_spill] sm:$0xff] }
 0x233   :  { %v12534_v4 = vpop.f32.mrf.mxu0 }
 0x234   :  { %v2654_v40 = vadd.f32 %v12534_v4, %v19926_v22  ;;  %v15733_v0 = vadd.f32 %v3105_v49, %v2651_v58  ;;  %v12600_v10 = vpop.f32.mrf.mxu1 }
 0x235   :  { %v2555_v44 = vpop.f32.mrf.mxu0 }
 0x236   :  { %v15736_v11 = vadd.f32 %v2555_v44, %v19927_v15  ;;  %v15738_v46 = vadd.f32 %v12600_v10, %v2654_v40  ;;  %v15740_v63 = vpop.f32.mrf.mxu1  ;;  %v11256_v15 = vld [vmem:[%s19701_s0 + $0x1a2] sm:$0xff]  ;;  %v4403_v44 = vpack.c.bf16 %v11258_v57, %v11257_v54 }
 0x237   :  { %19929 = vst [vmem:[#allocation12_spill] sm:$0xff] %v15740_v63  ;;  %v12537_v32 = vpop.f32.mrf.mxu0  ;;  %12768 = vmatmul.mubr.msk.bf16.gmra.mxu0 %vm226_vm0, %v4400_v9  ;;  %v4402_v22 = vpack.c.bf16 %v11256_v15, %v11255_v24  ;;  %v11261_v15 = vld [vmem:[%s19701_s0 + $0x212] sm:$0xff] }
 0x238   :  { %19928 = vst [vmem:[#allocation9_spill] sm:$0xff] %v15736_v11  ;;  %v2657_v33 = vadd.f32 %v12537_v32, %v19930_v29  ;;  %v12603_v42 = vpop.f32.mrf.mxu1  ;;  %12771 = vmatprep.mubr.msk.bf16.mxu0 %vm226_vm0, %v4401_v43 }
 0x239   :  { %v2568_v61 = vpop.f32.mrf.mxu0 }
 0x23a   :  { %v2655_v58 = vadd.f32 %v2568_v61, %v15253_v25  ;;  %v15758_v49 = vadd.f32 %v12603_v42, %v2657_v33  ;;  %v3121_v4 = vpop.f32.mrf.mxu1 }
 0x23b   :  { %v12538_v9 = vpop.f32.mrf.mxu0 }
 0x23c   :  { %v2658_v40 = vadd.f32 %v12538_v9, %v15256_v34  ;;  %v15761_v10 = vadd.f32 %v3121_v4, %v2655_v58  ;;  %v12604_v43 = vpop.f32.mrf.mxu1  ;;  %v11259_v34 = vld [vmem:[%s19701_s0 + $0x1fa] sm:$0xff] }
 0x23d   :  { %v2571_v32 = vpop.f32.mrf.mxu0 }
 0x23e   :  { %v15764_v29 = vadd.f32 %v2571_v32, %v15260_v39  ;;  %v15766_v63 = vadd.f32 %v12604_v43, %v2658_v40  ;;  %v15768_v11 = vpop.f32.mrf.mxu1  ;;  %v11260_v39 = vld [vmem:[%s19701_s0 + $0x202] sm:$0xff] }
 0x23f   :  { %19932 = vst [vmem:[#allocation10_spill] sm:$0xff] %v15768_v11  ;;  %v12541_v25 = vpop.f32.mrf.mxu0  ;;  %12772 = vmatmul.mubr.msk.bf16.gmra.mxu0 %vm226_vm0, %v4402_v22  ;;  %v4404_v4 = vpack.c.bf16 %v11260_v39, %v11259_v34 }
 0x240   :  { %19931 = vst [vmem:[#allocation13_spill] sm:$0xff] %v15764_v29  ;;  %v2661_v33 = vadd.f32 %v12541_v25, %v15278_v6  ;;  %v12607_v42 = vpop.f32.mrf.mxu1  ;;  %12775 = vmatprep.mubr.msk.bf16.mxu0 %vm226_vm0, %v4403_v44  ;;  %v11262_v6 = vld [vmem:[%s19701_s0 + $0x21a] sm:$0xff] }
 0x241   :  { %v2584_v24 = vpop.f32.mrf.mxu0  ;;  %v4405_v43 = vpack.c.bf16 %v11262_v6, %v11261_v15  ;;  %v15823_v15 = vld [vmem:[%s19701_s0 + $0x24a] sm:$0xff] }
 0x242   :  { %v2659_v61 = vadd.f32 %v2584_v24, %v15287_v17  ;;  %v15786_v54 = vadd.f32 %v12607_v42, %v2661_v33  ;;  %v3137_v57 = vpop.f32.mrf.mxu1  ;;  %v19935_v33 = vld [vmem:[#allocation30_spill] sm:$0xff]  ;;  %v15818_v24 = vld [vmem:[%s19701_s0 + $0x242] sm:$0xff] }
 0x243   :  { %v12542_v58 = vpop.f32.mrf.mxu0 }
 0x244   :  { %v2662_v9 = vadd.f32 %v12542_v58, %v15290_v1  ;;  %v15789_v22 = vadd.f32 %v3137_v57, %v2659_v61  ;;  %v12608_v40 = vpop.f32.mrf.mxu1  ;;  %v15808_v1 = vld [vmem:[%s19701_s0 + $0x22a] sm:$0xff] }
 0x245   :  { %v2587_v44 = vpop.f32.mrf.mxu0 }
 0x246   :  { %v15792_v32 = vadd.f32 %v2587_v44, %v15293_v51  ;;  %v15794_v25 = vadd.f32 %v12608_v40, %v2662_v9  ;;  %v15796_v11 = vpop.f32.mrf.mxu1  ;;  %v15813_v51 = vld [vmem:[%s19701_s0 + $0x232] sm:$0xff]  ;;  %v4407_v40 = vpack.c.bf16 %v15823_v15, %v15818_v24  ;;  %v13422_v44 = vmov 0.0  }
 0x247   :  { %19934 = vst [vmem:[#allocation15_spill] sm:$0xff] %v15796_v11  ;;  %v12613_v17 = vpop.f32.mrf.mxu0  ;;  %12776 = vmatmul.mubr.msk.bf16.gmra.mxu0 %vm226_vm0, %v4404_v4  ;;  %v4406_v58 = vpack.c.bf16 %v15813_v51, %v15808_v1  ;;  %5428 = vst.msk [vmem:[#allocation2 + $0x30] sm:$0xff] %vm226_vm0, %v13422_v44  ;;  %v11268_v1 = vld [vmem:[%s19701_s0 + $0x262] sm:$0xff] }
 0x248   :  { %19933 = vst [vmem:[#allocation14_spill] sm:$0xff] %v15792_v32  ;;  %v15800_v42 = vadd.f32 %v12613_v17, %v19935_v33  ;;  %v15802_v34 = vpop.f32.mrf.mxu1  ;;  %12779 = vmatprep.mubr.msk.bf16.mxu0 %vm226_vm0, %v4405_v43  ;;  %5429 = vst.msk [vmem:[#allocation2 + $0x38] sm:$0xff] %vm226_vm0, %v13422_v44 }
 0x249   :  { %v3451_v39 = vpop.f32.mrf.mxu0  ;;  %5421 = vst.msk [vmem:[#allocation2] sm:$0xff] %vm226_vm0, %v13422_v44  ;;  %5422 = vst.msk [vmem:[#allocation2 + $0x8] sm:$0xff] %vm226_vm0, %v13422_v44 }
 0x24a   :  { %v15826_v6 = vadd.f32 %v3451_v39, %v15322_v5  ;;  %v15828_v61 = vpop.f32.mrf.mxu1  ;;  %5425 = vst.msk [vmem:[#allocation2 + $0x18] sm:$0xff] %vm226_vm0, %v13422_v44  ;;  %5426 = vst.msk [vmem:[#allocation2 + $0x20] sm:$0xff] %vm226_vm0, %v13422_v44  ;;  %v11270_v39 = vld [vmem:[%s19701_s0 + $0x27a] sm:$0xff] }
 0x24b   :  { %v12614_v57 = vpop.f32.mrf.mxu0  ;;  %5431 = vst.msk [vmem:[#allocation2 + $0x48] sm:$0xff] %vm226_vm0, %v13422_v44  ;;  %5432 = vst.msk [vmem:[#allocation2 + $0x50] sm:$0xff] %vm226_vm0, %v13422_v44 }
 0x24c   :  { %v15833_v4 = vadd.f32 %v12614_v57, %v15325_v52  ;;  %v15835_v9 = vpop.f32.mrf.mxu1  ;;  %5434 = vst.msk [vmem:[#allocation2 + $0x60] sm:$0xff] %vm226_vm0, %v13422_v44  ;;  %5435 = vst.msk [vmem:[#allocation2 + $0x68] sm:$0xff] %vm226_vm0, %v13422_v44 }
 0x24d   :  { %v15839_v43 = vpop.f32.mrf.mxu0  ;;  %5437 = vst.msk [vmem:[#allocation2 + $0x78] sm:$0xff] %vm226_vm0, %v13422_v44  ;;  %5438 = vst.msk [vmem:[#allocation2 + $0x80] sm:$0xff] %vm226_vm0, %v13422_v44 }
 0x24e   :  { %5440 = vst.msk [vmem:[#allocation2 + $0x90] sm:$0xff] %vm226_vm0, %v13422_v44  ;;  %5441 = vst.msk [vmem:[#allocation2 + $0x98] sm:$0xff] %vm226_vm0, %v13422_v44  ;;  %v15987_v5 = vadd.f32 %v15839_v43, %v15329_v8  ;;  %v15996_v33 = vpop.f32.mrf.mxu1  ;;  %v11267_v8 = vld [vmem:[%s19701_s0 + $0x25a] sm:$0xff] }
 0x24f   :  { %5443 = vst.msk [vmem:[#allocation2 + $0xa8] sm:$0xff] %vm226_vm0, %v13422_v44  ;;  %5444 = vst.msk [vmem:[#allocation2 + $0xb0] sm:$0xff] %vm226_vm0, %v13422_v44  ;;  %v12617_v52 = vpop.f32.mrf.mxu0  ;;  %12780 = vmatmul.mubr.msk.bf16.gmra.mxu0 %vm226_vm0, %v4406_v58  ;;  %v4408_v57 = vpack.c.bf16 %v11268_v1, %v11267_v8  ;;  %v11273_v8 = vld [vmem:[%s19701_s0 + $0x2a2] sm:$0xff] }
 0x250   :  { %5446 = vst.msk [vmem:[#allocation2 + $0xc0] sm:$0xff] %vm226_vm0, %v13422_v44  ;;  %5447 = vst.msk [vmem:[#allocation2 + $0xc8] sm:$0xff] %vm226_vm0, %v13422_v44  ;;  %v15994_v17 = vadd.f32 %v12617_v52, %v15348_v3  ;;  %12783 = vmatprep.mubr.msk.bf16.mxu0 %vm226_vm0, %v4407_v40  ;;  %v11269_v3 = vld [vmem:[%s19701_s0 + $0x272] sm:$0xff]  ;;  %v16089_v58 = vpop.f32.mrf.mxu1 }
 0x251   :  { %5449 = vst.msk [vmem:[#allocation2 + $0xd8] sm:$0xff] %vm226_vm0, %v13422_v44  ;;  %5450 = vst.msk [vmem:[#allocation2 + $0xe0] sm:$0xff] %vm226_vm0, %v13422_v44  ;;  %v3467_v51 = vpop.f32.mrf.mxu0  ;;  %v4409_v43 = vpack.c.bf16 %v11270_v39, %v11269_v3 }
 0x252   :  { %5452 = vst.msk [vmem:[#allocation2 + $0xf0] sm:$0xff] %vm226_vm0, %v13422_v44  ;;  %5453 = vst.msk [vmem:[#allocation2 + $0xf8] sm:$0xff] %vm226_vm0, %v13422_v44  ;;  %v16087_v24 = vadd.f32 %v3467_v51, %v15357_v31  ;;  %v16098_v29 = vpop.f32.mrf.mxu1 }
 0x253   :  { %5455 = vst.msk [vmem:[#allocation2 + $0x108] sm:$0xff] %vm226_vm0, %v13422_v44  ;;  %5456 = vst.msk [vmem:[#allocation2 + $0x110] sm:$0xff] %vm226_vm0, %v13422_v44  ;;  %v12618_v15 = vpop.f32.mrf.mxu0 }
 0x254   :  { %5458 = vst.msk [vmem:[#allocation2 + $0x120] sm:$0xff] %vm226_vm0, %v13422_v44  ;;  %5459 = vst.msk [vmem:[#allocation2 + $0x128] sm:$0xff] %vm226_vm0, %v13422_v44  ;;  %v16092_v40 = vadd.f32 %v12618_v15, %v15360_v26  ;;  %v11271_v26 = vld [vmem:[%s19701_s0 + $0x28a] sm:$0xff]  ;;  %v16119_v3 = vpop.f32.mrf.mxu1 }
 0x255   :  { %5461 = vst.msk [vmem:[#allocation2 + $0x138] sm:$0xff] %vm226_vm0, %v13422_v44  ;;  %5462 = vst.msk [vmem:[#allocation2 + $0x140] sm:$0xff] %vm226_vm0, %v13422_v44  ;;  %v3470_v52 = vpop.f32.mrf.mxu0 }
 0x256   :  { %5464 = vst.msk [vmem:[#allocation2 + $0x150] sm:$0xff] %vm226_vm0, %v13422_v44  ;;  %5465 = vst.msk [vmem:[#allocation2 + $0x158] sm:$0xff] %vm226_vm0, %v13422_v44  ;;  %v16095_v11 = vadd.f32 %v3470_v52, %v15364_v56 }
 0x257   :  { %5467 = vst.msk [vmem:[#allocation2 + $0x168] sm:$0xff] %vm226_vm0, %v13422_v44  ;;  %5468 = vst.msk [vmem:[#allocation2 + $0x170] sm:$0xff] %vm226_vm0, %v13422_v44  ;;  %v12621_v32 = vpop.f32.mrf.mxu0  ;;  %12784 = vmatmul.mubr.msk.bf16.gmra.mxu0 %vm226_vm0, %v4408_v57 }
 0x258   :  { %5470 = vst.msk [vmem:[#allocation2 + $0x180] sm:$0xff] %vm226_vm0, %v13422_v44  ;;  %5471 = vst.msk [vmem:[#allocation2 + $0x188] sm:$0xff] %vm226_vm0, %v13422_v44  ;;  %v16101_v31 = vadd.f32 %v12621_v32, %v15383_v14  ;;  %12787 = vmatprep.mubr.msk.bf16.mxu0 %vm226_vm0, %v4409_v43  ;;  %v11274_v14 = vld [vmem:[%s19701_s0 + $0x2aa] sm:$0xff] }
 0x259   :  { %5473 = vst.msk [vmem:[#allocation2 + $0x198] sm:$0xff] %vm226_vm0, %v13422_v44  ;;  %5474 = vst.msk [vmem:[#allocation2 + $0x1a0] sm:$0xff] %vm226_vm0, %v13422_v44  ;;  %v3483_v56 = vpop.f32.mrf.mxu0  ;;  %v4411_v15 = vpack.c.bf16 %v11274_v14, %v11273_v8 }
 0x25a   :  { %5476 = vst.msk [vmem:[#allocation2 + $0x1b0] sm:$0xff] %vm226_vm0, %v13422_v44  ;;  %5477 = vst.msk [vmem:[#allocation2 + $0x1b8] sm:$0xff] %vm226_vm0, %v13422_v44  ;;  %v16117_v32 = vadd.f32 %v3483_v56, %v15392_v48 }
 0x25b   :  { %5479 = vst.msk [vmem:[#allocation2 + $0x1c8] sm:$0xff] %vm226_vm0, %v13422_v44  ;;  %5480 = vst.msk [vmem:[#allocation2 + $0x1d0] sm:$0xff] %vm226_vm0, %v13422_v44  ;;  %v12622_v1 = vpop.f32.mrf.mxu0 }
 0x25c   :  { %5482 = vst.msk [vmem:[#allocation2 + $0x1e0] sm:$0xff] %vm226_vm0, %v13422_v44  ;;  %5483 = vst.msk [vmem:[#allocation2 + $0x1e8] sm:$0xff] %vm226_vm0, %v13422_v44  ;;  %v16122_v39 = vadd.f32 %v12622_v1, %v15395_v16  ;;  %v11275_v16 = vld [vmem:[%s19701_s0 + $0x2ba] sm:$0xff] }
 0x25d   :  { %5485 = vst.msk [vmem:[#allocation2 + $0x1f8] sm:$0xff] %vm226_vm0, %v13422_v44  ;;  %5486 = vst.msk [vmem:[#allocation2 + $0x200] sm:$0xff] %vm226_vm0, %v13422_v44  ;;  %v3486_v57 = vpop.f32.mrf.mxu0 }
 0x25e   :  { %5488 = vst.msk [vmem:[#allocation2 + $0x210] sm:$0xff] %vm226_vm0, %v13422_v44  ;;  %5489 = vst.msk [vmem:[#allocation2 + $0x218] sm:$0xff] %vm226_vm0, %v13422_v44  ;;  %v16125_v43 = vadd.f32 %v3486_v57, %v15399_v47 }
 0x25f   :  { %5491 = vst.msk [vmem:[#allocation2 + $0x228] sm:$0xff] %vm226_vm0, %v13422_v44  ;;  %5492 = vst.msk [vmem:[#allocation2 + $0x230] sm:$0xff] %vm226_vm0, %v13422_v44  ;;  %v12625_v52 = vpop.f32.mrf.mxu0 }
 0x260   :  { %5494 = vst.msk [vmem:[#allocation2 + $0x240] sm:$0xff] %vm226_vm0, %v13422_v44  ;;  %5495 = vst.msk [vmem:[#allocation2 + $0x248] sm:$0xff] %vm226_vm0, %v13422_v44  ;;  %v16131_v48 = vadd.f32 %v12625_v52, %v15418_v19  ;;  %v11278_v19 = vld [vmem:[%s19701_s0 + $0x2da] sm:$0xff] }
 0x261   :  { %5497 = vst.msk [vmem:[#allocation2 + $0x258] sm:$0xff] %vm226_vm0, %v13422_v44  ;;  %5498 = vst.msk [vmem:[#allocation2 + $0x260] sm:$0xff] %vm226_vm0, %v13422_v44  ;;  %v3499_v47 = vpop.f32.mrf.mxu0 }
 0x262   :  { %5500 = vst.msk [vmem:[#allocation2 + $0x270] sm:$0xff] %vm226_vm0, %v13422_v44  ;;  %5501 = vst.msk [vmem:[#allocation2 + $0x278] sm:$0xff] %vm226_vm0, %v13422_v44  ;;  %v16147_v56 = vadd.f32 %v3499_v47, %v15427_v28 }
 0x263   :  { %5503 = vst.msk [vmem:[#allocation2 + $0x288] sm:$0xff] %vm226_vm0, %v13422_v44  ;;  %5504 = vst.msk [vmem:[#allocation2 + $0x290] sm:$0xff] %vm226_vm0, %v13422_v44  ;;  %v12626_v8 = vpop.f32.mrf.mxu0 }
 0x264   :  { %5506 = vst.msk [vmem:[#allocation2 + $0x2a0] sm:$0xff] %vm226_vm0, %v13422_v44  ;;  %5507 = vst.msk [vmem:[#allocation2 + $0x2a8] sm:$0xff] %vm226_vm0, %v13422_v44 }
 0x265   :  { %5509 = vst.msk [vmem:[#allocation2 + $0x2b8] sm:$0xff] %vm226_vm0, %v13422_v44  ;;  %5510 = vst.msk [vmem:[#allocation2 + $0x2c0] sm:$0xff] %vm226_vm0, %v13422_v44  ;;  %v3502_v57 = vpop.f32.mrf.mxu0 }
 0x266   :  { %5512 = vst.msk [vmem:[#allocation2 + $0x2d0] sm:$0xff] %vm226_vm0, %v13422_v44  ;;  %5513 = vst.msk [vmem:[#allocation2 + $0x2d8] sm:$0xff] %vm226_vm0, %v13422_v44  ;;  %v16155_v52 = vadd.f32 %v3502_v57, %v15434_v23 }
 0x267   :  { %5515 = vst.msk [vmem:[#allocation2 + $0x2e8] sm:$0xff] %vm226_vm0, %v13422_v44  ;;  %5516 = vst.msk [vmem:[#allocation2 + $0x2f0] sm:$0xff] %vm226_vm0, %v13422_v44 }
 0x268   :  { %5518 = vst.msk [vmem:[#allocation2 + $0x300] sm:$0xff] %vm226_vm0, %v13422_v44  ;;  %5519 = vst.msk [vmem:[#allocation2 + $0x308] sm:$0xff] %vm226_vm0, %v13422_v44 }
 0x269   :  { %5521 = vst.msk [vmem:[#allocation2 + $0x318] sm:$0xff] %vm226_vm0, %v13422_v44  ;;  %5522 = vst.msk [vmem:[#allocation2 + $0x320] sm:$0xff] %vm226_vm0, %v13422_v44 }
 0x26a   :  { %5524 = vst.msk [vmem:[#allocation2 + $0x330] sm:$0xff] %vm226_vm0, %v13422_v44  ;;  %5525 = vst.msk [vmem:[#allocation2 + $0x338] sm:$0xff] %vm226_vm0, %v13422_v44 }
 0x26b   :  { %5527 = vst.msk [vmem:[#allocation2 + $0x348] sm:$0xff] %vm226_vm0, %v13422_v44  ;;  %5528 = vst.msk [vmem:[#allocation2 + $0x350] sm:$0xff] %vm226_vm0, %v13422_v44 }
 0x26c   :  { %5430 = vst.msk [vmem:[#allocation2 + $0x40] sm:$0x3] %vm5423_vm1, %v13422_v44  ;;  %5424 = vst.msk [vmem:[#allocation2 + $0x10] sm:$0x3] %vm5423_vm1, %v13422_v44 }
 0x26d   :  { %5427 = vst.msk [vmem:[#allocation2 + $0x28] sm:$0x3] %vm5423_vm1, %v13422_v44  ;;  %5433 = vst.msk [vmem:[#allocation2 + $0x58] sm:$0x3] %vm5423_vm1, %v13422_v44 }
 0x26e   :  { %5436 = vst.msk [vmem:[#allocation2 + $0x70] sm:$0x3] %vm5423_vm1, %v13422_v44  ;;  %5439 = vst.msk [vmem:[#allocation2 + $0x88] sm:$0x3] %vm5423_vm1, %v13422_v44 }
 0x26f   :  { %5442 = vst.msk [vmem:[#allocation2 + $0xa0] sm:$0x3] %vm5423_vm1, %v13422_v44  ;;  %5445 = vst.msk [vmem:[#allocation2 + $0xb8] sm:$0x3] %vm5423_vm1, %v13422_v44 }
 0x270   :  { %5448 = vst.msk [vmem:[#allocation2 + $0xd0] sm:$0x3] %vm5423_vm1, %v13422_v44  ;;  %5451 = vst.msk [vmem:[#allocation2 + $0xe8] sm:$0x3] %vm5423_vm1, %v13422_v44 }
 0x271   :  { %5454 = vst.msk [vmem:[#allocation2 + $0x100] sm:$0x3] %vm5423_vm1, %v13422_v44  ;;  %5457 = vst.msk [vmem:[#allocation2 + $0x118] sm:$0x3] %vm5423_vm1, %v13422_v44 }
 0x272   :  { %5460 = vst.msk [vmem:[#allocation2 + $0x130] sm:$0x3] %vm5423_vm1, %v13422_v44  ;;  %5463 = vst.msk [vmem:[#allocation2 + $0x148] sm:$0x3] %vm5423_vm1, %v13422_v44 }
 0x273   :  { %5466 = vst.msk [vmem:[#allocation2 + $0x160] sm:$0x3] %vm5423_vm1, %v13422_v44  ;;  %5469 = vst.msk [vmem:[#allocation2 + $0x178] sm:$0x3] %vm5423_vm1, %v13422_v44 }
 0x274   :  { %5472 = vst.msk [vmem:[#allocation2 + $0x190] sm:$0x3] %vm5423_vm1, %v13422_v44  ;;  %5475 = vst.msk [vmem:[#allocation2 + $0x1a8] sm:$0x3] %vm5423_vm1, %v13422_v44 }
 0x275   :  { %5478 = vst.msk [vmem:[#allocation2 + $0x1c0] sm:$0x3] %vm5423_vm1, %v13422_v44  ;;  %5481 = vst.msk [vmem:[#allocation2 + $0x1d8] sm:$0x3] %vm5423_vm1, %v13422_v44 }
 0x276   :  { %5484 = vst.msk [vmem:[#allocation2 + $0x1f0] sm:$0x3] %vm5423_vm1, %v13422_v44  ;;  %5487 = vst.msk [vmem:[#allocation2 + $0x208] sm:$0x3] %vm5423_vm1, %v13422_v44 }
 0x277   :  { %5490 = vst.msk [vmem:[#allocation2 + $0x220] sm:$0x3] %vm5423_vm1, %v13422_v44  ;;  %5493 = vst.msk [vmem:[#allocation2 + $0x238] sm:$0x3] %vm5423_vm1, %v13422_v44 }
 0x278   :  { %5496 = vst.msk [vmem:[#allocation2 + $0x250] sm:$0x3] %vm5423_vm1, %v13422_v44  ;;  %5499 = vst.msk [vmem:[#allocation2 + $0x268] sm:$0x3] %vm5423_vm1, %v13422_v44 }
 0x279   :  { %5502 = vst.msk [vmem:[#allocation2 + $0x280] sm:$0x3] %vm5423_vm1, %v13422_v44  ;;  %5505 = vst.msk [vmem:[#allocation2 + $0x298] sm:$0x3] %vm5423_vm1, %v13422_v44 }
 0x27a   :  { %5508 = vst.msk [vmem:[#allocation2 + $0x2b0] sm:$0x3] %vm5423_vm1, %v13422_v44  ;;  %5511 = vst.msk [vmem:[#allocation2 + $0x2c8] sm:$0x3] %vm5423_vm1, %v13422_v44 }
 0x27b   :  { %5514 = vst.msk [vmem:[#allocation2 + $0x2e0] sm:$0x3] %vm5423_vm1, %v13422_v44  ;;  %5517 = vst.msk [vmem:[#allocation2 + $0x2f8] sm:$0x3] %vm5423_vm1, %v13422_v44 }
 0x27c   :  { %5520 = vst.msk [vmem:[#allocation2 + $0x310] sm:$0x3] %vm5423_vm1, %v13422_v44  ;;  %5523 = vst.msk [vmem:[#allocation2 + $0x328] sm:$0x3] %vm5423_vm1, %v13422_v44 }
 0x27d   :  { %5526 = vst.msk [vmem:[#allocation2 + $0x340] sm:$0x3] %vm5423_vm1, %v13422_v44  ;;  %5529 = vst.msk [vmem:[#allocation2 + $0x358] sm:$0x3] %vm5423_vm1, %v13422_v44  ;;  %v11272_v44 = vld [vmem:[%s19701_s0 + $0x292] sm:$0xff] }
 0x27e   :  { %19936 = vst [vmem:[#allocation17_spill] sm:$0xff] %v16101_v31  ;;  %v4410_v51 = vpack.c.bf16 %v11272_v44, %v11271_v26  ;;  %19937 = vst [vmem:[#allocation18_spill] sm:$0xff] %v16125_v43  ;;  %v16128_v31 = vpop.f32.mrf.mxu1  ;;  %v11276_v26 = vld [vmem:[%s19701_s0 + $0x2c2] sm:$0xff]  ;;  %v11277_v44 = vld [vmem:[%s19701_s0 + $0x2d2] sm:$0xff] }
 0x27f   :  { %19938 = vst [vmem:[#allocation16_spill] sm:$0xff] %v16131_v48  ;;  %v4412_v14 = vpack.c.bf16 %v11276_v26, %v11275_v16  ;;  %19939 = vst [vmem:[#allocation20_spill] sm:$0xff] %v16155_v52  ;;  %v12629_v48 = vpop.f32.mrf.mxu0  ;;  %v11280_v16 = vld [vmem:[%s19701_s0 + $0x2f2] sm:$0xff]  ;;  %v11281_v26 = vld [vmem:[%s19701_s0 + $0x302] sm:$0xff] }
 0x280   :  { %12788 = vmatmul.mubr.msk.bf16.gmra.mxu0 %vm226_vm0, %v4410_v51  ;;  %v16149_v1 = vpop.f32.mrf.mxu1  ;;  %v16152_v51 = vadd.f32 %v12626_v8, %v15430_v18  ;;  %v16161_v28 = vadd.f32 %v12629_v48, %v15453_v12  ;;  %v11279_v18 = vld [vmem:[%s19701_s0 + $0x2ea] sm:$0xff] }
 0x281   :  { %12791 = vmatprep.mubr.msk.bf16.mxu0 %vm226_vm0, %v4411_v15  ;;  %v4413_v15 = vpack.c.bf16 %v11278_v19, %v11277_v44  ;;  %v3515_v23 = vpop.f32.mrf.mxu0  ;;  %v11282_v12 = vld [vmem:[%s19701_s0 + $0x30a] sm:$0xff]  ;;  %v4414_v44 = vpack.c.bf16 %v11280_v16, %v11279_v18  ;;  %v11285_v16 = vld [vmem:[%s19701_s0 + $0x332] sm:$0xff] }
 0x282   :  { %v16158_v43 = vpop.f32.mrf.mxu1  ;;  %19940 = vst [vmem:[#allocation21_spill] sm:$0xff] %v16161_v28  ;;  %v16177_v48 = vadd.f32 %v3515_v23, %v15462_v35  ;;  %v11283_v35 = vld [vmem:[%s19701_s0 + $0x31a] sm:$0xff] }
 0x283   :  { %v12630_v47 = vpop.f32.mrf.mxu0 }
 0x284   :  { %19941 = vst [vmem:[#allocation22_spill] sm:$0xff] %v16177_v48  ;;  %v16179_v19 = vpop.f32.mrf.mxu1  ;;  %v16182_v8 = vadd.f32 %v12630_v47, %v15467_v50  ;;  %v11284_v50 = vld [vmem:[%s19701_s0 + $0x322] sm:$0xff] }
 0x286   :  { %19942 = vst [vmem:[#allocation19_spill] sm:$0xff] %v16182_v8  ;;  %v16187_v28 = vpop.f32.mrf.mxu1 }
 0x288   :  { %12792 = vmatmul.mubr.msk.bf16.gmra.mxu0 %vm226_vm0, %v4412_v14  ;;  %v4415_v14 = vpack.c.bf16 %v11282_v12, %v11281_v26  ;;  %v4416_v12 = vpack.c.bf16 %v11284_v50, %v11283_v35  ;;  %v16208_v47 = vpop.f32.mrf.mxu1  ;;  %v11288_v35 = vld [vmem:[%s19701_s0 + $0x352] sm:$0xff] }
 0x289   :  { %12795 = vmatprep.mubr.msk.bf16.mxu0 %vm226_vm0, %v4413_v15  ;;  %v16184_v15 = vpop.f32.mrf.mxu0 }
 0x28a   :  { %19943 = vst [vmem:[#allocation24_spill] sm:$0xff] %v16184_v15  ;;  %v16216_v15 = vpop.f32.mrf.mxu1 }
 0x28b   :  { %v12633_v57 = vpop.f32.mrf.mxu0 }
 0x28c   :  { %v16190_v52 = vadd.f32 %v12633_v57, %v15490_v7  ;;  %v11286_v7 = vld [vmem:[%s19701_s0 + $0x33a] sm:$0xff] }
 0x28d   :  { %v3531_v18 = vpop.f32.mrf.mxu0  ;;  %v4417_v57 = vpack.c.bf16 %v11286_v7, %v11285_v16 }
 0x28e   :  { %19944 = vst [vmem:[#allocation25_spill] sm:$0xff] %v16190_v52  ;;  %v16206_v23 = vadd.f32 %v3531_v18, %v15499_v55  ;;  %v11287_v55 = vld [vmem:[%s19701_s0 + $0x34a] sm:$0xff] }
 0x28f   :  { %v12634_v26 = vpop.f32.mrf.mxu0  ;;  %v4418_v7 = vpack.c.bf16 %v11288_v35, %v11287_v55 }
 0x290   :  { %12796 = vmatmul.mubr.msk.bf16.gmra.mxu0 %vm226_vm0, %v4414_v44  ;;  %v19945_v44 = vld [vmem:[#allocation34_spill] sm:$0xff] }
 0x291   :  { %12799 = vmatprep.mubr.msk.bf16.mxu0 %vm226_vm0, %v4415_v14  ;;  %v16211_v14 = vadd.f32 %v12634_v26, %v19945_v44  ;;  %v16213_v52 = vpop.f32.mrf.mxu0  ;;  %v16231_v26 = vpop.f32.mrf.mxu1 }
 0x293   :  { %v12637_v8 = vpop.f32.mrf.mxu0  ;;  %v16239_v44 = vpop.f32.mrf.mxu1 }
 0x294   :  { %v16219_v48 = vadd.f32 %v12637_v8, %v15533_v20 }
 0x295   :  { %v3547_v50 = vpop.f32.mrf.mxu0  ;;  %v16247_v35 = vpop.f32.mrf.mxu1 }
 0x296   :  { %19946 = vst [vmem:[#allocation26_spill] sm:$0xff] %v16219_v48  ;;  %v16229_v18 = vadd.f32 %v3547_v50, %v15536_v45 }
 0x297   :  { %v12638_v16 = vpop.f32.mrf.mxu0 }
 0x298   :  { %12800 = vmatmul.mubr.msk.bf16.gmra.mxu0 %vm226_vm0, %v4416_v12  ;;  %v16234_v20 = vadd.f32 %v12638_v16, %v15541_v60 }
 0x299   :  { %12803 = vmatprep.mubr.msk.bf16.mxu0 %vm226_vm0, %v4417_v57  ;;  %v16236_v8 = vpop.f32.mrf.mxu0 }
 0x29a   :  { %19947 = vst [vmem:[#allocation23_spill] sm:$0xff] %v16234_v20  ;;  %19948 = vst [vmem:[#allocation28_spill] sm:$0xff] %v16236_v8  ;;  %v16254_v20 = vpop.f32.mrf.mxu1 }
 0x29b   :  { %v12641_v12 = vpop.f32.mrf.mxu0 }
 0x29c   :  { %v16242_v57 = vadd.f32 %v12641_v12, %v15562_v13 }
 0x29d   :  { %v3563_v48 = vpop.f32.mrf.mxu0 }
 0x29e   :  { %19949 = vst [vmem:[#allocation29_spill] sm:$0xff] %v16242_v57  ;;  %v16245_v45 = vadd.f32 %v3563_v48, %v15565_v41  ;;  %v16262_v48 = vpop.f32.mrf.mxu1 }
 0x29f   :  { %v12642_v55 = vpop.f32.mrf.mxu0 }
 0x2a0   :  { %12804 = vmatmul.mubr.msk.bf16.gmra.mxu0 %vm226_vm0, %v4418_v7  ;;  %19950 = vst [vmem:[#allocation30_spill] sm:$0xff] %v16245_v45  ;;  %v16250_v60 = vadd.f32 %v12642_v55, %v15570_v38  ;;  %v13411_v55 = vld [vmem:[%s19702_s4 + $0x8] sm:$0xff]  }
 0x2a1   :  { %v16252_v50 = vpop.f32.mrf.mxu0  ;;  %12807 = vmatprep.subr.bf16.mxu1 %v13411_v55 }
 0x2a2   :  { %19951 = vst [vmem:[#allocation34_spill] sm:$0xff] %v16250_v60  ;;  %19952 = vst [vmem:[#allocation49_spill] sm:$0xff] %v16252_v50  ;;  %v16272_v50 = vpop.f32.mrf.mxu1  ;;  %12808 = vmatpush3.bf16.msra.mxu1 %v13411_v55 }
 0x2a3   :  { %v12645_v16 = vpop.f32.mrf.mxu0 }
 0x2a4   :  { %v16257_v7 = vadd.f32 %v12645_v16, %v15590_v53 }
 0x2a5   :  { %v3579_v13 = vpop.f32.mrf.mxu0 }
 0x2a6   :  { %19953 = vst [vmem:[#allocation50_spill] sm:$0xff] %v16257_v7  ;;  %v16260_v12 = vadd.f32 %v3579_v13, %v15593_v27  ;;  %v16280_v13 = vpop.f32.mrf.mxu1 }
 0x2a7   :  { %v12646_v41 = vpop.f32.mrf.mxu0 }
 0x2a8   :  { %19954 = vst [vmem:[#allocation51_spill] sm:$0xff] %v16260_v12  ;;  %v16265_v57 = vadd.f32 %v12646_v41, %v15598_v21 }
 0x2a9   :  { %v16267_v38 = vpop.f32.mrf.mxu0 }
 0x2aa   :  { %19955 = vst [vmem:[#allocation52_spill] sm:$0xff] %v16265_v57  ;;  %19956 = vst [vmem:[#allocation53_spill] sm:$0xff] %v16267_v38  ;;  %v16287_v38 = vpop.f32.mrf.mxu1 }
 0x2ab   :  { %v12649_v60 = vpop.f32.mrf.mxu0 }
 0x2ac   :  { %v16275_v53 = vadd.f32 %v12649_v60, %v15618_v62 }
 0x2ad   :  { %v3595_v27 = vpop.f32.mrf.mxu0 }
 0x2ae   :  { %19957 = vst [vmem:[#allocation54_spill] sm:$0xff] %v16275_v53  ;;  %v16278_v16 = vadd.f32 %v3595_v27, %v15621_v30  ;;  %v19962_v53 = vld [vmem:[#allocation40_spill] sm:$0xff]  ;;  %v16295_v27 = vpop.f32.mrf.mxu1 }
 0x2af   :  { %v12650_v21 = vpop.f32.mrf.mxu0 }
 0x2b0   :  { %19958 = vst [vmem:[#allocation55_spill] sm:$0xff] %v16278_v16  ;;  %v16283_v41 = vadd.f32 %v12650_v21, %v15626_v36  ;;  %v19964_v16 = vld [vmem:[#allocation45_spill] sm:$0xff] }
 0x2b1   :  { %v16285_v57 = vpop.f32.mrf.mxu0 }
 0x2b2   :  { %19959 = vst [vmem:[#allocation56_spill] sm:$0xff] %v16283_v41  ;;  %19960 = vst [vmem:[#allocation57_spill] sm:$0xff] %v16285_v57  ;;  %v16302_v41 = vpop.f32.mrf.mxu1  ;;  %v19967_v57 = vld [vmem:[#allocation48_spill] sm:$0xff] }
 0x2b3   :  { %v12653_v7 = vpop.f32.mrf.mxu0 }
 0x2b4   :  { %v16290_v62 = vadd.f32 %v12653_v7, %v15646_v37  ;;  %v19969_v7 = vld [vmem:[#allocation46_spill] sm:$0xff] }
 0x2b5   :  { %v3611_v60 = vpop.f32.mrf.mxu0 }
 0x2b6   :  { %19961 = vst [vmem:[#allocation58_spill] sm:$0xff] %v16290_v62  ;;  %v16293_v55 = vadd.f32 %v3611_v60, %v19962_v53  ;;  %v16310_v60 = vpop.f32.mrf.mxu1 }
 0x2b7   :  { %v12654_v30 = vpop.f32.mrf.mxu0  ;;  %19971 = vst [vmem:[#allocation60_spill] sm:$0xff] %v16310_v60 }
 0x2b8   :  { %19963 = vst [vmem:[#allocation40_spill] sm:$0xff] %v16293_v55  ;;  %v16298_v12 = vadd.f32 %v12654_v30, %v19964_v16  ;;  %v19972_v55 = vld [vmem:[#allocation6_spill] sm:$0xff] }
 0x2b9   :  { %v16300_v36 = vpop.f32.mrf.mxu0 }
 0x2ba   :  { %19965 = vst [vmem:[#allocation45_spill] sm:$0xff] %v16298_v12  ;;  %19966 = vst [vmem:[#allocation59_spill] sm:$0xff] %v16300_v36  ;;  %v16317_v12 = vpop.f32.mrf.mxu1 }
 0x2bb   :  { %v12657_v21 = vpop.f32.mrf.mxu0 }
 0x2bc   :  { %v16305_v45 = vadd.f32 %v12657_v21, %v19967_v57  ;;  %v19975_v21 = vld [vmem:[#allocation5_spill] sm:$0xff] }
 0x2bd   :  { %v3627_v37 = vpop.f32.mrf.mxu0 }
 0x2be   :  { %19968 = vst [vmem:[#allocation48_spill] sm:$0xff] %v16305_v45  ;;  %v16308_v62 = vadd.f32 %v3627_v37, %v19969_v7  ;;  %v16325_v7 = vpop.f32.mrf.mxu1 }
 0x2bf   :  { %v12658_v53 = vpop.f32.mrf.mxu0 }
 0x2c0   :  { %19970 = vst [vmem:[#allocation46_spill] sm:$0xff] %v16308_v62  ;;  %v16313_v8 = vadd.f32 %v12658_v53, %v19972_v55  ;;  %v19977_v62 = vld [vmem:[#allocation8_spill] sm:$0xff] }
 0x2c1   :  { %v16315_v16 = vpop.f32.mrf.mxu0 }
 0x2c2   :  { %19973 = vst [vmem:[#allocation6_spill] sm:$0xff] %v16313_v8  ;;  %19974 = vst [vmem:[#allocation61_spill] sm:$0xff] %v16315_v16  ;;  %v16332_v8 = vpop.f32.mrf.mxu1 }
 0x2c3   :  { %v12661_v30 = vpop.f32.mrf.mxu0 }
 0x2c4   :  { %v16320_v36 = vadd.f32 %v12661_v30, %v15702_v59 }
 0x2c5   :  { %v3643_v57 = vpop.f32.mrf.mxu0 }
 0x2c6   :  { %v16323_v45 = vadd.f32 %v3643_v57, %v19975_v21  ;;  %v16340_v21 = vpop.f32.mrf.mxu1 }
 0x2c7   :  { %v12662_v37 = vpop.f32.mrf.mxu0 }
 0x2c8   :  { %19976 = vst [vmem:[#allocation5_spill] sm:$0xff] %v16323_v45  ;;  %v16328_v60 = vadd.f32 %v12662_v37, %v19977_v62 }
 0x2c9   :  { %v16330_v55 = vpop.f32.mrf.mxu0 }
 0x2ca   :  { %19978 = vst [vmem:[#allocation8_spill] sm:$0xff] %v16328_v60  ;;  %19979 = vst [vmem:[#allocation62_spill] sm:$0xff] %v16330_v55  ;;  %v16347_v60 = vpop.f32.mrf.mxu1 }
 0x2cb   :  { %v12665_v53 = vpop.f32.mrf.mxu0 }
 0x2cc   :  { %v16335_v16 = vadd.f32 %v12665_v53, %v15730_v2 }
 0x2cd   :  { %v3659_v59 = vpop.f32.mrf.mxu0 }
 0x2ce   :  { %19980 = vst [vmem:[#allocation63_spill] sm:$0xff] %v16335_v16  ;;  %v16338_v30 = vadd.f32 %v3659_v59, %v15733_v0  ;;  %v16355_v59 = vpop.f32.mrf.mxu1 }
 0x2cf   :  { %v12666_v57 = vpop.f32.mrf.mxu0 }
 0x2d0   :  { %v16343_v45 = vadd.f32 %v12666_v57, %v15738_v46 }
 0x2d1   :  { %v16345_v62 = vpop.f32.mrf.mxu0 }
 0x2d2   :  { %19981 = vst [vmem:[#allocation64_spill] sm:$0xff] %v16343_v45  ;;  %19982 = vst [vmem:[#allocation65_spill] sm:$0xff] %v16345_v62  ;;  %v16362_v45 = vpop.f32.mrf.mxu1 }
 0x2d3   :  { %v12669_v37 = vpop.f32.mrf.mxu0 }
 0x2d4   :  { %v16350_v55 = vadd.f32 %v12669_v37, %v15758_v49 }
 0x2d5   :  { %v3675_v2 = vpop.f32.mrf.mxu0 }
 0x2d6   :  { %19983 = vst [vmem:[#allocation66_spill] sm:$0xff] %v16350_v55  ;;  %v16353_v53 = vadd.f32 %v3675_v2, %v15761_v10  ;;  %v16370_v2 = vpop.f32.mrf.mxu1 }
 0x2d7   :  { %v12670_v0 = vpop.f32.mrf.mxu0 }
 0x2d8   :  { %v16358_v16 = vadd.f32 %v12670_v0, %v15766_v63 }
 0x2d9   :  { %v16360_v46 = vpop.f32.mrf.mxu0 }
 0x2da   :  { %19984 = vst [vmem:[#allocation67_spill] sm:$0xff] %v16358_v16  ;;  %19985 = vst [vmem:[#allocation68_spill] sm:$0xff] %v16360_v46  ;;  %v4259_v16 = vadd.f32 %v15828_v61, %v15826_v6  ;;  %v16379_v46 = vpop.f32.mrf.mxu1 }
 0x2db   :  { %v12673_v57 = vpop.f32.mrf.mxu0 }
 0x2dc   :  { %v16365_v62 = vadd.f32 %v12673_v57, %v15786_v54  ;;  %v4261_v57 = vadd.f32 %v15802_v34, %v15800_v42  ;;  %v4263_v34 = vadd.f32 %v16098_v29, %v16087_v24 }
 0x2dd   :  { %v3691_v49 = vpop.f32.mrf.mxu0 }
 0x2de   :  { %19986 = vst [vmem:[#allocation69_spill] sm:$0xff] %v16365_v62  ;;  %v16368_v37 = vadd.f32 %v3691_v49, %v15789_v22  ;;  %v4262_v62 = vadd.f32 %v15835_v9, %v15833_v4 }
 0x2df   :  { %v12674_v10 = vpop.f32.mrf.mxu0 }
 0x2e0   :  { %19987 = vst [vmem:[#allocation70_spill] sm:$0xff] %v16368_v37  ;;  %v16373_v55 = vadd.f32 %v12674_v10, %v15794_v25  ;;  %v4260_v25 = vadd.f32 %v15996_v33, %v15987_v5  ;;  %v16389_v10 = vpop.f32.mrf.mxu1 }
 0x2e1   :  { %v16375_v63 = vpop.f32.mrf.mxu0 }
 0x2e2   :  { %19988 = vst [vmem:[#allocation71_spill] sm:$0xff] %v16373_v55  ;;  %19989 = vst [vmem:[#allocation72_spill] sm:$0xff] %v16375_v63  ;;  %v16401_v4 = vpop.f32.mrf.mxu1 }
 0x2e3   :  { %v12745_v0 = vpop.f32.mrf.mxu0 }
 0x2e4   :  { %v16391_v55 = vadd.f32 %v12745_v0, %v4261_v57  ;;  %v4265_v0 = vadd.f32 %v16089_v58, %v15994_v17  ;;  %v4264_v17 = vadd.f32 %v16128_v31, %v16095_v11 }
 0x2e5   :  { %v4557_v54 = vpop.f32.mrf.mxu0 }
 0x2e6   :  { %v16383_v22 = vadd.f32 %v4557_v54, %v4259_v16  ;;  %19991 = vst [vmem:[#allocation74_spill] sm:$0xff] %v16391_v55  ;;  %v5012_v9 = vmul.f32 %v16391_v55, %v16391_v55  ;;  %v4879_v29 = vsel %vm226_vm0, %v16391_v55, 0.0 }
 0x2e7   :  { %v12746_v49 = vpop.f32.mrf.mxu0 }
 0x2e8   :  { %19990 = vst [vmem:[#allocation73_spill] sm:$0xff] %v16383_v22  ;;  %v5010_v61 = vmul.f32 %v16383_v22, %v16383_v22  ;;  %v16395_v63 = vadd.f32 %v12746_v49, %v4262_v62  ;;  %v4876_v5 = vsel %vm226_vm0, %v16383_v22, 0.0 }
 0x2e9   :  { %v4560_v6 = vpop.f32.mrf.mxu0 }
 0x2ea   :  { %v16397_v42 = vadd.f32 %v4560_v6, %v4260_v25  ;;  %v5074_v57 = vsel %vm226_vm0, %v5010_v61, 0.0  ;;  %v5013_v49 = vmul.f32 %v16395_v63, %v16395_v63  ;;  %v5077_v61 = vsel %vm226_vm0, %v5012_v9, 0.0 }
 0x2eb   :  { %v12749_v16 = vpop.f32.mrf.mxu0  ;;  %v4267_v9 = vadd.f32 %v16158_v43, %v16117_v32 }
 0x2ec   :  { %19992 = vst [vmem:[#allocation75_spill] sm:$0xff] %v16397_v42  ;;  %v4877_v33 = vsel %vm226_vm0, %v16397_v42, 0.0  ;;  %v5011_v62 = vmul.f32 %v16397_v42, %v16397_v42  ;;  %v4266_v42 = vadd.f32 %v16119_v3, %v16092_v40  ;;  %v16430_v37 = vadd.f32 %v12749_v16, %v4265_v0 }
 0x2ed   :  { %v4878_v24 = vadd.f32 %v4877_v33, %v4876_v5  ;;  %v4573_v54 = vpop.f32.mrf.mxu0  ;;  %v16425_v5 = vpop.f32.mrf.mxu1  ;;  %v4881_v33 = vsel %vm226_vm0, %v16395_v63, 0.0  ;;  %v5079_v11 = vsel %vm226_vm0, %v5013_v49, 0.0 }
 0x2ee   :  { %v5075_v25 = vsel %vm226_vm0, %v5011_v62, 0.0  ;;  %v16419_v6 = vadd.f32 %v4573_v54, %v4263_v34 }
 0x2ef   :  { %v4880_v58 = vadd.f32 %v4879_v29, %v4878_v24  ;;  %v5076_v22 = vadd.f32 %v5075_v25, %v5074_v57  ;;  %v12750_v55 = vpop.f32.mrf.mxu0  ;;  %v16443_v57 = vpop.f32.mrf.mxu1 }
 0x2f0   :  { %v5014_v34 = vmul.f32 %v16419_v6, %v16419_v6  ;;  %v4883_v31 = vsel %vm226_vm0, %v16419_v6, 0.0  ;;  %v16437_v29 = vadd.f32 %v12750_v55, %v4266_v42  ;;  %v19993_v42 = vld [vmem:[#allocation17_spill] sm:$0xff] }
 0x2f1   :  { %v5078_v62 = vadd.f32 %v5077_v61, %v5076_v22  ;;  %v4882_v40 = vadd.f32 %v4881_v33, %v4880_v58  ;;  %v4576_v3 = vpop.f32.mrf.mxu0  ;;  %v5016_v22 = vmul.f32 %v16430_v37, %v16430_v37  ;;  %v4887_v61 = vsel %vm226_vm0, %v16430_v37, 0.0 }
 0x2f2   :  { %v16439_v24 = vadd.f32 %v4576_v3, %v4264_v17  ;;  %v5081_v49 = vsel %vm226_vm0, %v5014_v34, 0.0  ;;  %v4269_v17 = vadd.f32 %v16149_v1, %v19993_v42  ;;  %v5017_v33 = vmul.f32 %v16437_v29, %v16437_v29  ;;  %v19994_v3 = vld [vmem:[#allocation18_spill] sm:$0xff] }
 0x2f3   :  { %v4884_v16 = vadd.f32 %v4883_v31, %v4882_v40  ;;  %v5080_v0 = vadd.f32 %v5079_v11, %v5078_v62  ;;  %v12753_v54 = vpop.f32.mrf.mxu0  ;;  %v4270_v40 = vadd.f32 %v16179_v19, %v16122_v39  ;;  %v4268_v11 = vadd.f32 %v16187_v28, %v19994_v3 }
 0x2f4   :  { %v4885_v25 = vsel %vm226_vm0, %v16439_v24, 0.0  ;;  %v5015_v55 = vmul.f32 %v16439_v24, %v16439_v24  ;;  %v16470_v42 = vadd.f32 %v12753_v54, %v4269_v17  ;;  %v5087_v28 = vsel %vm226_vm0, %v5017_v33, 0.0 }
 0x2f5   :  { %v5082_v32 = vadd.f32 %v5081_v49, %v5080_v0  ;;  %v4886_v43 = vadd.f32 %v4885_v25, %v4884_v16  ;;  %v4589_v58 = vpop.f32.mrf.mxu0  ;;  %v16465_v0 = vpop.f32.mrf.mxu1  ;;  %v5085_v49 = vsel %vm226_vm0, %v5016_v22, 0.0  ;;  %v4889_v25 = vsel %vm226_vm0, %v16437_v29, 0.0 }
 0x2f6   :  { %v5083_v34 = vsel %vm226_vm0, %v5015_v55, 0.0  ;;  %v16459_v62 = vadd.f32 %v4589_v58, %v4267_v9  ;;  %19995 = vst [vmem:[#allocation17_spill] sm:$0xff] %v16470_v42  ;;  %v4271_v22 = vadd.f32 %v16216_v15, %v16147_v56  ;;  %v5020_v3 = vmul.f32 %v16470_v42, %v16470_v42 }
 0x2f7   :  { %v4888_v1 = vadd.f32 %v4887_v61, %v4886_v43  ;;  %v5084_v31 = vadd.f32 %v5083_v34, %v5082_v32  ;;  %v12754_v16 = vpop.f32.mrf.mxu0  ;;  %v16483_v34 = vpop.f32.mrf.mxu1 }
 0x2f8   :  { %v5018_v9 = vmul.f32 %v16459_v62, %v16459_v62  ;;  %v4891_v32 = vsel %vm226_vm0, %v16459_v62, 0.0  ;;  %v16477_v43 = vadd.f32 %v12754_v16, %v4270_v40 }
 0x2f9   :  { %v5086_v55 = vadd.f32 %v5085_v49, %v5084_v31  ;;  %v4890_v39 = vadd.f32 %v4889_v25, %v4888_v1  ;;  %v4592_v19 = vpop.f32.mrf.mxu0  ;;  %v4895_v49 = vsel %vm226_vm0, %v16470_v42, 0.0 }
 0x2fa   :  { %19996 = vst [vmem:[#allocation18_spill] sm:$0xff] %v16477_v43  ;;  %v16479_v58 = vadd.f32 %v4592_v19, %v4268_v11  ;;  %v5089_v33 = vsel %vm226_vm0, %v5018_v9, 0.0  ;;  %v19998_v11 = vld [vmem:[#allocation16_spill] sm:$0xff]  ;;  %v5021_v25 = vmul.f32 %v16477_v43, %v16477_v43 }
 0x2fb   :  { %v4892_v54 = vadd.f32 %v4891_v32, %v4890_v39  ;;  %v5088_v17 = vadd.f32 %v5087_v28, %v5086_v55  ;;  %v12757_v61 = vpop.f32.mrf.mxu0  ;;  %v4273_v31 = vadd.f32 %v16208_v47, %v19998_v11  ;;  %v4274_v39 = vadd.f32 %v16231_v26, %v16152_v51  ;;  %v19999_v19 = vld [vmem:[#allocation20_spill] sm:$0xff] }
 0x2fc   :  { %19997 = vst [vmem:[#allocation76_spill] sm:$0xff] %v16479_v58  ;;  %v4893_v1 = vsel %vm226_vm0, %v16479_v58, 0.0  ;;  %v5019_v40 = vmul.f32 %v16479_v58, %v16479_v58  ;;  %v4272_v28 = vadd.f32 %v16239_v44, %v19999_v19  ;;  %v20001_v51 = vld [vmem:[#allocation32_spill] sm:$0xff] }
 0x2fd   :  { %v5090_v56 = vadd.f32 %v5089_v33, %v5088_v17  ;;  %v4894_v15 = vadd.f32 %v4893_v1, %v4892_v54  ;;  %v4605_v16 = vpop.f32.mrf.mxu0  ;;  %v16505_v17 = vpop.f32.mrf.mxu1  ;;  %v5093_v33 = vsel %vm226_vm0, %v5020_v3, 0.0  ;;  %v4897_v1 = vsel %vm226_vm0, %v16477_v43, 0.0  ;;  %v20003_v19 = vld [vmem:[#allocation24_spill] sm:$0xff] }
 0x2fe   :  { %v5091_v9 = vsel %vm226_vm0, %v5019_v40, 0.0  ;;  %v16499_v55 = vadd.f32 %v4605_v16, %v4271_v22  ;;  %v16510_v11 = vadd.f32 %v12757_v61, %v4273_v31  ;;  %v20000_v40 = vld [vmem:[#allocation27_spill] sm:$0xff]  ;;  %v20002_v61 = vld [vmem:[#allocation22_spill] sm:$0xff] }
 0x2ff   :  { %v4896_v47 = vadd.f32 %v4895_v49, %v4894_v15  ;;  %v5092_v32 = vadd.f32 %v5091_v9, %v5090_v56  ;;  %v12758_v54 = vpop.f32.mrf.mxu0  ;;  %v3169_v26 = vadd.f32 %v20001_v51, %v20000_v40  ;;  %v5095_v56 = vsel %vm226_vm0, %v5021_v25, 0.0 }
 0x300   :  { %v5022_v22 = vmul.f32 %v16499_v55, %v16499_v55  ;;  %v4899_v49 = vsel %vm226_vm0, %v16499_v55, 0.0  ;;  %v16519_v3 = vadd.f32 %v12758_v54, %v4274_v39  ;;  %v4275_v31 = vadd.f32 %v16254_v20, %v20002_v61  ;;  %v20004_v54 = vld [vmem:[#allocation21_spill] sm:$0xff] }
 0x301   :  { %v5094_v16 = vadd.f32 %v5093_v33, %v5092_v32  ;;  %v4898_v44 = vadd.f32 %v4897_v1, %v4896_v47  ;;  %v4608_v15 = vpop.f32.mrf.mxu0  ;;  %v3723_v43 = vadd.f32 %v20003_v19, %v3169_v26  ;;  %v16526_v32 = vpop.f32.mrf.mxu1  ;;  %v5024_v25 = vmul.f32 %v16510_v11, %v16510_v11 }
 0x302   :  { %v16521_v9 = vadd.f32 %v4608_v15, %v4272_v28  ;;  %v5097_v47 = vsel %vm226_vm0, %v5022_v22, 0.0  ;;  %v4277_v20 = vadd.f32 %v16247_v35, %v20004_v54  ;;  %v4903_v26 = vsel %vm226_vm0, %v16510_v11, 0.0  ;;  %v20005_v15 = vld [vmem:[#allocation19_spill] sm:$0xff] }
 0x303   :  { %v4900_v42 = vadd.f32 %v4899_v49, %v4898_v44  ;;  %v5096_v58 = vadd.f32 %v5095_v56, %v5094_v16  ;;  %v12761_v40 = vpop.f32.mrf.mxu0  ;;  %v5025_v16 = vmul.f32 %v16519_v3, %v16519_v3  ;;  %v4278_v56 = vadd.f32 %v16262_v48, %v20005_v15  ;;  %v20007_v54 = vld [vmem:[#allocation31_spill] sm:$0xff] }
 0x304   :  { %v4901_v39 = vsel %vm226_vm0, %v16521_v9, 0.0  ;;  %v5023_v28 = vmul.f32 %v16521_v9, %v16521_v9  ;;  %v4276_v49 = vadd.f32 %v16272_v50, %v3723_v43  ;;  %v5101_v19 = vsel %vm226_vm0, %v5024_v25, 0.0 }
 0x305   :  { %v5098_v33 = vadd.f32 %v5097_v47, %v5096_v58  ;;  %v4902_v1 = vadd.f32 %v4901_v39, %v4900_v42  ;;  %v4621_v51 = vpop.f32.mrf.mxu0  ;;  %v16547_v42 = vpop.f32.mrf.mxu1  ;;  %v4905_v47 = vsel %vm226_vm0, %v16519_v3, 0.0  ;;  %v16552_v39 = vadd.f32 %v12761_v40, %v4277_v20 }
 0x306   :  { %v5099_v22 = vsel %vm226_vm0, %v5023_v28, 0.0  ;;  %v16542_v44 = vadd.f32 %v4621_v51, %v4275_v31  ;;  %v20006_v28 = vld [vmem:[#allocation33_spill] sm:$0xff]  ;;  %v4279_v40 = vadd.f32 %v16287_v38, %v16206_v23 }
 0x307   :  { %v4904_v61 = vadd.f32 %v4903_v26, %v4902_v1  ;;  %v5100_v35 = vadd.f32 %v5099_v22, %v5098_v33  ;;  %v12762_v58 = vpop.f32.mrf.mxu0  ;;  %v3173_v48 = vadd.f32 %v20007_v54, %v20006_v28  ;;  %v5103_v33 = vsel %vm226_vm0, %v5025_v16, 0.0 }
 0x308   :  { %v5026_v31 = vmul.f32 %v16542_v44, %v16542_v44  ;;  %v4907_v1 = vsel %vm226_vm0, %v16542_v44, 0.0  ;;  %v16561_v25 = vadd.f32 %v12762_v58, %v4278_v56  ;;  %v5028_v16 = vmul.f32 %v16552_v39, %v16552_v39  ;;  %v20008_v58 = vld [vmem:[#allocation25_spill] sm:$0xff] }
 0x309   :  { %v5102_v51 = vadd.f32 %v5101_v19, %v5100_v35  ;;  %v4906_v50 = vadd.f32 %v4905_v47, %v4904_v61  ;;  %v4624_v43 = vpop.f32.mrf.mxu0  ;;  %v3727_v20 = vadd.f32 %v16213_v52, %v3173_v48  ;;  %v16568_v35 = vpop.f32.mrf.mxu1  ;;  %v4281_v23 = vadd.f32 %v16280_v13, %v20008_v58 }
 0x30a   :  { %v16563_v26 = vadd.f32 %v4624_v43, %v4276_v49  ;;  %v5105_v61 = vsel %vm226_vm0, %v5026_v31, 0.0  ;;  %v4911_v47 = vsel %vm226_vm0, %v16552_v39, 0.0  ;;  %v5029_v54 = vmul.f32 %v16561_v25, %v16561_v25 }
 0x30b   :  { %v4908_v22 = vadd.f32 %v4907_v1, %v4906_v50  ;;  %v5104_v15 = vadd.f32 %v5103_v33, %v5102_v51  ;;  %v12765_v28 = vpop.f32.mrf.mxu0  ;;  %v4282_v51 = vadd.f32 %v16295_v27, %v16211_v14  ;;  %v4280_v50 = vadd.f32 %v16302_v41, %v3727_v20  ;;  %v16589_v1 = vpop.f32.mrf.mxu1 }
 0x30c   :  { %v4909_v56 = vsel %vm226_vm0, %v16563_v26, 0.0  ;;  %v5027_v49 = vmul.f32 %v16563_v26, %v16563_v26  ;;  %v5111_v58 = vsel %vm226_vm0, %v5029_v54, 0.0 }
 0x30d   :  { %v5106_v52 = vadd.f32 %v5105_v61, %v5104_v15  ;;  %v4910_v38 = vadd.f32 %v4909_v56, %v4908_v22  ;;  %v4637_v19 = vpop.f32.mrf.mxu0  ;;  %v5109_v22 = vsel %vm226_vm0, %v5028_v16, 0.0  ;;  %v4913_v15 = vsel %vm226_vm0, %v16561_v25, 0.0  ;;  %v20010_v56 = vld [vmem:[#allocation36_spill] sm:$0xff] }
 0x30e   :  { %v5107_v31 = vsel %vm226_vm0, %v5027_v49, 0.0  ;;  %v16584_v48 = vadd.f32 %v4637_v19, %v4279_v40  ;;  %v16594_v61 = vadd.f32 %v12765_v28, %v4281_v23  ;;  %v20011_v49 = vld [vmem:[#allocation37_spill] sm:$0xff]  ;;  %v4283_v28 = vadd.f32 %v16317_v12, %v16229_v18  ;;  %v20014_v23 = vld [vmem:[#allocation28_spill] sm:$0xff] }
 0x30f   :  { %v4912_v43 = vadd.f32 %v4911_v47, %v4910_v38  ;;  %v5108_v13 = vadd.f32 %v5107_v31, %v5106_v52  ;;  %v12766_v33 = vpop.f32.mrf.mxu0  ;;  %v3177_v14 = vadd.f32 %v20011_v49, %v20010_v56  ;;  %v20016_v18 = vld [vmem:[#allocation60_spill] sm:$0xff] }
 0x310   :  { %20009 = vst [vmem:[#allocation16_spill] sm:$0xff] %v16594_v61  ;;  %v5030_v40 = vmul.f32 %v16584_v48, %v16584_v48  ;;  %v4915_v52 = vsel %vm226_vm0, %v16584_v48, 0.0  ;;  %v16603_v16 = vadd.f32 %v12766_v33, %v4282_v51  ;;  %v5032_v54 = vmul.f32 %v16594_v61, %v16594_v61  ;;  %v20015_v33 = vld [vmem:[#allocation26_spill] sm:$0xff] }
 0x311   :  { %v5110_v27 = vadd.f32 %v5109_v22, %v5108_v13  ;;  %v4914_v41 = vadd.f32 %v4913_v15, %v4912_v43  ;;  %v4640_v20 = vpop.f32.mrf.mxu0  ;;  %v3731_v19 = vadd.f32 %v20014_v23, %v3177_v14  ;;  %v16610_v13 = vpop.f32.mrf.mxu1  ;;  %v4285_v12 = vadd.f32 %v20016_v18, %v20015_v33 }
 0x312   :  { %20012 = vst [vmem:[#allocation20_spill] sm:$0xff] %v16603_v16  ;;  %v16605_v38 = vadd.f32 %v4640_v20, %v4280_v50  ;;  %v5113_v43 = vsel %vm226_vm0, %v5030_v40, 0.0  ;;  %v4919_v14 = vsel %vm226_vm0, %v16594_v61, 0.0  ;;  %v20017_v20 = vld [vmem:[#allocation23_spill] sm:$0xff] }
 0x313   :  { %v4916_v47 = vadd.f32 %v4915_v52, %v4914_v41  ;;  %v5112_v31 = vadd.f32 %v5111_v58, %v5110_v27  ;;  %v12769_v56 = vpop.f32.mrf.mxu0  ;;  %v5033_v27 = vmul.f32 %v16603_v16, %v16603_v16  ;;  %v4286_v58 = vadd.f32 %v16325_v7, %v20017_v20 }
 0x314   :  { %20013 = vst [vmem:[#allocation27_spill] sm:$0xff] %v16605_v38  ;;  %v4917_v51 = vsel %vm226_vm0, %v16605_v38, 0.0  ;;  %v5031_v50 = vmul.f32 %v16605_v38, %v16605_v38  ;;  %v4284_v52 = vadd.f32 %v16332_v8, %v3731_v19  ;;  %v16636_v18 = vadd.f32 %v12769_v56, %v4285_v12  ;;  %v20020_v56 = vld [vmem:[#allocation30_spill] sm:$0xff] }
 0x315   :  { %v5114_v22 = vadd.f32 %v5113_v43, %v5112_v31  ;;  %v4918_v15 = vadd.f32 %v4917_v51, %v4916_v47  ;;  %v4653_v49 = vpop.f32.mrf.mxu0  ;;  %v16631_v47 = vpop.f32.mrf.mxu1  ;;  %v5117_v43 = vsel %vm226_vm0, %v5032_v54, 0.0  ;;  %v4921_v51 = vsel %vm226_vm0, %v16603_v16, 0.0 }
 0x316   :  { %v5115_v40 = vsel %vm226_vm0, %v5031_v50, 0.0  ;;  %v16626_v41 = vadd.f32 %v4653_v49, %v4283_v28  ;;  %v20018_v50 = vld [vmem:[#allocation38_spill] sm:$0xff]  ;;  %v20019_v49 = vld [vmem:[#allocation35_spill] sm:$0xff]  ;;  %v4287_v12 = vadd.f32 %v16347_v60, %v20020_v56 }
 0x317   :  { %v4920_v23 = vadd.f32 %v4919_v14, %v4918_v15  ;;  %v5116_v33 = vadd.f32 %v5115_v40, %v5114_v22  ;;  %v12770_v31 = vpop.f32.mrf.mxu0  ;;  %v3181_v7 = vadd.f32 %v20019_v49, %v20018_v50  ;;  %v5119_v22 = vsel %vm226_vm0, %v5033_v27, 0.0  ;;  %v20021_v40 = vld [vmem:[#allocation49_spill] sm:$0xff] }
 0x318   :  { %v5034_v28 = vmul.f32 %v16626_v41, %v16626_v41  ;;  %v4923_v15 = vsel %vm226_vm0, %v16626_v41, 0.0  ;;  %v16645_v54 = vadd.f32 %v12770_v31, %v4286_v58  ;;  %v5036_v27 = vmul.f32 %v16636_v18, %v16636_v18  ;;  %v20022_v31 = vld [vmem:[#allocation29_spill] sm:$0xff] }
 0x319   :  { %v5118_v20 = vadd.f32 %v5117_v43, %v5116_v33  ;;  %v4922_v8 = vadd.f32 %v4921_v51, %v4920_v23  ;;  %v4656_v19 = vpop.f32.mrf.mxu0  ;;  %v3735_v16 = vadd.f32 %v20021_v40, %v3181_v7  ;;  %v16652_v33 = vpop.f32.mrf.mxu1  ;;  %v4289_v60 = vadd.f32 %v16340_v21, %v20022_v31  ;;  %v20027_v31 = vld [vmem:[#allocation41_spill] sm:$0xff] }
 0x31a   :  { %v16647_v14 = vadd.f32 %v4656_v19, %v4284_v52  ;;  %v5121_v23 = vsel %vm226_vm0, %v5034_v28, 0.0  ;;  %v4927_v7 = vsel %vm226_vm0, %v16636_v18, 0.0  ;;  %v20024_v19 = vld [vmem:[#allocation34_spill] sm:$0xff]  ;;  %v5125_v40 = vsel %vm226_vm0, %v5036_v27, 0.0 }
 0x31b   :  { %v4924_v61 = vadd.f32 %v4923_v15, %v4922_v8  ;;  %v5120_v38 = vadd.f32 %v5119_v22, %v5118_v20  ;;  %v12773_v50 = vpop.f32.mrf.mxu0  ;;  %v5037_v20 = vmul.f32 %v16645_v54, %v16645_v54  ;;  %v4290_v22 = vadd.f32 %v16355_v59, %v20024_v19  ;;  %v20031_v19 = vld [vmem:[#allocation53_spill] sm:$0xff] }
 0x31c   :  { %v4925_v58 = vsel %vm226_vm0, %v16647_v14, 0.0  ;;  %v5035_v52 = vmul.f32 %v16647_v14, %v16647_v14  ;;  %v4288_v15 = vadd.f32 %v16362_v45, %v3735_v16 }
 0x31d   :  { %v5122_v43 = vadd.f32 %v5121_v23, %v5120_v38  ;;  %v4926_v51 = vadd.f32 %v4925_v58, %v4924_v61  ;;  %v4669_v49 = vpop.f32.mrf.mxu0  ;;  %v16673_v61 = vpop.f32.mrf.mxu1  ;;  %v4929_v23 = vsel %vm226_vm0, %v16645_v54, 0.0  ;;  %v16678_v58 = vadd.f32 %v12773_v50, %v4289_v60 }
 0x31e   :  { %v5123_v28 = vsel %vm226_vm0, %v5035_v52, 0.0  ;;  %v16668_v8 = vadd.f32 %v4669_v49, %v4287_v12  ;;  %v20026_v52 = vld [vmem:[#allocation39_spill] sm:$0xff]  ;;  %v5127_v27 = vsel %vm226_vm0, %v5037_v20, 0.0 }
 0x31f   :  { %v4928_v56 = vadd.f32 %v4927_v7, %v4926_v51  ;;  %v5124_v21 = vadd.f32 %v5123_v28, %v5122_v43  ;;  %v12774_v38 = vpop.f32.mrf.mxu0  ;;  %20025 = vst [vmem:[#allocation22_spill] sm:$0xff] %v16678_v58  ;;  %v3185_v59 = vadd.f32 %v20027_v31, %v20026_v52  ;;  %v13412_v43 = vld [vmem:[%s19702_s4] sm:$0xff]   ;;  %v16697_v52 = vpop.f32.mrf.mxu1  ;;  %v5040_v20 = vmul.f32 %v16678_v58, %v16678_v58 }
 0x320   :  { %20023 = vst [vmem:[#allocation32_spill] sm:$0xff] %v16668_v8  ;;  %v5038_v12 = vmul.f32 %v16668_v8, %v16668_v8  ;;  %v4931_v51 = vsel %vm226_vm0, %v16668_v8, 0.0  ;;  %v16690_v50 = vadd.f32 %v12774_v38, %v4290_v22  ;;  %v20030_v7 = vld [vmem:[#allocation51_spill] sm:$0xff]  ;;  %12873 = vmatprep.subr.bf16.mxu0 %v13412_v43 }
 0x321   :  { %v5126_v49 = vadd.f32 %v5125_v40, %v5124_v21  ;;  %v4930_v45 = vadd.f32 %v4929_v23, %v4928_v56  ;;  %v4672_v16 = vpop.f32.mrf.mxu0  ;;  %v4291_v28 = vadd.f32 %v16379_v46, %v20030_v7  ;;  %v3739_v21 = vadd.f32 %v20031_v19, %v3185_v59  ;;  %12874 = vmatpush3.bf16.msra.mxu0 %v13412_v43  ;;  %v20032_v46 = vld [vmem:[#allocation50_spill] sm:$0xff]  ;;  %v20033_v7 = vld [vmem:[#allocation52_spill] sm:$0xff] }
 0x322   :  { %20028 = vst [vmem:[#allocation24_spill] sm:$0xff] %v16690_v50  ;;  %v16692_v60 = vadd.f32 %v4672_v16, %v4288_v15  ;;  %v5129_v31 = vsel %vm226_vm0, %v5038_v12, 0.0  ;;  %v4293_v38 = vadd.f32 %v16370_v2, %v20032_v46  ;;  %v4935_v16 = vsel %vm226_vm0, %v16678_v58, 0.0 }
 0x323   :  { %v4932_v56 = vadd.f32 %v4931_v51, %v4930_v45  ;;  %v5128_v40 = vadd.f32 %v5127_v27, %v5126_v49  ;;  %v12777_v23 = vpop.f32.mrf.mxu0  ;;  %v5041_v27 = vmul.f32 %v16690_v50, %v16690_v50  ;;  %v4294_v19 = vadd.f32 %v16389_v10, %v20033_v7 }
 0x324   :  { %20029 = vst [vmem:[#allocation21_spill] sm:$0xff] %v16692_v60  ;;  %v4933_v22 = vsel %vm226_vm0, %v16692_v60, 0.0  ;;  %v5039_v15 = vmul.f32 %v16692_v60, %v16692_v60  ;;  %v4292_v43 = vadd.f32 %v16401_v4, %v3739_v21  ;;  %v16723_v46 = vadd.f32 %v12777_v23, %v4293_v38  ;;  %v20038_v23 = vld [vmem:[#allocation55_spill] sm:$0xff] }
 0x325   :  { %v5130_v59 = vadd.f32 %v5129_v31, %v5128_v40  ;;  %v4934_v49 = vadd.f32 %v4933_v22, %v4932_v56  ;;  %v4685_v45 = vpop.f32.mrf.mxu0  ;;  %v16718_v56 = vpop.f32.mrf.mxu1  ;;  %v5133_v31 = vsel %vm226_vm0, %v5040_v20, 0.0  ;;  %v4937_v22 = vsel %vm226_vm0, %v16690_v50, 0.0 }
 0x326   :  { %v5131_v12 = vsel %vm226_vm0, %v5039_v15, 0.0  ;;  %v16713_v51 = vadd.f32 %v4685_v45, %v4291_v28  ;;  %20034 = vst [vmem:[#allocation19_spill] sm:$0xff] %v16723_v46  ;;  %v20035_v15 = vld [vmem:[#allocation42_spill] sm:$0xff]  ;;  %v20036_v45 = vld [vmem:[#allocation43_spill] sm:$0xff]  ;;  %v4295_v38 = vadd.f32 %v16443_v57, %v20038_v23 }
 0x327   :  { %v4936_v60 = vadd.f32 %v4935_v16, %v4934_v49  ;;  %v5132_v2 = vadd.f32 %v5131_v12, %v5130_v59  ;;  %v12778_v40 = vpop.f32.mrf.mxu0  ;;  %v3189_v10 = vadd.f32 %v20036_v45, %v20035_v15  ;;  %v5135_v59 = vsel %vm226_vm0, %v5041_v27, 0.0  ;;  %v20039_v12 = vld [vmem:[#allocation57_spill] sm:$0xff] }
 0x328   :  { %v5042_v28 = vmul.f32 %v16713_v51, %v16713_v51  ;;  %v4939_v49 = vsel %vm226_vm0, %v16713_v51, 0.0  ;;  %v16732_v20 = vadd.f32 %v12778_v40, %v4294_v19  ;;  %v20040_v40 = vld [vmem:[#allocation54_spill] sm:$0xff] }
 0x329   :  { %v5134_v7 = vadd.f32 %v5133_v31, %v5132_v2  ;;  %v4938_v4 = vadd.f32 %v4937_v22, %v4936_v60  ;;  %v4688_v21 = vpop.f32.mrf.mxu0  ;;  %v3743_v50 = vadd.f32 %v20039_v12, %v3189_v10  ;;  %v16739_v2 = vpop.f32.mrf.mxu1  ;;  %v5044_v60 = vmul.f32 %v16723_v46, %v16723_v46 }
 0x32a   :  { %20037 = vst [vmem:[#allocation33_spill] sm:$0xff] %v16732_v20  ;;  %v16734_v16 = vadd.f32 %v4688_v21, %v4292_v43  ;;  %v5137_v27 = vsel %vm226_vm0, %v5042_v28, 0.0  ;;  %v4297_v57 = vadd.f32 %v16425_v5, %v20040_v40  ;;  %v4943_v10 = vsel %vm226_vm0, %v16723_v46, 0.0  ;;  %v20041_v21 = vld [vmem:[#allocation56_spill] sm:$0xff]  ;;  %v20044_v40 = vld [vmem:[#allocation47_spill] sm:$0xff] }
 0x32b   :  { %v4940_v58 = vadd.f32 %v4939_v49, %v4938_v4  ;;  %v5136_v8 = vadd.f32 %v5135_v59, %v5134_v7  ;;  %v12781_v15 = vpop.f32.mrf.mxu0  ;;  %v5045_v7 = vmul.f32 %v16732_v20, %v16732_v20  ;;  %v4298_v59 = vadd.f32 %v16465_v0, %v20041_v21 }
 0x32c   :  { %v4941_v19 = vsel %vm226_vm0, %v16734_v16, 0.0  ;;  %v5043_v43 = vmul.f32 %v16734_v16, %v16734_v16  ;;  %v4296_v49 = vadd.f32 %v16483_v34, %v3743_v50  ;;  %v5141_v12 = vsel %vm226_vm0, %v5044_v60, 0.0 }
 0x32d   :  { %v5138_v31 = vadd.f32 %v5137_v27, %v5136_v8  ;;  %v4942_v22 = vadd.f32 %v4941_v19, %v4940_v58  ;;  %v4701_v45 = vpop.f32.mrf.mxu0  ;;  %v16760_v58 = vpop.f32.mrf.mxu1  ;;  %v4945_v27 = vsel %vm226_vm0, %v16732_v20, 0.0  ;;  %v16765_v19 = vadd.f32 %v12781_v15, %v4297_v57  ;;  %v20046_v15 = vld [vmem:[#allocation40_spill] sm:$0xff] }
 0x32e   :  { %v5139_v28 = vsel %vm226_vm0, %v5043_v43, 0.0  ;;  %v16755_v4 = vadd.f32 %v4701_v45, %v4295_v38  ;;  %v20043_v43 = vld [vmem:[#allocation44_spill] sm:$0xff]  ;;  %v4299_v57 = vadd.f32 %v16526_v32, %v20046_v15 }
 0x32f   :  { %v4944_v23 = vadd.f32 %v4943_v10, %v4942_v22  ;;  %v5140_v5 = vadd.f32 %v5139_v28, %v5138_v31  ;;  %v12782_v8 = vpop.f32.mrf.mxu0  ;;  %20042 = vst [vmem:[#allocation31_spill] sm:$0xff] %v16765_v19  ;;  %v3193_v0 = vadd.f32 %v20044_v40, %v20043_v43  ;;  %v5143_v31 = vsel %vm226_vm0, %v5045_v7, 0.0  ;;  %v20047_v28 = vld [vmem:[#allocation59_spill] sm:$0xff] }
 0x330   :  { %v5046_v38 = vmul.f32 %v16755_v4, %v16755_v4  ;;  %v4947_v22 = vsel %vm226_vm0, %v16755_v4, 0.0  ;;  %v16774_v60 = vadd.f32 %v12782_v8, %v4298_v59  ;;  %v5048_v7 = vmul.f32 %v16765_v19, %v16765_v19  ;;  %v20048_v8 = vld [vmem:[#allocation58_spill] sm:$0xff] }
 0x331   :  { %v5142_v45 = vadd.f32 %v5141_v12, %v5140_v5  ;;  %v4946_v34 = vadd.f32 %v4945_v27, %v4944_v23  ;;  %v4704_v50 = vpop.f32.mrf.mxu0  ;;  %v3747_v21 = vadd.f32 %v20047_v28, %v3193_v0  ;;  %v16781_v5 = vpop.f32.mrf.mxu1  ;;  %v4301_v32 = vadd.f32 %v16505_v17, %v20048_v8  ;;  %v20051_v8 = vld [vmem:[#allocation7_spill] sm:$0xff] }
 0x332   :  { %20045 = vst [vmem:[#allocation25_spill] sm:$0xff] %v16774_v60  ;;  %v16776_v10 = vadd.f32 %v4704_v50, %v4296_v49  ;;  %v5145_v23 = vsel %vm226_vm0, %v5046_v38, 0.0  ;;  %v4951_v0 = vsel %vm226_vm0, %v16765_v19, 0.0  ;;  %v20049_v50 = vld [vmem:[#allocation45_spill] sm:$0xff]  ;;  %v5149_v28 = vsel %vm226_vm0, %v5048_v7, 0.0 }
 0x333   :  { %v4948_v20 = vadd.f32 %v4947_v22, %v4946_v34  ;;  %v5144_v46 = vadd.f32 %v5143_v31, %v5142_v45  ;;  %v12785_v43 = vpop.f32.mrf.mxu0  ;;  %v5049_v45 = vmul.f32 %v16774_v60, %v16774_v60  ;;  %v4302_v31 = vadd.f32 %v16547_v42, %v20049_v50 }
 0x334   :  { %v4949_v59 = vsel %vm226_vm0, %v16776_v10, 0.0  ;;  %v5047_v49 = vmul.f32 %v16776_v10, %v16776_v10  ;;  %v4300_v22 = vadd.f32 %v16568_v35, %v3747_v21 }
 0x335   :  { %v5146_v12 = vadd.f32 %v5145_v23, %v5144_v46  ;;  %v4950_v27 = vadd.f32 %v4949_v59, %v4948_v20  ;;  %v4717_v40 = vpop.f32.mrf.mxu0  ;;  %v16802_v20 = vpop.f32.mrf.mxu1  ;;  %v4953_v23 = vsel %vm226_vm0, %v16774_v60, 0.0  ;;  %v16807_v59 = vadd.f32 %v12785_v43, %v4301_v32  ;;  %v20053_v43 = vld [vmem:[#allocation46_spill] sm:$0xff] }
 0x336   :  { %v5147_v38 = vsel %vm226_vm0, %v5047_v49, 0.0  ;;  %v16797_v34 = vadd.f32 %v4717_v40, %v4299_v57  ;;  %v20050_v49 = vld [vmem:[#allocation3_spill] sm:$0xff]  ;;  %v4303_v32 = vadd.f32 %v16610_v13, %v20053_v43  ;;  %v20059_v43 = vld [vmem:[#allocation6_spill] sm:$0xff] }
 0x337   :  { %v4952_v15 = vadd.f32 %v4951_v0, %v4950_v27  ;;  %v5148_v17 = vadd.f32 %v5147_v38, %v5146_v12  ;;  %v12786_v46 = vpop.f32.mrf.mxu0  ;;  %v3197_v42 = vadd.f32 %v20051_v8, %v20050_v49  ;;  %v5151_v12 = vsel %vm226_vm0, %v5049_v45, 0.0  ;;  %v20054_v38 = vld [vmem:[#allocation61_spill] sm:$0xff]  ;;  %v20056_v13 = vld [vmem:[#allocation11_spill] sm:$0xff] }
 0x338   :  { %v5050_v57 = vmul.f32 %v16797_v34, %v16797_v34  ;;  %v4955_v27 = vsel %vm226_vm0, %v16797_v34, 0.0  ;;  %v16816_v7 = vadd.f32 %v12786_v46, %v4302_v31  ;;  %v5052_v45 = vmul.f32 %v16807_v59, %v16807_v59  ;;  %v20055_v46 = vld [vmem:[#allocation4_spill] sm:$0xff] }
 0x339   :  { %v5150_v40 = vadd.f32 %v5149_v28, %v5148_v17  ;;  %v4954_v35 = vadd.f32 %v4953_v23, %v4952_v15  ;;  %v4720_v21 = vpop.f32.mrf.mxu0  ;;  %v3751_v50 = vadd.f32 %v20054_v38, %v3197_v42  ;;  %v16823_v17 = vpop.f32.mrf.mxu1  ;;  %v3201_v28 = vadd.f32 %v20056_v13, %v20055_v46  ;;  %v20057_v23 = vld [vmem:[#allocation48_spill] sm:$0xff] }
 0x33a   :  { %20052 = vst [vmem:[#allocation36_spill] sm:$0xff] %v16816_v7  ;;  %v16818_v0 = vadd.f32 %v4720_v21, %v4300_v22  ;;  %v5153_v15 = vsel %vm226_vm0, %v5050_v57, 0.0  ;;  %v4305_v8 = vadd.f32 %v16589_v1, %v20057_v23  ;;  %v4959_v21 = vsel %vm226_vm0, %v16807_v59, 0.0 }
 0x33b   :  { %v4956_v60 = vadd.f32 %v4955_v27, %v4954_v35  ;;  %v5152_v19 = vadd.f32 %v5151_v12, %v5150_v40  ;;  %v5053_v57 = vmul.f32 %v16816_v7, %v16816_v7  ;;  %v4306_v38 = vadd.f32 %v16631_v47, %v20059_v43  ;;  %v20063_v43 = vld [vmem:[#allocation8_spill] sm:$0xff] }
 0x33c   :  { %v4957_v31 = vsel %vm226_vm0, %v16818_v0, 0.0  ;;  %v5051_v22 = vmul.f32 %v16818_v0, %v16818_v0  ;;  %v4304_v46 = vadd.f32 %v16652_v33, %v3751_v50  ;;  %v4309_v47 = vadd.f32 %v16673_v61, %v16320_v36 }
 0x33d   :  { %v5154_v42 = vadd.f32 %v5153_v15, %v5152_v19  ;;  %v4958_v40 = vadd.f32 %v4957_v31, %v4956_v60  ;;  %v16846_v60 = vpop.f32.mrf.mxu1  ;;  %v5157_v15 = vsel %vm226_vm0, %v5052_v45, 0.0  ;;  %v4961_v31 = vsel %vm226_vm0, %v16816_v7, 0.0 }
 0x33e   :  { %v5155_v12 = vsel %vm226_vm0, %v5051_v22, 0.0  ;;  %v20060_v22 = vld [vmem:[#allocation5_spill] sm:$0xff]  ;;  %v4310_v36 = vadd.f32 %v16718_v56, %v20063_v43  ;;  %v5596_v56 = vld [vmem:[#allocation2 + $0x8] sm:$0xff] }
 0x33f   :  { %v4960_v13 = vadd.f32 %v4959_v21, %v4958_v40  ;;  %v5156_v1 = vadd.f32 %v5155_v12, %v5154_v42  ;;  %v4307_v33 = vadd.f32 %v16697_v52, %v20060_v22 }
 0x340   :  { %v12789_v49 = vpop.f32.mrf.mxu0 }
 0x341   :  { %v16851_v23 = vadd.f32 %v12789_v49, %v4305_v8  ;;  %v5158_v50 = vadd.f32 %v5157_v15, %v5156_v1  ;;  %v4962_v42 = vadd.f32 %v4961_v31, %v4960_v13  ;;  %v20062_v8 = vld [vmem:[#allocation62_spill] sm:$0xff]  ;;  %v5693_v1 = vld [vmem:[#allocation2 + $0x1] sm:$0xff]  ;;  %v5694_v13 = vld [vmem:[#allocation2 + $0x9] sm:$0xff]  ;;  %v16869_v31 = vpop.f32.mrf.mxu1 }
 0x342   :  { %v4733_v35 = vpop.f32.mrf.mxu0  ;;  %v3755_v12 = vadd.f32 %v20062_v8, %v3201_v28  ;;  %v5595_v15 = vld [vmem:[#allocation2] sm:$0xff] }
 0x343   :  { %v16841_v27 = vadd.f32 %v4733_v35, %v4303_v32  ;;  %v5159_v35 = vsel %vm226_vm0, %v5053_v57, 0.0  ;;  %v5056_v57 = vmul.f32 %v16851_v23, %v16851_v23 }
 0x344   :  { %v12790_v19 = vpop.f32.mrf.mxu0  ;;  %v5160_v7 = vadd.f32 %v5159_v35, %v5158_v50  ;;  %v5659_v35 = vpack.c.bf16 %v5596_v56, %v5595_v15 }
 0x345   :  { %20058 = vst [vmem:[#allocation37_spill] sm:$0xff] %v16841_v27  ;;  %v5054_v32 = vmul.f32 %v16841_v27, %v16841_v27  ;;  %v4963_v45 = vsel %vm226_vm0, %v16841_v27, 0.0  ;;  %v16862_v21 = vadd.f32 %v12790_v19, %v4306_v38  ;;  %v16881_v19 = vld [vmem:[%s19702_s4 + $0x10] sm:$0xff]  }
 0x346   :  { %v4736_v40 = vpop.f32.mrf.mxu0  ;;  %v4964_v61 = vadd.f32 %v4963_v45, %v4962_v42  ;;  %20064 = vst [vmem:[#allocation26_spill] sm:$0xff] %v16881_v19  ;;  %12939 = vmatprep.subr.bf16.mxu1 %v16881_v19  ;;  %12875 = vmatprep.mubr.msk.bf16.mxu0 %vm226_vm0, %v5659_v35 }
 0x347   :  { %v16864_v49 = vadd.f32 %v4736_v40, %v4304_v46  ;;  %v5161_v38 = vsel %vm226_vm0, %v5054_v32, 0.0  ;;  %v5757_v40 = vpack.c.bf16 %v5694_v13, %v5693_v1  ;;  %v4967_v32 = vsel %vm226_vm0, %v16851_v23, 0.0  ;;  %v16894_v1 = vpop.f32.mrf.mxu1 }
 0x348   :  { %v12793_v52 = vpop.f32.mrf.mxu0  ;;  %v5162_v22 = vadd.f32 %v5161_v38, %v5160_v7  ;;  %v5057_v45 = vmul.f32 %v16862_v21, %v16862_v21  ;;  %v5165_v13 = vsel %vm226_vm0, %v5056_v57, 0.0  ;;  %v4969_v15 = vsel %vm226_vm0, %v16862_v21, 0.0 }
 0x349   :  { %20061 = vst [vmem:[#allocation28_spill] sm:$0xff] %v16864_v49  ;;  %v4965_v46 = vsel %vm226_vm0, %v16864_v49, 0.0  ;;  %v5055_v28 = vmul.f32 %v16864_v49, %v16864_v49  ;;  %v4308_v49 = vadd.f32 %v16739_v2, %v3755_v12  ;;  %12809 = vmatprep.mubr.msk.bf16.mxu1 %vm226_vm0, %v5757_v40  ;;  %v20065_v2 = vld [vmem:[#allocation9_spill] sm:$0xff]  ;;  %v20066_v12 = vld [vmem:[#allocation12_spill] sm:$0xff] }
 0x34a   :  { %v4966_v50 = vadd.f32 %v4965_v46, %v4964_v61  ;;  %v4749_v42 = vpop.f32.mrf.mxu0  ;;  %v3205_v46 = vadd.f32 %v20066_v12, %v20065_v2 }
 0x34b   :  { %v5163_v8 = vsel %vm226_vm0, %v5055_v28, 0.0  ;;  %v16888_v43 = vadd.f32 %v4749_v42, %v4307_v33  ;;  %v16899_v33 = vadd.f32 %v12793_v52, %v4309_v47  ;;  %v4311_v47 = vadd.f32 %v16781_v5, %v16338_v30  ;;  %v20067_v52 = vld [vmem:[#allocation65_spill] sm:$0xff] }
 0x34c   :  { %v4968_v27 = vadd.f32 %v4967_v32, %v4966_v50  ;;  %v5164_v7 = vadd.f32 %v5163_v8, %v5162_v22  ;;  %v12794_v61 = vpop.f32.mrf.mxu0  ;;  %v5167_v50 = vsel %vm226_vm0, %v5057_v45, 0.0  ;;  %v3759_v35 = vadd.f32 %v20067_v52, %v3205_v46 }
 0x34d   :  { %v5058_v38 = vmul.f32 %v16888_v43, %v16888_v43  ;;  %v4971_v42 = vsel %vm226_vm0, %v16888_v43, 0.0  ;;  %v16908_v57 = vadd.f32 %v12794_v61, %v4310_v36  ;;  %v20068_v61 = vld [vmem:[#allocation63_spill] sm:$0xff]  ;;  %v4975_v12 = vsel %vm226_vm0, %v16899_v33, 0.0 }
 0x34e   :  { %v5166_v28 = vadd.f32 %v5165_v13, %v5164_v7  ;;  %v4970_v56 = vadd.f32 %v4969_v15, %v4968_v27  ;;  %v4752_v22 = vpop.f32.mrf.mxu0  ;;  %v4231_v7 = vpop.f32.mrf.mxu1  ;;  %v5060_v27 = vmul.f32 %v16899_v33, %v16899_v33  ;;  %v4313_v30 = vadd.f32 %v16760_v58, %v20068_v61  ;;  %v20072_v61 = vld [vmem:[#allocation10_spill] sm:$0xff] }
 0x34f   :  { %v16910_v40 = vadd.f32 %v4752_v22, %v4308_v49  ;;  %v5169_v45 = vsel %vm226_vm0, %v5058_v38, 0.0  ;;  %v5061_v46 = vmul.f32 %v16908_v57, %v16908_v57 }
 0x350   :  { %v4972_v32 = vadd.f32 %v4971_v42, %v4970_v56  ;;  %v5168_v8 = vadd.f32 %v5167_v50, %v5166_v28  ;;  %v12797_v2 = vpop.f32.mrf.mxu0  ;;  %v20069_v56 = vld [vmem:[#allocation64_spill] sm:$0xff]  ;;  %v4312_v50 = vadd.f32 %v16823_v17, %v3759_v35 }
 0x351   :  { %v4973_v36 = vsel %vm226_vm0, %v16910_v40, 0.0  ;;  %v5059_v49 = vmul.f32 %v16910_v40, %v16910_v40  ;;  %v4314_v22 = vadd.f32 %v16802_v20, %v20069_v56  ;;  %v5175_v35 = vsel %vm226_vm0, %v5061_v46, 0.0 }
 0x352   :  { %v5170_v5 = vadd.f32 %v5169_v45, %v5168_v8  ;;  %v4974_v13 = vadd.f32 %v4973_v36, %v4972_v32  ;;  %v4765_v15 = vpop.f32.mrf.mxu0  ;;  %v12739_v32 = vpop.f32.mrf.mxu1  ;;  %v5173_v8 = vsel %vm226_vm0, %v5060_v27, 0.0  ;;  %v4977_v45 = vsel %vm226_vm0, %v16908_v57, 0.0 }
 0x353   :  { %v5171_v38 = vsel %vm226_vm0, %v5059_v49, 0.0  ;;  %v16929_v28 = vadd.f32 %v4765_v15, %v4311_v47  ;;  %v16937_v36 = vadd.f32 %v12797_v2, %v4313_v30  ;;  %v20071_v49 = vld [vmem:[#allocation13_spill] sm:$0xff]  ;;  %v4315_v2 = vadd.f32 %v16869_v31, %v16353_v53  ;;  %v20075_v30 = vld [vmem:[#allocation68_spill] sm:$0xff] }
 0x354   :  { %v4976_v42 = vadd.f32 %v4975_v12, %v4974_v13  ;;  %v5172_v58 = vadd.f32 %v5171_v38, %v5170_v5  ;;  %v12798_v52 = vpop.f32.mrf.mxu0  ;;  %v3209_v15 = vadd.f32 %v20072_v61, %v20071_v49 }
 0x355   :  { %20070 = vst [vmem:[#allocation60_spill] sm:$0xff] %v16937_v36  ;;  %v5062_v47 = vmul.f32 %v16929_v28, %v16929_v28  ;;  %v4979_v5 = vsel %vm226_vm0, %v16929_v28, 0.0  ;;  %v16946_v27 = vadd.f32 %v12798_v52, %v4314_v22  ;;  %v20076_v52 = vld [vmem:[#allocation66_spill] sm:$0xff]  ;;  %v4983_v61 = vsel %vm226_vm0, %v16937_v36, 0.0 }
 0x356   :  { %v5174_v20 = vadd.f32 %v5173_v8, %v5172_v58  ;;  %v4978_v56 = vadd.f32 %v4977_v45, %v4976_v42  ;;  %v4768_v17 = vpop.f32.mrf.mxu0  ;;  %v3763_v12 = vadd.f32 %v20075_v30, %v3209_v15  ;;  %v4244_v58 = vpop.f32.mrf.mxu1  ;;  %v5064_v42 = vmul.f32 %v16937_v36, %v16937_v36 }
 0x357   :  { %20073 = vst [vmem:[#allocation23_spill] sm:$0xff] %v16946_v27  ;;  %v16948_v13 = vadd.f32 %v4768_v17, %v4312_v50  ;;  %v5177_v46 = vsel %vm226_vm0, %v5062_v47, 0.0  ;;  %v4317_v53 = vadd.f32 %v16846_v60, %v20076_v52  ;;  %v5065_v15 = vmul.f32 %v16946_v27, %v16946_v27  ;;  %v20079_v52 = vld [vmem:[#allocation15_spill] sm:$0xff] }
 0x358   :  { %v4980_v38 = vadd.f32 %v4979_v5, %v4978_v56  ;;  %v5176_v19 = vadd.f32 %v5175_v35, %v5174_v20  ;;  %v12801_v49 = vpop.f32.mrf.mxu0  ;;  %v20077_v56 = vld [vmem:[#allocation67_spill] sm:$0xff]  ;;  %v4316_v35 = vadd.f32 %v4231_v7, %v3763_v12 }
 0x359   :  { %20074 = vst [vmem:[#allocation38_spill] sm:$0xff] %v16948_v13  ;;  %v4981_v22 = vsel %vm226_vm0, %v16948_v13, 0.0  ;;  %v5063_v50 = vmul.f32 %v16948_v13, %v16948_v13  ;;  %v4318_v17 = vadd.f32 %v16894_v1, %v20077_v56  ;;  %v5183_v12 = vsel %vm226_vm0, %v5065_v15, 0.0 }
 0x35a   :  { %v5178_v31 = vadd.f32 %v5177_v46, %v5176_v19  ;;  %v4982_v8 = vadd.f32 %v4981_v22, %v4980_v38  ;;  %v4781_v45 = vpop.f32.mrf.mxu0  ;;  %v12740_v19 = vpop.f32.mrf.mxu1  ;;  %v5181_v38 = vsel %vm226_vm0, %v5064_v42, 0.0  ;;  %v4985_v46 = vsel %vm226_vm0, %v16946_v27, 0.0 }
 0x35b   :  { %v5179_v47 = vsel %vm226_vm0, %v5063_v50, 0.0  ;;  %v16967_v20 = vadd.f32 %v4781_v45, %v4315_v2  ;;  %v16974_v22 = vadd.f32 %v12801_v49, %v4317_v53  ;;  %v20078_v2 = vld [vmem:[#allocation14_spill] sm:$0xff] }
 0x35c   :  { %v4984_v5 = vadd.f32 %v4983_v61, %v4982_v8  ;;  %v5180_v30 = vadd.f32 %v5179_v47, %v5178_v31  ;;  %v12802_v60 = vpop.f32.mrf.mxu0  ;;  %v3213_v45 = vadd.f32 %v20079_v52, %v20078_v2  ;;  %v20080_v49 = vld [vmem:[#allocation70_spill] sm:$0xff]  ;;  %v20081_v61 = vld [vmem:[#allocation72_spill] sm:$0xff]  ;;  %v4247_v2 = vpop.f32.mrf.mxu1 }
 0x35d   :  { %v5066_v50 = vmul.f32 %v16967_v20, %v16967_v20  ;;  %v4987_v31 = vsel %vm226_vm0, %v16967_v20, 0.0  ;;  %v16983_v42 = vadd.f32 %v12802_v60, %v4318_v17  ;;  %v4319_v53 = vadd.f32 %v4244_v58, %v20080_v49 }
 0x35e   :  { %v5182_v36 = vadd.f32 %v5181_v38, %v5180_v30  ;;  %v4986_v1 = vadd.f32 %v4985_v46, %v4984_v5  ;;  %v4784_v7 = vpop.f32.mrf.mxu0  ;;  %v3767_v47 = vadd.f32 %v20081_v61, %v3213_v45  ;;  %v5068_v5 = vmul.f32 %v16974_v22, %v16974_v22 }
 0x35f   :  { %v16985_v8 = vadd.f32 %v4784_v7, %v4316_v35  ;;  %v5185_v15 = vsel %vm226_vm0, %v5066_v50, 0.0  ;;  %v20082_v35 = vld [vmem:[#allocation69_spill] sm:$0xff]  ;;  %v5069_v52 = vmul.f32 %v16983_v42, %v16983_v42 }
 0x360   :  { %v4988_v56 = vadd.f32 %v4987_v31, %v4986_v1  ;;  %v5184_v27 = vadd.f32 %v5183_v12, %v5182_v36  ;;  %v12805_v13 = vpop.f32.mrf.mxu0  ;;  %v4321_v60 = vadd.f32 %v12739_v32, %v20082_v35  ;;  %v4991_v36 = vsel %vm226_vm0, %v16974_v22, 0.0  ;;  %v20083_v1 = vld [vmem:[#allocation71_spill] sm:$0xff] }
 0x361   :  { %v4989_v30 = vsel %vm226_vm0, %v16985_v8, 0.0  ;;  %v5067_v17 = vmul.f32 %v16985_v8, %v16985_v8  ;;  %v4322_v7 = vadd.f32 %v12740_v19, %v20083_v1  ;;  %v4320_v12 = vadd.f32 %v4247_v2, %v3767_v47 }
 0x362   :  { %v5186_v58 = vadd.f32 %v5185_v15, %v5184_v27  ;;  %v4990_v38 = vadd.f32 %v4989_v30, %v4988_v56  ;;  %v4797_v46 = vpop.f32.mrf.mxu0  ;;  %v5189_v32 = vsel %vm226_vm0, %v5068_v5, 0.0  ;;  %v4993_v27 = vsel %vm226_vm0, %v16983_v42, 0.0 }
 0x363   :  { %v5187_v45 = vsel %vm226_vm0, %v5067_v17, 0.0  ;;  %v17002_v50 = vadd.f32 %v4797_v46, %v4319_v53  ;;  %v17008_v56 = vadd.f32 %v12805_v13, %v4321_v60  ;;  %v5191_v35 = vsel %vm226_vm0, %v5069_v52, 0.0 }
 0x364   :  { %v4992_v31 = vadd.f32 %v4991_v36, %v4990_v38  ;;  %v5188_v49 = vadd.f32 %v5187_v45, %v5186_v58  ;;  %v12806_v61 = vpop.f32.mrf.mxu0 }
 0x365   :  { %v5070_v15 = vmul.f32 %v17002_v50, %v17002_v50  ;;  %v4995_v19 = vsel %vm226_vm0, %v17002_v50, 0.0  ;;  %v17015_v47 = vadd.f32 %v12806_v61, %v4322_v7  ;;  %v5072_v13 = vmul.f32 %v17008_v56, %v17008_v56 }
 0x366   :  { %v5190_v30 = vadd.f32 %v5189_v32, %v5188_v49  ;;  %v4994_v17 = vadd.f32 %v4993_v27, %v4992_v31  ;;  %v4800_v53 = vpop.f32.mrf.mxu0  ;;  %v4999_v52 = vsel %vm226_vm0, %v17008_v56, 0.0 }
 0x367   :  { %20084 = vst [vmem:[#allocation35_spill] sm:$0xff] %v17015_v47  ;;  %v4873_v2 = vadd.f32 %v4800_v53, %v4320_v12  ;;  %v5193_v60 = vsel %vm226_vm0, %v5070_v15, 0.0  ;;  %v5073_v1 = vmul.f32 %v17015_v47, %v17015_v47  ;;  %v5197_v49 = vsel %vm226_vm0, %v5072_v13, 0.0 }
 0x368   :  { %v4996_v5 = vadd.f32 %v4995_v19, %v4994_v17  ;;  %v5192_v58 = vadd.f32 %v5191_v35, %v5190_v30  ;;  %v5001_v61 = vsel %vm226_vm0, %v17015_v47, 0.0 }
 0x369   :  { %v4997_v38 = vsel %vm226_vm0, %v4873_v2, 0.0  ;;  %v5071_v46 = vmul.f32 %v4873_v2, %v4873_v2  ;;  %v5199_v15 = vsel %vm226_vm0, %v5073_v1, 0.0  ;;  %v5218_v1 = vlaneseq }
 0x36a   :  { %v5194_v36 = vadd.f32 %v5193_v60, %v5192_v58  ;;  %v4998_v45 = vadd.f32 %v4997_v38, %v4996_v5 }
 0x36b   :  { %v5195_v7 = vsel %vm226_vm0, %v5071_v46, 0.0 }
 0x36c   :  { %v5000_v12 = vadd.f32 %v4999_v52, %v4998_v45  ;;  %v5196_v31 = vadd.f32 %v5195_v7, %v5194_v36 }
 0x36e   :  { %v5002_v32 = vadd.f32 %v5001_v61, %v5000_v12  ;;  %v5198_v27 = vadd.f32 %v5197_v49, %v5196_v31  ;;  %v5219_v49 = vshrl.u32 %v5218_v1, 7  ;;  %v5210_v61 = vld [vmem:[%s19703_s2] sm:$0x1]  ;;  %v20090_v1 = vld [vmem:[#allocation18_spill] sm:$0xff] }
 0x370   :  { %v5003_v30 = vrot.slane %v5002_v32, 4  ;;  %v5200_v17 = vadd.f32 %v5199_v15, %v5198_v27 }
 0x372   :  { %v5004_v53 = vadd.f32 %v5003_v30, %v5002_v32  ;;  %v5201_v35 = vrot.slane %v5200_v17, 4  ;;  %v5220_v32 = vsub.s32 0, %v5219_v49  ;;  %v5214_v30 = vld [vmem:[%s19704_s3] sm:$0x1] }
 0x374   :  { %v5005_v19 = vrot.slane %v5004_v53, 2  ;;  %v5202_v5 = vadd.f32 %v5201_v35, %v5200_v17 }
 0x376   :  { %v5006_v58 = vadd.f32 %v5005_v19, %v5004_v53  ;;  %v5203_v60 = vrot.slane %v5202_v5, 2  ;;  %v20085_v19 = vld [vmem:[#allocation73_spill] sm:$0xff] }
 0x378   :  { %v5007_v38 = vrot.slane %v5006_v58, 1  ;;  %v5204_v46 = vadd.f32 %v5203_v60, %v5202_v5 }
 0x37a   :  { %v5008_v36 = vadd.f32 %v5007_v38, %v5006_v58  ;;  %v5205_v45 = vrot.slane %v5204_v46, 1  ;;  %v20086_v58 = vld [vmem:[#allocation75_spill] sm:$0xff]  ;;  %v20087_v38 = vld [vmem:[#allocation74_spill] sm:$0xff] }
 0x37c   :  { %v5009_v13 = vmul.f32 0.001953125, %v5008_v36  ;;  %v5206_v52 = vadd.f32 %v5205_v45, %v5204_v46 }
 0x37e   :  { %v5207_v7 = vmul.f32 0.001953125, %v5206_v52  ;;  %v5208_v47 = vmul.f32 %v5009_v13, %v5009_v13 }
 0x380   :  { %v5209_v12 = vsub.f32 %v5207_v7, %v5208_v47 }
 0x382   :  { %v5211_v31 = vadd.f32 1e-05, %v5209_v12 }
 0x384   :  { %13420 = vrsqrt.f32 %v5211_v31 }
 0x391   :  { %v13421_v27 = vpop.eup %13420 }
 0x392   :  { %v5213_v15 = vmul.f32 %v13421_v27, %v5210_v61 }
 0x394   :  { %v5215_v17 = vmul.f32 %v5213_v15, %v5009_v13  ;;  %v17036_v53 = vrot.slane %v5213_v15, %v5220_v32 }
 0x396   :  { %v5216_v35 = vsub.f32 %v5214_v30, %v5215_v17  ;;  %v5284_v47 = vmul.f32 %v17036_v53, %v4873_v2  ;;  %v17041_v5 = vmul.f32 %v17036_v53, %v20085_v19  ;;  %v17045_v60 = vmul.f32 %v17036_v53, %v20086_v58  ;;  %v20091_v30 = vld [vmem:[#allocation27_spill] sm:$0xff]  ;;  %v20092_v17 = vld [vmem:[#allocation16_spill] sm:$0xff] }
 0x397   :  { %v17049_v46 = vmul.f32 %v17036_v53, %v20087_v38  ;;  %v17053_v36 = vmul.f32 %v17036_v53, %v16395_v63  ;;  %v17057_v45 = vmul.f32 %v17036_v53, %v16419_v6  ;;  %v17061_v2 = vmul.f32 %v17036_v53, %v16439_v24  ;;  %v20088_v6 = vld [vmem:[#allocation76_spill] sm:$0xff]  ;;  %v20089_v24 = vld [vmem:[#allocation17_spill] sm:$0xff] }
 0x398   :  { %v17063_v13 = vrot.slane %v5216_v35, %v5220_v32  ;;  %v17067_v52 = vmul.f32 %v17036_v53, %v16430_v37  ;;  %v17071_v7 = vmul.f32 %v17036_v53, %v16437_v29  ;;  %v17075_v63 = vmul.f32 %v17036_v53, %v16459_v62  ;;  %v20093_v35 = vld [vmem:[#allocation20_spill] sm:$0xff] }
 0x399   :  { %v17079_v12 = vmul.f32 %v17036_v53, %v20088_v6  ;;  %v17083_v31 = vmul.f32 %v17036_v53, %v20089_v24  ;;  %v17087_v37 = vmul.f32 %v17036_v53, %v20090_v1  ;;  %v17091_v29 = vmul.f32 %v17036_v53, %v16499_v55  ;;  %v20094_v58 = vld [vmem:[#allocation32_spill] sm:$0xff] }
 0x39a   :  { %v5354_v49 = vadd.f32 %v17063_v13, %v5284_v47  ;;  %v17096_v62 = vmul.f32 %v17036_v53, %v16521_v9  ;;  %v17100_v61 = vmul.f32 %v17036_v53, %v16510_v11  ;;  %v17104_v32 = vmul.f32 %v17036_v53, %v16519_v3 }
 0x39b   :  { %v17108_v27 = vmul.f32 %v17036_v53, %v16542_v44  ;;  %v17112_v55 = vmul.f32 %v17036_v53, %v16563_v26  ;;  %v17116_v9 = vmul.f32 %v17036_v53, %v16552_v39  ;;  %v17120_v11 = vmul.f32 %v17036_v53, %v16561_v25 }
 0x39c   :  { %v5418_v15 = vmax.f32 %v5354_v49, 0.0  ;;  %v17124_v3 = vmul.f32 %v17036_v53, %v16584_v48  ;;  %v17128_v44 = vmul.f32 %v17036_v53, %v20091_v30  ;;  %v17132_v26 = vmul.f32 %v17036_v53, %v20092_v17  ;;  %v20099_v17 = vld [vmem:[#allocation33_spill] sm:$0xff] }
 0x39d   :  { %v17136_v39 = vmul.f32 %v17036_v53, %v20093_v35  ;;  %v17140_v25 = vmul.f32 %v17036_v53, %v16626_v41  ;;  %v17144_v48 = vmul.f32 %v17036_v53, %v16647_v14  ;;  %v17148_v47 = vmul.f32 %v17036_v53, %v16636_v18  ;;  %v20095_v41 = vld [vmem:[#allocation21_spill] sm:$0xff]  ;;  %v20096_v14 = vld [vmem:[#allocation22_spill] sm:$0xff]  ;;  %v20097_v18 = vld [vmem:[#allocation24_spill] sm:$0xff] }
 0x39e   :  { %5592 = vst.msk [vmem:[#allocation2 + $0x321] sm:$0xff] %vm226_vm0, %v5418_v15  ;;  %v17153_v19 = vmul.f32 %v17036_v53, %v16645_v54  ;;  %v17157_v38 = vmul.f32 %v17036_v53, %v20094_v58  ;;  %v17161_v6 = vmul.f32 %v17036_v53, %v20095_v41  ;;  %v17165_v24 = vmul.f32 %v17036_v53, %v20096_v14  ;;  %v20098_v15 = vld [vmem:[#allocation19_spill] sm:$0xff]  ;;  %v20102_v14 = vld [vmem:[#allocation25_spill] sm:$0xff] }
 0x39f   :  { %v17169_v1 = vmul.f32 %v17036_v53, %v20097_v18  ;;  %v17173_v54 = vmul.f32 %v17036_v53, %v16713_v51  ;;  %v17177_v49 = vmul.f32 %v17036_v53, %v16734_v16  ;;  %v17181_v30 = vmul.f32 %v17036_v53, %v20098_v15  ;;  %v20100_v41 = vld [vmem:[#allocation31_spill] sm:$0xff] }
 0x3a0   :  { %v17185_v35 = vmul.f32 %v17036_v53, %v20099_v17  ;;  %v17189_v58 = vmul.f32 %v17036_v53, %v16755_v4  ;;  %v17193_v51 = vmul.f32 %v17036_v53, %v16776_v10  ;;  %v17197_v16 = vmul.f32 %v17036_v53, %v20100_v41  ;;  %v20104_v17 = vld [vmem:[#allocation36_spill] sm:$0xff] }
 0x3a1   :  { %v17201_v18 = vmul.f32 %v17036_v53, %v20102_v14  ;;  %v17205_v15 = vmul.f32 %v17036_v53, %v16797_v34  ;;  %v17209_v4 = vmul.f32 %v17036_v53, %v16818_v0  ;;  %v17213_v10 = vmul.f32 %v17036_v53, %v16807_v59 }
 0x3a2   :  { %20101 = vst [vmem:[#allocation30_spill] sm:$0xff] %v17197_v16  ;;  %v17217_v41 = vmul.f32 %v17036_v53, %v20104_v17  ;;  %v20105_v16 = vld [vmem:[#allocation37_spill] sm:$0xff]  ;;  %v17229_v0 = vmul.f32 %v17036_v53, %v16851_v23  ;;  %v17233_v59 = vmul.f32 %v17036_v53, %v16862_v21  ;;  %v17237_v17 = vmul.f32 %v17036_v53, %v16888_v43 }
 0x3a3   :  { %20103 = vst [vmem:[#allocation49_spill] sm:$0xff] %v17201_v18  ;;  %v17221_v14 = vmul.f32 %v17036_v53, %v20105_v16  ;;  %v20106_v18 = vld [vmem:[#allocation28_spill] sm:$0xff]  ;;  %v17241_v16 = vmul.f32 %v17036_v53, %v16910_v40  ;;  %v17249_v23 = vmul.f32 %v17036_v53, %v16908_v57  ;;  %v17253_v21 = vmul.f32 %v17036_v53, %v16929_v28 }
 0x3a4   :  { %v17225_v34 = vmul.f32 %v17036_v53, %v20106_v18  ;;  %20107 = vst [vmem:[#allocation29_spill] sm:$0xff] %v17233_v59  ;;  %20108 = vst [vmem:[#allocation34_spill] sm:$0xff] %v17237_v17  ;;  %v17245_v18 = vmul.f32 %v17036_v53, %v16899_v33  ;;  %v20110_v59 = vld [vmem:[#allocation38_spill] sm:$0xff]  ;;  %v20111_v17 = vld [vmem:[#allocation60_spill] sm:$0xff]  ;;  %v17269_v57 = vmul.f32 %v17036_v53, %v16967_v20 }
 0x3a5   :  { %20109 = vst [vmem:[#allocation39_spill] sm:$0xff] %v17241_v16  ;;  %v17257_v43 = vmul.f32 %v17036_v53, %v20110_v59  ;;  %v17261_v40 = vmul.f32 %v17036_v53, %v20111_v17  ;;  %v20112_v16 = vld [vmem:[#allocation23_spill] sm:$0xff]  ;;  %v17273_v28 = vmul.f32 %v17036_v53, %v16985_v8  ;;  %v17277_v59 = vmul.f32 %v17036_v53, %v16974_v22 }
 0x3a6   :  { %v17265_v33 = vmul.f32 %v17036_v53, %v20112_v16  ;;  %20113 = vst [vmem:[#allocation41_spill] sm:$0xff] %v17269_v57  ;;  %v17281_v17 = vmul.f32 %v17036_v53, %v16983_v42  ;;  %v17285_v16 = vmul.f32 %v17036_v53, %v17002_v50  ;;  %v17289_v20 = vmul.f32 %v17036_v53, %v17008_v56  ;;  %v20114_v57 = vld [vmem:[#allocation35_spill] sm:$0xff] }
 0x3a7   :  { %v17293_v8 = vmul.f32 %v17036_v53, %v20114_v57  ;;  %v17297_v22 = vadd.f32 %v17063_v13, %v17041_v5  ;;  %v17301_v42 = vadd.f32 %v17063_v13, %v17045_v60  ;;  %v17305_v50 = vadd.f32 %v17063_v13, %v17049_v46 }
 0x3a8   :  { %v17309_v56 = vadd.f32 %v17063_v13, %v17053_v36  ;;  %v17313_v53 = vadd.f32 %v17063_v13, %v17057_v45  ;;  %v17317_v5 = vadd.f32 %v17063_v13, %v17061_v2  ;;  %v17321_v60 = vadd.f32 %v17063_v13, %v17067_v52 }
 0x3a9   :  { %v17325_v46 = vadd.f32 %v17063_v13, %v17071_v7  ;;  %v17329_v36 = vadd.f32 %v17063_v13, %v17075_v63  ;;  %v17333_v45 = vadd.f32 %v17063_v13, %v17079_v12  ;;  %v17337_v2 = vadd.f32 %v17063_v13, %v17083_v31  ;;  %v20116_v57 = vld [vmem:[#allocation30_spill] sm:$0xff] }
 0x3aa   :  { %v17341_v52 = vadd.f32 %v17063_v13, %v17087_v37  ;;  %v17345_v7 = vadd.f32 %v17063_v13, %v17091_v29  ;;  %v17349_v63 = vadd.f32 %v17063_v13, %v17096_v62  ;;  %v17353_v12 = vadd.f32 %v17063_v13, %v17100_v61 }
 0x3ab   :  { %v17357_v31 = vadd.f32 %v17063_v13, %v17104_v32  ;;  %v17361_v37 = vadd.f32 %v17063_v13, %v17108_v27  ;;  %v17365_v29 = vadd.f32 %v17063_v13, %v17112_v55  ;;  %v17369_v62 = vadd.f32 %v17063_v13, %v17116_v9 }
 0x3ac   :  { %v17373_v61 = vadd.f32 %v17063_v13, %v17120_v11  ;;  %v17377_v32 = vadd.f32 %v17063_v13, %v17124_v3  ;;  %v17381_v27 = vadd.f32 %v17063_v13, %v17128_v44  ;;  %v17385_v55 = vadd.f32 %v17063_v13, %v17132_v26 }
 0x3ad   :  { %v17389_v9 = vadd.f32 %v17063_v13, %v17136_v39  ;;  %v17393_v11 = vadd.f32 %v17063_v13, %v17140_v25  ;;  %v17397_v3 = vadd.f32 %v17063_v13, %v17144_v48  ;;  %v17401_v44 = vadd.f32 %v17063_v13, %v17148_v47 }
 0x3ae   :  { %v17405_v26 = vadd.f32 %v17063_v13, %v17153_v19  ;;  %v17409_v39 = vadd.f32 %v17063_v13, %v17157_v38  ;;  %v17413_v25 = vadd.f32 %v17063_v13, %v17161_v6  ;;  %v17417_v48 = vadd.f32 %v17063_v13, %v17165_v24 }
 0x3af   :  { %v17421_v47 = vadd.f32 %v17063_v13, %v17169_v1  ;;  %v17425_v19 = vadd.f32 %v17063_v13, %v17173_v54  ;;  %v17429_v38 = vadd.f32 %v17063_v13, %v17177_v49  ;;  %v17433_v6 = vadd.f32 %v17063_v13, %v17181_v30 }
 0x3b0   :  { %v17437_v24 = vadd.f32 %v17063_v13, %v17185_v35  ;;  %v17441_v1 = vadd.f32 %v17063_v13, %v17189_v58  ;;  %v17445_v54 = vadd.f32 %v17063_v13, %v17193_v51  ;;  %v17449_v49 = vadd.f32 %v17063_v13, %v20116_v57 }
 0x3b1   :  { %20115 = vst [vmem:[#allocation51_spill] sm:$0xff] %v17429_v38  ;;  %v20117_v38 = vld [vmem:[#allocation49_spill] sm:$0xff]  ;;  %v17457_v35 = vadd.f32 %v17063_v13, %v17205_v15  ;;  %v17461_v58 = vadd.f32 %v17063_v13, %v17209_v4  ;;  %v17465_v51 = vadd.f32 %v17063_v13, %v17213_v10  ;;  %v17469_v57 = vadd.f32 %v17063_v13, %v17217_v41 }
 0x3b2   :  { %v17453_v30 = vadd.f32 %v17063_v13, %v20117_v38  ;;  %v17473_v38 = vadd.f32 %v17063_v13, %v17221_v14  ;;  %v17477_v15 = vadd.f32 %v17063_v13, %v17225_v34  ;;  %v17481_v4 = vadd.f32 %v17063_v13, %v17229_v0 }
 0x3b3   :  { %20118 = vst [vmem:[#allocation53_spill] sm:$0xff] %v17461_v58  ;;  %20119 = vst [vmem:[#allocation50_spill] sm:$0xff] %v17465_v51  ;;  %v20121_v58 = vld [vmem:[#allocation29_spill] sm:$0xff]  ;;  %v20122_v51 = vld [vmem:[#allocation34_spill] sm:$0xff]  ;;  %v17497_v34 = vadd.f32 %v17063_v13, %v17245_v18  ;;  %v17501_v0 = vadd.f32 %v17063_v13, %v17249_v23  ;;  %v17517_v18 = vadd.f32 %v17063_v13, %v17265_v33 }
 0x3b4   :  { %20120 = vst [vmem:[#allocation52_spill] sm:$0xff] %v17469_v57  ;;  %v17485_v10 = vadd.f32 %v17063_v13, %v20121_v58  ;;  %v17489_v41 = vadd.f32 %v17063_v13, %v20122_v51  ;;  %v20123_v57 = vld [vmem:[#allocation39_spill] sm:$0xff]  ;;  %v17505_v58 = vadd.f32 %v17063_v13, %v17253_v21  ;;  %v17509_v51 = vadd.f32 %v17063_v13, %v17257_v43 }
 0x3b5   :  { %v17493_v14 = vadd.f32 %v17063_v13, %v20123_v57  ;;  %20124 = vst [vmem:[#allocation42_spill] sm:$0xff] %v17497_v34  ;;  %v17513_v57 = vadd.f32 %v17063_v13, %v17261_v40  ;;  %v20125_v34 = vld [vmem:[#allocation41_spill] sm:$0xff]  ;;  %v17525_v21 = vadd.f32 %v17063_v13, %v17273_v28  ;;  %v17529_v43 = vadd.f32 %v17063_v13, %v17277_v59 }
 0x3b6   :  { %v17521_v23 = vadd.f32 %v17063_v13, %v20125_v34  ;;  %v17533_v40 = vadd.f32 %v17063_v13, %v17281_v17  ;;  %v17537_v33 = vadd.f32 %v17063_v13, %v17285_v16  ;;  %v17541_v34 = vadd.f32 %v17063_v13, %v17289_v20 }
 0x3b7   :  { %20126 = vst [vmem:[#allocation43_spill] sm:$0xff] %v17525_v21  ;;  %20127 = vst [vmem:[#allocation55_spill] sm:$0xff] %v17529_v43  ;;  %v17545_v28 = vadd.f32 %v17063_v13, %v17293_v8  ;;  %v5357_v21 = vmax.f32 %v17297_v22, 0.0  ;;  %v5358_v59 = vmax.f32 %v17301_v42, 0.0  ;;  %v5359_v43 = vmax.f32 %v17305_v50, 0.0 }
 0x3b8   :  { %20128 = vst [vmem:[#allocation57_spill] sm:$0xff] %v17533_v40  ;;  %20129 = vst [vmem:[#allocation54_spill] sm:$0xff] %v17537_v33  ;;  %v5360_v17 = vmax.f32 %v17309_v56, 0.0  ;;  %v5361_v40 = vmax.f32 %v17313_v53, 0.0  ;;  %v5362_v16 = vmax.f32 %v17317_v5, 0.0  ;;  %v5363_v33 = vmax.f32 %v17321_v60, 0.0 }
 0x3b9   :  { %20130 = vst [vmem:[#allocation56_spill] sm:$0xff] %v17541_v34  ;;  %v5364_v20 = vmax.f32 %v17325_v46, 0.0  ;;  %v5365_v34 = vmax.f32 %v17329_v36, 0.0  ;;  %5531 = vst.msk [vmem:[#allocation2 + $0x19] sm:$0xff] %vm226_vm0, %v5357_v21  ;;  %v5366_v13 = vmax.f32 %v17333_v45, 0.0  ;;  %v5367_v8 = vmax.f32 %v17337_v2, 0.0 }
 0x3ba   :  { %v5368_v22 = vmax.f32 %v17341_v52, 0.0  ;;  %v5369_v42 = vmax.f32 %v17345_v7, 0.0  ;;  %5532 = vst.msk [vmem:[#allocation2 + $0x21] sm:$0xff] %vm226_vm0, %v5358_v59  ;;  %5533 = vst.msk [vmem:[#allocation2 + $0x31] sm:$0xff] %vm226_vm0, %v5359_v43  ;;  %v5370_v50 = vmax.f32 %v17349_v63, 0.0  ;;  %v5371_v56 = vmax.f32 %v17353_v12, 0.0 }
 0x3bb   :  { %5534 = vst.msk [vmem:[#allocation2 + $0x39] sm:$0xff] %vm226_vm0, %v5360_v17  ;;  %5535 = vst.msk [vmem:[#allocation2 + $0x49] sm:$0xff] %vm226_vm0, %v5361_v40  ;;  %v5372_v53 = vmax.f32 %v17357_v31, 0.0  ;;  %v5373_v5 = vmax.f32 %v17361_v37, 0.0  ;;  %v5374_v60 = vmax.f32 %v17365_v29, 0.0  ;;  %v5375_v46 = vmax.f32 %v17369_v62, 0.0 }
 0x3bc   :  { %5536 = vst.msk [vmem:[#allocation2 + $0x51] sm:$0xff] %vm226_vm0, %v5362_v16  ;;  %5537 = vst.msk [vmem:[#allocation2 + $0x61] sm:$0xff] %vm226_vm0, %v5363_v33  ;;  %v5376_v36 = vmax.f32 %v17373_v61, 0.0  ;;  %v5377_v45 = vmax.f32 %v17377_v32, 0.0  ;;  %v5378_v2 = vmax.f32 %v17381_v27, 0.0  ;;  %v5379_v52 = vmax.f32 %v17385_v55, 0.0 }
 0x3bd   :  { %5538 = vst.msk [vmem:[#allocation2 + $0x69] sm:$0xff] %vm226_vm0, %v5364_v20  ;;  %5539 = vst.msk [vmem:[#allocation2 + $0x79] sm:$0xff] %vm226_vm0, %v5365_v34  ;;  %v5380_v7 = vmax.f32 %v17389_v9, 0.0  ;;  %v5381_v63 = vmax.f32 %v17393_v11, 0.0  ;;  %v5382_v12 = vmax.f32 %v17397_v3, 0.0  ;;  %v5383_v31 = vmax.f32 %v17401_v44, 0.0 }
 0x3be   :  { %5540 = vst.msk [vmem:[#allocation2 + $0x81] sm:$0xff] %vm226_vm0, %v5366_v13  ;;  %5541 = vst.msk [vmem:[#allocation2 + $0x91] sm:$0xff] %vm226_vm0, %v5367_v8  ;;  %v5384_v37 = vmax.f32 %v17405_v26, 0.0  ;;  %v5385_v29 = vmax.f32 %v17409_v39, 0.0  ;;  %v5386_v62 = vmax.f32 %v17413_v25, 0.0  ;;  %v5387_v61 = vmax.f32 %v17417_v48, 0.0 }
 0x3bf   :  { %5542 = vst.msk [vmem:[#allocation2 + $0x99] sm:$0xff] %vm226_vm0, %v5368_v22  ;;  %5543 = vst.msk [vmem:[#allocation2 + $0xa9] sm:$0xff] %vm226_vm0, %v5369_v42  ;;  %v5388_v32 = vmax.f32 %v17421_v47, 0.0  ;;  %v5389_v27 = vmax.f32 %v17425_v19, 0.0  ;;  %v20131_v55 = vld [vmem:[#allocation51_spill] sm:$0xff]  ;;  %v5391_v11 = vmax.f32 %v17433_v6, 0.0 }
 0x3c0   :  { %5544 = vst.msk [vmem:[#allocation2 + $0xb1] sm:$0xff] %vm226_vm0, %v5370_v50  ;;  %5545 = vst.msk [vmem:[#allocation2 + $0xc1] sm:$0xff] %vm226_vm0, %v5371_v56  ;;  %v5390_v9 = vmax.f32 %v20131_v55, 0.0  ;;  %v5392_v3 = vmax.f32 %v17437_v24, 0.0  ;;  %v5393_v44 = vmax.f32 %v17441_v1, 0.0  ;;  %v5394_v26 = vmax.f32 %v17445_v54, 0.0 }
 0x3c1   :  { %5546 = vst.msk [vmem:[#allocation2 + $0xc9] sm:$0xff] %vm226_vm0, %v5372_v53  ;;  %5547 = vst.msk [vmem:[#allocation2 + $0xd9] sm:$0xff] %vm226_vm0, %v5373_v5  ;;  %v5395_v39 = vmax.f32 %v17449_v49, 0.0  ;;  %v5396_v25 = vmax.f32 %v17453_v30, 0.0  ;;  %v5397_v48 = vmax.f32 %v17457_v35, 0.0  ;;  %v20132_v47 = vld [vmem:[#allocation53_spill] sm:$0xff] }
 0x3c2   :  { %5548 = vst.msk [vmem:[#allocation2 + $0xe1] sm:$0xff] %vm226_vm0, %v5374_v60  ;;  %5549 = vst.msk [vmem:[#allocation2 + $0xf1] sm:$0xff] %vm226_vm0, %v5375_v46  ;;  %v5398_v19 = vmax.f32 %v20132_v47, 0.0  ;;  %v20133_v6 = vld [vmem:[#allocation50_spill] sm:$0xff]  ;;  %v20134_v1 = vld [vmem:[#allocation52_spill] sm:$0xff]  ;;  %v5401_v49 = vmax.f32 %v17473_v38, 0.0 }
 0x3c3   :  { %5550 = vst.msk [vmem:[#allocation2 + $0xf9] sm:$0xff] %vm226_vm0, %v5376_v36  ;;  %5551 = vst.msk [vmem:[#allocation2 + $0x109] sm:$0xff] %vm226_vm0, %v5377_v45  ;;  %v5399_v24 = vmax.f32 %v20133_v6, 0.0  ;;  %v5400_v54 = vmax.f32 %v20134_v1, 0.0  ;;  %v5695_v30 = vld [vmem:[#allocation2 + $0x19] sm:$0xff]  ;;  %v5402_v21 = vmax.f32 %v17477_v15, 0.0 }
 0x3c4   :  { %5552 = vst.msk [vmem:[#allocation2 + $0x111] sm:$0xff] %vm226_vm0, %v5378_v2  ;;  %5553 = vst.msk [vmem:[#allocation2 + $0x121] sm:$0xff] %vm226_vm0, %v5379_v52  ;;  %v5597_v35 = vld [vmem:[#allocation2 + $0x18] sm:$0xff]  ;;  %v5403_v43 = vmax.f32 %v17481_v4, 0.0  ;;  %v5404_v40 = vmax.f32 %v17485_v10, 0.0  ;;  %v5405_v33 = vmax.f32 %v17489_v41, 0.0 }
 0x3c5   :  { %5554 = vst.msk [vmem:[#allocation2 + $0x129] sm:$0xff] %vm226_vm0, %v5380_v7  ;;  %5555 = vst.msk [vmem:[#allocation2 + $0x139] sm:$0xff] %vm226_vm0, %v5381_v63  ;;  %v5696_v38 = vld [vmem:[#allocation2 + $0x21] sm:$0xff]  ;;  %v5406_v59 = vmax.f32 %v17493_v14, 0.0  ;;  %v20135_v17 = vld [vmem:[#allocation42_spill] sm:$0xff]  ;;  %v5408_v4 = vmax.f32 %v17501_v0, 0.0 }
 0x3c6   :  { %5556 = vst.msk [vmem:[#allocation2 + $0x141] sm:$0xff] %vm226_vm0, %v5382_v12  ;;  %5557 = vst.msk [vmem:[#allocation2 + $0x151] sm:$0xff] %vm226_vm0, %v5383_v31  ;;  %v5598_v34 = vld [vmem:[#allocation2 + $0x20] sm:$0xff]  ;;  %v5407_v15 = vmax.f32 %v20135_v17, 0.0  ;;  %v5409_v10 = vmax.f32 %v17505_v58, 0.0  ;;  %v5697_v41 = vld [vmem:[#allocation2 + $0x31] sm:$0xff]  ;;  %v5758_v46 = vpack.c.bf16 %v5696_v38, %v5695_v30 }
 0x3c7   :  { %5558 = vst.msk [vmem:[#allocation2 + $0x159] sm:$0xff] %vm226_vm0, %v5384_v37  ;;  %5559 = vst.msk [vmem:[#allocation2 + $0x169] sm:$0xff] %vm226_vm0, %v5385_v29  ;;  %v5698_v16 = vld [vmem:[#allocation2 + $0x39] sm:$0xff]  ;;  %v5410_v20 = vmax.f32 %v17509_v51, 0.0  ;;  %v5411_v14 = vmax.f32 %v17513_v57, 0.0  ;;  %v5412_v13 = vmax.f32 %v17517_v18, 0.0  ;;  %v17667_v36 = vpack.c.bf16 %v5598_v34, %v5597_v35 }
 0x3c8   :  { %5560 = vst.msk [vmem:[#allocation2 + $0x171] sm:$0xff] %vm226_vm0, %v5386_v62  ;;  %5561 = vst.msk [vmem:[#allocation2 + $0x181] sm:$0xff] %vm226_vm0, %v5387_v61  ;;  %v5413_v0 = vmax.f32 %v17521_v23, 0.0  ;;  %v5599_v58 = vld [vmem:[#allocation2 + $0x30] sm:$0xff]  ;;  %v5600_v8 = vld [vmem:[#allocation2 + $0x38] sm:$0xff]  ;;  %v5420_v60 = vmax.f32 %v17545_v28, 0.0  ;;  %v5759_v28 = vpack.c.bf16 %v5698_v16, %v5697_v41  ;;  %12810 = vmatmul.mubr.msk.bf16.vlgmr.msra.gmra.mxu1 %vm226_vm0, %v5758_v46 }
 0x3c9   :  { %5562 = vst.msk [vmem:[#allocation2 + $0x189] sm:$0xff] %vm226_vm0, %v5388_v32  ;;  %5563 = vst.msk [vmem:[#allocation2 + $0x1c9] sm:$0xff] %vm226_vm0, %v5389_v27  ;;  %v20136_v22 = vld [vmem:[#allocation43_spill] sm:$0xff]  ;;  %v20138_v56 = vld [vmem:[#allocation57_spill] sm:$0xff]  ;;  %v17673_v45 = vpack.c.bf16 %v5600_v8, %v5599_v58  ;;  %12876 = vmatmul.mubr.msk.bf16.vlgmr.msra.gmra.mxu0 %vm226_vm0, %v17667_v36 }
 0x3ca   :  { %5564 = vst.msk [vmem:[#allocation2 + $0x1d1] sm:$0xff] %vm226_vm0, %v5390_v9  ;;  %5565 = vst.msk [vmem:[#allocation2 + $0x1e1] sm:$0xff] %vm226_vm0, %v5391_v11  ;;  %v5414_v42 = vmax.f32 %v20136_v22, 0.0  ;;  %v20137_v50 = vld [vmem:[#allocation55_spill] sm:$0xff]  ;;  %v5416_v57 = vmax.f32 %v20138_v56, 0.0  ;;  %v20139_v53 = vld [vmem:[#allocation54_spill] sm:$0xff]  ;;  %12813 = vmatprep.mubr.msk.bf16.mxu1 %vm226_vm0, %v5759_v28 }
 0x3cb   :  { %5566 = vst.msk [vmem:[#allocation2 + $0x1e9] sm:$0xff] %vm226_vm0, %v5392_v3  ;;  %5567 = vst.msk [vmem:[#allocation2 + $0x1f9] sm:$0xff] %vm226_vm0, %v5393_v44  ;;  %v5415_v51 = vmax.f32 %v20137_v50, 0.0  ;;  %v5417_v18 = vmax.f32 %v20139_v53, 0.0  ;;  %v20140_v23 = vld [vmem:[#allocation56_spill] sm:$0xff]  ;;  %12879 = vmatprep.mubr.msk.bf16.mxu0 %vm226_vm0, %v17673_v45  ;;  %v20141_v2 = vld [vmem:[#allocation26_spill] sm:$0xff] }
 0x3cc   :  { %5568 = vst.msk [vmem:[#allocation2 + $0x201] sm:$0xff] %vm226_vm0, %v5394_v26  ;;  %5569 = vst.msk [vmem:[#allocation2 + $0x211] sm:$0xff] %vm226_vm0, %v5395_v39  ;;  %v5419_v5 = vmax.f32 %v20140_v23, 0.0  ;;  %12940 = vmatpush3.bf16.msra.mxu1 %v20141_v2  ;;  %v5699_v52 = vld [vmem:[#allocation2 + $0x49] sm:$0xff]  ;;  %v5700_v7 = vld [vmem:[#allocation2 + $0x51] sm:$0xff] }
 0x3cd   :  { %5570 = vst.msk [vmem:[#allocation2 + $0x219] sm:$0xff] %vm226_vm0, %v5396_v25  ;;  %5571 = vst.msk [vmem:[#allocation2 + $0x229] sm:$0xff] %vm226_vm0, %v5397_v48  ;;  %v5601_v63 = vld [vmem:[#allocation2 + $0x48] sm:$0xff]  ;;  %v5602_v12 = vld [vmem:[#allocation2 + $0x50] sm:$0xff]  ;;  %v5760_v61 = vpack.c.bf16 %v5700_v7, %v5699_v52 }
 0x3ce   :  { %5572 = vst.msk [vmem:[#allocation2 + $0x231] sm:$0xff] %vm226_vm0, %v5398_v19  ;;  %5573 = vst.msk [vmem:[#allocation2 + $0x241] sm:$0xff] %vm226_vm0, %v5399_v24  ;;  %v5701_v31 = vld [vmem:[#allocation2 + $0x61] sm:$0xff]  ;;  %v5702_v37 = vld [vmem:[#allocation2 + $0x69] sm:$0xff]  ;;  %v17684_v32 = vpack.c.bf16 %v5602_v12, %v5601_v63 }
 0x3cf   :  { %5574 = vst.msk [vmem:[#allocation2 + $0x249] sm:$0xff] %vm226_vm0, %v5400_v54  ;;  %5575 = vst.msk [vmem:[#allocation2 + $0x259] sm:$0xff] %vm226_vm0, %v5401_v49  ;;  %v5603_v29 = vld [vmem:[#allocation2 + $0x60] sm:$0xff]  ;;  %v5604_v62 = vld [vmem:[#allocation2 + $0x68] sm:$0xff]  ;;  %v5761_v27 = vpack.c.bf16 %v5702_v37, %v5701_v31 }
 0x3d0   :  { %5576 = vst.msk [vmem:[#allocation2 + $0x261] sm:$0xff] %vm226_vm0, %v5402_v21  ;;  %5577 = vst.msk [vmem:[#allocation2 + $0x271] sm:$0xff] %vm226_vm0, %v5403_v43  ;;  %v17686_v55 = vpack.c.bf16 %v5604_v62, %v5603_v29  ;;  %12814 = vmatmul.mubr.msk.bf16.gmra.mxu1 %vm226_vm0, %v5760_v61  ;;  %v5703_v9 = vld [vmem:[#allocation2 + $0x79] sm:$0xff]  ;;  %v5704_v11 = vld [vmem:[#allocation2 + $0x81] sm:$0xff] }
 0x3d1   :  { %5578 = vst.msk [vmem:[#allocation2 + $0x279] sm:$0xff] %vm226_vm0, %v5404_v40  ;;  %5579 = vst.msk [vmem:[#allocation2 + $0x289] sm:$0xff] %vm226_vm0, %v5405_v33  ;;  %12880 = vmatmul.mubr.msk.bf16.gmra.mxu0 %vm226_vm0, %v17684_v32  ;;  %12817 = vmatprep.mubr.msk.bf16.mxu1 %vm226_vm0, %v5761_v27  ;;  %v5605_v3 = vld [vmem:[#allocation2 + $0x78] sm:$0xff]  ;;  %v5606_v44 = vld [vmem:[#allocation2 + $0x80] sm:$0xff]  ;;  %v5762_v47 = vpack.c.bf16 %v5704_v11, %v5703_v9 }
 0x3d2   :  { %5580 = vst.msk [vmem:[#allocation2 + $0x291] sm:$0xff] %vm226_vm0, %v5406_v59  ;;  %5581 = vst.msk [vmem:[#allocation2 + $0x2a1] sm:$0xff] %vm226_vm0, %v5407_v15  ;;  %12883 = vmatprep.mubr.msk.bf16.mxu0 %vm226_vm0, %v17686_v55  ;;  %v5705_v26 = vld [vmem:[#allocation2 + $0x91] sm:$0xff]  ;;  %v5706_v39 = vld [vmem:[#allocation2 + $0x99] sm:$0xff]  ;;  %v17694_v19 = vpack.c.bf16 %v5606_v44, %v5605_v3 }
 0x3d3   :  { %5582 = vst.msk [vmem:[#allocation2 + $0x2a9] sm:$0xff] %vm226_vm0, %v5408_v4  ;;  %5583 = vst.msk [vmem:[#allocation2 + $0x2b9] sm:$0xff] %vm226_vm0, %v5409_v10  ;;  %v5607_v25 = vld [vmem:[#allocation2 + $0x90] sm:$0xff]  ;;  %v5608_v48 = vld [vmem:[#allocation2 + $0x98] sm:$0xff]  ;;  %v5763_v6 = vpack.c.bf16 %v5706_v39, %v5705_v26 }
 0x3d4   :  { %5584 = vst.msk [vmem:[#allocation2 + $0x2c1] sm:$0xff] %vm226_vm0, %v5410_v20  ;;  %5585 = vst.msk [vmem:[#allocation2 + $0x2d1] sm:$0xff] %vm226_vm0, %v5411_v14  ;;  %v17696_v24 = vpack.c.bf16 %v5608_v48, %v5607_v25  ;;  %v5707_v1 = vld [vmem:[#allocation2 + $0xa9] sm:$0xff]  ;;  %v5708_v54 = vld [vmem:[#allocation2 + $0xb1] sm:$0xff] }
 0x3d5   :  { %5586 = vst.msk [vmem:[#allocation2 + $0x2d9] sm:$0xff] %vm226_vm0, %v5412_v13  ;;  %5587 = vst.msk [vmem:[#allocation2 + $0x2e9] sm:$0xff] %vm226_vm0, %v5413_v0  ;;  %v5609_v49 = vld [vmem:[#allocation2 + $0xa8] sm:$0xff]  ;;  %v5610_v30 = vld [vmem:[#allocation2 + $0xb0] sm:$0xff]  ;;  %v5764_v33 = vpack.c.bf16 %v5708_v54, %v5707_v1 }
 0x3d6   :  { %5588 = vst.msk [vmem:[#allocation2 + $0x2f1] sm:$0xff] %vm226_vm0, %v5414_v42  ;;  %5589 = vst.msk [vmem:[#allocation2 + $0x301] sm:$0xff] %vm226_vm0, %v5415_v51  ;;  %v5709_v35 = vld [vmem:[#allocation2 + $0xc1] sm:$0xff]  ;;  %v5710_v21 = vld [vmem:[#allocation2 + $0xc9] sm:$0xff]  ;;  %v17704_v38 = vpack.c.bf16 %v5610_v30, %v5609_v49 }
 0x3d7   :  { %5590 = vst.msk [vmem:[#allocation2 + $0x309] sm:$0xff] %vm226_vm0, %v5416_v57  ;;  %5591 = vst.msk [vmem:[#allocation2 + $0x319] sm:$0xff] %vm226_vm0, %v5417_v18  ;;  %v5611_v43 = vld [vmem:[#allocation2 + $0xc0] sm:$0xff]  ;;  %v5612_v40 = vld [vmem:[#allocation2 + $0xc8] sm:$0xff]  ;;  %v5765_v34 = vpack.c.bf16 %v5710_v21, %v5709_v35 }
 0x3d8   :  { %5593 = vst.msk [vmem:[#allocation2 + $0x331] sm:$0xff] %vm226_vm0, %v5419_v5  ;;  %5594 = vst.msk [vmem:[#allocation2 + $0x339] sm:$0xff] %vm226_vm0, %v5420_v60  ;;  %12818 = vmatmul.mubr.msk.bf16.gmra.mxu1 %vm226_vm0, %v5762_v47  ;;  %v17706_v59 = vpack.c.bf16 %v5612_v40, %v5611_v43  ;;  %v5711_v17 = vld [vmem:[#allocation2 + $0xd9] sm:$0xff]  ;;  %v5712_v15 = vld [vmem:[#allocation2 + $0xe1] sm:$0xff] }
 0x3d9   :  { %12884 = vmatmul.mubr.msk.bf16.gmra.mxu0 %vm226_vm0, %v17694_v19  ;;  %12821 = vmatprep.mubr.msk.bf16.mxu1 %vm226_vm0, %v5763_v6  ;;  %v5613_v4 = vld [vmem:[#allocation2 + $0xd8] sm:$0xff]  ;;  %v5614_v10 = vld [vmem:[#allocation2 + $0xe0] sm:$0xff]  ;;  %v5615_v20 = vld [vmem:[#allocation2 + $0xf0] sm:$0xff]  ;;  %v5766_v13 = vpack.c.bf16 %v5712_v15, %v5711_v17 }
 0x3da   :  { %12887 = vmatprep.mubr.msk.bf16.mxu0 %vm226_vm0, %v17696_v24  ;;  %v5713_v41 = vld [vmem:[#allocation2 + $0xf1] sm:$0xff]  ;;  %v5714_v16 = vld [vmem:[#allocation2 + $0xf9] sm:$0xff]  ;;  %v17714_v0 = vpack.c.bf16 %v5614_v10, %v5613_v4  ;;  %v5715_v42 = vld [vmem:[#allocation2 + $0x109] sm:$0xff] }
 0x3db   :  { %v5616_v14 = vld [vmem:[#allocation2 + $0xf8] sm:$0xff]  ;;  %v5767_v58 = vpack.c.bf16 %v5714_v16, %v5713_v41  ;;  %v17730_v51 = vld [vmem:[%s19702_s4 + $0x20] sm:$0xff]   ;;  %v5617_v56 = vld [vmem:[#allocation2 + $0x108] sm:$0xff] }
 0x3dc   :  { %v17716_v8 = vpack.c.bf16 %v5616_v14, %v5615_v20  ;;  %v13414_v22 = vld [vmem:[%s19702_s4 + $0x18] sm:$0xff]   ;;  %v5618_v57 = vld [vmem:[#allocation2 + $0x110] sm:$0xff]  ;;  %v5717_v53 = vld [vmem:[#allocation2 + $0x121] sm:$0xff]  ;;  %13071 = vmatprep.subr.bf16.mxu1 %v17730_v51 }
 0x3dd   :  { %v5716_v50 = vld [vmem:[#allocation2 + $0x111] sm:$0xff]  ;;  %13005 = vmatprep.subr.bf16.mxu0 %v13414_v22  ;;  %v5718_v18 = vld [vmem:[#allocation2 + $0x129] sm:$0xff]  ;;  %v5619_v23 = vld [vmem:[#allocation2 + $0x120] sm:$0xff]  ;;  %v17733_v46 = vpack.c.bf16 %v5618_v57, %v5617_v56 }
 0x3de   :  { %v5620_v5 = vld [vmem:[#allocation2 + $0x128] sm:$0xff]  ;;  %13006 = vmatpush3.bf16.msra.mxu0 %v13414_v22  ;;  %v5768_v60 = vpack.c.bf16 %v5716_v50, %v5715_v42  ;;  %v5769_v28 = vpack.c.bf16 %v5718_v18, %v5717_v53  ;;  %v5719_v52 = vld [vmem:[#allocation2 + $0x139] sm:$0xff]  ;;  %v5721_v31 = vld [vmem:[#allocation2 + $0x151] sm:$0xff] }
 0x3df   :  { %v17735_v2 = vpack.c.bf16 %v5620_v5, %v5619_v23  ;;  %v5720_v7 = vld [vmem:[#allocation2 + $0x141] sm:$0xff]  ;;  %v5621_v63 = vld [vmem:[#allocation2 + $0x138] sm:$0xff]  ;;  %v5623_v29 = vld [vmem:[#allocation2 + $0x150] sm:$0xff] }
 0x3e0   :  { %12822 = vmatmul.mubr.msk.bf16.gmra.mxu1 %vm226_vm0, %v5764_v33  ;;  %v5622_v12 = vld [vmem:[#allocation2 + $0x140] sm:$0xff]  ;;  %v5624_v62 = vld [vmem:[#allocation2 + $0x158] sm:$0xff]  ;;  %v5770_v61 = vpack.c.bf16 %v5720_v7, %v5719_v52  ;;  %v5723_v26 = vld [vmem:[#allocation2 + $0x169] sm:$0xff] }
 0x3e1   :  { %12888 = vmatmul.mubr.msk.bf16.gmra.mxu0 %vm226_vm0, %v17704_v38  ;;  %12825 = vmatprep.mubr.msk.bf16.mxu1 %vm226_vm0, %v5765_v34  ;;  %v5722_v37 = vld [vmem:[#allocation2 + $0x159] sm:$0xff]  ;;  %v17743_v27 = vpack.c.bf16 %v5622_v12, %v5621_v63  ;;  %v17745_v11 = vpack.c.bf16 %v5624_v62, %v5623_v29  ;;  %v5725_v3 = vld [vmem:[#allocation2 + $0x1b1] sm:$0xff]  ;;  %v5625_v47 = vld [vmem:[#allocation2 + $0x168] sm:$0xff] }
 0x3e2   :  { %12891 = vmatprep.mubr.msk.bf16.mxu0 %vm226_vm0, %v17706_v59  ;;  %v5771_v9 = vpack.c.bf16 %v5722_v37, %v5721_v31  ;;  %v5726_v44 = vld [vmem:[#allocation2 + $0x1b9] sm:$0xff]  ;;  %v5627_v39 = vld [vmem:[#allocation2 + $0x1b0] sm:$0xff]  ;;  %v5629_v43 = vld [vmem:[#allocation2 + $0x1c8] sm:$0xff] }
 0x3e3   :  { %v5628_v25 = vld [vmem:[#allocation2 + $0x1b8] sm:$0xff]  ;;  %v5626_v6 = vld [vmem:[#allocation2 + $0x170] sm:$0xff]  ;;  %v5773_v1 = vpack.c.bf16 %v5726_v44, %v5725_v3  ;;  %v5729_v33 = vld [vmem:[#allocation2 + $0x1e1] sm:$0xff] }
 0x3e4   :  { %v5724_v48 = vld [vmem:[#allocation2 + $0x171] sm:$0xff]  ;;  %v5675_v54 = vpack.c.bf16 %v5628_v25, %v5627_v39  ;;  %v17753_v30 = vpack.c.bf16 %v5626_v6, %v5625_v47  ;;  %v5727_v35 = vld [vmem:[#allocation2 + $0x1c9] sm:$0xff]  ;;  %v5631_v17 = vld [vmem:[#allocation2 + $0x1e0] sm:$0xff] }
 0x3e5   :  { %v5772_v49 = vpack.c.bf16 %v5724_v48, %v5723_v26  ;;  %v5728_v21 = vld [vmem:[#allocation2 + $0x1d1] sm:$0xff]  ;;  %v5730_v34 = vld [vmem:[#allocation2 + $0x1e9] sm:$0xff]  ;;  %v5731_v20 = vld [vmem:[#allocation2 + $0x1f9] sm:$0xff] }
 0x3e6   :  { %v5630_v40 = vld [vmem:[#allocation2 + $0x1d0] sm:$0xff]  ;;  %v5632_v15 = vld [vmem:[#allocation2 + $0x1e8] sm:$0xff]  ;;  %v5774_v4 = vpack.c.bf16 %v5728_v21, %v5727_v35  ;;  %v5775_v41 = vpack.c.bf16 %v5730_v34, %v5729_v33  ;;  %v5734_v42 = vld [vmem:[#allocation2 + $0x219] sm:$0xff] }
 0x3e7   :  { %v17760_v10 = vpack.c.bf16 %v5630_v40, %v5629_v43  ;;  %v17762_v16 = vpack.c.bf16 %v5632_v15, %v5631_v17  ;;  %v5732_v14 = vld [vmem:[#allocation2 + $0x201] sm:$0xff]  ;;  %v5733_v22 = vld [vmem:[#allocation2 + $0x211] sm:$0xff]  ;;  %v5735_v5 = vld [vmem:[#allocation2 + $0x229] sm:$0xff] }
 0x3e8   :  { %12826 = vmatmul.mubr.msk.bf16.gmra.mxu1 %vm226_vm0, %v5766_v13  ;;  %v5633_v13 = vld [vmem:[#allocation2 + $0x1f8] sm:$0xff]  ;;  %v5635_v50 = vld [vmem:[#allocation2 + $0x210] sm:$0xff]  ;;  %v5776_v57 = vpack.c.bf16 %v5732_v14, %v5731_v20  ;;  %v5777_v18 = vpack.c.bf16 %v5734_v42, %v5733_v22  ;;  %v5737_v7 = vld [vmem:[#allocation2 + $0x241] sm:$0xff] }
 0x3e9   :  { %12892 = vmatmul.mubr.msk.bf16.gmra.mxu0 %vm226_vm0, %v17714_v0  ;;  %12829 = vmatprep.mubr.msk.bf16.mxu1 %vm226_vm0, %v5767_v58  ;;  %v5634_v58 = vld [vmem:[#allocation2 + $0x200] sm:$0xff]  ;;  %v5636_v56 = vld [vmem:[#allocation2 + $0x218] sm:$0xff]  ;;  %v5638_v52 = vld [vmem:[#allocation2 + $0x230] sm:$0xff] }
 0x3ea   :  { %12895 = vmatprep.mubr.msk.bf16.mxu0 %vm226_vm0, %v17716_v8  ;;  %v17770_v53 = vpack.c.bf16 %v5634_v58, %v5633_v13  ;;  %v17772_v23 = vpack.c.bf16 %v5636_v56, %v5635_v50  ;;  %v5738_v63 = vld [vmem:[#allocation2 + $0x249] sm:$0xff]  ;;  %v5639_v12 = vld [vmem:[#allocation2 + $0x240] sm:$0xff]  ;;  %v5641_v44 = vld [vmem:[#allocation2 + $0x258] sm:$0xff] }
 0x3eb   :  { %v5640_v31 = vld [vmem:[#allocation2 + $0x248] sm:$0xff]  ;;  %v5779_v62 = vpack.c.bf16 %v5738_v63, %v5737_v7  ;;  %v5642_v26 = vld [vmem:[#allocation2 + $0x260] sm:$0xff]  ;;  %v5741_v39 = vld [vmem:[#allocation2 + $0x271] sm:$0xff] }
 0x3ec   :  { %v5740_v3 = vld [vmem:[#allocation2 + $0x261] sm:$0xff]  ;;  %v5742_v25 = vld [vmem:[#allocation2 + $0x279] sm:$0xff]  ;;  %v5643_v48 = vld [vmem:[#allocation2 + $0x270] sm:$0xff] }
 0x3ed   :  { %v5644_v47 = vld [vmem:[#allocation2 + $0x278] sm:$0xff]  ;;  %v5743_v35 = vld [vmem:[#allocation2 + $0x289] sm:$0xff]  ;;  %v5745_v33 = vld [vmem:[#allocation2 + $0x2a1] sm:$0xff] }
 0x3ee   :  { %v5744_v21 = vld [vmem:[#allocation2 + $0x291] sm:$0xff]  ;;  %v5645_v43 = vld [vmem:[#allocation2 + $0x288] sm:$0xff]  ;;  %v5647_v17 = vld [vmem:[#allocation2 + $0x2a0] sm:$0xff] }
 0x3ef   :  { %v5646_v40 = vld [vmem:[#allocation2 + $0x290] sm:$0xff]  ;;  %v5648_v15 = vld [vmem:[#allocation2 + $0x2a8] sm:$0xff]  ;;  %v5747_v13 = vld [vmem:[#allocation2 + $0x2b9] sm:$0xff] }
 0x3f0   :  { %12830 = vmatmul.mubr.msk.bf16.gmra.mxu1 %vm226_vm0, %v5768_v60  ;;  %v5736_v60 = vld [vmem:[#allocation2 + $0x231] sm:$0xff]  ;;  %v5746_v34 = vld [vmem:[#allocation2 + $0x2a9] sm:$0xff]  ;;  %v17802_v14 = vpack.c.bf16 %v5648_v15, %v5647_v17  ;;  %v5748_v58 = vld [vmem:[#allocation2 + $0x2c1] sm:$0xff] }
 0x3f1   :  { %12896 = vmatmul.mubr.msk.bf16.gmra.mxu0 %vm226_vm0, %v17733_v46  ;;  %12833 = vmatprep.mubr.msk.bf16.mxu1 %vm226_vm0, %v5769_v28  ;;  %v5637_v28 = vld [vmem:[#allocation2 + $0x228] sm:$0xff]  ;;  %v5778_v37 = vpack.c.bf16 %v5736_v60, %v5735_v5  ;;  %v5783_v20 = vpack.c.bf16 %v5746_v34, %v5745_v33  ;;  %v5649_v22 = vld [vmem:[#allocation2 + $0x2b8] sm:$0xff]  ;;  %v5650_v42 = vld [vmem:[#allocation2 + $0x2c0] sm:$0xff]  ;;  %v5784_v5 = vpack.c.bf16 %v5748_v58, %v5747_v13 }
 0x3f2   :  { %12899 = vmatprep.mubr.msk.bf16.mxu0 %vm226_vm0, %v17735_v2  ;;  %v17780_v29 = vpack.c.bf16 %v5638_v52, %v5637_v28  ;;  %v5749_v50 = vld [vmem:[#allocation2 + $0x2d1] sm:$0xff]  ;;  %v5750_v56 = vld [vmem:[#allocation2 + $0x2d9] sm:$0xff]  ;;  %v17810_v60 = vpack.c.bf16 %v5650_v42, %v5649_v22  ;;  %v5751_v7 = vld [vmem:[#allocation2 + $0x2e9] sm:$0xff] }
 0x3f3   :  { %v5785_v28 = vpack.c.bf16 %v5750_v56, %v5749_v50  ;;  %v5752_v63 = vld [vmem:[#allocation2 + $0x2f1] sm:$0xff]  ;;  %v6575_v34 = vld [vmem:[#allocation2 + $0x1a] sm:$0xff]  ;;  %v6576_v17 = vld [vmem:[#allocation2 + $0x22] sm:$0xff] }
 0x3f4   :  { %v6577_v15 = vld [vmem:[#allocation2 + $0x32] sm:$0xff]  ;;  %v17841_v13 = vpack.c.bf16 %v6576_v17, %v6575_v34  ;;  %v6579_v22 = vld [vmem:[#allocation2 + $0x4a] sm:$0xff]  ;;  %v6581_v50 = vld [vmem:[#allocation2 + $0x62] sm:$0xff] }
 0x3f5   :  { %v6580_v42 = vld [vmem:[#allocation2 + $0x52] sm:$0xff]  ;;  %v7156_v17 = vld [vmem:[#allocation2 + $0x180] sm:$0xff] }
 0x3f6   :  { %v17860_v56 = vpack.c.bf16 %v6580_v42, %v6579_v22  ;;  %v6604_v34 = vld [vmem:[#allocation2 + $0x172] sm:$0xff]  ;;  %v6609_v42 = vld [vmem:[#allocation2 + $0x1e2] sm:$0xff] }
 0x3f8   :  { %12834 = vmatmul.mubr.msk.bf16.gmra.mxu1 %vm226_vm0, %v5770_v61  ;;  %v17782_v61 = vpack.c.bf16 %v5640_v31, %v5639_v12  ;;  %v5653_v12 = vld [vmem:[#allocation2 + $0x2e8] sm:$0xff]  ;;  %v5654_v31 = vld [vmem:[#allocation2 + $0x2f0] sm:$0xff] }
 0x3f9   :  { %12900 = vmatmul.mubr.msk.bf16.gmra.mxu0 %vm226_vm0, %v17743_v27  ;;  %12837 = vmatprep.mubr.msk.bf16.mxu1 %vm226_vm0, %v5771_v9  ;;  %v5739_v9 = vld [vmem:[#allocation2 + $0x259] sm:$0xff] }
 0x3fa   :  { %12903 = vmatprep.mubr.msk.bf16.mxu0 %vm226_vm0, %v17745_v11  ;;  %v5780_v6 = vpack.c.bf16 %v5740_v3, %v5739_v9  ;;  %v5655_v9 = vld [vmem:[#allocation2 + $0x300] sm:$0xff]  ;;  %v5656_v3 = vld [vmem:[#allocation2 + $0x308] sm:$0xff] }
 0x400   :  { %12838 = vmatmul.mubr.msk.bf16.gmra.mxu1 %vm226_vm0, %v5772_v49  ;;  %v17792_v49 = vpack.c.bf16 %v5644_v47, %v5643_v48  ;;  %v5756_v48 = vld [vmem:[#allocation2 + $0x321] sm:$0xff] }
 0x401   :  { %12904 = vmatmul.mubr.msk.bf16.gmra.mxu0 %vm226_vm0, %v17753_v30  ;;  %12841 = vmatprep.mubr.msk.bf16.mxu1 %vm226_vm0, %v5773_v1  ;;  %v17790_v1 = vpack.c.bf16 %v5642_v26, %v5641_v44  ;;  %v5786_v44 = vpack.c.bf16 %v5752_v63, %v5751_v7  ;;  %v17820_v26 = vpack.c.bf16 %v5654_v31, %v5653_v12  ;;  %v6573_v47 = vld [vmem:[#allocation2 + $0x2] sm:$0xff]  ;;  %v6590_v12 = vld [vmem:[#allocation2 + $0xca] sm:$0xff] }
 0x402   :  { %12907 = vmatprep.mubr.msk.bf16.mxu0 %vm226_vm0, %v5675_v54  ;;  %v5781_v54 = vpack.c.bf16 %v5742_v25, %v5741_v39  ;;  %v17822_v25 = vpack.c.bf16 %v5656_v3, %v5655_v9  ;;  %v6589_v63 = vld [vmem:[#allocation2 + $0xc2] sm:$0xff]  ;;  %v6594_v9 = vld [vmem:[#allocation2 + $0xfa] sm:$0xff] }
 0x408   :  { %12842 = vmatmul.mubr.msk.bf16.gmra.mxu1 %vm226_vm0, %v5774_v4  ;;  %v5782_v4 = vpack.c.bf16 %v5744_v21, %v5743_v35  ;;  %v5657_v35 = vld [vmem:[#allocation2 + $0x318] sm:$0xff]  ;;  %v5658_v21 = vld [vmem:[#allocation2 + $0x320] sm:$0xff] }
 0x409   :  { %12908 = vmatmul.mubr.msk.bf16.gmra.mxu0 %vm226_vm0, %v17760_v10  ;;  %12845 = vmatprep.mubr.msk.bf16.mxu1 %vm226_vm0, %v5775_v41  ;;  %v17800_v41 = vpack.c.bf16 %v5646_v40, %v5645_v43  ;;  %v17830_v33 = vpack.c.bf16 %v5658_v21, %v5657_v35  ;;  %v6602_v35 = vld [vmem:[#allocation2 + $0x15a] sm:$0xff] }
 0x40a   :  { %12911 = vmatprep.mubr.msk.bf16.mxu0 %vm226_vm0, %v17762_v16 }
 0x410   :  { %12846 = vmatmul.mubr.msk.bf16.gmra.mxu1 %vm226_vm0, %v5776_v57  ;;  %v5651_v57 = vld [vmem:[#allocation2 + $0x2d0] sm:$0xff] }
 0x411   :  { %12912 = vmatmul.mubr.msk.bf16.gmra.mxu0 %vm226_vm0, %v17770_v53  ;;  %12849 = vmatprep.mubr.msk.bf16.mxu1 %vm226_vm0, %v5777_v18  ;;  %v5652_v18 = vld [vmem:[#allocation2 + $0x2d8] sm:$0xff] }
 0x412   :  { %12915 = vmatprep.mubr.msk.bf16.mxu0 %vm226_vm0, %v17772_v23  ;;  %v17812_v52 = vpack.c.bf16 %v5652_v18, %v5651_v57  ;;  %v6585_v18 = vld [vmem:[#allocation2 + $0x92] sm:$0xff] }
 0x418   :  { %12850 = vmatmul.mubr.msk.bf16.gmra.mxu1 %vm226_vm0, %v5778_v37  ;;  %v5753_v37 = vld [vmem:[#allocation2 + $0x301] sm:$0xff] }
 0x419   :  { %12916 = vmatmul.mubr.msk.bf16.gmra.mxu0 %vm226_vm0, %v17780_v29  ;;  %12853 = vmatprep.mubr.msk.bf16.mxu1 %vm226_vm0, %v5779_v62  ;;  %v5754_v62 = vld [vmem:[#allocation2 + $0x309] sm:$0xff] }
 0x41a   :  { %12919 = vmatprep.mubr.msk.bf16.mxu0 %vm226_vm0, %v17782_v61  ;;  %v5787_v39 = vpack.c.bf16 %v5754_v62, %v5753_v37  ;;  %v17886_v37 = vpack.c.bf16 %v6590_v12, %v6589_v63  ;;  %v6593_v62 = vld [vmem:[#allocation2 + $0xf2] sm:$0xff]  ;;  %v6611_v63 = vld [vmem:[#allocation2 + $0x1fa] sm:$0xff]  ;;  %v6612_v12 = vld [vmem:[#allocation2 + $0x202] sm:$0xff] }
 0x420   :  { %12854 = vmatmul.mubr.msk.bf16.gmra.mxu1 %vm226_vm0, %v5780_v6  ;;  %v6574_v6 = vld [vmem:[#allocation2 + $0xa] sm:$0xff] }
 0x421   :  { %12920 = vmatmul.mubr.msk.bf16.gmra.mxu0 %vm226_vm0, %v17790_v1  ;;  %12857 = vmatprep.mubr.msk.bf16.mxu1 %vm226_vm0, %v5781_v54  ;;  %v5755_v54 = vld [vmem:[#allocation2 + $0x319] sm:$0xff]  ;;  %v6637_v43 = vpack.c.bf16 %v6574_v6, %v6573_v47 }
 0x422   :  { %12923 = vmatprep.mubr.msk.bf16.mxu0 %vm226_vm0, %v17792_v49  ;;  %v5788_v40 = vpack.c.bf16 %v5756_v48, %v5755_v54  ;;  %v6598_v48 = vld [vmem:[#allocation2 + $0x12a] sm:$0xff]  ;;  %v6601_v54 = vld [vmem:[#allocation2 + $0x152] sm:$0xff] }
 0x428   :  { %12858 = vmatmul.mubr.msk.bf16.gmra.mxu1 %vm226_vm0, %v5782_v4  ;;  %v6578_v4 = vld [vmem:[#allocation2 + $0x3a] sm:$0xff] }
 0x429   :  { %12924 = vmatmul.mubr.msk.bf16.gmra.mxu0 %vm226_vm0, %v17800_v41  ;;  %12861 = vmatprep.mubr.msk.bf16.mxu1 %vm226_vm0, %v5783_v20  ;;  %v13416_v20 = vld [vmem:[%s19702_s4 + $0x28] sm:$0xff]   ;;  %v17843_v58 = vpack.c.bf16 %v6578_v4, %v6577_v15 }
 0x42a   :  { %12927 = vmatprep.mubr.msk.bf16.mxu0 %vm226_vm0, %v17802_v14  ;;  %13137 = vmatprep.subr.bf16.mxu0 %v13416_v20  ;;  %v7157_v15 = vld [vmem:[#allocation2 + $0x188] sm:$0xff] }
 0x42b   :  { %v7205_v22 = vpack.c.bf16 %v7157_v15, %v7156_v17 }
 0x430   :  { %12862 = vmatmul.mubr.msk.bf16.gmra.mxu1 %vm226_vm0, %v5784_v5  ;;  %v6586_v5 = vld [vmem:[#allocation2 + $0x9a] sm:$0xff] }
 0x431   :  { %12928 = vmatmul.mubr.msk.bf16.gmra.mxu0 %vm226_vm0, %v17810_v60  ;;  %12865 = vmatprep.mubr.msk.bf16.mxu1 %vm226_vm0, %v5785_v28  ;;  %v17874_v7 = vpack.c.bf16 %v6586_v5, %v6585_v18 }
 0x432   :  { %12931 = vmatprep.mubr.msk.bf16.mxu0 %vm226_vm0, %v17812_v52 }
 0x438   :  { %12866 = vmatmul.mubr.msk.bf16.gmra.mxu1 %vm226_vm0, %v5786_v44  ;;  %v17898_v44 = vpack.c.bf16 %v6594_v9, %v6593_v62  ;;  %v6613_v62 = vld [vmem:[#allocation2 + $0x212] sm:$0xff]  ;;  %v6614_v9 = vld [vmem:[#allocation2 + $0x21a] sm:$0xff] }
 0x439   :  { %12932 = vmatmul.mubr.msk.bf16.gmra.mxu0 %vm226_vm0, %v17820_v26  ;;  %12869 = vmatprep.mubr.msk.bf16.mxu1 %vm226_vm0, %v5787_v39  ;;  %v6597_v39 = vld [vmem:[#allocation2 + $0x122] sm:$0xff] }
 0x43a   :  { %12935 = vmatprep.mubr.msk.bf16.mxu0 %vm226_vm0, %v17822_v25  ;;  %v17910_v6 = vpack.c.bf16 %v6598_v48, %v6597_v39  ;;  %v17958_v39 = vpack.c.bf16 %v6612_v12, %v6611_v63 }
 0x440   :  { %12870 = vmatmul.mubr.msk.bf16.gmra.mxu1 %vm226_vm0, %v5788_v40  ;;  %v6606_v40 = vld [vmem:[#allocation2 + $0x1ba] sm:$0xff] }
 0x441   :  { %12936 = vmatmul.mubr.msk.bf16.gmra.mxu0 %vm226_vm0, %v17830_v33  ;;  %12941 = vmatprep.mubr.msk.bf16.mxu1 %vm226_vm0, %v6637_v43  ;;  %v17922_v43 = vpack.c.bf16 %v6602_v35, %v6601_v54 }
 0x442   :  { %13007 = vmatprep.mubr.msk.bf16.mxu0 %vm226_vm0, %v17667_v36  ;;  %v17856_v36 = vld [vmem:[%s19702_s4 + $0x30] sm:$0xff]  }
 0x448   :  { %12942 = vmatmul.mubr.msk.bf16.vlgmr.msra.gmra.mxu1 %vm226_vm0, %v17841_v13 }
 0x449   :  { %13008 = vmatmul.mubr.msk.bf16.vlgmr.msra.gmra.mxu0 %vm226_vm0, %v17673_v45  ;;  %12945 = vmatprep.mubr.msk.bf16.mxu1 %vm226_vm0, %v17843_v58  ;;  %v6582_v45 = vld [vmem:[#allocation2 + $0x6a] sm:$0xff] }
 0x44a   :  { %13011 = vmatprep.mubr.msk.bf16.mxu0 %vm226_vm0, %v17684_v32  ;;  %13072 = vmatpush3.bf16.msra.mxu1 %v17730_v51  ;;  %v17862_v57 = vpack.c.bf16 %v6582_v45, %v6581_v50  ;;  %v6583_v32 = vld [vmem:[#allocation2 + $0x7a] sm:$0xff]  ;;  %v6584_v51 = vld [vmem:[#allocation2 + $0x82] sm:$0xff]  ;;  %v6610_v50 = vld [vmem:[#allocation2 + $0x1ea] sm:$0xff] }
 0x44b   :  { %13138 = vmatpush3.bf16.msra.mxu0 %v13416_v20  ;;  %13203 = vmatprep.subr.bf16.mxu1 %v17856_v36  ;;  %v17872_v28 = vpack.c.bf16 %v6584_v51, %v6583_v32  ;;  %v17942_v32 = vpack.c.bf16 %v6610_v50, %v6609_v42 }
 0x450   :  { %12946 = vmatmul.mubr.msk.bf16.gmra.mxu1 %vm226_vm0, %v17860_v56 }
 0x451   :  { %13012 = vmatmul.mubr.msk.bf16.gmra.mxu0 %vm226_vm0, %v17686_v55  ;;  %12949 = vmatprep.mubr.msk.bf16.mxu1 %vm226_vm0, %v17862_v57  ;;  %v6587_v55 = vld [vmem:[#allocation2 + $0xaa] sm:$0xff] }
 0x452   :  { %13015 = vmatprep.mubr.msk.bf16.mxu0 %vm226_vm0, %v17694_v19  ;;  %v6588_v19 = vld [vmem:[#allocation2 + $0xb2] sm:$0xff] }
 0x453   :  { %v17884_v31 = vpack.c.bf16 %v6588_v19, %v6587_v55 }
 0x458   :  { %12950 = vmatmul.mubr.msk.bf16.gmra.mxu1 %vm226_vm0, %v17872_v28 }
 0x459   :  { %13016 = vmatmul.mubr.msk.bf16.gmra.mxu0 %vm226_vm0, %v17696_v24  ;;  %12953 = vmatprep.mubr.msk.bf16.mxu1 %vm226_vm0, %v17874_v7  ;;  %v6591_v24 = vld [vmem:[#allocation2 + $0xda] sm:$0xff] }
 0x45a   :  { %13019 = vmatprep.mubr.msk.bf16.mxu0 %vm226_vm0, %v17704_v38  ;;  %v6592_v38 = vld [vmem:[#allocation2 + $0xe2] sm:$0xff] }
 0x45b   :  { %v17896_v3 = vpack.c.bf16 %v6592_v38, %v6591_v24 }
 0x460   :  { %12954 = vmatmul.mubr.msk.bf16.gmra.mxu1 %vm226_vm0, %v17884_v31 }
 0x461   :  { %13020 = vmatmul.mubr.msk.bf16.gmra.mxu0 %vm226_vm0, %v17706_v59  ;;  %12957 = vmatprep.mubr.msk.bf16.mxu1 %vm226_vm0, %v17886_v37  ;;  %v6595_v59 = vld [vmem:[#allocation2 + $0x10a] sm:$0xff] }
 0x462   :  { %13023 = vmatprep.mubr.msk.bf16.mxu0 %vm226_vm0, %v17714_v0  ;;  %v6596_v0 = vld [vmem:[#allocation2 + $0x112] sm:$0xff] }
 0x463   :  { %v17908_v47 = vpack.c.bf16 %v6596_v0, %v6595_v59 }
 0x468   :  { %12958 = vmatmul.mubr.msk.bf16.gmra.mxu1 %vm226_vm0, %v17896_v3 }
 0x469   :  { %13024 = vmatmul.mubr.msk.bf16.gmra.mxu0 %vm226_vm0, %v17716_v8  ;;  %12961 = vmatprep.mubr.msk.bf16.mxu1 %vm226_vm0, %v17898_v44  ;;  %v6599_v8 = vld [vmem:[#allocation2 + $0x13a] sm:$0xff] }
 0x46a   :  { %13027 = vmatprep.mubr.msk.bf16.mxu0 %vm226_vm0, %v17733_v46  ;;  %v6600_v46 = vld [vmem:[#allocation2 + $0x142] sm:$0xff] }
 0x46b   :  { %v17920_v21 = vpack.c.bf16 %v6600_v46, %v6599_v8  ;;  %v17962_v8 = vpack.c.bf16 %v6614_v9, %v6613_v62 }
 0x470   :  { %12962 = vmatmul.mubr.msk.bf16.gmra.mxu1 %vm226_vm0, %v17908_v47 }
 0x471   :  { %13028 = vmatmul.mubr.msk.bf16.gmra.mxu0 %vm226_vm0, %v17735_v2  ;;  %12965 = vmatprep.mubr.msk.bf16.mxu1 %vm226_vm0, %v17910_v6  ;;  %v6603_v2 = vld [vmem:[#allocation2 + $0x16a] sm:$0xff] }
 0x472   :  { %13031 = vmatprep.mubr.msk.bf16.mxu0 %vm226_vm0, %v17743_v27  ;;  %v6605_v27 = vld [vmem:[#allocation2 + $0x1b2] sm:$0xff]  ;;  %v17932_v20 = vpack.c.bf16 %v6604_v34, %v6603_v2 }
 0x473   :  { %v6653_v4 = vpack.c.bf16 %v6606_v40, %v6605_v27  ;;  %v6615_v40 = vld [vmem:[#allocation2 + $0x22a] sm:$0xff]  ;;  %v6616_v34 = vld [vmem:[#allocation2 + $0x232] sm:$0xff] }
 0x474   :  { %v17978_v42 = vpack.c.bf16 %v6616_v34, %v6615_v40 }
 0x478   :  { %12966 = vmatmul.mubr.msk.bf16.gmra.mxu1 %vm226_vm0, %v17920_v21 }
 0x479   :  { %13032 = vmatmul.mubr.msk.bf16.gmra.mxu0 %vm226_vm0, %v17745_v11  ;;  %12969 = vmatprep.mubr.msk.bf16.mxu1 %vm226_vm0, %v17922_v43  ;;  %v6607_v11 = vld [vmem:[#allocation2 + $0x1ca] sm:$0xff] }
 0x47a   :  { %13035 = vmatprep.mubr.msk.bf16.mxu0 %vm226_vm0, %v17753_v30  ;;  %v6608_v30 = vld [vmem:[#allocation2 + $0x1d2] sm:$0xff] }
 0x47b   :  { %v17940_v45 = vpack.c.bf16 %v6608_v30, %v6607_v11 }
 0x480   :  { %12970 = vmatmul.mubr.msk.bf16.gmra.mxu1 %vm226_vm0, %v17932_v20 }
 0x481   :  { %13036 = vmatmul.mubr.msk.bf16.gmra.mxu0 %vm226_vm0, %v7205_v22  ;;  %12973 = vmatprep.mubr.msk.bf16.mxu1 %vm226_vm0, %v6653_v4  ;;  %v6617_v4 = vld [vmem:[#allocation2 + $0x242] sm:$0xff]  ;;  %v6618_v22 = vld [vmem:[#allocation2 + $0x24a] sm:$0xff] }
 0x482   :  { %13039 = vmatprep.mubr.msk.bf16.mxu0 %vm226_vm0, %v17760_v10 }
 0x488   :  { %v12811_v51 = vpop.f32.mrf.mxu1  ;;  %12974 = vmatmul.mubr.msk.bf16.gmra.mxu1 %vm226_vm0, %v17940_v45 }
 0x489   :  { %v12877_v18 = vpop.f32.mrf.mxu0  ;;  %13040 = vmatmul.mubr.msk.bf16.gmra.mxu0 %vm226_vm0, %v17762_v16  ;;  %12977 = vmatprep.mubr.msk.bf16.mxu1 %vm226_vm0, %v17942_v32 }
 0x48a   :  { %v17948_v5 = vadd.f32 %v12877_v18, %v12811_v51  ;;  %13043 = vmatprep.mubr.msk.bf16.mxu0 %vm226_vm0, %v17770_v53  ;;  %v5927_v10 = vpop.f32.mrf.mxu1  ;;  %v17982_v51 = vpack.c.bf16 %v6618_v22, %v6617_v4 }
 0x48b   :  { %v6318_v55 = vpop.f32.mrf.mxu0 }
 0x48c   :  { %v17954_v19 = vadd.f32 %v6318_v55, %v5927_v10  ;;  %v12812_v24 = vpop.f32.mrf.mxu1 }
 0x48d   :  { %v12878_v38 = vpop.f32.mrf.mxu0 }
 0x48e   :  { %v17956_v59 = vadd.f32 %v12878_v38, %v12812_v24  ;;  %v5930_v16 = vpop.f32.mrf.mxu1  ;;  %v6619_v24 = vld [vmem:[#allocation2 + $0x25a] sm:$0xff]  ;;  %v6620_v38 = vld [vmem:[#allocation2 + $0x262] sm:$0xff] }
 0x48f   :  { %v6321_v0 = vpop.f32.mrf.mxu0 }
 0x490   :  { %v17960_v48 = vadd.f32 %v6321_v0, %v5930_v16  ;;  %v12815_v53 = vpop.f32.mrf.mxu1  ;;  %12978 = vmatmul.mubr.msk.bf16.gmra.mxu1 %vm226_vm0, %v17958_v39  ;;  %v6621_v16 = vld [vmem:[#allocation2 + $0x272] sm:$0xff]  ;;  %v6622_v0 = vld [vmem:[#allocation2 + $0x27a] sm:$0xff] }
 0x491   :  { %v12881_v46 = vpop.f32.mrf.mxu0  ;;  %13044 = vmatmul.mubr.msk.bf16.gmra.mxu0 %vm226_vm0, %v17772_v23  ;;  %12981 = vmatprep.mubr.msk.bf16.mxu1 %vm226_vm0, %v17962_v8  ;;  %v18002_v40 = vpack.c.bf16 %v6622_v0, %v6621_v16 }
 0x492   :  { %v17968_v54 = vadd.f32 %v12881_v46, %v12815_v53  ;;  %13047 = vmatprep.mubr.msk.bf16.mxu0 %vm226_vm0, %v17780_v29  ;;  %v5943_v35 = vpop.f32.mrf.mxu1 }
 0x493   :  { %v6334_v2 = vpop.f32.mrf.mxu0 }
 0x494   :  { %v17974_v27 = vadd.f32 %v6334_v2, %v5943_v35  ;;  %v12816_v17 = vpop.f32.mrf.mxu1  ;;  %v17998_v35 = vpack.c.bf16 %v6620_v38, %v6619_v24 }
 0x495   :  { %v12882_v15 = vpop.f32.mrf.mxu0 }
 0x496   :  { %v17976_v11 = vadd.f32 %v12882_v15, %v12816_v17  ;;  %v5946_v23 = vpop.f32.mrf.mxu1 }
 0x497   :  { %v6337_v30 = vpop.f32.mrf.mxu0 }
 0x498   :  { %v17980_v50 = vadd.f32 %v6337_v30, %v5946_v23  ;;  %v12819_v29 = vpop.f32.mrf.mxu1  ;;  %12982 = vmatmul.mubr.msk.bf16.gmra.mxu1 %vm226_vm0, %v17978_v42  ;;  %v6623_v23 = vld [vmem:[#allocation2 + $0x28a] sm:$0xff]  ;;  %v6624_v30 = vld [vmem:[#allocation2 + $0x292] sm:$0xff] }
 0x499   :  { %v12885_v18 = vpop.f32.mrf.mxu0  ;;  %13048 = vmatmul.mubr.msk.bf16.gmra.mxu0 %vm226_vm0, %v17782_v61  ;;  %12985 = vmatprep.mubr.msk.bf16.mxu1 %vm226_vm0, %v17982_v51 }
 0x49a   :  { %v17988_v10 = vadd.f32 %v12885_v18, %v12819_v29  ;;  %13051 = vmatprep.mubr.msk.bf16.mxu0 %vm226_vm0, %v17790_v1  ;;  %v5959_v55 = vpop.f32.mrf.mxu1 }
 0x49b   :  { %v6350_v63 = vpop.f32.mrf.mxu0 }
 0x49c   :  { %v17994_v12 = vadd.f32 %v6350_v63, %v5959_v55  ;;  %v12820_v62 = vpop.f32.mrf.mxu1  ;;  %v6625_v55 = vld [vmem:[#allocation2 + $0x2a2] sm:$0xff]  ;;  %v6626_v63 = vld [vmem:[#allocation2 + $0x2aa] sm:$0xff] }
 0x49d   :  { %v12886_v9 = vpop.f32.mrf.mxu0  ;;  %v18022_v16 = vpack.c.bf16 %v6626_v63, %v6625_v55 }
 0x49e   :  { %v17996_v53 = vadd.f32 %v12886_v9, %v12820_v62  ;;  %v5962_v61 = vpop.f32.mrf.mxu1  ;;  %v18018_v62 = vpack.c.bf16 %v6624_v30, %v6623_v23 }
 0x49f   :  { %v6353_v46 = vpop.f32.mrf.mxu0 }
 0x4a0   :  { %v18000_v2 = vadd.f32 %v6353_v46, %v5962_v61  ;;  %v12823_v1 = vpop.f32.mrf.mxu1  ;;  %12986 = vmatmul.mubr.msk.bf16.gmra.mxu1 %vm226_vm0, %v17998_v35 }
 0x4a1   :  { %v12889_v34 = vpop.f32.mrf.mxu0  ;;  %13052 = vmatmul.mubr.msk.bf16.gmra.mxu0 %vm226_vm0, %v17792_v49  ;;  %12989 = vmatprep.mubr.msk.bf16.mxu1 %vm226_vm0, %v18002_v40 }
 0x4a2   :  { %v18008_v17 = vadd.f32 %v12889_v34, %v12823_v1  ;;  %13055 = vmatprep.mubr.msk.bf16.mxu0 %vm226_vm0, %v17800_v41  ;;  %v5975_v15 = vpop.f32.mrf.mxu1 }
 0x4a3   :  { %v6366_v4 = vpop.f32.mrf.mxu0 }
 0x4a4   :  { %v18014_v22 = vadd.f32 %v6366_v4, %v5975_v15  ;;  %v12824_v29 = vpop.f32.mrf.mxu1  ;;  %v6627_v15 = vld [vmem:[#allocation2 + $0x2ba] sm:$0xff]  ;;  %v6628_v4 = vld [vmem:[#allocation2 + $0x2c2] sm:$0xff] }
 0x4a5   :  { %v12890_v18 = vpop.f32.mrf.mxu0 }
 0x4a6   :  { %v18016_v24 = vadd.f32 %v12890_v18, %v12824_v29  ;;  %v5978_v49 = vpop.f32.mrf.mxu1  ;;  %v6629_v29 = vld [vmem:[#allocation2 + $0x2d2] sm:$0xff]  ;;  %v6630_v18 = vld [vmem:[#allocation2 + $0x2da] sm:$0xff] }
 0x4a7   :  { %v6369_v38 = vpop.f32.mrf.mxu0 }
 0x4a8   :  { %v18020_v9 = vadd.f32 %v6369_v38, %v5978_v49  ;;  %v12827_v41 = vpop.f32.mrf.mxu1  ;;  %12990 = vmatmul.mubr.msk.bf16.gmra.mxu1 %vm226_vm0, %v18018_v62  ;;  %v18038_v49 = vpack.c.bf16 %v6628_v4, %v6627_v15 }
 0x4a9   :  { %v12893_v0 = vpop.f32.mrf.mxu0  ;;  %13056 = vmatmul.mubr.msk.bf16.gmra.mxu0 %vm226_vm0, %v17802_v14  ;;  %12993 = vmatprep.mubr.msk.bf16.mxu1 %vm226_vm0, %v18022_v16 }
 0x4aa   :  { %v18028_v61 = vadd.f32 %v12893_v0, %v12827_v41  ;;  %13059 = vmatprep.mubr.msk.bf16.mxu0 %vm226_vm0, %v17810_v60  ;;  %v5991_v46 = vpop.f32.mrf.mxu1  ;;  %v18042_v41 = vpack.c.bf16 %v6630_v18, %v6629_v29 }
 0x4ab   :  { %v6382_v1 = vpop.f32.mrf.mxu0 }
 0x4ac   :  { %v18034_v34 = vadd.f32 %v6382_v1, %v5991_v46  ;;  %v12828_v23 = vpop.f32.mrf.mxu1  ;;  %20144 = vst [vmem:[#allocation40_spill] sm:$0xff] %v18042_v41 }
 0x4ad   :  { %v12894_v30 = vpop.f32.mrf.mxu0 }
 0x4ae   :  { %v18036_v55 = vadd.f32 %v12894_v30, %v12828_v23  ;;  %v5994_v14 = vpop.f32.mrf.mxu1  ;;  %v6631_v23 = vld [vmem:[#allocation2 + $0x2ea] sm:$0xff]  ;;  %v6632_v30 = vld [vmem:[#allocation2 + $0x2f2] sm:$0xff] }
 0x4af   :  { %v6385_v63 = vpop.f32.mrf.mxu0 }
 0x4b0   :  { %20142 = vst [vmem:[#allocation44_spill] sm:$0xff] %v18036_v55  ;;  %v18040_v38 = vadd.f32 %v6385_v63, %v5994_v14  ;;  %v12831_v60 = vpop.f32.mrf.mxu1  ;;  %12994 = vmatmul.mubr.msk.bf16.gmra.mxu1 %vm226_vm0, %v18038_v49  ;;  %v6633_v14 = vld [vmem:[#allocation2 + $0x302] sm:$0xff]  ;;  %v6634_v63 = vld [vmem:[#allocation2 + $0x30a] sm:$0xff] }
 0x4b1   :  { %v12897_v0 = vpop.f32.mrf.mxu0  ;;  %13060 = vmatmul.mubr.msk.bf16.gmra.mxu0 %vm226_vm0, %v17812_v52  ;;  %12997 = vmatprep.mubr.msk.bf16.mxu1 %vm226_vm0, %v18042_v41  ;;  %v18062_v41 = vpack.c.bf16 %v6634_v63, %v6633_v14  ;;  %v7188_v14 = vld [vmem:[#allocation2 + $0x330] sm:$0xff]  ;;  %v7189_v63 = vld [vmem:[#allocation2 + $0x338] sm:$0xff] }
 0x4b2   :  { %20143 = vst [vmem:[#allocation47_spill] sm:$0xff] %v18040_v38  ;;  %v18048_v46 = vadd.f32 %v12897_v0, %v12831_v60  ;;  %13063 = vmatprep.mubr.msk.bf16.mxu0 %vm226_vm0, %v17820_v26  ;;  %v6007_v1 = vpop.f32.mrf.mxu1  ;;  %v18058_v0 = vpack.c.bf16 %v6632_v30, %v6631_v23  ;;  %v6636_v30 = vld [vmem:[#allocation2 + $0x322] sm:$0xff] }
 0x4b3   :  { %v6398_v15 = vpop.f32.mrf.mxu0  ;;  %20150 = vst [vmem:[#allocation46_spill] sm:$0xff] %v18062_v41 }
 0x4b4   :  { %20145 = vst [vmem:[#allocation59_spill] sm:$0xff] %v18048_v46  ;;  %v18054_v4 = vadd.f32 %v6398_v15, %v6007_v1  ;;  %v12832_v29 = vpop.f32.mrf.mxu1  ;;  %20148 = vst [vmem:[#allocation3_spill] sm:$0xff] %v18058_v0 }
 0x4b5   :  { %v12898_v18 = vpop.f32.mrf.mxu0 }
 0x4b6   :  { %20146 = vst [vmem:[#allocation58_spill] sm:$0xff] %v18054_v4  ;;  %v18056_v38 = vadd.f32 %v12898_v18, %v12832_v29  ;;  %v6010_v52 = vpop.f32.mrf.mxu1  ;;  %v6635_v18 = vld [vmem:[#allocation2 + $0x31a] sm:$0xff] }
 0x4b7   :  { %v6401_v60 = vpop.f32.mrf.mxu0 }
 0x4b8   :  { %20147 = vst [vmem:[#allocation45_spill] sm:$0xff] %v18056_v38  ;;  %v18060_v46 = vadd.f32 %v6401_v60, %v6010_v52  ;;  %v12835_v26 = vpop.f32.mrf.mxu1  ;;  %12998 = vmatmul.mubr.msk.bf16.gmra.mxu1 %vm226_vm0, %v18058_v0  ;;  %v7221_v38 = vpack.c.bf16 %v7189_v63, %v7188_v14 }
 0x4b9   :  { %v12901_v55 = vpop.f32.mrf.mxu0  ;;  %13064 = vmatmul.mubr.msk.bf16.gmra.mxu0 %vm226_vm0, %v17822_v25  ;;  %13001 = vmatprep.mubr.msk.bf16.mxu1 %vm226_vm0, %v18062_v41  ;;  %v7680_v25 = vld [vmem:[#allocation2 + $0x21] sm:$0xff]  ;;  %v18078_v41 = vpack.c.bf16 %v6636_v30, %v6635_v18 }
 0x4ba   :  { %20149 = vst [vmem:[#allocation7_spill] sm:$0xff] %v18060_v46  ;;  %v18068_v1 = vadd.f32 %v12901_v55, %v12835_v26  ;;  %13067 = vmatprep.mubr.msk.bf16.mxu0 %vm226_vm0, %v17830_v33  ;;  %v6023_v15 = vpop.f32.mrf.mxu1  ;;  %v7679_v46 = vld [vmem:[#allocation2 + $0x19] sm:$0xff] }
 0x4bb   :  { %v6414_v23 = vpop.f32.mrf.mxu0  ;;  %v7743_v4 = vpack.c.bf16 %v7680_v25, %v7679_v46  ;;  %v7682_v46 = vld [vmem:[#allocation2 + $0x39] sm:$0xff]  ;;  %v7684_v25 = vld [vmem:[#allocation2 + $0x51] sm:$0xff] }
 0x4bc   :  { %20151 = vst [vmem:[#allocation61_spill] sm:$0xff] %v18068_v1  ;;  %v18074_v29 = vadd.f32 %v6414_v23, %v6023_v15  ;;  %v12836_v52 = vpop.f32.mrf.mxu1 }
 0x4bd   :  { %v12902_v60 = vpop.f32.mrf.mxu0 }
 0x4be   :  { %v18076_v55 = vadd.f32 %v12902_v60, %v12836_v52  ;;  %v6026_v26 = vpop.f32.mrf.mxu1  ;;  %v7683_v60 = vld [vmem:[#allocation2 + $0x49] sm:$0xff] }
 0x4bf   :  { %v6417_v1 = vpop.f32.mrf.mxu0 }
 0x4c0   :  { %v18080_v33 = vadd.f32 %v6417_v1, %v6026_v26  ;;  %v12839_v0 = vpop.f32.mrf.mxu1  ;;  %13002 = vmatmul.mubr.msk.bf16.gmra.mxu1 %vm226_vm0, %v18078_v41  ;;  %v7681_v1 = vld [vmem:[#allocation2 + $0x31] sm:$0xff] }
 0x4c1   :  { %v12905_v15 = vpop.f32.mrf.mxu0  ;;  %13068 = vmatmul.mubr.msk.bf16.gmra.mxu0 %vm226_vm0, %v7221_v38  ;;  %13073 = vmatprep.mubr.msk.bf16.mxu1 %vm226_vm0, %v7743_v4 }
 0x4c2   :  { %v18085_v23 = vadd.f32 %v12905_v15, %v12839_v0  ;;  %13139 = vmatprep.mubr.msk.bf16.mxu0 %vm226_vm0, %v17841_v13  ;;  %v6039_v30 = vpop.f32.mrf.mxu1  ;;  %v18094_v15 = vpack.c.bf16 %v7682_v46, %v7681_v1  ;;  %v13418_v13 = vld [vmem:[%s19702_s4 + $0x38] sm:$0xff]  }
 0x4c3   :  { %v6430_v18 = vpop.f32.mrf.mxu0  ;;  %13269 = vmatprep.subr.bf16.mxu0 %v13418_v13 }
 0x4c4   :  { %20152 = vst [vmem:[#allocation4_spill] sm:$0xff] %v18085_v23  ;;  %v18090_v14 = vadd.f32 %v6430_v18, %v6039_v30  ;;  %v12840_v63 = vpop.f32.mrf.mxu1  ;;  %v18098_v23 = vpack.c.bf16 %v7684_v25, %v7683_v60  ;;  %v7685_v60 = vld [vmem:[#allocation2 + $0x61] sm:$0xff]  ;;  %v7686_v25 = vld [vmem:[#allocation2 + $0x69] sm:$0xff] }
 0x4c5   :  { %v12906_v52 = vpop.f32.mrf.mxu0 }
 0x4c6   :  { %v18092_v26 = vadd.f32 %v12906_v52, %v12840_v63  ;;  %v6042_v38 = vpop.f32.mrf.mxu1  ;;  %20153 = vst [vmem:[#allocation11_spill] sm:$0xff] %v18098_v23 }
 0x4c7   :  { %v6433_v0 = vpop.f32.mrf.mxu0 }
 0x4c8   :  { %v18096_v4 = vadd.f32 %v6433_v0, %v6042_v38  ;;  %v12843_v30 = vpop.f32.mrf.mxu1  ;;  %13074 = vmatmul.mubr.msk.bf16.vlgmr.msra.gmra.mxu1 %vm226_vm0, %v18094_v15 }
 0x4c9   :  { %v12909_v18 = vpop.f32.mrf.mxu0  ;;  %13140 = vmatmul.mubr.msk.bf16.vlgmr.msra.gmra.mxu0 %vm226_vm0, %v17843_v58  ;;  %13077 = vmatprep.mubr.msk.bf16.mxu1 %vm226_vm0, %v18098_v23  ;;  %v18119_v58 = vld [vmem:[%s19702_s4 + $0x40] sm:$0xff]  }
 0x4ca   :  { %v18107_v63 = vadd.f32 %v12909_v18, %v12843_v30  ;;  %13143 = vmatprep.mubr.msk.bf16.mxu0 %vm226_vm0, %v17860_v56  ;;  %13204 = vmatpush3.bf16.msra.mxu1 %v17856_v36  ;;  %v6055_v1 = vpop.f32.mrf.mxu1  ;;  %20156 = vst [vmem:[#allocation5_spill] sm:$0xff] %v18119_v58  ;;  %v7687_v30 = vld [vmem:[#allocation2 + $0x79] sm:$0xff]  ;;  %v7688_v18 = vld [vmem:[#allocation2 + $0x81] sm:$0xff] }
 0x4cb   :  { %v6446_v46 = vpop.f32.mrf.mxu0  ;;  %13270 = vmatpush3.bf16.msra.mxu0 %v13418_v13  ;;  %13335 = vmatprep.subr.bf16.mxu1 %v18119_v58  ;;  %v18128_v13 = vpack.c.bf16 %v7688_v18, %v7687_v30  ;;  %v7690_v30 = vld [vmem:[#allocation2 + $0x99] sm:$0xff] }
 0x4cc   :  { %20154 = vst [vmem:[#allocation48_spill] sm:$0xff] %v18107_v63  ;;  %v18114_v52 = vadd.f32 %v6446_v46, %v6055_v1  ;;  %v12844_v38 = vpop.f32.mrf.mxu1  ;;  %v18124_v1 = vpack.c.bf16 %v7686_v25, %v7685_v60 }
 0x4cd   :  { %v12910_v0 = vpop.f32.mrf.mxu0  ;;  %20160 = vst [vmem:[#allocation12_spill] sm:$0xff] %v18128_v13 }
 0x4ce   :  { %20155 = vst [vmem:[#allocation6_spill] sm:$0xff] %v18114_v52  ;;  %v18121_v56 = vadd.f32 %v12910_v0, %v12844_v38  ;;  %v6058_v36 = vpop.f32.mrf.mxu1  ;;  %20158 = vst [vmem:[#allocation8_spill] sm:$0xff] %v18124_v1  ;;  %v7689_v0 = vld [vmem:[#allocation2 + $0x91] sm:$0xff] }
 0x4cf   :  { %v6449_v63 = vpop.f32.mrf.mxu0 }
 0x4d0   :  { %20157 = vst [vmem:[#allocation62_spill] sm:$0xff] %v18121_v56  ;;  %v18126_v46 = vadd.f32 %v6449_v63, %v6058_v36  ;;  %v12847_v52 = vpop.f32.mrf.mxu1  ;;  %13078 = vmatmul.mubr.msk.bf16.gmra.mxu1 %vm226_vm0, %v18124_v1  ;;  %v7692_v56 = vld [vmem:[#allocation2 + $0xb1] sm:$0xff] }
 0x4d1   :  { %v12913_v23 = vpop.f32.mrf.mxu0  ;;  %13144 = vmatmul.mubr.msk.bf16.gmra.mxu0 %vm226_vm0, %v17862_v57  ;;  %13081 = vmatprep.mubr.msk.bf16.mxu1 %vm226_vm0, %v18128_v13 }
 0x4d2   :  { %20159 = vst [vmem:[#allocation9_spill] sm:$0xff] %v18126_v46  ;;  %v18134_v38 = vadd.f32 %v12913_v23, %v12847_v52  ;;  %13147 = vmatprep.mubr.msk.bf16.mxu0 %vm226_vm0, %v17872_v28  ;;  %v6071_v63 = vpop.f32.mrf.mxu1  ;;  %v7691_v46 = vld [vmem:[#allocation2 + $0xa9] sm:$0xff]  ;;  %v18144_v52 = vpack.c.bf16 %v7690_v30, %v7689_v0 }
 0x4d3   :  { %v6462_v60 = vpop.f32.mrf.mxu0  ;;  %v18148_v13 = vpack.c.bf16 %v7692_v56, %v7691_v46  ;;  %v7693_v46 = vld [vmem:[#allocation2 + $0xc1] sm:$0xff]  ;;  %v7694_v30 = vld [vmem:[#allocation2 + $0xc9] sm:$0xff] }
 0x4d4   :  { %20161 = vst [vmem:[#allocation65_spill] sm:$0xff] %v18134_v38  ;;  %v18140_v25 = vadd.f32 %v6462_v60, %v6071_v63  ;;  %v12848_v18 = vpop.f32.mrf.mxu1 }
 0x4d5   :  { %v12914_v36 = vpop.f32.mrf.mxu0  ;;  %20164 = vst [vmem:[#allocation13_spill] sm:$0xff] %v18148_v13 }
 0x4d6   :  { %v18142_v58 = vadd.f32 %v12914_v36, %v12848_v18  ;;  %v6074_v57 = vpop.f32.mrf.mxu1 }
 0x4d7   :  { %v6465_v23 = vpop.f32.mrf.mxu0 }
 0x4d8   :  { %20162 = vst [vmem:[#allocation63_spill] sm:$0xff] %v18142_v58  ;;  %v18146_v38 = vadd.f32 %v6465_v23, %v6074_v57  ;;  %v12851_v28 = vpop.f32.mrf.mxu1  ;;  %13082 = vmatmul.mubr.msk.bf16.gmra.mxu1 %vm226_vm0, %v18144_v52  ;;  %v7695_v57 = vld [vmem:[#allocation2 + $0xd9] sm:$0xff]  ;;  %v7696_v23 = vld [vmem:[#allocation2 + $0xe1] sm:$0xff] }
 0x4d9   :  { %v12917_v1 = vpop.f32.mrf.mxu0  ;;  %13148 = vmatmul.mubr.msk.bf16.gmra.mxu0 %vm226_vm0, %v17874_v7  ;;  %13085 = vmatprep.mubr.msk.bf16.mxu1 %vm226_vm0, %v18148_v13  ;;  %v18168_v13 = vpack.c.bf16 %v7696_v23, %v7695_v57 }
 0x4da   :  { %20163 = vst [vmem:[#allocation64_spill] sm:$0xff] %v18146_v38  ;;  %v18154_v63 = vadd.f32 %v12917_v1, %v12851_v28  ;;  %13151 = vmatprep.mubr.msk.bf16.mxu0 %vm226_vm0, %v17884_v31  ;;  %v6087_v60 = vpop.f32.mrf.mxu1  ;;  %v18164_v28 = vpack.c.bf16 %v7694_v30, %v7693_v46 }
 0x4db   :  { %v6478_v0 = vpop.f32.mrf.mxu0  ;;  %20168 = vst [vmem:[#allocation67_spill] sm:$0xff] %v18168_v13 }
 0x4dc   :  { %20165 = vst [vmem:[#allocation10_spill] sm:$0xff] %v18154_v63  ;;  %v18160_v56 = vadd.f32 %v6478_v0, %v6087_v60  ;;  %v12852_v18 = vpop.f32.mrf.mxu1 }
 0x4dd   :  { %v12918_v36 = vpop.f32.mrf.mxu0 }
 0x4de   :  { %v18162_v38 = vadd.f32 %v12918_v36, %v12852_v18  ;;  %v6090_v7 = vpop.f32.mrf.mxu1  ;;  %v7697_v18 = vld [vmem:[#allocation2 + $0xf1] sm:$0xff]  ;;  %v7698_v36 = vld [vmem:[#allocation2 + $0xf9] sm:$0xff] }
 0x4df   :  { %v6481_v1 = vpop.f32.mrf.mxu0 }
 0x4e0   :  { %20166 = vst [vmem:[#allocation68_spill] sm:$0xff] %v18162_v38  ;;  %v18166_v63 = vadd.f32 %v6481_v1, %v6090_v7  ;;  %v12855_v31 = vpop.f32.mrf.mxu1  ;;  %13086 = vmatmul.mubr.msk.bf16.gmra.mxu1 %vm226_vm0, %v18164_v28  ;;  %v7699_v7 = vld [vmem:[#allocation2 + $0x109] sm:$0xff]  ;;  %v7700_v1 = vld [vmem:[#allocation2 + $0x111] sm:$0xff] }
 0x4e1   :  { %v12921_v58 = vpop.f32.mrf.mxu0  ;;  %13152 = vmatmul.mubr.msk.bf16.gmra.mxu0 %vm226_vm0, %v17886_v37  ;;  %13089 = vmatprep.mubr.msk.bf16.mxu1 %vm226_vm0, %v18168_v13  ;;  %v18188_v13 = vpack.c.bf16 %v7700_v1, %v7699_v7 }
 0x4e2   :  { %20167 = vst [vmem:[#allocation66_spill] sm:$0xff] %v18166_v63  ;;  %v18174_v60 = vadd.f32 %v12921_v58, %v12855_v31  ;;  %13155 = vmatprep.mubr.msk.bf16.mxu0 %vm226_vm0, %v17896_v3  ;;  %v6103_v0 = vpop.f32.mrf.mxu1  ;;  %v18184_v31 = vpack.c.bf16 %v7698_v36, %v7697_v18 }
 0x4e3   :  { %v6494_v46 = vpop.f32.mrf.mxu0  ;;  %20172 = vst [vmem:[#allocation72_spill] sm:$0xff] %v18188_v13 }
 0x4e4   :  { %20169 = vst [vmem:[#allocation14_spill] sm:$0xff] %v18174_v60  ;;  %v18180_v30 = vadd.f32 %v6494_v46, %v6103_v0  ;;  %v12856_v57 = vpop.f32.mrf.mxu1 }
 0x4e5   :  { %v12922_v23 = vpop.f32.mrf.mxu0 }
 0x4e6   :  { %v18182_v63 = vadd.f32 %v12922_v23, %v12856_v57  ;;  %v6106_v37 = vpop.f32.mrf.mxu1  ;;  %v7701_v57 = vld [vmem:[#allocation2 + $0x121] sm:$0xff]  ;;  %v7702_v23 = vld [vmem:[#allocation2 + $0x129] sm:$0xff] }
 0x4e7   :  { %v6497_v58 = vpop.f32.mrf.mxu0 }
 0x4e8   :  { %20170 = vst [vmem:[#allocation15_spill] sm:$0xff] %v18182_v63  ;;  %v18186_v60 = vadd.f32 %v6497_v58, %v6106_v37  ;;  %v12859_v3 = vpop.f32.mrf.mxu1  ;;  %13090 = vmatmul.mubr.msk.bf16.gmra.mxu1 %vm226_vm0, %v18184_v31  ;;  %v7703_v37 = vld [vmem:[#allocation2 + $0x139] sm:$0xff]  ;;  %v7704_v58 = vld [vmem:[#allocation2 + $0x141] sm:$0xff] }
 0x4e9   :  { %v12925_v38 = vpop.f32.mrf.mxu0  ;;  %13156 = vmatmul.mubr.msk.bf16.gmra.mxu0 %vm226_vm0, %v17898_v44  ;;  %13093 = vmatprep.mubr.msk.bf16.mxu1 %vm226_vm0, %v18188_v13  ;;  %v18208_v13 = vpack.c.bf16 %v7704_v58, %v7703_v37 }
 0x4ea   :  { %20171 = vst [vmem:[#allocation70_spill] sm:$0xff] %v18186_v60  ;;  %v18194_v0 = vadd.f32 %v12925_v38, %v12859_v3  ;;  %13159 = vmatprep.mubr.msk.bf16.mxu0 %vm226_vm0, %v17908_v47  ;;  %v6119_v46 = vpop.f32.mrf.mxu1  ;;  %v18204_v3 = vpack.c.bf16 %v7702_v23, %v7701_v57 }
 0x4eb   :  { %v6510_v18 = vpop.f32.mrf.mxu0  ;;  %20176 = vst [vmem:[#allocation75_spill] sm:$0xff] %v18208_v13 }
 0x4ec   :  { %20173 = vst [vmem:[#allocation69_spill] sm:$0xff] %v18194_v0  ;;  %v18200_v36 = vadd.f32 %v6510_v18, %v6119_v46  ;;  %v12860_v7 = vpop.f32.mrf.mxu1 }
 0x4ed   :  { %v12926_v1 = vpop.f32.mrf.mxu0 }
 0x4ee   :  { %v18202_v60 = vadd.f32 %v12926_v1, %v12860_v7  ;;  %v6122_v44 = vpop.f32.mrf.mxu1  ;;  %v7705_v7 = vld [vmem:[#allocation2 + $0x151] sm:$0xff]  ;;  %v7706_v1 = vld [vmem:[#allocation2 + $0x159] sm:$0xff] }
 0x4ef   :  { %v6513_v38 = vpop.f32.mrf.mxu0 }
 0x4f0   :  { %20174 = vst [vmem:[#allocation71_spill] sm:$0xff] %v18202_v60  ;;  %v18206_v0 = vadd.f32 %v6513_v38, %v6122_v44  ;;  %v12863_v47 = vpop.f32.mrf.mxu1  ;;  %13094 = vmatmul.mubr.msk.bf16.gmra.mxu1 %vm226_vm0, %v18204_v3  ;;  %v7707_v44 = vld [vmem:[#allocation2 + $0x169] sm:$0xff]  ;;  %v7708_v38 = vld [vmem:[#allocation2 + $0x171] sm:$0xff] }
 0x4f1   :  { %v12929_v63 = vpop.f32.mrf.mxu0  ;;  %13160 = vmatmul.mubr.msk.bf16.gmra.mxu0 %vm226_vm0, %v17910_v6  ;;  %13097 = vmatprep.mubr.msk.bf16.mxu1 %vm226_vm0, %v18208_v13  ;;  %v18228_v13 = vpack.c.bf16 %v7708_v38, %v7707_v44  ;;  %v8262_v44 = vld [vmem:[#allocation2 + $0x182] sm:$0xff]  ;;  %v8263_v38 = vld [vmem:[#allocation2 + $0x18a] sm:$0xff] }
 0x4f2   :  { %20175 = vst [vmem:[#allocation73_spill] sm:$0xff] %v18206_v0  ;;  %v18214_v46 = vadd.f32 %v12929_v63, %v12863_v47  ;;  %13163 = vmatprep.mubr.msk.bf16.mxu0 %vm226_vm0, %v17920_v21  ;;  %v6135_v18 = vpop.f32.mrf.mxu1  ;;  %v18224_v47 = vpack.c.bf16 %v7706_v1, %v7705_v7  ;;  %v7709_v1 = vld [vmem:[#allocation2 + $0x181] sm:$0xff] }
 0x4f3   :  { %v6526_v57 = vpop.f32.mrf.mxu0  ;;  %20182 = vst [vmem:[#allocation16_spill] sm:$0xff] %v18228_v13 }
 0x4f4   :  { %20177 = vst [vmem:[#allocation74_spill] sm:$0xff] %v18214_v46  ;;  %v18220_v23 = vadd.f32 %v6526_v57, %v6135_v18  ;;  %v12864_v37 = vpop.f32.mrf.mxu1  ;;  %20180 = vst [vmem:[#allocation18_spill] sm:$0xff] %v18224_v47 }
 0x4f5   :  { %v12930_v58 = vpop.f32.mrf.mxu0 }
 0x4f6   :  { %20178 = vst [vmem:[#allocation76_spill] sm:$0xff] %v18220_v23  ;;  %v18222_v0 = vadd.f32 %v12930_v58, %v12864_v37  ;;  %v6138_v6 = vpop.f32.mrf.mxu1  ;;  %v7710_v58 = vld [vmem:[#allocation2 + $0x189] sm:$0xff] }
 0x4f7   :  { %v6529_v63 = vpop.f32.mrf.mxu0 }
 0x4f8   :  { %20179 = vst [vmem:[#allocation17_spill] sm:$0xff] %v18222_v0  ;;  %v18226_v46 = vadd.f32 %v6529_v63, %v6138_v6  ;;  %v12867_v21 = vpop.f32.mrf.mxu1  ;;  %13098 = vmatmul.mubr.msk.bf16.gmra.mxu1 %vm226_vm0, %v18224_v47  ;;  %v8311_v0 = vpack.c.bf16 %v8263_v38, %v8262_v44 }
 0x4f9   :  { %v12933_v60 = vpop.f32.mrf.mxu0  ;;  %13164 = vmatmul.mubr.msk.bf16.gmra.mxu0 %vm226_vm0, %v17922_v43  ;;  %13101 = vmatprep.mubr.msk.bf16.mxu1 %vm226_vm0, %v18228_v13  ;;  %v7712_v43 = vld [vmem:[#allocation2 + $0x1d1] sm:$0xff]  ;;  %v18244_v13 = vpack.c.bf16 %v7710_v58, %v7709_v1 }
 0x4fa   :  { %20181 = vst [vmem:[#allocation27_spill] sm:$0xff] %v18226_v46  ;;  %v18234_v18 = vadd.f32 %v12933_v60, %v12867_v21  ;;  %13167 = vmatprep.mubr.msk.bf16.mxu0 %vm226_vm0, %v17932_v20  ;;  %v6151_v57 = vpop.f32.mrf.mxu1  ;;  %v7711_v46 = vld [vmem:[#allocation2 + $0x1c9] sm:$0xff] }
 0x4fb   :  { %v6542_v7 = vpop.f32.mrf.mxu0  ;;  %v7759_v23 = vpack.c.bf16 %v7712_v43, %v7711_v46  ;;  %v7714_v46 = vld [vmem:[#allocation2 + $0x1e9] sm:$0xff]  ;;  %v7716_v43 = vld [vmem:[#allocation2 + $0x201] sm:$0xff] }
 0x4fc   :  { %20183 = vst [vmem:[#allocation20_spill] sm:$0xff] %v18234_v18  ;;  %v18240_v37 = vadd.f32 %v6542_v7, %v6151_v57  ;;  %v12868_v6 = vpop.f32.mrf.mxu1 }
 0x4fd   :  { %v12934_v63 = vpop.f32.mrf.mxu0 }
 0x4fe   :  { %v18242_v60 = vadd.f32 %v12934_v63, %v12868_v6  ;;  %v6154_v21 = vpop.f32.mrf.mxu1  ;;  %v7715_v63 = vld [vmem:[#allocation2 + $0x1f9] sm:$0xff] }
 0x4ff   :  { %v6545_v18 = vpop.f32.mrf.mxu0 }
 0x500   :  { %v18246_v20 = vadd.f32 %v6545_v18, %v6154_v21  ;;  %v12871_v47 = vpop.f32.mrf.mxu1  ;;  %13102 = vmatmul.mubr.msk.bf16.gmra.mxu1 %vm226_vm0, %v18244_v13  ;;  %v7713_v18 = vld [vmem:[#allocation2 + $0x1e1] sm:$0xff] }
 0x501   :  { %v12937_v57 = vpop.f32.mrf.mxu0  ;;  %13168 = vmatmul.mubr.msk.bf16.gmra.mxu0 %vm226_vm0, %v8311_v0  ;;  %13105 = vmatprep.mubr.msk.bf16.mxu1 %vm226_vm0, %v7759_v23 }
 0x502   :  { %20184 = vst [vmem:[#allocation32_spill] sm:$0xff] %v18246_v20  ;;  %v18251_v7 = vadd.f32 %v12937_v57, %v12871_v47  ;;  %13171 = vmatprep.mubr.msk.bf16.mxu0 %vm226_vm0, %v17940_v45  ;;  %v6167_v1 = vpop.f32.mrf.mxu1  ;;  %v18260_v57 = vpack.c.bf16 %v7714_v46, %v7713_v18 }
 0x503   :  { %v6558_v58 = vpop.f32.mrf.mxu0 }
 0x504   :  { %20185 = vst [vmem:[#allocation21_spill] sm:$0xff] %v18251_v7  ;;  %v18256_v44 = vadd.f32 %v6558_v58, %v6167_v1  ;;  %v12872_v38 = vpop.f32.mrf.mxu1  ;;  %v7761_v7 = vpack.c.bf16 %v7716_v43, %v7715_v63  ;;  %v7718_v63 = vld [vmem:[#allocation2 + $0x219] sm:$0xff] }
 0x505   :  { %v12938_v6 = vpop.f32.mrf.mxu0 }
 0x506   :  { %v18258_v21 = vadd.f32 %v12938_v6, %v12872_v38  ;;  %v6170_v0 = vpop.f32.mrf.mxu1  ;;  %v7717_v6 = vld [vmem:[#allocation2 + $0x211] sm:$0xff] }
 0x507   :  { %v6561_v47 = vpop.f32.mrf.mxu0 }
 0x508   :  { %20186 = vst [vmem:[#allocation22_spill] sm:$0xff] %v18258_v21  ;;  %v18262_v23 = vadd.f32 %v6561_v47, %v6170_v0  ;;  %v12943_v45 = vpop.f32.mrf.mxu1  ;;  %13106 = vmatmul.mubr.msk.bf16.gmra.mxu1 %vm226_vm0, %v18260_v57  ;;  %v7719_v47 = vld [vmem:[#allocation2 + $0x229] sm:$0xff]  ;;  %v18278_v21 = vpack.c.bf16 %v7718_v63, %v7717_v6  ;;  %v7721_v63 = vld [vmem:[#allocation2 + $0x241] sm:$0xff] }
 0x509   :  { %v13009_v20 = vpop.f32.mrf.mxu0  ;;  %13172 = vmatmul.mubr.msk.bf16.gmra.mxu0 %vm226_vm0, %v17942_v32  ;;  %v7064_v1 = vadd.f32 %v12943_v45, %v17948_v5  ;;  %13109 = vmatprep.mubr.msk.bf16.mxu1 %vm226_vm0, %v7761_v7 }
 0x50a   :  { %20187 = vst [vmem:[#allocation24_spill] sm:$0xff] %v18262_v23  ;;  %13175 = vmatprep.mubr.msk.bf16.mxu0 %vm226_vm0, %v17958_v39  ;;  %v6807_v58 = vpop.f32.mrf.mxu1  ;;  %v7720_v23 = vld [vmem:[#allocation2 + $0x231] sm:$0xff] }
 0x50b   :  { %v7360_v18 = vpop.f32.mrf.mxu0  ;;  %v18272_v46 = vadd.f32 %v13009_v20, %v7064_v1  ;;  %v7062_v38 = vadd.f32 %v6807_v58, %v17954_v19  ;;  %v7763_v1 = vpack.c.bf16 %v7720_v23, %v7719_v47 }
 0x50c   :  { %v12944_v43 = vpop.f32.mrf.mxu1 }
 0x50d   :  { %v13010_v0 = vpop.f32.mrf.mxu0  ;;  %v18275_v32 = vadd.f32 %v7360_v18, %v7062_v38  ;;  %v7065_v5 = vadd.f32 %v12944_v43, %v17956_v59  ;;  %v7722_v43 = vld [vmem:[#allocation2 + $0x249] sm:$0xff] }
 0x50e   :  { %v6810_v7 = vpop.f32.mrf.mxu1 }
 0x50f   :  { %v7363_v45 = vpop.f32.mrf.mxu0  ;;  %v18280_v39 = vadd.f32 %v13010_v0, %v7065_v5  ;;  %v7063_v20 = vadd.f32 %v6810_v7, %v17960_v48  ;;  %v7724_v5 = vld [vmem:[#allocation2 + $0x261] sm:$0xff] }
 0x510   :  { %v12947_v19 = vpop.f32.mrf.mxu1  ;;  %13110 = vmatmul.mubr.msk.bf16.gmra.mxu1 %vm226_vm0, %v18278_v21 }
 0x511   :  { %v13013_v58 = vpop.f32.mrf.mxu0  ;;  %13176 = vmatmul.mubr.msk.bf16.gmra.mxu0 %vm226_vm0, %v17962_v8  ;;  %v18287_v18 = vadd.f32 %v7363_v45, %v7063_v20  ;;  %v7068_v59 = vadd.f32 %v12947_v19, %v17968_v54  ;;  %13113 = vmatprep.mubr.msk.bf16.mxu1 %vm226_vm0, %v7763_v1  ;;  %v7723_v8 = vld [vmem:[#allocation2 + $0x259] sm:$0xff]  ;;  %v18299_v1 = vpack.c.bf16 %v7722_v43, %v7721_v63  ;;  %v7725_v43 = vld [vmem:[#allocation2 + $0x271] sm:$0xff] }
 0x512   :  { %13179 = vmatprep.mubr.msk.bf16.mxu0 %vm226_vm0, %v17978_v42  ;;  %v6823_v38 = vpop.f32.mrf.mxu1 }
 0x513   :  { %v7376_v48 = vpop.f32.mrf.mxu0  ;;  %v18293_v23 = vadd.f32 %v13013_v58, %v7068_v59  ;;  %v7066_v6 = vadd.f32 %v6823_v38, %v17974_v27  ;;  %v7765_v58 = vpack.c.bf16 %v7724_v5, %v7723_v8  ;;  %v7728_v5 = vld [vmem:[#allocation2 + $0x291] sm:$0xff] }
 0x514   :  { %v12948_v0 = vpop.f32.mrf.mxu1 }
 0x515   :  { %v13014_v47 = vpop.f32.mrf.mxu0  ;;  %v18296_v7 = vadd.f32 %v7376_v48, %v7066_v6  ;;  %v7069_v54 = vadd.f32 %v12948_v0, %v17976_v11  ;;  %v7726_v0 = vld [vmem:[#allocation2 + $0x279] sm:$0xff] }
 0x516   :  { %v6826_v45 = vpop.f32.mrf.mxu1 }
 0x517   :  { %v7379_v20 = vpop.f32.mrf.mxu0  ;;  %v18301_v42 = vadd.f32 %v13014_v47, %v7069_v54  ;;  %v7067_v19 = vadd.f32 %v6826_v45, %v17980_v50 }
 0x518   :  { %v12951_v27 = vpop.f32.mrf.mxu1  ;;  %13114 = vmatmul.mubr.msk.bf16.gmra.mxu1 %vm226_vm0, %v18299_v1 }
 0x519   :  { %v13017_v59 = vpop.f32.mrf.mxu0  ;;  %13180 = vmatmul.mubr.msk.bf16.gmra.mxu0 %vm226_vm0, %v17982_v51  ;;  %v18308_v38 = vadd.f32 %v7379_v20, %v7067_v19  ;;  %v7072_v11 = vadd.f32 %v12951_v27, %v17988_v10  ;;  %13117 = vmatprep.mubr.msk.bf16.mxu1 %vm226_vm0, %v7765_v58  ;;  %v7727_v51 = vld [vmem:[#allocation2 + $0x289] sm:$0xff]  ;;  %v18320_v19 = vpack.c.bf16 %v7726_v0, %v7725_v43  ;;  %v7729_v43 = vld [vmem:[#allocation2 + $0x2a1] sm:$0xff] }
 0x51a   :  { %13183 = vmatprep.mubr.msk.bf16.mxu0 %vm226_vm0, %v17998_v35  ;;  %v6839_v48 = vpop.f32.mrf.mxu1  ;;  %v7767_v27 = vpack.c.bf16 %v7728_v5, %v7727_v51  ;;  %v7730_v0 = vld [vmem:[#allocation2 + $0x2a9] sm:$0xff]  ;;  %v7732_v51 = vld [vmem:[#allocation2 + $0x2c1] sm:$0xff] }
 0x51b   :  { %v7392_v50 = vpop.f32.mrf.mxu0  ;;  %v18314_v6 = vadd.f32 %v13017_v59, %v7072_v11  ;;  %v7070_v63 = vadd.f32 %v6839_v48, %v17994_v12 }
 0x51c   :  { %v12952_v47 = vpop.f32.mrf.mxu1 }
 0x51d   :  { %v13018_v8 = vpop.f32.mrf.mxu0  ;;  %v18317_v54 = vadd.f32 %v7392_v50, %v7070_v63  ;;  %v7073_v10 = vadd.f32 %v12952_v47, %v17996_v53 }
 0x51e   :  { %v6842_v45 = vpop.f32.mrf.mxu1 }
 0x51f   :  { %v7395_v20 = vpop.f32.mrf.mxu0  ;;  %v18322_v35 = vadd.f32 %v13018_v8, %v7073_v10  ;;  %v7071_v58 = vadd.f32 %v6842_v45, %v18000_v2 }
 0x520   :  { %v12955_v12 = vpop.f32.mrf.mxu1  ;;  %13118 = vmatmul.mubr.msk.bf16.gmra.mxu1 %vm226_vm0, %v18320_v19 }
 0x521   :  { %v13021_v59 = vpop.f32.mrf.mxu0  ;;  %13184 = vmatmul.mubr.msk.bf16.gmra.mxu0 %vm226_vm0, %v18002_v40  ;;  %v18329_v11 = vadd.f32 %v7395_v20, %v7071_v58  ;;  %v7076_v53 = vadd.f32 %v12955_v12, %v18008_v17  ;;  %13121 = vmatprep.mubr.msk.bf16.mxu1 %vm226_vm0, %v7767_v27  ;;  %v7731_v40 = vld [vmem:[#allocation2 + $0x2b9] sm:$0xff]  ;;  %v18341_v20 = vpack.c.bf16 %v7730_v0, %v7729_v43 }
 0x522   :  { %13187 = vmatprep.mubr.msk.bf16.mxu0 %vm226_vm0, %v18018_v62  ;;  %v6855_v48 = vpop.f32.mrf.mxu1  ;;  %v7769_v27 = vpack.c.bf16 %v7732_v51, %v7731_v40  ;;  %v7734_v43 = vld [vmem:[#allocation2 + $0x2d9] sm:$0xff] }
 0x523   :  { %v7408_v2 = vpop.f32.mrf.mxu0  ;;  %v18335_v50 = vadd.f32 %v13021_v59, %v7076_v53  ;;  %v7074_v63 = vadd.f32 %v6855_v48, %v18014_v22 }
 0x524   :  { %v12956_v47 = vpop.f32.mrf.mxu1 }
 0x525   :  { %v13022_v8 = vpop.f32.mrf.mxu0  ;;  %v18338_v5 = vadd.f32 %v7408_v2, %v7074_v63  ;;  %v7077_v17 = vadd.f32 %v12956_v47, %v18016_v24  ;;  %v7733_v63 = vld [vmem:[#allocation2 + $0x2d1] sm:$0xff] }
 0x526   :  { %v6858_v10 = vpop.f32.mrf.mxu1 }
 0x527   :  { %v7411_v45 = vpop.f32.mrf.mxu0  ;;  %v18343_v62 = vadd.f32 %v13022_v8, %v7077_v17  ;;  %v7075_v58 = vadd.f32 %v6858_v10, %v18020_v9  ;;  %v7736_v8 = vld [vmem:[#allocation2 + $0x2f1] sm:$0xff] }
 0x528   :  { %v12959_v22 = vpop.f32.mrf.mxu1  ;;  %13122 = vmatmul.mubr.msk.bf16.gmra.mxu1 %vm226_vm0, %v18341_v20 }
 0x529   :  { %v13025_v12 = vpop.f32.mrf.mxu0  ;;  %13188 = vmatmul.mubr.msk.bf16.gmra.mxu0 %vm226_vm0, %v18022_v16  ;;  %v18350_v59 = vadd.f32 %v7411_v45, %v7075_v58  ;;  %v7080_v24 = vadd.f32 %v12959_v22, %v18028_v61  ;;  %13125 = vmatprep.mubr.msk.bf16.mxu1 %vm226_vm0, %v7769_v27  ;;  %v7735_v16 = vld [vmem:[#allocation2 + $0x2e9] sm:$0xff]  ;;  %v18362_v45 = vpack.c.bf16 %v7734_v43, %v7733_v63  ;;  %v20191_v58 = vld [vmem:[#allocation47_spill] sm:$0xff] }
 0x52a   :  { %13191 = vmatprep.mubr.msk.bf16.mxu0 %vm226_vm0, %v18038_v49  ;;  %v6871_v53 = vpop.f32.mrf.mxu1  ;;  %v20189_v61 = vld [vmem:[#allocation44_spill] sm:$0xff]  ;;  %v7771_v22 = vpack.c.bf16 %v7736_v8, %v7735_v16  ;;  %v20195_v63 = vld [vmem:[#allocation3_spill] sm:$0xff]  ;;  %v20197_v16 = vld [vmem:[#allocation58_spill] sm:$0xff] }
 0x52b   :  { %v7424_v9 = vpop.f32.mrf.mxu0  ;;  %v18356_v48 = vadd.f32 %v13025_v12, %v7080_v24  ;;  %v7078_v2 = vadd.f32 %v6871_v53, %v18034_v34  ;;  %v20192_v24 = vld [vmem:[#allocation40_spill] sm:$0xff] }
 0x52c   :  { %v12960_v0 = vpop.f32.mrf.mxu1 }
 0x52d   :  { %v13026_v47 = vpop.f32.mrf.mxu0  ;;  %v18359_v40 = vadd.f32 %v7424_v9, %v7078_v2  ;;  %v7081_v51 = vadd.f32 %v12960_v0, %v20189_v61  ;;  %v20194_v9 = vld [vmem:[#allocation59_spill] sm:$0xff] }
 0x52e   :  { %v6874_v17 = vpop.f32.mrf.mxu1  ;;  %v7737_v61 = vld [vmem:[#allocation2 + $0x301] sm:$0xff] }
 0x52f   :  { %20188 = vst [vmem:[#allocation19_spill] sm:$0xff] %v18359_v40  ;;  %v7427_v10 = vpop.f32.mrf.mxu0  ;;  %v18364_v49 = vadd.f32 %v13026_v47, %v7081_v51  ;;  %v7079_v27 = vadd.f32 %v6874_v17, %v20191_v58  ;;  %v7738_v51 = vld [vmem:[#allocation2 + $0x309] sm:$0xff]  ;;  %v20201_v40 = vld [vmem:[#allocation46_spill] sm:$0xff] }
 0x530   :  { %v12963_v34 = vpop.f32.mrf.mxu1  ;;  %13126 = vmatmul.mubr.msk.bf16.gmra.mxu1 %vm226_vm0, %v18362_v45 }
 0x531   :  { %20190 = vst [vmem:[#allocation33_spill] sm:$0xff] %v18364_v49  ;;  %v13029_v12 = vpop.f32.mrf.mxu0  ;;  %13192 = vmatmul.mubr.msk.bf16.gmra.mxu0 %vm226_vm0, %v20192_v24  ;;  %v18371_v53 = vadd.f32 %v7427_v10, %v7079_v27  ;;  %v7084_v2 = vadd.f32 %v12963_v34, %v20194_v9  ;;  %13129 = vmatprep.mubr.msk.bf16.mxu1 %vm226_vm0, %v7771_v22  ;;  %v7739_v24 = vld [vmem:[#allocation2 + $0x319] sm:$0xff]  ;;  %v7740_v10 = vld [vmem:[#allocation2 + $0x321] sm:$0xff]  ;;  %v20198_v34 = vld [vmem:[#allocation45_spill] sm:$0xff] }
 0x532   :  { %13195 = vmatprep.mubr.msk.bf16.mxu0 %vm226_vm0, %v20195_v63  ;;  %v6887_v43 = vpop.f32.mrf.mxu1  ;;  %v18383_v49 = vpack.c.bf16 %v7738_v51, %v7737_v61 }
 0x533   :  { %20193 = vst [vmem:[#allocation31_spill] sm:$0xff] %v18371_v53  ;;  %v7440_v0 = vpop.f32.mrf.mxu0  ;;  %v18377_v47 = vadd.f32 %v13029_v12, %v7084_v2  ;;  %v7082_v8 = vadd.f32 %v6887_v43, %v20197_v16  ;;  %v20200_v12 = vld [vmem:[#allocation7_spill] sm:$0xff] }
 0x534   :  { %v12964_v17 = vpop.f32.mrf.mxu1 }
 0x535   :  { %20196 = vst [vmem:[#allocation25_spill] sm:$0xff] %v18377_v47  ;;  %v13030_v58 = vpop.f32.mrf.mxu0  ;;  %v18380_v27 = vadd.f32 %v7440_v0, %v7082_v8  ;;  %v7085_v9 = vadd.f32 %v12964_v17, %v20198_v34  ;;  %v7773_v47 = vpack.c.bf16 %v7740_v10, %v7739_v24  ;;  %v20203_v8 = vld [vmem:[#allocation61_spill] sm:$0xff]  ;;  %v7742_v34 = vld [vmem:[#allocation2 + $0x339] sm:$0xff] }
 0x536   :  { %v6890_v22 = vpop.f32.mrf.mxu1 }
 0x537   :  { %v7443_v53 = vpop.f32.mrf.mxu0  ;;  %v18385_v63 = vadd.f32 %v13030_v58, %v7085_v9  ;;  %v7083_v2 = vadd.f32 %v6890_v22, %v20200_v12  ;;  %v7741_v58 = vld [vmem:[#allocation2 + $0x331] sm:$0xff]  ;;  %v8295_v22 = vld [vmem:[#allocation2 + $0x33a] sm:$0xff] }
 0x538   :  { %v12967_v43 = vpop.f32.mrf.mxu1  ;;  %13130 = vmatmul.mubr.msk.bf16.gmra.mxu1 %vm226_vm0, %v18383_v49  ;;  %v8294_v9 = vld [vmem:[#allocation2 + $0x332] sm:$0xff] }
 0x539   :  { %20199 = vst [vmem:[#allocation36_spill] sm:$0xff] %v18385_v63  ;;  %v13033_v16 = vpop.f32.mrf.mxu0  ;;  %13196 = vmatmul.mubr.msk.bf16.gmra.mxu0 %vm226_vm0, %v20201_v40  ;;  %v18392_v0 = vadd.f32 %v7443_v53, %v7083_v2  ;;  %v7088_v17 = vadd.f32 %v12967_v43, %v20203_v8  ;;  %13133 = vmatprep.mubr.msk.bf16.mxu1 %vm226_vm0, %v7773_v47  ;;  %v8786_v12 = vld [vmem:[#allocation2 + $0x30] sm:$0xff]  ;;  %v8787_v2 = vld [vmem:[#allocation2 + $0x38] sm:$0xff] }
 0x53a   :  { %13199 = vmatprep.mubr.msk.bf16.mxu0 %vm226_vm0, %v18078_v41  ;;  %v6903_v61 = vpop.f32.mrf.mxu1  ;;  %v8327_v63 = vpack.c.bf16 %v8295_v22, %v8294_v9  ;;  %v8788_v22 = vld [vmem:[#allocation2 + $0x48] sm:$0xff] }
 0x53b   :  { %20202 = vst [vmem:[#allocation37_spill] sm:$0xff] %v18392_v0  ;;  %v7456_v51 = vpop.f32.mrf.mxu0  ;;  %v18398_v24 = vadd.f32 %v13033_v16, %v7088_v17  ;;  %v7086_v10 = vadd.f32 %v6903_v61, %v18074_v29  ;;  %v18404_v0 = vpack.c.bf16 %v7742_v34, %v7741_v58  ;;  %v8850_v17 = vpack.c.bf16 %v8787_v2, %v8786_v12  ;;  %v8791_v2 = vld [vmem:[#allocation2 + $0x68] sm:$0xff] }
 0x53c   :  { %v12968_v40 = vpop.f32.mrf.mxu1 }
 0x53d   :  { %20204 = vst [vmem:[#allocation28_spill] sm:$0xff] %v18398_v24  ;;  %v13034_v53 = vpop.f32.mrf.mxu0  ;;  %v18401_v43 = vadd.f32 %v7456_v51, %v7086_v10  ;;  %v7089_v47 = vadd.f32 %v12968_v40, %v18076_v55  ;;  %v20205_v55 = vld [vmem:[#allocation4_spill] sm:$0xff]  ;;  %v8789_v40 = vld [vmem:[#allocation2 + $0x50] sm:$0xff] }
 0x53e   :  { %v6906_v8 = vpop.f32.mrf.mxu1 }
 0x53f   :  { %v7459_v41 = vpop.f32.mrf.mxu0  ;;  %v18406_v16 = vadd.f32 %v13034_v53, %v7089_v47  ;;  %v7087_v29 = vadd.f32 %v6906_v8, %v18080_v33 }
 0x540   :  { %v12971_v61 = vpop.f32.mrf.mxu1  ;;  %13134 = vmatmul.mubr.msk.bf16.gmra.mxu1 %vm226_vm0, %v18404_v0 }
 0x541   :  { %v13037_v24 = vpop.f32.mrf.mxu0  ;;  %13200 = vmatmul.mubr.msk.bf16.gmra.mxu0 %vm226_vm0, %v8327_v63  ;;  %v18412_v51 = vadd.f32 %v7459_v41, %v7087_v29  ;;  %v7092_v10 = vadd.f32 %v12971_v61, %v20205_v55  ;;  %13205 = vmatprep.mubr.msk.bf16.mxu1 %vm226_vm0, %v8850_v17  ;;  %v8790_v63 = vld [vmem:[#allocation2 + $0x60] sm:$0xff]  ;;  %v8851_v17 = vpack.c.bf16 %v8789_v40, %v8788_v22  ;;  %v20212_v22 = vld [vmem:[#allocation5_spill] sm:$0xff] }
 0x542   :  { %13271 = vmatprep.mubr.msk.bf16.mxu0 %vm226_vm0, %v18094_v15  ;;  %v6919_v58 = vpop.f32.mrf.mxu1  ;;  %v8852_v61 = vpack.c.bf16 %v8791_v2, %v8790_v63  ;;  %v8792_v2 = vld [vmem:[#allocation2 + $0x78] sm:$0xff] }
 0x543   :  { %v7472_v34 = vpop.f32.mrf.mxu0  ;;  %v18418_v33 = vadd.f32 %v13037_v24, %v7092_v10  ;;  %v7090_v9 = vadd.f32 %v6919_v58, %v18090_v14  ;;  %v20208_v10 = vld [vmem:[#allocation11_spill] sm:$0xff] }
 0x544   :  { %v12972_v53 = vpop.f32.mrf.mxu1 }
 0x545   :  { %v13038_v12 = vpop.f32.mrf.mxu0  ;;  %v18421_v47 = vadd.f32 %v7472_v34, %v7090_v9  ;;  %v7093_v8 = vadd.f32 %v12972_v53, %v18092_v26  ;;  %v20210_v34 = vld [vmem:[#allocation48_spill] sm:$0xff] }
 0x546   :  { %v6922_v41 = vpop.f32.mrf.mxu1  ;;  %v20211_v26 = vld [vmem:[#allocation8_spill] sm:$0xff] }
 0x547   :  { %20206 = vst [vmem:[#allocation38_spill] sm:$0xff] %v18421_v47  ;;  %v7475_v29 = vpop.f32.mrf.mxu0  ;;  %v18424_v15 = vadd.f32 %v13038_v12, %v7093_v8  ;;  %v7091_v24 = vadd.f32 %v6922_v41, %v18096_v4  ;;  %v20214_v12 = vld [vmem:[#allocation6_spill] sm:$0xff]  ;;  %v8793_v8 = vld [vmem:[#allocation2 + $0x80] sm:$0xff] }
 0x548   :  { %v12975_v55 = vpop.f32.mrf.mxu1  ;;  %13206 = vmatmul.mubr.msk.bf16.vlgmr.msra.gmra.mxu1 %vm226_vm0, %v8851_v17  ;;  %v8794_v17 = vld [vmem:[#allocation2 + $0x90] sm:$0xff] }
 0x549   :  { %20207 = vst [vmem:[#allocation60_spill] sm:$0xff] %v18424_v15  ;;  %v13041_v14 = vpop.f32.mrf.mxu0  ;;  %13272 = vmatmul.mubr.msk.bf16.vlgmr.msra.gmra.mxu0 %vm226_vm0, %v20208_v10  ;;  %v18430_v58 = vadd.f32 %v7475_v29, %v7091_v24  ;;  %v7096_v9 = vadd.f32 %v12975_v55, %v20210_v34  ;;  %13209 = vmatprep.mubr.msk.bf16.mxu1 %vm226_vm0, %v8852_v61  ;;  %v8795_v24 = vld [vmem:[#allocation2 + $0x98] sm:$0xff]  ;;  %v20216_v15 = vld [vmem:[#allocation9_spill] sm:$0xff] }
 0x54a   :  { %13275 = vmatprep.mubr.msk.bf16.mxu0 %vm226_vm0, %v20211_v26  ;;  %13336 = vmatpush3.bf16.msra.mxu1 %v20212_v22  ;;  %v6935_v4 = vpop.f32.mrf.mxu1  ;;  %v20215_v61 = vld [vmem:[#allocation62_spill] sm:$0xff] }
 0x54b   :  { %20209 = vst [vmem:[#allocation23_spill] sm:$0xff] %v18430_v58  ;;  %v7488_v40 = vpop.f32.mrf.mxu0  ;;  %v18437_v53 = vadd.f32 %v13041_v14, %v7096_v9  ;;  %v7094_v63 = vadd.f32 %v6935_v4, %v20214_v12  ;;  %v8853_v58 = vpack.c.bf16 %v8793_v8, %v8792_v2  ;;  %v8854_v9 = vpack.c.bf16 %v8795_v24, %v8794_v17  ;;  %v20217_v12 = vld [vmem:[#allocation12_spill] sm:$0xff] }
 0x54c   :  { %v12976_v41 = vpop.f32.mrf.mxu1 }
 0x54d   :  { %20213 = vst [vmem:[#allocation35_spill] sm:$0xff] %v18437_v53  ;;  %v13042_v29 = vpop.f32.mrf.mxu0  ;;  %v18440_v55 = vadd.f32 %v7488_v40, %v7094_v63  ;;  %v7097_v10 = vadd.f32 %v12976_v41, %v20215_v61  ;;  %v20219_v40 = vld [vmem:[#allocation65_spill] sm:$0xff]  ;;  %v8798_v61 = vld [vmem:[#allocation2 + $0xc0] sm:$0xff] }
 0x54e   :  { %v6938_v34 = vpop.f32.mrf.mxu1 }
 0x54f   :  { %v7491_v26 = vpop.f32.mrf.mxu0  ;;  %v18443_v22 = vadd.f32 %v13042_v29, %v7097_v10  ;;  %v7095_v14 = vadd.f32 %v6938_v34, %v20216_v15  ;;  %v8796_v29 = vld [vmem:[#allocation2 + $0xa8] sm:$0xff] }
 0x550   :  { %v12979_v53 = vpop.f32.mrf.mxu1  ;;  %13210 = vmatmul.mubr.msk.bf16.gmra.mxu1 %vm226_vm0, %v8853_v58  ;;  %v8797_v58 = vld [vmem:[#allocation2 + $0xb0] sm:$0xff]  ;;  %v8799_v10 = vld [vmem:[#allocation2 + $0xc8] sm:$0xff] }
 0x551   :  { %v13045_v4 = vpop.f32.mrf.mxu0  ;;  %13276 = vmatmul.mubr.msk.bf16.gmra.mxu0 %vm226_vm0, %v20217_v12  ;;  %v18449_v47 = vadd.f32 %v7491_v26, %v7095_v14  ;;  %v7100_v63 = vadd.f32 %v12979_v53, %v20219_v40  ;;  %13213 = vmatprep.mubr.msk.bf16.mxu1 %vm226_vm0, %v8854_v9  ;;  %v20221_v53 = vld [vmem:[#allocation63_spill] sm:$0xff]  ;;  %v8855_v12 = vpack.c.bf16 %v8797_v58, %v8796_v29  ;;  %v20222_v40 = vld [vmem:[#allocation64_spill] sm:$0xff] }
 0x552   :  { %13279 = vmatprep.mubr.msk.bf16.mxu0 %vm226_vm0, %v18144_v52  ;;  %v6951_v2 = vpop.f32.mrf.mxu1 }
 0x553   :  { %20218 = vst [vmem:[#allocation30_spill] sm:$0xff] %v18449_v47  ;;  %v7504_v8 = vpop.f32.mrf.mxu0  ;;  %v18455_v15 = vadd.f32 %v13045_v4, %v7100_v63  ;;  %v7098_v41 = vadd.f32 %v6951_v2, %v18140_v25  ;;  %v8856_v63 = vpack.c.bf16 %v8799_v10, %v8798_v61  ;;  %v20223_v2 = vld [vmem:[#allocation13_spill] sm:$0xff]  ;;  %v8800_v61 = vld [vmem:[#allocation2 + $0xd8] sm:$0xff]  ;;  %v8801_v10 = vld [vmem:[#allocation2 + $0xe0] sm:$0xff] }
 0x554   :  { %v12980_v17 = vpop.f32.mrf.mxu1 }
 0x555   :  { %20220 = vst [vmem:[#allocation49_spill] sm:$0xff] %v18455_v15  ;;  %v13046_v24 = vpop.f32.mrf.mxu0  ;;  %v18458_v34 = vadd.f32 %v7504_v8, %v7098_v41  ;;  %v7101_v26 = vadd.f32 %v12980_v17, %v20221_v53  ;;  %v20225_v8 = vld [vmem:[#allocation10_spill] sm:$0xff] }
 0x556   :  { %v6954_v14 = vpop.f32.mrf.mxu1 }
 0x557   :  { %v7507_v9 = vpop.f32.mrf.mxu0  ;;  %v18461_v52 = vadd.f32 %v13046_v24, %v7101_v26  ;;  %v7099_v4 = vadd.f32 %v6954_v14, %v20222_v40  ;;  %v8802_v14 = vld [vmem:[#allocation2 + $0xf0] sm:$0xff] }
 0x558   :  { %v12983_v15 = vpop.f32.mrf.mxu1  ;;  %13214 = vmatmul.mubr.msk.bf16.gmra.mxu1 %vm226_vm0, %v8855_v12 }
 0x559   :  { %v13049_v25 = vpop.f32.mrf.mxu0  ;;  %13280 = vmatmul.mubr.msk.bf16.gmra.mxu0 %vm226_vm0, %v20223_v2  ;;  %v18467_v47 = vadd.f32 %v7507_v9, %v7099_v4  ;;  %v7104_v41 = vadd.f32 %v12983_v15, %v20225_v8  ;;  %13217 = vmatprep.mubr.msk.bf16.mxu1 %vm226_vm0, %v8856_v63  ;;  %v8803_v9 = vld [vmem:[#allocation2 + $0xf8] sm:$0xff]  ;;  %v20227_v15 = vld [vmem:[#allocation68_spill] sm:$0xff]  ;;  %v8857_v2 = vpack.c.bf16 %v8801_v10, %v8800_v61 }
 0x55a   :  { %13283 = vmatprep.mubr.msk.bf16.mxu0 %vm226_vm0, %v18164_v28  ;;  %v6967_v29 = vpop.f32.mrf.mxu1  ;;  %v20228_v8 = vld [vmem:[#allocation66_spill] sm:$0xff] }
 0x55b   :  { %20224 = vst [vmem:[#allocation29_spill] sm:$0xff] %v18467_v47  ;;  %v7520_v58 = vpop.f32.mrf.mxu0  ;;  %v18473_v17 = vadd.f32 %v13049_v25, %v7104_v41  ;;  %v7102_v24 = vadd.f32 %v6967_v29, %v18160_v56  ;;  %v8858_v41 = vpack.c.bf16 %v8803_v9, %v8802_v14  ;;  %v20229_v29 = vld [vmem:[#allocation67_spill] sm:$0xff]  ;;  %v8804_v14 = vld [vmem:[#allocation2 + $0x108] sm:$0xff]  ;;  %v8805_v9 = vld [vmem:[#allocation2 + $0x110] sm:$0xff] }
 0x55c   :  { %v12984_v53 = vpop.f32.mrf.mxu1 }
 0x55d   :  { %20226 = vst [vmem:[#allocation34_spill] sm:$0xff] %v18473_v17  ;;  %v13050_v26 = vpop.f32.mrf.mxu0  ;;  %v18476_v12 = vadd.f32 %v7520_v58, %v7102_v24  ;;  %v7105_v40 = vadd.f32 %v12984_v53, %v20227_v15  ;;  %v20231_v58 = vld [vmem:[#allocation14_spill] sm:$0xff] }
 0x55e   :  { %v6970_v4 = vpop.f32.mrf.mxu1 }
 0x55f   :  { %v7523_v63 = vpop.f32.mrf.mxu0  ;;  %v18479_v28 = vadd.f32 %v13050_v26, %v7105_v40  ;;  %v7103_v25 = vadd.f32 %v6970_v4, %v20228_v8  ;;  %v8806_v4 = vld [vmem:[#allocation2 + $0x120] sm:$0xff] }
 0x560   :  { %v12987_v17 = vpop.f32.mrf.mxu1  ;;  %13218 = vmatmul.mubr.msk.bf16.gmra.mxu1 %vm226_vm0, %v8857_v2 }
 0x561   :  { %v13053_v56 = vpop.f32.mrf.mxu0  ;;  %13284 = vmatmul.mubr.msk.bf16.gmra.mxu0 %vm226_vm0, %v20229_v29  ;;  %v18485_v47 = vadd.f32 %v7523_v63, %v7103_v25  ;;  %v7108_v24 = vadd.f32 %v12987_v17, %v20231_v58  ;;  %13221 = vmatprep.mubr.msk.bf16.mxu1 %vm226_vm0, %v8858_v41  ;;  %v8807_v63 = vld [vmem:[#allocation2 + $0x128] sm:$0xff]  ;;  %v20233_v17 = vld [vmem:[#allocation15_spill] sm:$0xff]  ;;  %v8859_v29 = vpack.c.bf16 %v8805_v9, %v8804_v14  ;;  %v20234_v58 = vld [vmem:[#allocation70_spill] sm:$0xff] }
 0x562   :  { %13287 = vmatprep.mubr.msk.bf16.mxu0 %vm226_vm0, %v18184_v31  ;;  %v6983_v61 = vpop.f32.mrf.mxu1 }
 0x563   :  { %20230 = vst [vmem:[#allocation39_spill] sm:$0xff] %v18485_v47  ;;  %v7536_v10 = vpop.f32.mrf.mxu0  ;;  %v18491_v53 = vadd.f32 %v13053_v56, %v7108_v24  ;;  %v7106_v26 = vadd.f32 %v6983_v61, %v18180_v30  ;;  %v8860_v24 = vpack.c.bf16 %v8807_v63, %v8806_v4  ;;  %v20235_v61 = vld [vmem:[#allocation72_spill] sm:$0xff]  ;;  %v8808_v4 = vld [vmem:[#allocation2 + $0x138] sm:$0xff]  ;;  %v8809_v63 = vld [vmem:[#allocation2 + $0x140] sm:$0xff] }
 0x564   :  { %v12988_v15 = vpop.f32.mrf.mxu1 }
 0x565   :  { %20232 = vst [vmem:[#allocation41_spill] sm:$0xff] %v18491_v53  ;;  %v13054_v40 = vpop.f32.mrf.mxu0  ;;  %v18494_v2 = vadd.f32 %v7536_v10, %v7106_v26  ;;  %v7109_v8 = vadd.f32 %v12988_v15, %v20233_v17  ;;  %v20237_v10 = vld [vmem:[#allocation69_spill] sm:$0xff] }
 0x566   :  { %v6986_v25 = vpop.f32.mrf.mxu1 }
 0x567   :  { %v7539_v41 = vpop.f32.mrf.mxu0  ;;  %v18497_v31 = vadd.f32 %v13054_v40, %v7109_v8  ;;  %v7107_v56 = vadd.f32 %v6986_v25, %v20234_v58  ;;  %v8810_v25 = vld [vmem:[#allocation2 + $0x150] sm:$0xff] }
 0x568   :  { %v12991_v53 = vpop.f32.mrf.mxu1  ;;  %13222 = vmatmul.mubr.msk.bf16.gmra.mxu1 %vm226_vm0, %v8859_v29 }
 0x569   :  { %v13057_v30 = vpop.f32.mrf.mxu0  ;;  %13288 = vmatmul.mubr.msk.bf16.gmra.mxu0 %vm226_vm0, %v20235_v61  ;;  %v18503_v47 = vadd.f32 %v7539_v41, %v7107_v56  ;;  %v7112_v26 = vadd.f32 %v12991_v53, %v20237_v10  ;;  %13225 = vmatprep.mubr.msk.bf16.mxu1 %vm226_vm0, %v8860_v24  ;;  %v8811_v41 = vld [vmem:[#allocation2 + $0x158] sm:$0xff]  ;;  %v20240_v53 = vld [vmem:[#allocation71_spill] sm:$0xff]  ;;  %v8861_v61 = vpack.c.bf16 %v8809_v63, %v8808_v4  ;;  %v20242_v10 = vld [vmem:[#allocation73_spill] sm:$0xff] }
 0x56a   :  { %13291 = vmatprep.mubr.msk.bf16.mxu0 %vm226_vm0, %v18204_v3  ;;  %v6999_v14 = vpop.f32.mrf.mxu1 }
 0x56b   :  { %20236 = vst [vmem:[#allocation51_spill] sm:$0xff] %v18503_v47  ;;  %v7552_v9 = vpop.f32.mrf.mxu0  ;;  %v18509_v15 = vadd.f32 %v13057_v30, %v7112_v26  ;;  %v7110_v40 = vadd.f32 %v6999_v14, %v18200_v36  ;;  %v8862_v26 = vpack.c.bf16 %v8811_v41, %v8810_v25  ;;  %v20243_v14 = vld [vmem:[#allocation75_spill] sm:$0xff]  ;;  %v20248_v25 = vld [vmem:[#allocation76_spill] sm:$0xff] }
 0x56c   :  { %v12992_v17 = vpop.f32.mrf.mxu1 }
 0x56d   :  { %20238 = vst [vmem:[#allocation53_spill] sm:$0xff] %v18509_v15  ;;  %v13058_v8 = vpop.f32.mrf.mxu0  ;;  %v18512_v29 = vadd.f32 %v7552_v9, %v7110_v40  ;;  %v7113_v58 = vadd.f32 %v12992_v17, %v20240_v53  ;;  %v20245_v9 = vld [vmem:[#allocation74_spill] sm:$0xff]  ;;  %v8812_v53 = vld [vmem:[#allocation2 + $0x168] sm:$0xff] }
 0x56e   :  { %v7002_v56 = vpop.f32.mrf.mxu1  ;;  %v20246_v17 = vld [vmem:[#allocation18_spill] sm:$0xff] }
 0x56f   :  { %20239 = vst [vmem:[#allocation50_spill] sm:$0xff] %v18512_v29  ;;  %v7555_v24 = vpop.f32.mrf.mxu0  ;;  %v18515_v3 = vadd.f32 %v13058_v8, %v7113_v58  ;;  %v7111_v30 = vadd.f32 %v7002_v56, %v20242_v10  ;;  %v8813_v58 = vld [vmem:[#allocation2 + $0x170] sm:$0xff]  ;;  %v8814_v10 = vld [vmem:[#allocation2 + $0x180] sm:$0xff]  ;;  %v8816_v29 = vld [vmem:[#allocation2 + $0x198] sm:$0xff] }
 0x570   :  { %v12995_v15 = vpop.f32.mrf.mxu1  ;;  %13226 = vmatmul.mubr.msk.bf16.gmra.mxu1 %vm226_vm0, %v8861_v61 }
 0x571   :  { %20241 = vst [vmem:[#allocation52_spill] sm:$0xff] %v18515_v3  ;;  %v13061_v36 = vpop.f32.mrf.mxu0  ;;  %13292 = vmatmul.mubr.msk.bf16.gmra.mxu0 %vm226_vm0, %v20243_v14  ;;  %v18521_v47 = vadd.f32 %v7555_v24, %v7111_v30  ;;  %v7116_v40 = vadd.f32 %v12995_v15, %v20245_v9  ;;  %13229 = vmatprep.mubr.msk.bf16.mxu1 %vm226_vm0, %v8862_v26  ;;  %v8815_v24 = vld [vmem:[#allocation2 + $0x188] sm:$0xff]  ;;  %v20250_v15 = vld [vmem:[#allocation17_spill] sm:$0xff]  ;;  %v20252_v3 = vld [vmem:[#allocation27_spill] sm:$0xff] }
 0x572   :  { %13295 = vmatprep.mubr.msk.bf16.mxu0 %vm226_vm0, %v20246_v17  ;;  %v7015_v4 = vpop.f32.mrf.mxu1 }
 0x573   :  { %20244 = vst [vmem:[#allocation42_spill] sm:$0xff] %v18521_v47  ;;  %v7568_v63 = vpop.f32.mrf.mxu0  ;;  %v18527_v8 = vadd.f32 %v13061_v36, %v7116_v40  ;;  %v7114_v41 = vadd.f32 %v7015_v4, %v20248_v25  ;;  %v8863_v47 = vpack.c.bf16 %v8813_v58, %v8812_v53  ;;  %v8864_v40 = vpack.c.bf16 %v8815_v24, %v8814_v10  ;;  %v20253_v25 = vld [vmem:[#allocation16_spill] sm:$0xff]  ;;  %v8817_v53 = vld [vmem:[#allocation2 + $0x1a0] sm:$0xff] }
 0x574   :  { %v12996_v56 = vpop.f32.mrf.mxu1  ;;  %v9370_v58 = vld [vmem:[#allocation2 + $0x1a1] sm:$0xff] }
 0x575   :  { %20247 = vst [vmem:[#allocation43_spill] sm:$0xff] %v18527_v8  ;;  %v13062_v61 = vpop.f32.mrf.mxu0  ;;  %v18530_v30 = vadd.f32 %v7568_v63, %v7114_v41  ;;  %v7117_v14 = vadd.f32 %v12996_v56, %v20250_v15  ;;  %v20255_v41 = vld [vmem:[#allocation20_spill] sm:$0xff] }
 0x576   :  { %v7018_v26 = vpop.f32.mrf.mxu1 }
 0x577   :  { %20249 = vst [vmem:[#allocation55_spill] sm:$0xff] %v18530_v30  ;;  %v7571_v9 = vpop.f32.mrf.mxu0  ;;  %v18533_v17 = vadd.f32 %v13062_v61, %v7117_v14  ;;  %v7115_v36 = vadd.f32 %v7018_v26, %v20252_v3  ;;  %v9369_v3 = vld [vmem:[#allocation2 + $0x199] sm:$0xff]  ;;  %v8865_v26 = vpack.c.bf16 %v8817_v53, %v8816_v29  ;;  %v20258_v29 = vld [vmem:[#allocation21_spill] sm:$0xff] }
 0x578   :  { %v12999_v8 = vpop.f32.mrf.mxu1  ;;  %13230 = vmatmul.mubr.msk.bf16.gmra.mxu1 %vm226_vm0, %v8863_v47 }
 0x579   :  { %20251 = vst [vmem:[#allocation57_spill] sm:$0xff] %v18533_v17  ;;  %v13065_v4 = vpop.f32.mrf.mxu0  ;;  %13296 = vmatmul.mubr.msk.bf16.gmra.mxu0 %vm226_vm0, %v20253_v25  ;;  %v18539_v63 = vadd.f32 %v7571_v9, %v7115_v36  ;;  %v7120_v56 = vadd.f32 %v12999_v8, %v20255_v41  ;;  %13233 = vmatprep.mubr.msk.bf16.mxu1 %vm226_vm0, %v8864_v40  ;;  %v8818_v36 = vld [vmem:[#allocation2 + $0x1e0] sm:$0xff]  ;;  %v8819_v8 = vld [vmem:[#allocation2 + $0x1e8] sm:$0xff] }
 0x57a   :  { %13299 = vmatprep.mubr.msk.bf16.mxu0 %vm226_vm0, %v18244_v13  ;;  %v7031_v61 = vpop.f32.mrf.mxu1  ;;  %v9418_v9 = vpack.c.bf16 %v9370_v58, %v9369_v3  ;;  %v20257_v17 = vld [vmem:[#allocation32_spill] sm:$0xff]  ;;  %v8820_v58 = vld [vmem:[#allocation2 + $0x1f8] sm:$0xff] }
 0x57b   :  { %20254 = vst [vmem:[#allocation54_spill] sm:$0xff] %v18539_v63  ;;  %v7584_v10 = vpop.f32.mrf.mxu0  ;;  %v18545_v24 = vadd.f32 %v13065_v4, %v7120_v56  ;;  %v7118_v47 = vadd.f32 %v7031_v61, %v18240_v37  ;;  %v8866_v4 = vpack.c.bf16 %v8819_v8, %v8818_v36  ;;  %v20260_v8 = vld [vmem:[#allocation22_spill] sm:$0xff] }
 0x57c   :  { %v13000_v15 = vpop.f32.mrf.mxu1 }
 0x57d   :  { %20256 = vst [vmem:[#allocation56_spill] sm:$0xff] %v18545_v24  ;;  %v13066_v14 = vpop.f32.mrf.mxu0  ;;  %v18548_v25 = vadd.f32 %v7584_v10, %v7118_v47  ;;  %v7121_v40 = vadd.f32 %v13000_v15, %v18242_v60  ;;  %v8821_v10 = vld [vmem:[#allocation2 + $0x200] sm:$0xff] }
 0x57e   :  { %v7034_v13 = vpop.f32.mrf.mxu1  ;;  %v9373_v47 = vld [vmem:[#allocation2 + $0x1f9] sm:$0xff]  ;;  %v9374_v15 = vld [vmem:[#allocation2 + $0x201] sm:$0xff] }
 0x57f   :  { %v7587_v41 = vpop.f32.mrf.mxu0  ;;  %v18551_v63 = vadd.f32 %v13066_v14, %v7121_v40  ;;  %v7119_v30 = vadd.f32 %v7034_v13, %v20257_v17 }
 0x580   :  { %v13003_v56 = vpop.f32.mrf.mxu1  ;;  %13234 = vmatmul.mubr.msk.bf16.gmra.mxu1 %vm226_vm0, %v8865_v26  ;;  %v8822_v26 = vld [vmem:[#allocation2 + $0x210] sm:$0xff] }
 0x581   :  { %v13069_v24 = vpop.f32.mrf.mxu0  ;;  %13300 = vmatmul.mubr.msk.bf16.gmra.mxu0 %vm226_vm0, %v9418_v9  ;;  %v18556_v37 = vadd.f32 %v7587_v41, %v7119_v30  ;;  %v7124_v53 = vadd.f32 %v13003_v56, %v20258_v29  ;;  %13237 = vmatprep.mubr.msk.bf16.mxu1 %vm226_vm0, %v8866_v4  ;;  %v8823_v9 = vld [vmem:[#allocation2 + $0x218] sm:$0xff]  ;;  %v8867_v41 = vpack.c.bf16 %v8821_v10, %v8820_v58  ;;  %v8824_v10 = vld [vmem:[#allocation2 + $0x228] sm:$0xff] }
 0x582   :  { %13303 = vmatprep.mubr.msk.bf16.mxu0 %vm226_vm0, %v18260_v57  ;;  %v7047_v60 = vpop.f32.mrf.mxu1  ;;  %v9420_v4 = vpack.c.bf16 %v9374_v15, %v9373_v47 }
 0x583   :  { %v7600_v3 = vpop.f32.mrf.mxu0  ;;  %v18562_v17 = vadd.f32 %v13069_v24, %v7124_v53  ;;  %v7122_v61 = vadd.f32 %v7047_v60, %v18256_v44  ;;  %v20261_v24 = vld [vmem:[#allocation24_spill] sm:$0xff]  ;;  %v8868_v44 = vpack.c.bf16 %v8823_v9, %v8822_v26  ;;  %v9378_v26 = vld [vmem:[#allocation2 + $0x231] sm:$0xff] }
 0x584   :  { %v13004_v14 = vpop.f32.mrf.mxu1 }
 0x585   :  { %20259 = vst [vmem:[#allocation26_spill] sm:$0xff] %v18562_v17  ;;  %v13070_v30 = vpop.f32.mrf.mxu0  ;;  %v18565_v36 = vadd.f32 %v7600_v3, %v7122_v61  ;;  %v7125_v40 = vadd.f32 %v13004_v14, %v20260_v8  ;;  %v8825_v14 = vld [vmem:[#allocation2 + $0x230] sm:$0xff] }
 0x586   :  { %v7050_v13 = vpop.f32.mrf.mxu1 }
 0x587   :  { %v7603_v57 = vpop.f32.mrf.mxu0  ;;  %v18568_v56 = vadd.f32 %v13070_v30, %v7125_v40  ;;  %v7123_v29 = vadd.f32 %v7050_v13, %v20261_v24  ;;  %v9377_v30 = vld [vmem:[#allocation2 + $0x229] sm:$0xff]  ;;  %v8826_v40 = vld [vmem:[#allocation2 + $0x240] sm:$0xff] }
 0x588   :  { %v13075_v53 = vpop.f32.mrf.mxu1  ;;  %13238 = vmatmul.mubr.msk.bf16.gmra.mxu1 %vm226_vm0, %v8867_v41  ;;  %v8827_v13 = vld [vmem:[#allocation2 + $0x248] sm:$0xff]  ;;  %v9422_v24 = vpack.c.bf16 %v9378_v26, %v9377_v30  ;;  %v9381_v30 = vld [vmem:[#allocation2 + $0x259] sm:$0xff] }
 0x589   :  { %v13141_v60 = vpop.f32.mrf.mxu0  ;;  %13304 = vmatmul.mubr.msk.bf16.gmra.mxu0 %vm226_vm0, %v9420_v4  ;;  %v18573_v17 = vadd.f32 %v7603_v57, %v7123_v29  ;;  %v8170_v3 = vadd.f32 %v13075_v53, %v18272_v46  ;;  %13241 = vmatprep.mubr.msk.bf16.mxu1 %vm226_vm0, %v8868_v44  ;;  %v8869_v4 = vpack.c.bf16 %v8825_v14, %v8824_v10  ;;  %v8828_v10 = vld [vmem:[#allocation2 + $0x258] sm:$0xff]  ;;  %v8829_v14 = vld [vmem:[#allocation2 + $0x260] sm:$0xff] }
 0x58a   :  { %13307 = vmatprep.mubr.msk.bf16.mxu0 %vm226_vm0, %v18278_v21  ;;  %v7913_v58 = vpop.f32.mrf.mxu1  ;;  %v9382_v26 = vld [vmem:[#allocation2 + $0x261] sm:$0xff] }
 0x58b   :  { %v8466_v61 = vpop.f32.mrf.mxu0  ;;  %v18579_v47 = vadd.f32 %v13141_v60, %v8170_v3  ;;  %v8168_v15 = vadd.f32 %v7913_v58, %v18275_v32  ;;  %v8870_v32 = vpack.c.bf16 %v8827_v13, %v8826_v40  ;;  %v8830_v40 = vld [vmem:[#allocation2 + $0x270] sm:$0xff]  ;;  %v8831_v13 = vld [vmem:[#allocation2 + $0x278] sm:$0xff] }
 0x58c   :  { %v13076_v9 = vpop.f32.mrf.mxu1 }
 0x58d   :  { %v13142_v8 = vpop.f32.mrf.mxu0  ;;  %v18582_v46 = vadd.f32 %v8466_v61, %v8168_v15  ;;  %v8171_v57 = vadd.f32 %v13076_v9, %v18280_v39 }
 0x58e   :  { %v7916_v41 = vpop.f32.mrf.mxu1 }
 0x58f   :  { %v8469_v21 = vpop.f32.mrf.mxu0  ;;  %v18585_v29 = vadd.f32 %v13142_v8, %v8171_v57  ;;  %v8169_v44 = vadd.f32 %v7916_v41, %v18287_v18 }
 0x590   :  { %v13079_v53 = vpop.f32.mrf.mxu1  ;;  %13242 = vmatmul.mubr.msk.bf16.gmra.mxu1 %vm226_vm0, %v8869_v4  ;;  %v9424_v4 = vpack.c.bf16 %v9382_v26, %v9381_v30  ;;  %v9386_v30 = vld [vmem:[#allocation2 + $0x291] sm:$0xff] }
 0x591   :  { %v13145_v60 = vpop.f32.mrf.mxu0  ;;  %13308 = vmatmul.mubr.msk.bf16.gmra.mxu0 %vm226_vm0, %v9422_v24  ;;  %v18590_v3 = vadd.f32 %v8469_v21, %v8169_v44  ;;  %v8174_v58 = vadd.f32 %v13079_v53, %v18293_v23  ;;  %13245 = vmatprep.mubr.msk.bf16.mxu1 %vm226_vm0, %v8870_v32  ;;  %v8871_v21 = vpack.c.bf16 %v8829_v14, %v8828_v10  ;;  %v9385_v14 = vld [vmem:[#allocation2 + $0x289] sm:$0xff] }
 0x592   :  { %13311 = vmatprep.mubr.msk.bf16.mxu0 %vm226_vm0, %v18299_v1  ;;  %v7929_v39 = vpop.f32.mrf.mxu1 }
 0x593   :  { %v8482_v61 = vpop.f32.mrf.mxu0  ;;  %v18596_v18 = vadd.f32 %v13145_v60, %v8174_v58  ;;  %v8172_v15 = vadd.f32 %v7929_v39, %v18296_v7  ;;  %v8872_v7 = vpack.c.bf16 %v8831_v13, %v8830_v40  ;;  %v8835_v40 = vld [vmem:[#allocation2 + $0x2a8] sm:$0xff] }
 0x594   :  { %v13080_v9 = vpop.f32.mrf.mxu1 }
 0x595   :  { %v13146_v8 = vpop.f32.mrf.mxu0  ;;  %v18599_v23 = vadd.f32 %v8482_v61, %v8172_v15  ;;  %v8175_v57 = vadd.f32 %v13080_v9, %v18301_v42  ;;  %v8832_v61 = vld [vmem:[#allocation2 + $0x288] sm:$0xff]  ;;  %v8833_v15 = vld [vmem:[#allocation2 + $0x290] sm:$0xff] }
 0x596   :  { %v7932_v41 = vpop.f32.mrf.mxu1 }
 0x597   :  { %v8485_v1 = vpop.f32.mrf.mxu0  ;;  %v18602_v24 = vadd.f32 %v13146_v8, %v8175_v57  ;;  %v8173_v44 = vadd.f32 %v7932_v41, %v18308_v38  ;;  %v8834_v8 = vld [vmem:[#allocation2 + $0x2a0] sm:$0xff]  ;;  %v8873_v41 = vpack.c.bf16 %v8833_v15, %v8832_v61 }
 0x598   :  { %v13083_v32 = vpop.f32.mrf.mxu1  ;;  %13246 = vmatmul.mubr.msk.bf16.gmra.mxu1 %vm226_vm0, %v8871_v21  ;;  %v8837_v61 = vld [vmem:[#allocation2 + $0x2c0] sm:$0xff] }
 0x599   :  { %v13149_v53 = vpop.f32.mrf.mxu0  ;;  %13312 = vmatmul.mubr.msk.bf16.gmra.mxu0 %vm226_vm0, %v9424_v4  ;;  %v18607_v60 = vadd.f32 %v8485_v1, %v8173_v44  ;;  %v8178_v58 = vadd.f32 %v13083_v32, %v18314_v6  ;;  %13249 = vmatprep.mubr.msk.bf16.mxu1 %vm226_vm0, %v8872_v7  ;;  %v9426_v1 = vpack.c.bf16 %v9386_v30, %v9385_v14  ;;  %v9390_v15 = vld [vmem:[#allocation2 + $0x2c1] sm:$0xff] }
 0x59a   :  { %13315 = vmatprep.mubr.msk.bf16.mxu0 %vm226_vm0, %v18320_v19  ;;  %v7945_v42 = vpop.f32.mrf.mxu1 }
 0x59b   :  { %v8498_v39 = vpop.f32.mrf.mxu0  ;;  %v18613_v38 = vadd.f32 %v13149_v53, %v8178_v58  ;;  %v8176_v10 = vadd.f32 %v7945_v42, %v18317_v54  ;;  %v8874_v54 = vpack.c.bf16 %v8835_v40, %v8834_v8  ;;  %v8836_v42 = vld [vmem:[#allocation2 + $0x2b8] sm:$0xff] }
 0x59c   :  { %v13084_v26 = vpop.f32.mrf.mxu1 }
 0x59d   :  { %v13150_v9 = vpop.f32.mrf.mxu0  ;;  %v18616_v6 = vadd.f32 %v8498_v39, %v8176_v10  ;;  %v8179_v13 = vadd.f32 %v13084_v26, %v18322_v35  ;;  %v9389_v10 = vld [vmem:[#allocation2 + $0x2b9] sm:$0xff]  ;;  %v8838_v26 = vld [vmem:[#allocation2 + $0x2d0] sm:$0xff] }
 0x59e   :  { %v7948_v57 = vpop.f32.mrf.mxu1 }
 0x59f   :  { %v8501_v19 = vpop.f32.mrf.mxu0  ;;  %v18619_v21 = vadd.f32 %v13150_v9, %v8179_v13  ;;  %v8177_v4 = vadd.f32 %v7948_v57, %v18329_v11  ;;  %v8839_v9 = vld [vmem:[#allocation2 + $0x2d8] sm:$0xff]  ;;  %v8875_v13 = vpack.c.bf16 %v8837_v61, %v8836_v42  ;;  %v9428_v57 = vpack.c.bf16 %v9390_v15, %v9389_v10  ;;  %v8841_v42 = vld [vmem:[#allocation2 + $0x2f0] sm:$0xff] }
 0x5a0   :  { %v13087_v44 = vpop.f32.mrf.mxu1  ;;  %13250 = vmatmul.mubr.msk.bf16.gmra.mxu1 %vm226_vm0, %v8873_v41  ;;  %v9394_v61 = vld [vmem:[#allocation2 + $0x2f1] sm:$0xff] }
 0x5a1   :  { %v13153_v7 = vpop.f32.mrf.mxu0  ;;  %13316 = vmatmul.mubr.msk.bf16.gmra.mxu0 %vm226_vm0, %v9426_v1  ;;  %v18624_v32 = vadd.f32 %v8501_v19, %v8177_v4  ;;  %v8182_v53 = vadd.f32 %v13087_v44, %v18335_v50  ;;  %13253 = vmatprep.mubr.msk.bf16.mxu1 %vm226_vm0, %v8874_v54 }
 0x5a2   :  { %13319 = vmatprep.mubr.msk.bf16.mxu0 %vm226_vm0, %v18341_v20  ;;  %v7961_v35 = vpop.f32.mrf.mxu1 }
 0x5a3   :  { %v8514_v58 = vpop.f32.mrf.mxu0  ;;  %v18630_v11 = vadd.f32 %v13153_v7, %v8182_v53  ;;  %v8180_v39 = vadd.f32 %v7961_v35, %v18338_v5  ;;  %v8876_v5 = vpack.c.bf16 %v8839_v9, %v8838_v26  ;;  %v8840_v53 = vld [vmem:[#allocation2 + $0x2e8] sm:$0xff]  ;;  %v20262_v35 = vld [vmem:[#allocation19_spill] sm:$0xff]  ;;  %v20263_v26 = vld [vmem:[#allocation33_spill] sm:$0xff] }
 0x5a4   :  { %v13088_v14 = vpop.f32.mrf.mxu1 }
 0x5a5   :  { %v13154_v30 = vpop.f32.mrf.mxu0  ;;  %v18633_v50 = vadd.f32 %v8514_v58, %v8180_v39  ;;  %v8183_v8 = vadd.f32 %v13088_v14, %v18343_v62  ;;  %v9393_v39 = vld [vmem:[#allocation2 + $0x2e9] sm:$0xff]  ;;  %v8842_v14 = vld [vmem:[#allocation2 + $0x300] sm:$0xff] }
 0x5a6   :  { %v7964_v40 = vpop.f32.mrf.mxu1 }
 0x5a7   :  { %v8517_v20 = vpop.f32.mrf.mxu0  ;;  %v18636_v19 = vadd.f32 %v13154_v30, %v8183_v8  ;;  %v8181_v41 = vadd.f32 %v7964_v40, %v18350_v59  ;;  %v8843_v30 = vld [vmem:[#allocation2 + $0x308] sm:$0xff]  ;;  %v8877_v40 = vpack.c.bf16 %v8841_v42, %v8840_v53 }
 0x5a8   :  { %v13091_v1 = vpop.f32.mrf.mxu1  ;;  %13254 = vmatmul.mubr.msk.bf16.gmra.mxu1 %vm226_vm0, %v8875_v13 }
 0x5a9   :  { %v13157_v4 = vpop.f32.mrf.mxu0  ;;  %13320 = vmatmul.mubr.msk.bf16.gmra.mxu0 %vm226_vm0, %v9428_v57  ;;  %v18641_v54 = vadd.f32 %v8517_v20, %v8181_v41  ;;  %v8186_v44 = vadd.f32 %v13091_v1, %v18356_v48  ;;  %13257 = vmatprep.mubr.msk.bf16.mxu1 %vm226_vm0, %v8876_v5  ;;  %v9430_v20 = vpack.c.bf16 %v9394_v61, %v9393_v39  ;;  %v20264_v57 = vld [vmem:[#allocation31_spill] sm:$0xff]  ;;  %v8844_v61 = vld [vmem:[#allocation2 + $0x318] sm:$0xff] }
 0x5aa   :  { %13323 = vmatprep.mubr.msk.bf16.mxu0 %vm226_vm0, %v18362_v45  ;;  %v7977_v62 = vpop.f32.mrf.mxu1  ;;  %v8878_v5 = vpack.c.bf16 %v8843_v30, %v8842_v14 }
 0x5ab   :  { %v8530_v7 = vpop.f32.mrf.mxu0  ;;  %v18647_v59 = vadd.f32 %v13157_v4, %v8186_v44  ;;  %v8184_v58 = vadd.f32 %v7977_v62, %v20262_v35  ;;  %v20265_v62 = vld [vmem:[#allocation25_spill] sm:$0xff] }
 0x5ac   :  { %v13092_v10 = vpop.f32.mrf.mxu1 }
 0x5ad   :  { %v13158_v15 = vpop.f32.mrf.mxu0  ;;  %v18650_v48 = vadd.f32 %v8530_v7, %v8184_v58  ;;  %v8187_v9 = vadd.f32 %v13092_v10, %v20263_v26  ;;  %v9398_v58 = vld [vmem:[#allocation2 + $0x321] sm:$0xff]  ;;  %v8846_v26 = vld [vmem:[#allocation2 + $0x330] sm:$0xff] }
 0x5ae   :  { %v7980_v8 = vpop.f32.mrf.mxu1  ;;  %v8845_v10 = vld [vmem:[#allocation2 + $0x320] sm:$0xff] }
 0x5af   :  { %v8533_v45 = vpop.f32.mrf.mxu0  ;;  %v18653_v13 = vadd.f32 %v13158_v15, %v8187_v9  ;;  %v8185_v41 = vadd.f32 %v7980_v8, %v20264_v57  ;;  %v9397_v15 = vld [vmem:[#allocation2 + $0x319] sm:$0xff]  ;;  %v8879_v57 = vpack.c.bf16 %v8845_v10, %v8844_v61  ;;  %v9401_v61 = vld [vmem:[#allocation2 + $0x349] sm:$0xff]  ;;  %v9402_v10 = vld [vmem:[#allocation2 + $0x351] sm:$0xff] }
 0x5b0   :  { %v13095_v1 = vpop.f32.mrf.mxu1  ;;  %13258 = vmatmul.mubr.msk.bf16.gmra.mxu1 %vm226_vm0, %v8877_v40  ;;  %v8847_v9 = vld [vmem:[#allocation2 + $0x338] sm:$0xff] }
 0x5b1   :  { %v13161_v4 = vpop.f32.mrf.mxu0  ;;  %13324 = vmatmul.mubr.msk.bf16.gmra.mxu0 %vm226_vm0, %v9430_v20  ;;  %v18658_v44 = vadd.f32 %v8533_v45, %v8185_v41  ;;  %v8190_v7 = vadd.f32 %v13095_v1, %v20265_v62  ;;  %13261 = vmatprep.mubr.msk.bf16.mxu1 %vm226_vm0, %v8878_v5  ;;  %v20266_v45 = vld [vmem:[#allocation36_spill] sm:$0xff]  ;;  %v9432_v41 = vpack.c.bf16 %v9398_v58, %v9397_v15  ;;  %v20267_v1 = vld [vmem:[#allocation37_spill] sm:$0xff] }
 0x5b2   :  { %13327 = vmatprep.mubr.msk.bf16.mxu0 %vm226_vm0, %v18383_v49  ;;  %v7993_v53 = vpop.f32.mrf.mxu1  ;;  %v8849_v58 = vld [vmem:[#allocation2 + $0x350] sm:$0xff] }
 0x5b3   :  { %v8546_v35 = vpop.f32.mrf.mxu0  ;;  %v18664_v42 = vadd.f32 %v13161_v4, %v8190_v7  ;;  %v8188_v39 = vadd.f32 %v7993_v53, %v18380_v27  ;;  %v8880_v27 = vpack.c.bf16 %v8847_v9, %v8846_v26  ;;  %v8848_v53 = vld [vmem:[#allocation2 + $0x348] sm:$0xff] }
 0x5b4   :  { %v13096_v14 = vpop.f32.mrf.mxu1 }
 0x5b5   :  { %v13162_v30 = vpop.f32.mrf.mxu0  ;;  %v18667_v8 = vadd.f32 %v8546_v35, %v8188_v39  ;;  %v8191_v40 = vadd.f32 %v13096_v14, %v20266_v45  ;;  %v20268_v39 = vld [vmem:[#allocation28_spill] sm:$0xff] }
 0x5b6   :  { %v7996_v20 = vpop.f32.mrf.mxu1 }
 0x5b7   :  { %v8549_v49 = vpop.f32.mrf.mxu0  ;;  %v18670_v5 = vadd.f32 %v13162_v30, %v8191_v40  ;;  %v8189_v4 = vadd.f32 %v7996_v20, %v20267_v1  ;;  %v8881_v20 = vpack.c.bf16 %v8849_v58, %v8848_v53 }
 0x5b8   :  { %v13099_v62 = vpop.f32.mrf.mxu1  ;;  %13262 = vmatmul.mubr.msk.bf16.gmra.mxu1 %vm226_vm0, %v8879_v57  ;;  %v9893_v57 = vld [vmem:[#allocation2 + $0x3a] sm:$0xff] }
 0x5b9   :  { %v13165_v7 = vpop.f32.mrf.mxu0  ;;  %13328 = vmatmul.mubr.msk.bf16.gmra.mxu0 %vm226_vm0, %v9432_v41  ;;  %v18675_v35 = vadd.f32 %v8549_v49, %v8189_v4  ;;  %v8194_v14 = vadd.f32 %v13099_v62, %v20268_v39  ;;  %13265 = vmatprep.mubr.msk.bf16.mxu1 %vm226_vm0, %v8880_v27  ;;  %v9892_v49 = vld [vmem:[#allocation2 + $0x32] sm:$0xff]  ;;  %v9434_v41 = vpack.c.bf16 %v9402_v10, %v9401_v61 }
 0x5ba   :  { %13331 = vmatprep.mubr.msk.bf16.mxu0 %vm226_vm0, %v18404_v0  ;;  %v8009_v15 = vpop.f32.mrf.mxu1  ;;  %v20271_v10 = vld [vmem:[#allocation38_spill] sm:$0xff] }
 0x5bb   :  { %v8562_v30 = vpop.f32.mrf.mxu0  ;;  %v18681_v26 = vadd.f32 %v13165_v7, %v8194_v14  ;;  %v8192_v9 = vadd.f32 %v8009_v15, %v18401_v43  ;;  %v9956_v7 = vpack.c.bf16 %v9893_v57, %v9892_v49  ;;  %v20272_v57 = vld [vmem:[#allocation60_spill] sm:$0xff] }
 0x5bc   :  { %v13100_v45 = vpop.f32.mrf.mxu1 }
 0x5bd   :  { %20269 = vst [vmem:[#allocation44_spill] sm:$0xff] %v18681_v26  ;;  %v13166_v40 = vpop.f32.mrf.mxu0  ;;  %v18684_v1 = vadd.f32 %v8562_v30, %v8192_v9  ;;  %v8195_v4 = vadd.f32 %v13100_v45, %v18406_v16  ;;  %v9895_v30 = vld [vmem:[#allocation2 + $0x52] sm:$0xff] }
 0x5be   :  { %v8012_v0 = vpop.f32.mrf.mxu1 }
 0x5bf   :  { %v8565_v27 = vpop.f32.mrf.mxu0  ;;  %v18687_v62 = vadd.f32 %v13166_v40, %v8195_v4  ;;  %v8193_v39 = vadd.f32 %v8012_v0, %v18412_v51  ;;  %v9894_v51 = vld [vmem:[#allocation2 + $0x4a] sm:$0xff]  ;;  %v9896_v40 = vld [vmem:[#allocation2 + $0x62] sm:$0xff] }
 0x5c0   :  { %v13103_v14 = vpop.f32.mrf.mxu1  ;;  %13266 = vmatmul.mubr.msk.bf16.gmra.mxu1 %vm226_vm0, %v8881_v20  ;;  %v9897_v20 = vld [vmem:[#allocation2 + $0x6a] sm:$0xff]  ;;  %v9957_v0 = vpack.c.bf16 %v9895_v30, %v9894_v51  ;;  %v9898_v30 = vld [vmem:[#allocation2 + $0x7a] sm:$0xff] }
 0x5c1   :  { %v13169_v26 = vpop.f32.mrf.mxu0  ;;  %13332 = vmatmul.mubr.msk.bf16.gmra.mxu0 %vm226_vm0, %v9434_v41  ;;  %v18692_v43 = vadd.f32 %v8565_v27, %v8193_v39  ;;  %v8198_v53 = vadd.f32 %v13103_v14, %v18418_v33  ;;  %13337 = vmatprep.mubr.msk.bf16.mxu1 %vm226_vm0, %v9956_v7  ;;  %v20273_v39 = vld [vmem:[#allocation23_spill] sm:$0xff]  ;;  %v9958_v7 = vpack.c.bf16 %v9897_v20, %v9896_v40  ;;  %v9900_v20 = vld [vmem:[#allocation2 + $0x92] sm:$0xff] }
 0x5c2   :  { %v8025_v16 = vpop.f32.mrf.mxu1 }
 0x5c3   :  { %v8578_v58 = vpop.f32.mrf.mxu0  ;;  %v18696_v61 = vadd.f32 %v13169_v26, %v8198_v53  ;;  %v8196_v15 = vadd.f32 %v8025_v16, %v20271_v10  ;;  %v20275_v10 = vld [vmem:[#allocation35_spill] sm:$0xff] }
 0x5c4   :  { %v13104_v9 = vpop.f32.mrf.mxu1 }
 0x5c5   :  { %20270 = vst [vmem:[#allocation47_spill] sm:$0xff] %v18696_v61  ;;  %v13170_v45 = vpop.f32.mrf.mxu0  ;;  %v18699_v49 = vadd.f32 %v8578_v58, %v8196_v15  ;;  %v8199_v41 = vadd.f32 %v13104_v9, %v20272_v57 }
 0x5c6   :  { %v8028_v4 = vpop.f32.mrf.mxu1 }
 0x5c7   :  { %v8581_v33 = vpop.f32.mrf.mxu0  ;;  %v18702_v27 = vadd.f32 %v13170_v45, %v8199_v41  ;;  %v8197_v26 = vadd.f32 %v8028_v4, %v20273_v39  ;;  %v9899_v45 = vld [vmem:[#allocation2 + $0x82] sm:$0xff]  ;;  %v9901_v41 = vld [vmem:[#allocation2 + $0x9a] sm:$0xff] }
 0x5c8   :  { %v13107_v14 = vpop.f32.mrf.mxu1  ;;  %13338 = vmatmul.mubr.msk.bf16.vlgmr.msra.gmra.mxu1 %vm226_vm0, %v9957_v0 }
 0x5c9   :  { %v13173_v53 = vpop.f32.mrf.mxu0  ;;  %v18706_v16 = vadd.f32 %v8581_v33, %v8197_v26  ;;  %v8202_v61 = vadd.f32 %v13107_v14, %v20275_v10  ;;  %13341 = vmatprep.mubr.msk.bf16.mxu1 %vm226_vm0, %v9958_v7  ;;  %v9959_v26 = vpack.c.bf16 %v9899_v45, %v9898_v30  ;;  %v20277_v14 = vld [vmem:[#allocation30_spill] sm:$0xff]  ;;  %v9902_v45 = vld [vmem:[#allocation2 + $0xaa] sm:$0xff] }
 0x5ca   :  { %v8041_v58 = vpop.f32.mrf.mxu1 }
 0x5cb   :  { %20274 = vst [vmem:[#allocation40_spill] sm:$0xff] %v18706_v16  ;;  %v8594_v15 = vpop.f32.mrf.mxu0  ;;  %v18710_v9 = vadd.f32 %v13173_v53, %v8202_v61  ;;  %v8200_v51 = vadd.f32 %v8041_v58, %v18440_v55  ;;  %v9960_v53 = vpack.c.bf16 %v9901_v41, %v9900_v20  ;;  %v9904_v41 = vld [vmem:[#allocation2 + $0xc2] sm:$0xff] }
 0x5cc   :  { %v13108_v57 = vpop.f32.mrf.mxu1 }
 0x5cd   :  { %20276 = vst [vmem:[#allocation59_spill] sm:$0xff] %v18710_v9  ;;  %v13174_v40 = vpop.f32.mrf.mxu0  ;;  %v18713_v4 = vadd.f32 %v8594_v15, %v8200_v51  ;;  %v8203_v33 = vadd.f32 %v13108_v57, %v18443_v22  ;;  %v20279_v9 = vld [vmem:[#allocation49_spill] sm:$0xff] }
 0x5ce   :  { %v8044_v0 = vpop.f32.mrf.mxu1  ;;  %v9903_v57 = vld [vmem:[#allocation2 + $0xb2] sm:$0xff] }
 0x5cf   :  { %v8597_v39 = vpop.f32.mrf.mxu0  ;;  %v18716_v7 = vadd.f32 %v13174_v40, %v8203_v33  ;;  %v8201_v61 = vadd.f32 %v8044_v0, %v20277_v14  ;;  %v9905_v33 = vld [vmem:[#allocation2 + $0xca] sm:$0xff]  ;;  %v9961_v14 = vpack.c.bf16 %v9903_v57, %v9902_v45  ;;  %v9906_v57 = vld [vmem:[#allocation2 + $0xda] sm:$0xff] }
 0x5d0   :  { %v13111_v10 = vpop.f32.mrf.mxu1  ;;  %13342 = vmatmul.mubr.msk.bf16.gmra.mxu1 %vm226_vm0, %v9959_v26 }
 0x5d1   :  { %v13177_v55 = vpop.f32.mrf.mxu0  ;;  %v18720_v58 = vadd.f32 %v8597_v39, %v8201_v61  ;;  %v8206_v16 = vadd.f32 %v13111_v10, %v20279_v9  ;;  %13345 = vmatprep.mubr.msk.bf16.mxu1 %vm226_vm0, %v9960_v53  ;;  %v20281_v53 = vld [vmem:[#allocation29_spill] sm:$0xff]  ;;  %v9962_v10 = vpack.c.bf16 %v9905_v33, %v9904_v41 }
 0x5d2   :  { %v8057_v15 = vpop.f32.mrf.mxu1  ;;  %v9908_v33 = vld [vmem:[#allocation2 + $0xf2] sm:$0xff] }
 0x5d3   :  { %20278 = vst [vmem:[#allocation3_spill] sm:$0xff] %v18720_v58  ;;  %v8610_v22 = vpop.f32.mrf.mxu0  ;;  %v18724_v51 = vadd.f32 %v13177_v55, %v8206_v16  ;;  %v8204_v30 = vadd.f32 %v8057_v15, %v18458_v34 }
 0x5d4   :  { %v13112_v40 = vpop.f32.mrf.mxu1 }
 0x5d5   :  { %20280 = vst [vmem:[#allocation58_spill] sm:$0xff] %v18724_v51  ;;  %v13178_v20 = vpop.f32.mrf.mxu0  ;;  %v18727_v0 = vadd.f32 %v8610_v22, %v8204_v30  ;;  %v8207_v39 = vadd.f32 %v13112_v40, %v18461_v52  ;;  %v20283_v51 = vld [vmem:[#allocation34_spill] sm:$0xff]  ;;  %v9907_v40 = vld [vmem:[#allocation2 + $0xe2] sm:$0xff] }
 0x5d6   :  { %v8060_v26 = vpop.f32.mrf.mxu1 }
 0x5d7   :  { %v8613_v9 = vpop.f32.mrf.mxu0  ;;  %v18730_v61 = vadd.f32 %v13178_v20, %v8207_v39  ;;  %v8205_v16 = vadd.f32 %v8060_v26, %v20281_v53  ;;  %v9909_v39 = vld [vmem:[#allocation2 + $0xfa] sm:$0xff]  ;;  %v9963_v53 = vpack.c.bf16 %v9907_v40, %v9906_v57  ;;  %v9910_v40 = vld [vmem:[#allocation2 + $0x10a] sm:$0xff] }
 0x5d8   :  { %v13115_v55 = vpop.f32.mrf.mxu1  ;;  %13346 = vmatmul.mubr.msk.bf16.gmra.mxu1 %vm226_vm0, %v9961_v14 }
 0x5d9   :  { %v13181_v34 = vpop.f32.mrf.mxu0  ;;  %v18734_v15 = vadd.f32 %v8613_v9, %v8205_v16  ;;  %v8210_v58 = vadd.f32 %v13115_v55, %v20283_v51  ;;  %13349 = vmatprep.mubr.msk.bf16.mxu1 %vm226_vm0, %v9962_v10  ;;  %v20285_v10 = vld [vmem:[#allocation39_spill] sm:$0xff]  ;;  %v9964_v55 = vpack.c.bf16 %v9909_v39, %v9908_v33 }
 0x5da   :  { %v8073_v22 = vpop.f32.mrf.mxu1  ;;  %v9912_v39 = vld [vmem:[#allocation2 + $0x122] sm:$0xff] }
 0x5db   :  { %20282 = vst [vmem:[#allocation45_spill] sm:$0xff] %v18734_v15  ;;  %v8626_v52 = vpop.f32.mrf.mxu0  ;;  %v18738_v30 = vadd.f32 %v13181_v34, %v8210_v58  ;;  %v8208_v45 = vadd.f32 %v8073_v22, %v18476_v12 }
 0x5dc   :  { %v13116_v20 = vpop.f32.mrf.mxu1 }
 0x5dd   :  { %20284 = vst [vmem:[#allocation7_spill] sm:$0xff] %v18738_v30  ;;  %v13182_v41 = vpop.f32.mrf.mxu0  ;;  %v18741_v26 = vadd.f32 %v8626_v52, %v8208_v45  ;;  %v8211_v9 = vadd.f32 %v13116_v20, %v18479_v28  ;;  %v20287_v30 = vld [vmem:[#allocation41_spill] sm:$0xff] }
 0x5de   :  { %v8076_v14 = vpop.f32.mrf.mxu1  ;;  %v9911_v20 = vld [vmem:[#allocation2 + $0x112] sm:$0xff] }
 0x5df   :  { %v8629_v51 = vpop.f32.mrf.mxu0  ;;  %v18744_v16 = vadd.f32 %v13182_v41, %v8211_v9  ;;  %v8209_v58 = vadd.f32 %v8076_v14, %v20285_v10  ;;  %v9913_v9 = vld [vmem:[#allocation2 + $0x12a] sm:$0xff]  ;;  %v9965_v10 = vpack.c.bf16 %v9911_v20, %v9910_v40  ;;  %v20295_v40 = vld [vmem:[#allocation50_spill] sm:$0xff] }
 0x5e0   :  { %v13119_v34 = vpop.f32.mrf.mxu1  ;;  %13350 = vmatmul.mubr.msk.bf16.gmra.mxu1 %vm226_vm0, %v9963_v53 }
 0x5e1   :  { %v13185_v12 = vpop.f32.mrf.mxu0  ;;  %v18748_v22 = vadd.f32 %v8629_v51, %v8209_v58  ;;  %v8214_v15 = vadd.f32 %v13119_v34, %v20287_v30  ;;  %13353 = vmatprep.mubr.msk.bf16.mxu1 %vm226_vm0, %v9964_v55  ;;  %v20291_v55 = vld [vmem:[#allocation51_spill] sm:$0xff]  ;;  %v9966_v34 = vpack.c.bf16 %v9913_v9, %v9912_v39  ;;  %v9916_v9 = vld [vmem:[#allocation2 + $0x152] sm:$0xff] }
 0x5e2   :  { %v8089_v52 = vpop.f32.mrf.mxu1 }
 0x5e3   :  { %20286 = vst [vmem:[#allocation46_spill] sm:$0xff] %v18748_v22  ;;  %v8642_v28 = vpop.f32.mrf.mxu0  ;;  %v18752_v45 = vadd.f32 %v13185_v12, %v8214_v15  ;;  %v8212_v57 = vadd.f32 %v8089_v52, %v18494_v2 }
 0x5e4   :  { %v13120_v41 = vpop.f32.mrf.mxu1 }
 0x5e5   :  { %20288 = vst [vmem:[#allocation61_spill] sm:$0xff] %v18752_v45  ;;  %v13186_v33 = vpop.f32.mrf.mxu0  ;;  %v18755_v14 = vadd.f32 %v8642_v28, %v8212_v57  ;;  %v8215_v51 = vadd.f32 %v13120_v41, %v18497_v31  ;;  %v20293_v45 = vld [vmem:[#allocation53_spill] sm:$0xff]  ;;  %v9914_v41 = vld [vmem:[#allocation2 + $0x13a] sm:$0xff] }
 0x5e6   :  { %v8092_v53 = vpop.f32.mrf.mxu1 }
 0x5e7   :  { %20289 = vst [vmem:[#allocation4_spill] sm:$0xff] %v18755_v14  ;;  %v8645_v30 = vpop.f32.mrf.mxu0  ;;  %v18758_v58 = vadd.f32 %v13186_v33, %v8215_v51  ;;  %v8213_v15 = vadd.f32 %v8092_v53, %v20291_v55  ;;  %v9915_v33 = vld [vmem:[#allocation2 + $0x142] sm:$0xff]  ;;  %v9917_v53 = vld [vmem:[#allocation2 + $0x15a] sm:$0xff] }
 0x5e8   :  { %v13123_v12 = vpop.f32.mrf.mxu1  ;;  %13354 = vmatmul.mubr.msk.bf16.gmra.mxu1 %vm226_vm0, %v9965_v10 }
 0x5e9   :  { %20290 = vst [vmem:[#allocation11_spill] sm:$0xff] %v18758_v58  ;;  %v13189_v2 = vpop.f32.mrf.mxu0  ;;  %v18762_v52 = vadd.f32 %v8645_v30, %v8213_v15  ;;  %v8218_v22 = vadd.f32 %v13123_v12, %v20293_v45  ;;  %13357 = vmatprep.mubr.msk.bf16.mxu1 %vm226_vm0, %v9966_v34  ;;  %v20297_v30 = vld [vmem:[#allocation52_spill] sm:$0xff]  ;;  %v9967_v12 = vpack.c.bf16 %v9915_v33, %v9914_v41  ;;  %v20301_v58 = vld [vmem:[#allocation43_spill] sm:$0xff] }
 0x5ea   :  { %v8105_v28 = vpop.f32.mrf.mxu1  ;;  %v20303_v41 = vld [vmem:[#allocation55_spill] sm:$0xff] }
 0x5eb   :  { %20292 = vst [vmem:[#allocation48_spill] sm:$0xff] %v18762_v52  ;;  %v8658_v31 = vpop.f32.mrf.mxu0  ;;  %v18766_v57 = vadd.f32 %v13189_v2, %v8218_v22  ;;  %v8216_v20 = vadd.f32 %v8105_v28, %v20295_v40  ;;  %v20299_v52 = vld [vmem:[#allocation42_spill] sm:$0xff]  ;;  %v9968_v2 = vpack.c.bf16 %v9917_v53, %v9916_v9  ;;  %v9920_v53 = vld [vmem:[#allocation2 + $0x182] sm:$0xff] }
 0x5ec   :  { %v13124_v51 = vpop.f32.mrf.mxu1 }
 0x5ed   :  { %20294 = vst [vmem:[#allocation8_spill] sm:$0xff] %v18766_v57  ;;  %v13190_v39 = vpop.f32.mrf.mxu0  ;;  %v18769_v55 = vadd.f32 %v8658_v31, %v8216_v20  ;;  %v8219_v10 = vadd.f32 %v13124_v51, %v20297_v30  ;;  %v9919_v30 = vld [vmem:[#allocation2 + $0x172] sm:$0xff] }
 0x5ee   :  { %v8108_v15 = vpop.f32.mrf.mxu1 }
 0x5ef   :  { %20296 = vst [vmem:[#allocation5_spill] sm:$0xff] %v18769_v55  ;;  %v8661_v45 = vpop.f32.mrf.mxu0  ;;  %v18772_v34 = vadd.f32 %v13190_v39, %v8219_v10  ;;  %v8217_v22 = vadd.f32 %v8108_v15, %v20299_v52  ;;  %v9918_v39 = vld [vmem:[#allocation2 + $0x16a] sm:$0xff] }
 0x5f0   :  { %v13127_v57 = vpop.f32.mrf.mxu1  ;;  %13358 = vmatmul.mubr.msk.bf16.gmra.mxu1 %vm226_vm0, %v9967_v12  ;;  %v9921_v10 = vld [vmem:[#allocation2 + $0x18a] sm:$0xff] }
 0x5f1   :  { %20298 = vst [vmem:[#allocation6_spill] sm:$0xff] %v18772_v34  ;;  %v13193_v28 = vpop.f32.mrf.mxu0  ;;  %v18776_v40 = vadd.f32 %v8661_v45, %v8217_v22  ;;  %v8222_v14 = vadd.f32 %v13127_v57, %v20301_v58  ;;  %13361 = vmatprep.mubr.msk.bf16.mxu1 %vm226_vm0, %v9968_v2  ;;  %v20304_v45 = vld [vmem:[#allocation57_spill] sm:$0xff]  ;;  %v9969_v57 = vpack.c.bf16 %v9919_v30, %v9918_v39  ;;  %v20306_v34 = vld [vmem:[#allocation56_spill] sm:$0xff] }
 0x5f2   :  { %v8121_v31 = vpop.f32.mrf.mxu1 }
 0x5f3   :  { %20300 = vst [vmem:[#allocation62_spill] sm:$0xff] %v18776_v40  ;;  %v8674_v20 = vpop.f32.mrf.mxu0  ;;  %v18780_v51 = vadd.f32 %v13193_v28, %v8222_v14  ;;  %v8220_v33 = vadd.f32 %v8121_v31, %v20303_v41  ;;  %v20305_v40 = vld [vmem:[#allocation54_spill] sm:$0xff]  ;;  %v9970_v28 = vpack.c.bf16 %v9921_v10, %v9920_v53  ;;  %v9924_v10 = vld [vmem:[#allocation2 + $0x1e2] sm:$0xff] }
 0x5f4   :  { %v13128_v52 = vpop.f32.mrf.mxu1 }
 0x5f5   :  { %20302 = vst [vmem:[#allocation9_spill] sm:$0xff] %v18780_v51  ;;  %v13194_v9 = vpop.f32.mrf.mxu0  ;;  %v18783_v15 = vadd.f32 %v8674_v20, %v8220_v33  ;;  %v8223_v12 = vadd.f32 %v13128_v52, %v20304_v45  ;;  %v9922_v20 = vld [vmem:[#allocation2 + $0x19a] sm:$0xff]  ;;  %v9923_v33 = vld [vmem:[#allocation2 + $0x1a2] sm:$0xff] }
 0x5f6   :  { %v8124_v22 = vpop.f32.mrf.mxu1  ;;  %v9971_v53 = vpack.c.bf16 %v9923_v33, %v9922_v20  ;;  %v20307_v20 = vld [vmem:[#allocation26_spill] sm:$0xff] }
 0x5f7   :  { %v8677_v58 = vpop.f32.mrf.mxu0  ;;  %v18786_v2 = vadd.f32 %v13194_v9, %v8223_v12  ;;  %v8221_v14 = vadd.f32 %v8124_v22, %v20305_v40  ;;  %v9925_v12 = vld [vmem:[#allocation2 + $0x1ea] sm:$0xff] }
 0x5f8   :  { %v13131_v51 = vpop.f32.mrf.mxu1  ;;  %13362 = vmatmul.mubr.msk.bf16.gmra.mxu1 %vm226_vm0, %v9969_v57 }
 0x5f9   :  { %v13197_v31 = vpop.f32.mrf.mxu0  ;;  %v18790_v41 = vadd.f32 %v8677_v58, %v8221_v14  ;;  %v8226_v55 = vadd.f32 %v13131_v51, %v20306_v34  ;;  %13365 = vmatprep.mubr.msk.bf16.mxu1 %vm226_vm0, %v9970_v28  ;;  %v9972_v28 = vpack.c.bf16 %v9925_v12, %v9924_v10  ;;  %v9928_v12 = vld [vmem:[#allocation2 + $0x212] sm:$0xff] }
 0x5fa   :  { %v8137_v52 = vpop.f32.mrf.mxu1 }
 0x5fb   :  { %v8690_v45 = vpop.f32.mrf.mxu0  ;;  %v18794_v39 = vadd.f32 %v13197_v31, %v8226_v55  ;;  %v8224_v30 = vadd.f32 %v8137_v52, %v18548_v25 }
 0x5fc   :  { %v13132_v40 = vpop.f32.mrf.mxu1 }
 0x5fd   :  { %v13198_v9 = vpop.f32.mrf.mxu0  ;;  %v18797_v22 = vadd.f32 %v8690_v45, %v8224_v30  ;;  %v8227_v58 = vadd.f32 %v13132_v40, %v18551_v63  ;;  %v9926_v40 = vld [vmem:[#allocation2 + $0x1fa] sm:$0xff] }
 0x5fe   :  { %v8140_v34 = vpop.f32.mrf.mxu1 }
 0x5ff   :  { %v8693_v51 = vpop.f32.mrf.mxu0  ;;  %v18800_v57 = vadd.f32 %v13198_v9, %v8227_v58  ;;  %v8225_v14 = vadd.f32 %v8140_v34, %v18556_v37  ;;  %v9927_v9 = vld [vmem:[#allocation2 + $0x202] sm:$0xff]  ;;  %v9929_v58 = vld [vmem:[#allocation2 + $0x21a] sm:$0xff] }
 0x600   :  { %v13135_v55 = vpop.f32.mrf.mxu1  ;;  %13366 = vmatmul.mubr.msk.bf16.gmra.mxu1 %vm226_vm0, %v9971_v53 }
 0x601   :  { %v13201_v31 = vpop.f32.mrf.mxu0  ;;  %v18804_v25 = vadd.f32 %v8693_v51, %v8225_v14  ;;  %v8230_v33 = vadd.f32 %v13135_v55, %v20307_v20  ;;  %13369 = vmatprep.mubr.msk.bf16.mxu1 %vm226_vm0, %v9972_v28  ;;  %v9973_v55 = vpack.c.bf16 %v9927_v9, %v9926_v40  ;;  %v9974_v20 = vpack.c.bf16 %v9929_v58, %v9928_v12  ;;  %v9930_v40 = vld [vmem:[#allocation2 + $0x22a] sm:$0xff]  ;;  %v9931_v9 = vld [vmem:[#allocation2 + $0x232] sm:$0xff] }
 0x602   :  { %v8153_v52 = vpop.f32.mrf.mxu1  ;;  %v9933_v12 = vld [vmem:[#allocation2 + $0x24a] sm:$0xff] }
 0x603   :  { %v8706_v45 = vpop.f32.mrf.mxu0  ;;  %v18808_v63 = vadd.f32 %v13201_v31, %v8230_v33  ;;  %v8228_v30 = vadd.f32 %v8153_v52, %v18565_v36 }
 0x604   :  { %v13136_v37 = vpop.f32.mrf.mxu1 }
 0x605   :  { %v13202_v10 = vpop.f32.mrf.mxu0  ;;  %v18811_v34 = vadd.f32 %v8706_v45, %v8228_v30  ;;  %v8231_v53 = vadd.f32 %v13136_v37, %v18568_v56 }
 0x606   :  { %v8156_v51 = vpop.f32.mrf.mxu1 }
 0x607   :  { %v8709_v14 = vpop.f32.mrf.mxu0  ;;  %v18814_v28 = vadd.f32 %v13202_v10, %v8231_v53  ;;  %v8229_v31 = vadd.f32 %v8156_v51, %v18573_v17  ;;  %v9932_v10 = vld [vmem:[#allocation2 + $0x242] sm:$0xff]  ;;  %v9975_v51 = vpack.c.bf16 %v9931_v9, %v9930_v40  ;;  %v9936_v9 = vld [vmem:[#allocation2 + $0x272] sm:$0xff] }
 0x608   :  { %v13207_v33 = vpop.f32.mrf.mxu1  ;;  %13370 = vmatmul.mubr.msk.bf16.gmra.mxu1 %vm226_vm0, %v9973_v55 }
 0x609   :  { %v18817_v36 = vpop.f32.mrf.mxu0  ;;  %v18820_v52 = vadd.f32 %v8709_v14, %v8229_v31  ;;  %v18823_v45 = vadd.f32 %v13207_v33, %v18579_v47  ;;  %13373 = vmatprep.mubr.msk.bf16.mxu1 %vm226_vm0, %v9974_v20  ;;  %v9976_v14 = vpack.c.bf16 %v9933_v12, %v9932_v10  ;;  %v9934_v33 = vld [vmem:[#allocation2 + $0x25a] sm:$0xff] }
 0x60a   :  { %v9020_v56 = vpop.f32.mrf.mxu1 }
 0x60b   :  { %v18827_v30 = vadd.f32 %v9020_v56, %v18582_v46  ;;  %v18829_v17 = vpop.f32.mrf.mxu0  ;;  %v9935_v56 = vld [vmem:[#allocation2 + $0x262] sm:$0xff] }
 0x60c   :  { %v13208_v37 = vpop.f32.mrf.mxu1 }
 0x60d   :  { %v18832_v58 = vadd.f32 %v13208_v37, %v18585_v29  ;;  %v18837_v55 = vpop.f32.mrf.mxu0  ;;  %v9937_v37 = vld [vmem:[#allocation2 + $0x27a] sm:$0xff] }
 0x60e   :  { %v9023_v53 = vpop.f32.mrf.mxu1 }
 0x60f   :  { %v18835_v47 = vadd.f32 %v9023_v53, %v18590_v3  ;;  %v18847_v40 = vpop.f32.mrf.mxu0  ;;  %v9977_v53 = vpack.c.bf16 %v9935_v56, %v9934_v33  ;;  %v9939_v33 = vld [vmem:[#allocation2 + $0x292] sm:$0xff] }
 0x610   :  { %v13211_v46 = vpop.f32.mrf.mxu1  ;;  %13374 = vmatmul.mubr.msk.bf16.gmra.mxu1 %vm226_vm0, %v9975_v51  ;;  %v9978_v51 = vpack.c.bf16 %v9937_v37, %v9936_v9  ;;  %v9940_v9 = vld [vmem:[#allocation2 + $0x2a2] sm:$0xff]  ;;  %v9941_v37 = vld [vmem:[#allocation2 + $0x2aa] sm:$0xff] }
 0x611   :  { %v18841_v31 = vadd.f32 %v13211_v46, %v18596_v18  ;;  %13377 = vmatprep.mubr.msk.bf16.mxu1 %vm226_vm0, %v9976_v14  ;;  %v18855_v14 = vpop.f32.mrf.mxu0 }
 0x612   :  { %v9036_v20 = vpop.f32.mrf.mxu1 }
 0x613   :  { %v18845_v29 = vadd.f32 %v9036_v20, %v18599_v23  ;;  %v18865_v56 = vpop.f32.mrf.mxu0 }
 0x614   :  { %v13212_v3 = vpop.f32.mrf.mxu1 }
 0x615   :  { %v18850_v10 = vadd.f32 %v13212_v3, %v18602_v24  ;;  %v9938_v3 = vld [vmem:[#allocation2 + $0x28a] sm:$0xff] }
 0x616   :  { %v9039_v12 = vpop.f32.mrf.mxu1 }
 0x617   :  { %v18853_v18 = vadd.f32 %v9039_v12, %v18607_v60 }
 0x618   :  { %v13215_v23 = vpop.f32.mrf.mxu1  ;;  %13378 = vmatmul.mubr.msk.bf16.gmra.mxu1 %vm226_vm0, %v9977_v53 }
 0x619   :  { %20308 = vst [vmem:[#allocation12_spill] sm:$0xff] %v18853_v18  ;;  %v18859_v46 = vadd.f32 %v13215_v23, %v18613_v38  ;;  %13381 = vmatprep.mubr.msk.bf16.mxu1 %vm226_vm0, %v9978_v51  ;;  %v9979_v18 = vpack.c.bf16 %v9939_v33, %v9938_v3  ;;  %v9980_v51 = vpack.c.bf16 %v9941_v37, %v9940_v9  ;;  %v18873_v23 = vpop.f32.mrf.mxu0  ;;  %v9943_v3 = vld [vmem:[#allocation2 + $0x2c2] sm:$0xff]  ;;  %v9944_v9 = vld [vmem:[#allocation2 + $0x2d2] sm:$0xff]  ;;  %v9945_v37 = vld [vmem:[#allocation2 + $0x2da] sm:$0xff] }
 0x61a   :  { %v9052_v20 = vpop.f32.mrf.mxu1 }
 0x61b   :  { %v18863_v24 = vadd.f32 %v9052_v20, %v18616_v6  ;;  %v18883_v33 = vpop.f32.mrf.mxu0 }
 0x61c   :  { %v13216_v60 = vpop.f32.mrf.mxu1 }
 0x61d   :  { %20309 = vst [vmem:[#allocation65_spill] sm:$0xff] %v18863_v24  ;;  %v18868_v12 = vadd.f32 %v13216_v60, %v18619_v21  ;;  %v9942_v60 = vld [vmem:[#allocation2 + $0x2ba] sm:$0xff] }
 0x61e   :  { %v9055_v53 = vpop.f32.mrf.mxu1 }
 0x61f   :  { %v18871_v38 = vadd.f32 %v9055_v53, %v18624_v32 }
 0x620   :  { %v13219_v6 = vpop.f32.mrf.mxu1  ;;  %13382 = vmatmul.mubr.msk.bf16.gmra.mxu1 %vm226_vm0, %v9979_v18 }
 0x621   :  { %20310 = vst [vmem:[#allocation63_spill] sm:$0xff] %v18871_v38  ;;  %v18877_v20 = vadd.f32 %v13219_v6, %v18630_v11  ;;  %13385 = vmatprep.mubr.msk.bf16.mxu1 %vm226_vm0, %v9980_v51  ;;  %v9981_v38 = vpack.c.bf16 %v9943_v3, %v9942_v60  ;;  %v9982_v51 = vpack.c.bf16 %v9945_v37, %v9944_v9  ;;  %v18891_v6 = vpop.f32.mrf.mxu0  ;;  %v9947_v60 = vld [vmem:[#allocation2 + $0x2f2] sm:$0xff]  ;;  %v9948_v9 = vld [vmem:[#allocation2 + $0x302] sm:$0xff]  ;;  %v9949_v37 = vld [vmem:[#allocation2 + $0x30a] sm:$0xff] }
 0x622   :  { %v9068_v24 = vpop.f32.mrf.mxu1 }
 0x623   :  { %v18881_v21 = vadd.f32 %v9068_v24, %v18633_v50  ;;  %v18901_v3 = vpop.f32.mrf.mxu0 }
 0x624   :  { %v13220_v32 = vpop.f32.mrf.mxu1 }
 0x625   :  { %20311 = vst [vmem:[#allocation64_spill] sm:$0xff] %v18881_v21  ;;  %v18886_v53 = vadd.f32 %v13220_v32, %v18636_v19  ;;  %v9946_v32 = vld [vmem:[#allocation2 + $0x2ea] sm:$0xff] }
 0x626   :  { %v9071_v18 = vpop.f32.mrf.mxu1 }
 0x627   :  { %v18889_v11 = vadd.f32 %v9071_v18, %v18641_v54 }
 0x628   :  { %v13223_v50 = vpop.f32.mrf.mxu1  ;;  %13386 = vmatmul.mubr.msk.bf16.gmra.mxu1 %vm226_vm0, %v9981_v38 }
 0x629   :  { %20312 = vst [vmem:[#allocation13_spill] sm:$0xff] %v18889_v11  ;;  %v18895_v24 = vadd.f32 %v13223_v50, %v18647_v59  ;;  %13389 = vmatprep.mubr.msk.bf16.mxu1 %vm226_vm0, %v9982_v51  ;;  %v9983_v11 = vpack.c.bf16 %v9947_v60, %v9946_v32  ;;  %v9984_v51 = vpack.c.bf16 %v9949_v37, %v9948_v9  ;;  %v18909_v50 = vpop.f32.mrf.mxu0  ;;  %v9951_v32 = vld [vmem:[#allocation2 + $0x322] sm:$0xff]  ;;  %v9952_v9 = vld [vmem:[#allocation2 + $0x332] sm:$0xff]  ;;  %v9953_v37 = vld [vmem:[#allocation2 + $0x33a] sm:$0xff] }
 0x62a   :  { %v9084_v21 = vpop.f32.mrf.mxu1 }
 0x62b   :  { %v18899_v19 = vadd.f32 %v9084_v21, %v18650_v48  ;;  %v18919_v60 = vpop.f32.mrf.mxu0 }
 0x62c   :  { %v13224_v54 = vpop.f32.mrf.mxu1 }
 0x62d   :  { %20313 = vst [vmem:[#allocation10_spill] sm:$0xff] %v18899_v19  ;;  %v18904_v18 = vadd.f32 %v13224_v54, %v18653_v13  ;;  %v9950_v54 = vld [vmem:[#allocation2 + $0x31a] sm:$0xff] }
 0x62e   :  { %v9087_v38 = vpop.f32.mrf.mxu1 }
 0x62f   :  { %20314 = vst [vmem:[#allocation68_spill] sm:$0xff] %v18904_v18  ;;  %v18907_v59 = vadd.f32 %v9087_v38, %v18658_v44  ;;  %v9955_v18 = vld [vmem:[#allocation2 + $0x352] sm:$0xff] }
 0x630   :  { %v13227_v48 = vpop.f32.mrf.mxu1  ;;  %13390 = vmatmul.mubr.msk.bf16.gmra.mxu1 %vm226_vm0, %v9983_v11 }
 0x631   :  { %20315 = vst [vmem:[#allocation66_spill] sm:$0xff] %v18907_v59  ;;  %v18913_v21 = vadd.f32 %v13227_v48, %v18664_v42  ;;  %13393 = vmatprep.mubr.msk.bf16.mxu1 %vm226_vm0, %v9984_v51  ;;  %v9985_v59 = vpack.c.bf16 %v9951_v32, %v9950_v54  ;;  %v9986_v51 = vpack.c.bf16 %v9953_v37, %v9952_v9  ;;  %v18927_v48 = vpop.f32.mrf.mxu0 }
 0x632   :  { %v9100_v19 = vpop.f32.mrf.mxu1 }
 0x633   :  { %20316 = vst [vmem:[#allocation67_spill] sm:$0xff] %v18913_v21  ;;  %v18917_v13 = vadd.f32 %v9100_v19, %v18667_v8  ;;  %v20318_v19 = vld [vmem:[#allocation44_spill] sm:$0xff]  ;;  %v18937_v54 = vpop.f32.mrf.mxu0 }
 0x634   :  { %v13228_v44 = vpop.f32.mrf.mxu1  ;;  %v9954_v21 = vld [vmem:[#allocation2 + $0x34a] sm:$0xff] }
 0x635   :  { %20317 = vst [vmem:[#allocation14_spill] sm:$0xff] %v18917_v13  ;;  %v18922_v38 = vadd.f32 %v13228_v44, %v18670_v5  ;;  %v9987_v32 = vpack.c.bf16 %v9955_v18, %v9954_v21 }
 0x636   :  { %v9103_v11 = vpop.f32.mrf.mxu1 }
 0x637   :  { %v18925_v42 = vadd.f32 %v9103_v11, %v18675_v35  ;;  %v18945_v11 = vpop.f32.mrf.mxu0 }
 0x638   :  { %v13231_v8 = vpop.f32.mrf.mxu1  ;;  %13394 = vmatmul.mubr.msk.bf16.gmra.mxu1 %vm226_vm0, %v9985_v59 }
 0x639   :  { %v18931_v13 = vadd.f32 %v13231_v8, %v20318_v19  ;;  %13397 = vmatprep.mubr.msk.bf16.mxu1 %vm226_vm0, %v9986_v51  ;;  %v20323_v8 = vld [vmem:[#allocation47_spill] sm:$0xff]  ;;  %v18954_v18 = vpop.f32.mrf.mxu0 }
 0x63a   :  { %v9116_v5 = vpop.f32.mrf.mxu1 }
 0x63b   :  { %20319 = vst [vmem:[#allocation15_spill] sm:$0xff] %v18931_v13  ;;  %v18935_v44 = vadd.f32 %v9116_v5, %v18684_v1  ;;  %v20357_v13 = vld [vmem:[#allocation8_spill] sm:$0xff] }
 0x63c   :  { %v13232_v35 = vpop.f32.mrf.mxu1 }
 0x63d   :  { %20320 = vst [vmem:[#allocation70_spill] sm:$0xff] %v18935_v44  ;;  %v18940_v9 = vadd.f32 %v13232_v35, %v18687_v62  ;;  %v20327_v35 = vld [vmem:[#allocation40_spill] sm:$0xff]  ;;  %v20352_v44 = vld [vmem:[#allocation11_spill] sm:$0xff] }
 0x63e   :  { %v9119_v37 = vpop.f32.mrf.mxu1 }
 0x63f   :  { %20321 = vst [vmem:[#allocation72_spill] sm:$0xff] %v18940_v9  ;;  %v18943_v59 = vadd.f32 %v9119_v37, %v18692_v43  ;;  %v20329_v9 = vld [vmem:[#allocation59_spill] sm:$0xff] }
 0x640   :  { %v13235_v51 = vpop.f32.mrf.mxu1  ;;  %13398 = vmatmul.mubr.msk.bf16.gmra.mxu1 %vm226_vm0, %v9987_v32 }
 0x641   :  { %20322 = vst [vmem:[#allocation69_spill] sm:$0xff] %v18943_v59  ;;  %v18949_v19 = vadd.f32 %v13235_v51, %v20323_v8  ;;  %v18962_v59 = vpop.f32.mrf.mxu0 }
 0x642   :  { %v9132_v1 = vpop.f32.mrf.mxu1 }
 0x643   :  { %20324 = vst [vmem:[#allocation71_spill] sm:$0xff] %v18949_v19  ;;  %v18952_v5 = vadd.f32 %v9132_v1, %v18699_v49  ;;  %v18970_v1 = vpop.f32.mrf.mxu0  ;;  %v20335_v19 = vld [vmem:[#allocation58_spill] sm:$0xff] }
 0x644   :  { %v13236_v62 = vpop.f32.mrf.mxu1 }
 0x645   :  { %20325 = vst [vmem:[#allocation73_spill] sm:$0xff] %v18952_v5  ;;  %v18957_v21 = vadd.f32 %v13236_v62, %v18702_v27 }
 0x646   :  { %v9135_v43 = vpop.f32.mrf.mxu1 }
 0x647   :  { %20326 = vst [vmem:[#allocation75_spill] sm:$0xff] %v18957_v21  ;;  %v18960_v37 = vadd.f32 %v9135_v43, %v20327_v35  ;;  %v20333_v21 = vld [vmem:[#allocation3_spill] sm:$0xff]  ;;  %v18978_v35 = vpop.f32.mrf.mxu0 }
 0x648   :  { %v13239_v32 = vpop.f32.mrf.mxu1 }
 0x649   :  { %20328 = vst [vmem:[#allocation74_spill] sm:$0xff] %v18960_v37  ;;  %v18965_v51 = vadd.f32 %v13239_v32, %v20329_v9 }
 0x64a   :  { %v9148_v8 = vpop.f32.mrf.mxu1 }
 0x64b   :  { %20330 = vst [vmem:[#allocation18_spill] sm:$0xff] %v18965_v51  ;;  %v18968_v49 = vadd.f32 %v9148_v8, %v18713_v4  ;;  %v18986_v8 = vpop.f32.mrf.mxu0  ;;  %v20341_v51 = vld [vmem:[#allocation7_spill] sm:$0xff] }
 0x64c   :  { %v13240_v5 = vpop.f32.mrf.mxu1 }
 0x64d   :  { %20331 = vst [vmem:[#allocation76_spill] sm:$0xff] %v18968_v49  ;;  %v18973_v27 = vadd.f32 %v13240_v5, %v18716_v7 }
 0x64e   :  { %v9151_v62 = vpop.f32.mrf.mxu1 }
 0x64f   :  { %20332 = vst [vmem:[#allocation17_spill] sm:$0xff] %v18973_v27  ;;  %v18976_v43 = vadd.f32 %v9151_v62, %v20333_v21  ;;  %v20339_v27 = vld [vmem:[#allocation45_spill] sm:$0xff]  ;;  %v18994_v62 = vpop.f32.mrf.mxu0 }
 0x650   :  { %v13243_v37 = vpop.f32.mrf.mxu1 }
 0x651   :  { %20334 = vst [vmem:[#allocation27_spill] sm:$0xff] %v18976_v43  ;;  %v18981_v9 = vadd.f32 %v13243_v37, %v20335_v19 }
 0x652   :  { %v9164_v32 = vpop.f32.mrf.mxu1 }
 0x653   :  { %20336 = vst [vmem:[#allocation16_spill] sm:$0xff] %v18981_v9  ;;  %v18984_v4 = vadd.f32 %v9164_v32, %v18727_v0  ;;  %v19002_v32 = vpop.f32.mrf.mxu0  ;;  %v20347_v9 = vld [vmem:[#allocation61_spill] sm:$0xff] }
 0x654   :  { %v13244_v49 = vpop.f32.mrf.mxu1 }
 0x655   :  { %20337 = vst [vmem:[#allocation20_spill] sm:$0xff] %v18984_v4  ;;  %v18989_v7 = vadd.f32 %v13244_v49, %v18730_v61 }
 0x656   :  { %v9167_v5 = vpop.f32.mrf.mxu1 }
 0x657   :  { %20338 = vst [vmem:[#allocation32_spill] sm:$0xff] %v18989_v7  ;;  %v18992_v21 = vadd.f32 %v9167_v5, %v20339_v27  ;;  %v20345_v7 = vld [vmem:[#allocation46_spill] sm:$0xff]  ;;  %v19010_v5 = vpop.f32.mrf.mxu0 }
 0x658   :  { %v13247_v43 = vpop.f32.mrf.mxu1 }
 0x659   :  { %20340 = vst [vmem:[#allocation21_spill] sm:$0xff] %v18992_v21  ;;  %v18997_v19 = vadd.f32 %v13247_v43, %v20341_v51 }
 0x65a   :  { %v9180_v37 = vpop.f32.mrf.mxu1 }
 0x65b   :  { %20342 = vst [vmem:[#allocation22_spill] sm:$0xff] %v18997_v19  ;;  %v19000_v0 = vadd.f32 %v9180_v37, %v18741_v26  ;;  %v20349_v19 = vld [vmem:[#allocation4_spill] sm:$0xff]  ;;  %v19018_v37 = vpop.f32.mrf.mxu0 }
 0x65c   :  { %v13248_v4 = vpop.f32.mrf.mxu1  ;;  %20351 = vst [vmem:[#allocation36_spill] sm:$0xff] %v19018_v37  ;;  %v20360_v37 = vld [vmem:[#allocation6_spill] sm:$0xff] }
 0x65d   :  { %20343 = vst [vmem:[#allocation24_spill] sm:$0xff] %v19000_v0  ;;  %v19005_v61 = vadd.f32 %v13248_v4, %v18744_v16 }
 0x65e   :  { %v9183_v49 = vpop.f32.mrf.mxu1 }
 0x65f   :  { %20344 = vst [vmem:[#allocation19_spill] sm:$0xff] %v19005_v61  ;;  %v19008_v27 = vadd.f32 %v9183_v49, %v20345_v7  ;;  %v20354_v61 = vld [vmem:[#allocation48_spill] sm:$0xff]  ;;  %v19026_v49 = vpop.f32.mrf.mxu0 }
 0x660   :  { %v13251_v21 = vpop.f32.mrf.mxu1  ;;  %20356 = vst [vmem:[#allocation38_spill] sm:$0xff] %v19026_v49  ;;  %v20363_v49 = vld [vmem:[#allocation9_spill] sm:$0xff] }
 0x661   :  { %20346 = vst [vmem:[#allocation33_spill] sm:$0xff] %v19008_v27  ;;  %v19013_v51 = vadd.f32 %v13251_v21, %v20347_v9 }
 0x662   :  { %v9196_v43 = vpop.f32.mrf.mxu1 }
 0x663   :  { %20348 = vst [vmem:[#allocation31_spill] sm:$0xff] %v19013_v51  ;;  %v19016_v26 = vadd.f32 %v9196_v43, %v20349_v19  ;;  %v20358_v51 = vld [vmem:[#allocation5_spill] sm:$0xff]  ;;  %v19034_v43 = vpop.f32.mrf.mxu0 }
 0x664   :  { %v13252_v0 = vpop.f32.mrf.mxu1 }
 0x665   :  { %20350 = vst [vmem:[#allocation25_spill] sm:$0xff] %v19016_v26  ;;  %v19021_v16 = vadd.f32 %v13252_v0, %v20352_v44 }
 0x666   :  { %v9199_v4 = vpop.f32.mrf.mxu1 }
 0x667   :  { %20353 = vst [vmem:[#allocation37_spill] sm:$0xff] %v19021_v16  ;;  %v19024_v7 = vadd.f32 %v9199_v4, %v20354_v61  ;;  %v20361_v16 = vld [vmem:[#allocation62_spill] sm:$0xff]  ;;  %v19042_v4 = vpop.f32.mrf.mxu0 }
 0x668   :  { %v13255_v27 = vpop.f32.mrf.mxu1 }
 0x669   :  { %20355 = vst [vmem:[#allocation28_spill] sm:$0xff] %v19024_v7  ;;  %v19029_v9 = vadd.f32 %v13255_v27, %v20357_v13 }
 0x66a   :  { %v9212_v21 = vpop.f32.mrf.mxu1 }
 0x66b   :  { %v19032_v19 = vadd.f32 %v9212_v21, %v20358_v51  ;;  %v19050_v21 = vpop.f32.mrf.mxu0 }
 0x66c   :  { %v13256_v26 = vpop.f32.mrf.mxu1 }
 0x66d   :  { %20359 = vst [vmem:[#allocation60_spill] sm:$0xff] %v19032_v19  ;;  %v19037_v44 = vadd.f32 %v13256_v26, %v20360_v37 }
 0x66e   :  { %v9215_v0 = vpop.f32.mrf.mxu1 }
 0x66f   :  { %v19040_v61 = vadd.f32 %v9215_v0, %v20361_v16  ;;  %v19058_v0 = vpop.f32.mrf.mxu0 }
 0x670   :  { %v13259_v7 = vpop.f32.mrf.mxu1 }
 0x671   :  { %20362 = vst [vmem:[#allocation23_spill] sm:$0xff] %v19040_v61  ;;  %v19045_v13 = vadd.f32 %v13259_v7, %v20363_v49 }
 0x672   :  { %v9228_v27 = vpop.f32.mrf.mxu1 }
 0x673   :  { %v19048_v51 = vadd.f32 %v9228_v27, %v18783_v15  ;;  %v19066_v27 = vpop.f32.mrf.mxu0 }
 0x674   :  { %v13260_v19 = vpop.f32.mrf.mxu1 }
 0x675   :  { %20364 = vst [vmem:[#allocation35_spill] sm:$0xff] %v19048_v51  ;;  %v19053_v26 = vadd.f32 %v13260_v19, %v18786_v2 }
 0x676   :  { %v9231_v37 = vpop.f32.mrf.mxu1 }
 0x677   :  { %v19056_v16 = vadd.f32 %v9231_v37, %v18790_v41  ;;  %v19074_v37 = vpop.f32.mrf.mxu0 }
 0x678   :  { %v13263_v61 = vpop.f32.mrf.mxu1 }
 0x679   :  { %20365 = vst [vmem:[#allocation30_spill] sm:$0xff] %v19056_v16  ;;  %v19061_v7 = vadd.f32 %v13263_v61, %v18794_v39 }
 0x67a   :  { %v9244_v49 = vpop.f32.mrf.mxu1 }
 0x67b   :  { %v19064_v15 = vadd.f32 %v9244_v49, %v18797_v22  ;;  %v19082_v49 = vpop.f32.mrf.mxu0 }
 0x67c   :  { %v13264_v51 = vpop.f32.mrf.mxu1 }
 0x67d   :  { %20366 = vst [vmem:[#allocation49_spill] sm:$0xff] %v19064_v15  ;;  %v19069_v2 = vadd.f32 %v13264_v51, %v18800_v57 }
 0x67e   :  { %v9247_v19 = vpop.f32.mrf.mxu1 }
 0x67f   :  { %v19072_v41 = vadd.f32 %v9247_v19, %v18804_v25  ;;  %v9830_v25 = vadd.f32 %v18817_v36, %v18823_v45  ;;  %v9831_v36 = vadd.f32 %v18837_v55, %v18832_v58  ;;  %v10446_v55 = vld [vmem:[%s19705_s5 + $0x8] sm:$0xff] }
 0x680   :  { %v13267_v16 = vpop.f32.mrf.mxu1 }
 0x681   :  { %20367 = vst [vmem:[#allocation29_spill] sm:$0xff] %v19072_v41  ;;  %v19077_v39 = vadd.f32 %v13267_v16, %v18808_v63  ;;  %v19092_v41 = vpop.f32.mrf.mxu0  ;;  %v9828_v16 = vadd.f32 %v18829_v17, %v18827_v30  ;;  %v9829_v30 = vadd.f32 %v18847_v40, %v18835_v47 }
 0x682   :  { %v9260_v61 = vpop.f32.mrf.mxu1 }
 0x683   :  { %v19080_v22 = vadd.f32 %v9260_v61, %v18811_v34  ;;  %v10447_v34 = vld [vmem:[%s19705_s5 + $0x10] sm:$0xff] }
 0x684   :  { %v13268_v15 = vpop.f32.mrf.mxu1 }
 0x685   :  { %v19085_v57 = vadd.f32 %v13268_v15, %v18814_v28  ;;  %v10445_v15 = vld [vmem:[%s19705_s5] sm:$0xff] }
 0x686   :  { %v9263_v51 = vpop.f32.mrf.mxu1 }
 0x687   :  { %20368 = vst [vmem:[#allocation34_spill] sm:$0xff] %v19085_v57  ;;  %v19090_v19 = vadd.f32 %v9263_v51, %v18820_v52  ;;  %v19104_v51 = vpop.f32.mrf.mxu0  ;;  %v10448_v57 = vld [vmem:[%s19705_s5 + $0x18] sm:$0xff] }
 0x688   :  { %v13339_v63 = vpop.f32.mrf.mxu1 }
 0x689   :  { %20369 = vst [vmem:[#allocation39_spill] sm:$0xff] %v19090_v19  ;;  %v10383_v61 = vadd.f32 %v13339_v63, %v9830_v25  ;;  %v9834_v63 = vadd.f32 %v18855_v14, %v18841_v31 }
 0x68a   :  { %v10126_v28 = vpop.f32.mrf.mxu1 }
 0x68b   :  { %v10511_v52 = vadd.f32 %v10447_v34, %v10383_v61  ;;  %v10381_v45 = vadd.f32 %v10126_v28, %v9828_v16  ;;  %v19124_v34 = vpop.f32.mrf.mxu0  ;;  %v9832_v61 = vadd.f32 %v18865_v56, %v18845_v29 }
 0x68c   :  { %v13340_v19 = vpop.f32.mrf.mxu1 }
 0x68d   :  { %10575 = vst.msk [vmem:[%s19706_s6 + $0x10] sm:$0xff] %vm226_vm0, %v10511_v52  ;;  %v10509_v17 = vadd.f32 %v10445_v15, %v10381_v45  ;;  %v10384_v25 = vadd.f32 %v13340_v19, %v9831_v36  ;;  %v10451_v19 = vld [vmem:[%s19705_s5 + $0x30] sm:$0xff]  ;;  %v9835_v15 = vadd.f32 %v18873_v23, %v18850_v10  ;;  %v19144_v36 = vpop.f32.mrf.mxu0  ;;  %v10452_v45 = vld [vmem:[%s19705_s5 + $0x38] sm:$0xff] }
 0x68e   :  { %v10129_v58 = vpop.f32.mrf.mxu1 }
 0x68f   :  { %10573 = vst.msk [vmem:[%s19706_s6] sm:$0xff] %vm226_vm0, %v10509_v17  ;;  %v10512_v47 = vadd.f32 %v10448_v57, %v10384_v25  ;;  %v10382_v40 = vadd.f32 %v10129_v58, %v9829_v30  ;;  %v10449_v57 = vld [vmem:[%s19705_s5 + $0x20] sm:$0xff]  ;;  %v20370_v30 = vld [vmem:[#allocation12_spill] sm:$0xff] }
 0x690   :  { %v13343_v16 = vpop.f32.mrf.mxu1  ;;  %v9833_v17 = vadd.f32 %v18883_v33, %v20370_v30  ;;  %v10450_v58 = vld [vmem:[%s19705_s5 + $0x28] sm:$0xff] }
 0x691   :  { %10576 = vst.msk [vmem:[%s19706_s6 + $0x18] sm:$0xff] %vm226_vm0, %v10512_v47  ;;  %v10510_v31 = vadd.f32 %v10446_v55, %v10382_v40  ;;  %v10387_v14 = vadd.f32 %v13343_v16, %v9834_v63  ;;  %v9838_v55 = vadd.f32 %v18891_v6, %v18859_v46  ;;  %v19164_v47 = vpop.f32.mrf.mxu0  ;;  %v10455_v16 = vld [vmem:[%s19705_s5 + $0x50] sm:$0xff] }
 0x692   :  { %v10142_v28 = vpop.f32.mrf.mxu1 }
 0x693   :  { %10574 = vst.msk [vmem:[%s19706_s6 + $0x8] sm:$0xff] %vm226_vm0, %v10510_v31  ;;  %v10515_v29 = vadd.f32 %v10451_v19, %v10387_v14  ;;  %v10385_v56 = vadd.f32 %v10142_v28, %v9832_v61  ;;  %v20371_v19 = vld [vmem:[#allocation65_spill] sm:$0xff]  ;;  %v10453_v14 = vld [vmem:[%s19705_s5 + $0x40] sm:$0xff]  ;;  %v9839_v28 = vadd.f32 %v18909_v50, %v18868_v12 }
 0x694   :  { %v13344_v52 = vpop.f32.mrf.mxu1  ;;  %v9836_v61 = vadd.f32 %v18901_v3, %v20371_v19  ;;  %v9843_v19 = vadd.f32 %v18945_v11, %v18886_v53 }
 0x695   :  { %10579 = vst.msk [vmem:[%s19706_s6 + $0x30] sm:$0xff] %vm226_vm0, %v10515_v29  ;;  %v10513_v10 = vadd.f32 %v10449_v57, %v10385_v56  ;;  %v10388_v23 = vadd.f32 %v13344_v52, %v9835_v15  ;;  %v19184_v15 = vpop.f32.mrf.mxu0  ;;  %v10456_v56 = vld [vmem:[%s19705_s5 + $0x58] sm:$0xff]  ;;  %v20372_v52 = vld [vmem:[#allocation63_spill] sm:$0xff] }
 0x696   :  { %v10145_v25 = vpop.f32.mrf.mxu1 }
 0x697   :  { %10577 = vst.msk [vmem:[%s19706_s6 + $0x20] sm:$0xff] %vm226_vm0, %v10513_v10  ;;  %v10516_v33 = vadd.f32 %v10452_v45, %v10388_v23  ;;  %v10386_v63 = vadd.f32 %v10145_v25, %v9833_v17  ;;  %v9837_v45 = vadd.f32 %v18919_v60, %v20372_v52  ;;  %v10454_v17 = vld [vmem:[%s19705_s5 + $0x48] sm:$0xff]  ;;  %v9842_v10 = vadd.f32 %v18927_v48, %v18877_v20  ;;  %v19204_v25 = vpop.f32.mrf.mxu0 }
 0x698   :  { %v13347_v40 = vpop.f32.mrf.mxu1 }
 0x699   :  { %10580 = vst.msk [vmem:[%s19706_s6 + $0x38] sm:$0xff] %vm226_vm0, %v10516_v33  ;;  %v10514_v46 = vadd.f32 %v10450_v58, %v10386_v63  ;;  %v10391_v6 = vadd.f32 %v13347_v40, %v9838_v55  ;;  %v10459_v55 = vld [vmem:[%s19705_s5 + $0x70] sm:$0xff]  ;;  %v20373_v33 = vld [vmem:[#allocation64_spill] sm:$0xff] }
 0x69a   :  { %v10158_v31 = vpop.f32.mrf.mxu1  ;;  %v9840_v63 = vadd.f32 %v18937_v54, %v20373_v33 }
 0x69b   :  { %10578 = vst.msk [vmem:[%s19706_s6 + $0x28] sm:$0xff] %vm226_vm0, %v10514_v46  ;;  %v10519_v3 = vadd.f32 %v10455_v16, %v10391_v6  ;;  %v10389_v57 = vadd.f32 %v10158_v31, %v9836_v61  ;;  %v10457_v16 = vld [vmem:[%s19705_s5 + $0x60] sm:$0xff]  ;;  %v19224_v46 = vpop.f32.mrf.mxu0  ;;  %v10460_v31 = vld [vmem:[%s19705_s5 + $0x78] sm:$0xff] }
 0x69c   :  { %v13348_v29 = vpop.f32.mrf.mxu1 }
 0x69d   :  { %10583 = vst.msk [vmem:[%s19706_s6 + $0x50] sm:$0xff] %vm226_vm0, %v10519_v3  ;;  %v10517_v12 = vadd.f32 %v10453_v14, %v10389_v57  ;;  %v10392_v50 = vadd.f32 %v13348_v29, %v9839_v28  ;;  %v20374_v14 = vld [vmem:[#allocation13_spill] sm:$0xff]  ;;  %v10458_v57 = vld [vmem:[%s19705_s5 + $0x68] sm:$0xff]  ;;  %v9846_v29 = vadd.f32 %v18962_v59, %v18895_v24  ;;  %v19244_v52 = vpop.f32.mrf.mxu0 }
 0x69e   :  { %v10161_v30 = vpop.f32.mrf.mxu1  ;;  %v9841_v28 = vadd.f32 %v18954_v18, %v20374_v14 }
 0x69f   :  { %10581 = vst.msk [vmem:[%s19706_s6 + $0x40] sm:$0xff] %vm226_vm0, %v10517_v12  ;;  %v10520_v60 = vadd.f32 %v10456_v56, %v10392_v50  ;;  %v10390_v23 = vadd.f32 %v10161_v30, %v9837_v45  ;;  %v10463_v12 = vld [vmem:[%s19705_s5 + $0x90] sm:$0xff]  ;;  %v20375_v50 = vld [vmem:[#allocation10_spill] sm:$0xff] }
 0x6a0   :  { %v13351_v58 = vpop.f32.mrf.mxu1  ;;  %v9844_v30 = vadd.f32 %v18970_v1, %v20375_v50  ;;  %v10468_v50 = vld [vmem:[%s19705_s5 + $0xb8] sm:$0xff] }
 0x6a1   :  { %10584 = vst.msk [vmem:[%s19706_s6 + $0x58] sm:$0xff] %vm226_vm0, %v10520_v60  ;;  %v10518_v20 = vadd.f32 %v10454_v17, %v10390_v23  ;;  %v10395_v48 = vadd.f32 %v13351_v58, %v9842_v10  ;;  %v10461_v10 = vld [vmem:[%s19705_s5 + $0x80] sm:$0xff]  ;;  %v20376_v60 = vld [vmem:[#allocation68_spill] sm:$0xff] }
 0x6a2   :  { %v10174_v40 = vpop.f32.mrf.mxu1  ;;  %v9847_v23 = vadd.f32 %v18978_v35, %v20376_v60  ;;  %v20382_v60 = vld [vmem:[#allocation38_spill] sm:$0xff] }
 0x6a3   :  { %10582 = vst.msk [vmem:[%s19706_s6 + $0x48] sm:$0xff] %vm226_vm0, %v10518_v20  ;;  %v10523_v54 = vadd.f32 %v10459_v55, %v10395_v48  ;;  %v10393_v61 = vadd.f32 %v10174_v40, %v9840_v63  ;;  %v19264_v55 = vpop.f32.mrf.mxu0  ;;  %v10464_v63 = vld [vmem:[%s19705_s5 + $0x98] sm:$0xff] }
 0x6a4   :  { %v13352_v6 = vpop.f32.mrf.mxu1  ;;  %v20377_v20 = vld [vmem:[#allocation66_spill] sm:$0xff] }
 0x6a5   :  { %10587 = vst.msk [vmem:[%s19706_s6 + $0x70] sm:$0xff] %vm226_vm0, %v10523_v54  ;;  %v10521_v53 = vadd.f32 %v10457_v16, %v10393_v61  ;;  %v10396_v11 = vadd.f32 %v13352_v6, %v9843_v19  ;;  %v9845_v48 = vadd.f32 %v18986_v8, %v20377_v20  ;;  %v10462_v19 = vld [vmem:[%s19705_s5 + $0x88] sm:$0xff]  ;;  %v20378_v54 = vld [vmem:[#allocation67_spill] sm:$0xff]  ;;  %v20383_v20 = vld [vmem:[#allocation70_spill] sm:$0xff] }
 0x6a6   :  { %v10177_v3 = vpop.f32.mrf.mxu1  ;;  %v9850_v61 = vadd.f32 %v18994_v62, %v20378_v54  ;;  %v20384_v54 = vld [vmem:[#allocation72_spill] sm:$0xff] }
 0x6a7   :  { %10585 = vst.msk [vmem:[%s19706_s6 + $0x60] sm:$0xff] %vm226_vm0, %v10521_v53  ;;  %v10524_v18 = vadd.f32 %v10460_v31, %v10396_v11  ;;  %v10394_v56 = vadd.f32 %v10177_v3, %v9841_v28  ;;  %v19284_v31 = vpop.f32.mrf.mxu0  ;;  %v10467_v28 = vld [vmem:[%s19705_s5 + $0xb0] sm:$0xff]  ;;  %v20379_v53 = vld [vmem:[#allocation14_spill] sm:$0xff] }
 0x6a8   :  { %v13355_v45 = vpop.f32.mrf.mxu1  ;;  %v9848_v11 = vadd.f32 %v19002_v32, %v20379_v53  ;;  %v20385_v53 = vld [vmem:[#allocation69_spill] sm:$0xff] }
 0x6a9   :  { %10588 = vst.msk [vmem:[%s19706_s6 + $0x78] sm:$0xff] %vm226_vm0, %v10524_v18  ;;  %v10522_v24 = vadd.f32 %v10458_v57, %v10394_v56  ;;  %v10399_v59 = vadd.f32 %v13355_v45, %v9846_v29  ;;  %v10465_v29 = vld [vmem:[%s19705_s5 + $0xa0] sm:$0xff]  ;;  %v9851_v18 = vadd.f32 %v19010_v5, %v18922_v38  ;;  %v19304_v45 = vpop.f32.mrf.mxu0 }
 0x6aa   :  { %v10190_v17 = vpop.f32.mrf.mxu1 }
 0x6ab   :  { %10586 = vst.msk [vmem:[%s19706_s6 + $0x68] sm:$0xff] %vm226_vm0, %v10522_v24  ;;  %v10527_v1 = vadd.f32 %v10463_v12, %v10399_v59  ;;  %v10397_v58 = vadd.f32 %v10190_v17, %v9844_v30  ;;  %v20380_v30 = vld [vmem:[#allocation36_spill] sm:$0xff] }
 0x6ac   :  { %v13356_v33 = vpop.f32.mrf.mxu1  ;;  %v9849_v24 = vadd.f32 %v20380_v30, %v18925_v42  ;;  %v10466_v17 = vld [vmem:[%s19705_s5 + $0xa8] sm:$0xff]  ;;  %v20387_v30 = vld [vmem:[#allocation73_spill] sm:$0xff] }
 0x6ad   :  { %10591 = vst.msk [vmem:[%s19706_s6 + $0x90] sm:$0xff] %vm226_vm0, %v10527_v1  ;;  %v10525_v35 = vadd.f32 %v10461_v10, %v10397_v58  ;;  %v10400_v40 = vadd.f32 %v13356_v33, %v9847_v23  ;;  %v20381_v10 = vld [vmem:[#allocation15_spill] sm:$0xff]  ;;  %v19324_v58 = vpop.f32.mrf.mxu0 }
 0x6ae   :  { %v10193_v16 = vpop.f32.mrf.mxu1  ;;  %v9854_v23 = vadd.f32 %v20382_v60, %v20381_v10 }
 0x6af   :  { %10589 = vst.msk [vmem:[%s19706_s6 + $0x80] sm:$0xff] %vm226_vm0, %v10525_v35  ;;  %v10528_v8 = vadd.f32 %v10464_v63, %v10400_v40  ;;  %v10398_v6 = vadd.f32 %v10193_v16, %v9845_v48  ;;  %v10471_v63 = vld [vmem:[%s19705_s5 + $0xd0] sm:$0xff]  ;;  %v9852_v48 = vadd.f32 %v19034_v43, %v20383_v20 }
 0x6b0   :  { %v13359_v14 = vpop.f32.mrf.mxu1 }
 0x6b1   :  { %10592 = vst.msk [vmem:[%s19706_s6 + $0x98] sm:$0xff] %vm226_vm0, %v10528_v8  ;;  %v10526_v62 = vadd.f32 %v10462_v19, %v10398_v6  ;;  %v10403_v3 = vadd.f32 %v13359_v14, %v9850_v61  ;;  %v10469_v19 = vld [vmem:[%s19705_s5 + $0xc0] sm:$0xff]  ;;  %v9855_v61 = vadd.f32 %v19042_v4, %v20384_v54  ;;  %v19344_v6 = vpop.f32.mrf.mxu0 }
 0x6b2   :  { %v10206_v57 = vpop.f32.mrf.mxu1 }
 0x6b3   :  { %10590 = vst.msk [vmem:[%s19706_s6 + $0x88] sm:$0xff] %vm226_vm0, %v10526_v62  ;;  %v10531_v32 = vadd.f32 %v10467_v28, %v10403_v3  ;;  %v10401_v56 = vadd.f32 %v10206_v57, %v9848_v11  ;;  %v10472_v28 = vld [vmem:[%s19705_s5 + $0xd8] sm:$0xff]  ;;  %v9853_v11 = vadd.f32 %v19050_v21, %v20385_v53  ;;  %v10470_v57 = vld [vmem:[%s19705_s5 + $0xc8] sm:$0xff] }
 0x6b4   :  { %v13360_v12 = vpop.f32.mrf.mxu1 }
 0x6b5   :  { %10595 = vst.msk [vmem:[%s19706_s6 + $0xb0] sm:$0xff] %vm226_vm0, %v10531_v32  ;;  %v10529_v38 = vadd.f32 %v10465_v29, %v10401_v56  ;;  %v10404_v5 = vadd.f32 %v13360_v12, %v9851_v18  ;;  %v20386_v29 = vld [vmem:[#allocation71_spill] sm:$0xff]  ;;  %v19364_v56 = vpop.f32.mrf.mxu0 }
 0x6b6   :  { %v10209_v59 = vpop.f32.mrf.mxu1  ;;  %v9858_v18 = vadd.f32 %v19058_v0, %v20386_v29 }
 0x6b7   :  { %10593 = vst.msk [vmem:[%s19706_s6 + $0xa0] sm:$0xff] %vm226_vm0, %v10529_v38  ;;  %v10532_v42 = vadd.f32 %v10468_v50, %v10404_v5  ;;  %v10402_v1 = vadd.f32 %v10209_v59, %v9849_v24  ;;  %v10475_v50 = vld [vmem:[%s19705_s5 + $0xf0] sm:$0xff]  ;;  %v9856_v24 = vadd.f32 %v19066_v27, %v20387_v30  ;;  %v10473_v59 = vld [vmem:[%s19705_s5 + $0xe0] sm:$0xff]  ;;  %v10478_v30 = vld [vmem:[%s19705_s5 + $0x108] sm:$0xff] }
 0x6b8   :  { %v13363_v33 = vpop.f32.mrf.mxu1 }
 0x6b9   :  { %10596 = vst.msk [vmem:[%s19706_s6 + $0xb8] sm:$0xff] %vm226_vm0, %v10532_v42  ;;  %v10530_v35 = vadd.f32 %v10466_v17, %v10402_v1  ;;  %v10407_v40 = vadd.f32 %v13363_v33, %v9854_v23  ;;  %v20388_v17 = vld [vmem:[#allocation75_spill] sm:$0xff]  ;;  %v19384_v23 = vpop.f32.mrf.mxu0  ;;  %v10476_v1 = vld [vmem:[%s19705_s5 + $0xf8] sm:$0xff] }
 0x6ba   :  { %v10222_v16 = vpop.f32.mrf.mxu1  ;;  %v9859_v10 = vadd.f32 %v19074_v37, %v20388_v17  ;;  %v20389_v33 = vld [vmem:[#allocation74_spill] sm:$0xff]  ;;  %v10483_v17 = vld [vmem:[%s19705_s5 + $0x130] sm:$0xff] }
 0x6bb   :  { %10594 = vst.msk [vmem:[%s19706_s6 + $0xa8] sm:$0xff] %vm226_vm0, %v10530_v35  ;;  %v10535_v43 = vadd.f32 %v10471_v63, %v10407_v40  ;;  %v10405_v8 = vadd.f32 %v10222_v16, %v9852_v48  ;;  %v9857_v63 = vadd.f32 %v19082_v49, %v20389_v33  ;;  %v10474_v35 = vld [vmem:[%s19705_s5 + $0xe8] sm:$0xff]  ;;  %v20390_v40 = vld [vmem:[#allocation18_spill] sm:$0xff]  ;;  %v19404_v54 = vpop.f32.mrf.mxu0 }
 0x6bc   :  { %v13364_v14 = vpop.f32.mrf.mxu1  ;;  %v9862_v16 = vadd.f32 %v19092_v41, %v20390_v40  ;;  %v20396_v33 = vld [vmem:[#allocation32_spill] sm:$0xff]  ;;  %v20397_v40 = vld [vmem:[#allocation21_spill] sm:$0xff] }
 0x6bd   :  { %10599 = vst.msk [vmem:[%s19706_s6 + $0xd0] sm:$0xff] %vm226_vm0, %v10535_v43  ;;  %v10533_v4 = vadd.f32 %v10469_v19, %v10405_v8  ;;  %v10408_v62 = vadd.f32 %v13364_v14, %v9855_v61  ;;  %v10479_v43 = vld [vmem:[%s19705_s5 + $0x110] sm:$0xff]  ;;  %v20391_v8 = vld [vmem:[#allocation76_spill] sm:$0xff] }
 0x6be   :  { %v10225_v3 = vpop.f32.mrf.mxu1  ;;  %v9860_v14 = vadd.f32 %v19104_v51, %v20391_v8 }
 0x6bf   :  { %10597 = vst.msk [vmem:[%s19706_s6 + $0xc0] sm:$0xff] %vm226_vm0, %v10533_v4  ;;  %v10536_v21 = vadd.f32 %v10472_v28, %v10408_v62  ;;  %v10406_v32 = vadd.f32 %v10225_v3, %v9853_v11  ;;  %v10477_v11 = vld [vmem:[%s19705_s5 + $0x100] sm:$0xff]  ;;  %v20392_v4 = vld [vmem:[#allocation17_spill] sm:$0xff] }
 0x6c0   :  { %v13367_v12 = vpop.f32.mrf.mxu1  ;;  %v9863_v62 = vadd.f32 %v19124_v34, %v20392_v4 }
 0x6c1   :  { %10600 = vst.msk [vmem:[%s19706_s6 + $0xd8] sm:$0xff] %vm226_vm0, %v10536_v21  ;;  %v10534_v0 = vadd.f32 %v10470_v57, %v10406_v32  ;;  %v10411_v38 = vadd.f32 %v13367_v12, %v9858_v18  ;;  %v19424_v57 = vpop.f32.mrf.mxu0  ;;  %v10480_v18 = vld [vmem:[%s19705_s5 + $0x118] sm:$0xff]  ;;  %v20393_v21 = vld [vmem:[#allocation27_spill] sm:$0xff] }
 0x6c2   :  { %v10238_v5 = vpop.f32.mrf.mxu1  ;;  %v9861_v32 = vadd.f32 %v19144_v36, %v20393_v21 }
 0x6c3   :  { %10598 = vst.msk [vmem:[%s19706_s6 + $0xc8] sm:$0xff] %vm226_vm0, %v10534_v0  ;;  %v10539_v27 = vadd.f32 %v10475_v50, %v10411_v38  ;;  %v10409_v60 = vadd.f32 %v10238_v5, %v9856_v24  ;;  %v20394_v24 = vld [vmem:[#allocation16_spill] sm:$0xff]  ;;  %v19444_v5 = vpop.f32.mrf.mxu0 }
 0x6c4   :  { %v13368_v42 = vpop.f32.mrf.mxu1  ;;  %v9866_v0 = vadd.f32 %v19164_v47, %v20394_v24 }
 0x6c5   :  { %10603 = vst.msk [vmem:[%s19706_s6 + $0xf0] sm:$0xff] %vm226_vm0, %v10539_v27  ;;  %v10537_v37 = vadd.f32 %v10473_v59, %v10409_v60  ;;  %v10412_v20 = vadd.f32 %v13368_v42, %v9859_v10  ;;  %v20395_v10 = vld [vmem:[#allocation20_spill] sm:$0xff] }
 0x6c6   :  { %v10241_v48 = vpop.f32.mrf.mxu1  ;;  %v9864_v27 = vadd.f32 %v19184_v15, %v20395_v10 }
 0x6c7   :  { %10601 = vst.msk [vmem:[%s19706_s6 + $0xe0] sm:$0xff] %vm226_vm0, %v10537_v37  ;;  %v10540_v49 = vadd.f32 %v10476_v1, %v10412_v20  ;;  %v10410_v19 = vadd.f32 %v10241_v48, %v9857_v63  ;;  %v10481_v1 = vld [vmem:[%s19705_s5 + $0x120] sm:$0xff]  ;;  %v9867_v63 = vadd.f32 %v19204_v25, %v20396_v33  ;;  %v19464_v20 = vpop.f32.mrf.mxu0 }
 0x6c8   :  { %v13371_v61 = vpop.f32.mrf.mxu1 }
 0x6c9   :  { %10604 = vst.msk [vmem:[%s19706_s6 + $0xf8] sm:$0xff] %vm226_vm0, %v10540_v49  ;;  %v10538_v41 = vadd.f32 %v10474_v35, %v10410_v19  ;;  %v10415_v28 = vadd.f32 %v13371_v61, %v9862_v16  ;;  %v10484_v35 = vld [vmem:[%s19705_s5 + $0x138] sm:$0xff]  ;;  %v9865_v16 = vadd.f32 %v19224_v46, %v20397_v40  ;;  %v10482_v61 = vld [vmem:[%s19705_s5 + $0x128] sm:$0xff] }
 0x6ca   :  { %v10254_v53 = vpop.f32.mrf.mxu1 }
 0x6cb   :  { %10602 = vst.msk [vmem:[%s19706_s6 + $0xe8] sm:$0xff] %vm226_vm0, %v10538_v41  ;;  %v10543_v51 = vadd.f32 %v10479_v43, %v10415_v28  ;;  %v10413_v3 = vadd.f32 %v10254_v53, %v9860_v14  ;;  %v20398_v43 = vld [vmem:[#allocation22_spill] sm:$0xff]  ;;  %v19484_v41 = vpop.f32.mrf.mxu0  ;;  %v10487_v53 = vld [vmem:[%s19705_s5 + $0x150] sm:$0xff] }
 0x6cc   :  { %v13372_v29 = vpop.f32.mrf.mxu1  ;;  %v9870_v8 = vadd.f32 %v19244_v52, %v20398_v43  ;;  %v10490_v43 = vld [vmem:[%s19705_s5 + $0x168] sm:$0xff] }
 0x6cd   :  { %10607 = vst.msk [vmem:[%s19706_s6 + $0x110] sm:$0xff] %vm226_vm0, %v10543_v51  ;;  %v10541_v34 = vadd.f32 %v10477_v11, %v10413_v3  ;;  %v10416_v12 = vadd.f32 %v13372_v29, %v9863_v62  ;;  %v20399_v11 = vld [vmem:[#allocation24_spill] sm:$0xff]  ;;  %v10485_v3 = vld [vmem:[%s19705_s5 + $0x140] sm:$0xff] }
 0x6ce   :  { %v10257_v50 = vpop.f32.mrf.mxu1  ;;  %v9868_v4 = vadd.f32 %v19264_v55, %v20399_v11  ;;  %v20400_v29 = vld [vmem:[#allocation19_spill] sm:$0xff]  ;;  %v20406_v11 = vld [vmem:[#allocation60_spill] sm:$0xff] }
 0x6cf   :  { %10605 = vst.msk [vmem:[%s19706_s6 + $0x100] sm:$0xff] %vm226_vm0, %v10541_v34  ;;  %v10544_v36 = vadd.f32 %v10480_v18, %v10416_v12  ;;  %v10414_v38 = vadd.f32 %v10257_v50, %v9861_v32  ;;  %v9871_v18 = vadd.f32 %v19284_v31, %v20400_v29  ;;  %v19504_v32 = vpop.f32.mrf.mxu0  ;;  %v10488_v12 = vld [vmem:[%s19705_s5 + $0x158] sm:$0xff]  ;;  %v20401_v50 = vld [vmem:[#allocation33_spill] sm:$0xff] }
 0x6d0   :  { %v13375_v59 = vpop.f32.mrf.mxu1 }
 0x6d1   :  { %10608 = vst.msk [vmem:[%s19706_s6 + $0x118] sm:$0xff] %vm226_vm0, %v10544_v36  ;;  %v10542_v47 = vadd.f32 %v10478_v30, %v10414_v38  ;;  %v10419_v60 = vadd.f32 %v13375_v59, %v9866_v0  ;;  %v9869_v30 = vadd.f32 %v19304_v45, %v20401_v50  ;;  %v10486_v36 = vld [vmem:[%s19705_s5 + $0x148] sm:$0xff]  ;;  %v20402_v38 = vld [vmem:[#allocation31_spill] sm:$0xff]  ;;  %v13326_v10 = vpop.f32.mrf.mxu0 }
 0x6d2   :  { %v10270_v42 = vpop.f32.mrf.mxu1  ;;  %v9874_v59 = vadd.f32 %v19324_v58, %v20402_v38  ;;  %v10494_v50 = vld [vmem:[%s19705_s5 + $0x188] sm:$0xff]  ;;  %v20408_v38 = vld [vmem:[#allocation35_spill] sm:$0xff] }
 0x6d3   :  { %10606 = vst.msk [vmem:[%s19706_s6 + $0x108] sm:$0xff] %vm226_vm0, %v10542_v47  ;;  %v10547_v15 = vadd.f32 %v10483_v17, %v10419_v60  ;;  %v10417_v37 = vadd.f32 %v10270_v42, %v9864_v27  ;;  %v10491_v47 = vld [vmem:[%s19705_s5 + $0x170] sm:$0xff] }
 0x6d4   :  { %v13376_v48 = vpop.f32.mrf.mxu1  ;;  %v20403_v60 = vld [vmem:[#allocation25_spill] sm:$0xff] }
 0x6d5   :  { %10611 = vst.msk [vmem:[%s19706_s6 + $0x130] sm:$0xff] %vm226_vm0, %v10547_v15  ;;  %v10545_v25 = vadd.f32 %v10481_v1, %v10417_v37  ;;  %v10420_v49 = vadd.f32 %v13376_v48, %v9867_v63  ;;  %v9872_v42 = vadd.f32 %v19344_v6, %v20403_v60  ;;  %v10489_v63 = vld [vmem:[%s19705_s5 + $0x160] sm:$0xff]  ;;  %v20404_v15 = vld [vmem:[#allocation37_spill] sm:$0xff] }
 0x6d6   :  { %v10273_v19 = vpop.f32.mrf.mxu1  ;;  %v9875_v37 = vadd.f32 %v19364_v56, %v20404_v15 }
 0x6d7   :  { %10609 = vst.msk [vmem:[%s19706_s6 + $0x120] sm:$0xff] %vm226_vm0, %v10545_v25  ;;  %v10548_v46 = vadd.f32 %v10484_v35, %v10420_v49  ;;  %v10418_v14 = vadd.f32 %v10273_v19, %v9865_v16  ;;  %v9784_v35 = vpop.f32.mrf.mxu0  ;;  %v10492_v16 = vld [vmem:[%s19705_s5 + $0x178] sm:$0xff]  ;;  %v20405_v25 = vld [vmem:[#allocation28_spill] sm:$0xff] }
 0x6d8   :  { %v13379_v28 = vpop.f32.mrf.mxu1  ;;  %v9873_v49 = vadd.f32 %v19384_v23, %v20405_v25  ;;  %v20410_v25 = vld [vmem:[#allocation49_spill] sm:$0xff] }
 0x6d9   :  { %10612 = vst.msk [vmem:[%s19706_s6 + $0x138] sm:$0xff] %vm226_vm0, %v10548_v46  ;;  %v10546_v52 = vadd.f32 %v10482_v61, %v10418_v14  ;;  %v10423_v62 = vadd.f32 %v13379_v28, %v9870_v8  ;;  %v9878_v8 = vadd.f32 %v19404_v54, %v19029_v9  ;;  %v13329_v14 = vpop.f32.mrf.mxu0 }
 0x6da   :  { %v10286_v51 = vpop.f32.mrf.mxu1 }
 0x6db   :  { %10610 = vst.msk [vmem:[%s19706_s6 + $0x128] sm:$0xff] %vm226_vm0, %v10546_v52  ;;  %v10551_v55 = vadd.f32 %v10487_v53, %v10423_v62  ;;  %v10421_v21 = vadd.f32 %v10286_v51, %v9868_v4  ;;  %v10495_v53 = vld [vmem:[%s19705_s5 + $0x190] sm:$0xff]  ;;  %v9876_v4 = vadd.f32 %v19424_v57, %v20406_v11  ;;  %v10493_v62 = vld [vmem:[%s19705_s5 + $0x180] sm:$0xff]  ;;  %v9879_v51 = vadd.f32 %v19444_v5, %v19037_v44  ;;  %v9797_v29 = vpop.f32.mrf.mxu0 }
 0x6dc   :  { %v13380_v34 = vpop.f32.mrf.mxu1 }
 0x6dd   :  { %10615 = vst.msk [vmem:[%s19706_s6 + $0x150] sm:$0xff] %vm226_vm0, %v10551_v55  ;;  %v10549_v31 = vadd.f32 %v10485_v3, %v10421_v21  ;;  %v10424_v24 = vadd.f32 %v13380_v34, %v9871_v18  ;;  %v10496_v55 = vld [vmem:[%s19705_s5 + $0x198] sm:$0xff]  ;;  %v20407_v21 = vld [vmem:[#allocation23_spill] sm:$0xff] }
 0x6de   :  { %v10289_v0 = vpop.f32.mrf.mxu1  ;;  %v9877_v34 = vadd.f32 %v19464_v20, %v20407_v21 }
 0x6df   :  { %10613 = vst.msk [vmem:[%s19706_s6 + $0x140] sm:$0xff] %vm226_vm0, %v10549_v31  ;;  %v10552_v45 = vadd.f32 %v10488_v12, %v10424_v24  ;;  %v10422_v17 = vadd.f32 %v10289_v0, %v9869_v30  ;;  %v9882_v30 = vadd.f32 %v19484_v41, %v19045_v13  ;;  %v13330_v24 = vpop.f32.mrf.mxu0 }
 0x6e0   :  { %v13383_v27 = vpop.f32.mrf.mxu1 }
 0x6e1   :  { %10616 = vst.msk [vmem:[%s19706_s6 + $0x158] sm:$0xff] %vm226_vm0, %v10552_v45  ;;  %v10550_v58 = vadd.f32 %v10486_v36, %v10422_v17  ;;  %v10427_v1 = vadd.f32 %v13383_v27, %v9874_v59  ;;  %v10499_v36 = vld [vmem:[%s19705_s5 + $0x1b0] sm:$0xff]  ;;  %v9880_v59 = vadd.f32 %v19504_v32, %v20408_v38  ;;  %v10497_v17 = vld [vmem:[%s19705_s5 + $0x1a0] sm:$0xff]  ;;  %v9883_v27 = vadd.f32 %v13326_v10, %v19053_v26  ;;  %v9800_v60 = vpop.f32.mrf.mxu0 }
 0x6e2   :  { %v10302_v33 = vpop.f32.mrf.mxu1 }
 0x6e3   :  { %10614 = vst.msk [vmem:[%s19706_s6 + $0x148] sm:$0xff] %vm226_vm0, %v10550_v58  ;;  %v10555_v6 = vadd.f32 %v10491_v47, %v10427_v1  ;;  %v10425_v48 = vadd.f32 %v10302_v33, %v9872_v42  ;;  %v10500_v58 = vld [vmem:[%s19705_s5 + $0x1b8] sm:$0xff] }
 0x6e4   :  { %v13384_v40 = vpop.f32.mrf.mxu1  ;;  %v20409_v1 = vld [vmem:[#allocation30_spill] sm:$0xff] }
 0x6e5   :  { %10619 = vst.msk [vmem:[%s19706_s6 + $0x170] sm:$0xff] %vm226_vm0, %v10555_v6  ;;  %v10553_v56 = vadd.f32 %v10489_v63, %v10425_v48  ;;  %v10428_v19 = vadd.f32 %v13384_v40, %v9875_v37  ;;  %v9881_v33 = vadd.f32 %v9784_v35, %v20409_v1  ;;  %v13333_v63 = vpop.f32.mrf.mxu0  ;;  %v10498_v37 = vld [vmem:[%s19705_s5 + $0x1a8] sm:$0xff]  ;;  %v9886_v6 = vadd.f32 %v13329_v14, %v19061_v7 }
 0x6e6   :  { %v10305_v61 = vpop.f32.mrf.mxu1 }
 0x6e7   :  { %10617 = vst.msk [vmem:[%s19706_s6 + $0x160] sm:$0xff] %vm226_vm0, %v10553_v56  ;;  %v10556_v23 = vadd.f32 %v10492_v16, %v10428_v19  ;;  %v10426_v46 = vadd.f32 %v10305_v61, %v9873_v49  ;;  %v10503_v16 = vld [vmem:[%s19705_s5 + $0x1d0] sm:$0xff]  ;;  %v9884_v49 = vadd.f32 %v9797_v29, %v20410_v25  ;;  %v9813_v19 = vpop.f32.mrf.mxu0 }
 0x6e8   :  { %v13387_v28 = vpop.f32.mrf.mxu1  ;;  %v10507_v29 = vld [vmem:[%s19705_s5 + $0x1f0] sm:$0xff] }
 0x6e9   :  { %10620 = vst.msk [vmem:[%s19706_s6 + $0x178] sm:$0xff] %vm226_vm0, %v10556_v23  ;;  %v10554_v9 = vadd.f32 %v10490_v43, %v10426_v46  ;;  %v10431_v54 = vadd.f32 %v13387_v28, %v9878_v8  ;;  %v10501_v43 = vld [vmem:[%s19705_s5 + $0x1c0] sm:$0xff]  ;;  %v9887_v8 = vadd.f32 %v13330_v24, %v19069_v2  ;;  %v10504_v28 = vld [vmem:[%s19705_s5 + $0x1d8] sm:$0xff] }
 0x6ea   :  { %v10318_v52 = vpop.f32.mrf.mxu1 }
 0x6eb   :  { %10618 = vst.msk [vmem:[%s19706_s6 + $0x168] sm:$0xff] %vm226_vm0, %v10554_v9  ;;  %v10559_v57 = vadd.f32 %v10495_v53, %v10431_v54  ;;  %v10429_v3 = vadd.f32 %v10318_v52, %v9876_v4  ;;  %v20411_v53 = vld [vmem:[#allocation29_spill] sm:$0xff]  ;;  %v13334_v9 = vpop.f32.mrf.mxu0  ;;  %v10502_v52 = vld [vmem:[%s19705_s5 + $0x1c8] sm:$0xff] }
 0x6ec   :  { %v13388_v18 = vpop.f32.mrf.mxu1  ;;  %v9885_v11 = vadd.f32 %v9800_v60, %v20411_v53 }
 0x6ed   :  { %10623 = vst.msk [vmem:[%s19706_s6 + $0x190] sm:$0xff] %vm226_vm0, %v10559_v57  ;;  %v10557_v44 = vadd.f32 %v10493_v62, %v10429_v3  ;;  %v10432_v5 = vadd.f32 %v13388_v18, %v9879_v51  ;;  %v9890_v62 = vadd.f32 %v13333_v63, %v19077_v39  ;;  %v9888_v18 = vadd.f32 %v9813_v19, %v19080_v22  ;;  %v9816_v21 = vpop.f32.mrf.mxu0 }
 0x6ee   :  { %v10321_v12 = vpop.f32.mrf.mxu1 }
 0x6ef   :  { %10621 = vst.msk [vmem:[%s19706_s6 + $0x180] sm:$0xff] %vm226_vm0, %v10557_v44  ;;  %v10560_v20 = vadd.f32 %v10496_v55, %v10432_v5  ;;  %v10430_v31 = vadd.f32 %v10321_v12, %v9877_v34  ;;  %v10505_v44 = vld [vmem:[%s19705_s5 + $0x1e0] sm:$0xff]  ;;  %v20412_v5 = vld [vmem:[#allocation34_spill] sm:$0xff] }
 0x6f0   :  { %v13391_v0 = vpop.f32.mrf.mxu1  ;;  %v9891_v12 = vadd.f32 %v13334_v9, %v20412_v5 }
 0x6f1   :  { %10624 = vst.msk [vmem:[%s19706_s6 + $0x198] sm:$0xff] %vm226_vm0, %v10560_v20  ;;  %v10558_v13 = vadd.f32 %v10494_v50, %v10430_v31  ;;  %v10435_v41 = vadd.f32 %v13391_v0, %v9882_v30  ;;  %v10508_v20 = vld [vmem:[%s19705_s5 + $0x1f8] sm:$0xff]  ;;  %v20413_v31 = vld [vmem:[#allocation39_spill] sm:$0xff] }
 0x6f2   :  { %v10334_v45 = vpop.f32.mrf.mxu1  ;;  %v9889_v24 = vadd.f32 %v9816_v21, %v20413_v31 }
 0x6f3   :  { %10622 = vst.msk [vmem:[%s19706_s6 + $0x188] sm:$0xff] %vm226_vm0, %v10558_v13  ;;  %v10563_v32 = vadd.f32 %v10499_v36, %v10435_v41  ;;  %v10433_v47 = vadd.f32 %v10334_v45, %v9880_v59  ;;  %v10506_v59 = vld [vmem:[%s19705_s5 + $0x1e8] sm:$0xff] }
 0x6f4   :  { %v13392_v42 = vpop.f32.mrf.mxu1 }
 0x6f5   :  { %10627 = vst.msk [vmem:[%s19706_s6 + $0x1b0] sm:$0xff] %vm226_vm0, %v10563_v32  ;;  %v10561_v26 = vadd.f32 %v10497_v17, %v10433_v47  ;;  %v10436_v10 = vadd.f32 %v13392_v42, %v9883_v27 }
 0x6f6   :  { %v10337_v15 = vpop.f32.mrf.mxu1 }
 0x6f7   :  { %10625 = vst.msk [vmem:[%s19706_s6 + $0x1a0] sm:$0xff] %vm226_vm0, %v10561_v26  ;;  %v10564_v48 = vadd.f32 %v10500_v58, %v10436_v10  ;;  %v10434_v35 = vadd.f32 %v10337_v15, %v9881_v33 }
 0x6f8   :  { %v13395_v40 = vpop.f32.mrf.mxu1 }
 0x6f9   :  { %10628 = vst.msk [vmem:[%s19706_s6 + $0x1b8] sm:$0xff] %vm226_vm0, %v10564_v48  ;;  %v10562_v7 = vadd.f32 %v10498_v37, %v10434_v35  ;;  %v10439_v56 = vadd.f32 %v13395_v40, %v9886_v6 }
 0x6fa   :  { %v10350_v61 = vpop.f32.mrf.mxu1 }
 0x6fb   :  { %10626 = vst.msk [vmem:[%s19706_s6 + $0x1a8] sm:$0xff] %vm226_vm0, %v10562_v7  ;;  %v10567_v23 = vadd.f32 %v10503_v16, %v10439_v56  ;;  %v10437_v46 = vadd.f32 %v10350_v61, %v9884_v49 }
 0x6fc   :  { %v13396_v14 = vpop.f32.mrf.mxu1 }
 0x6fd   :  { %10631 = vst.msk [vmem:[%s19706_s6 + $0x1d0] sm:$0xff] %vm226_vm0, %v10567_v23  ;;  %v10565_v2 = vadd.f32 %v10501_v43, %v10437_v46  ;;  %v10440_v4 = vadd.f32 %v13396_v14, %v9887_v8 }
 0x6fe   :  { %v10353_v54 = vpop.f32.mrf.mxu1 }
 0x6ff   :  { %10629 = vst.msk [vmem:[%s19706_s6 + $0x1c0] sm:$0xff] %vm226_vm0, %v10565_v2  ;;  %v10568_v51 = vadd.f32 %v10504_v28, %v10440_v4  ;;  %v10438_v57 = vadd.f32 %v10353_v54, %v9885_v11 }
 0x700   :  { %v13399_v3 = vpop.f32.mrf.mxu1 }
 0x701   :  { %10632 = vst.msk [vmem:[%s19706_s6 + $0x1d8] sm:$0xff] %vm226_vm0, %v10568_v51  ;;  %v10566_v39 = vadd.f32 %v10502_v52, %v10438_v57  ;;  %v10443_v55 = vadd.f32 %v13399_v3, %v9890_v62 }
 0x702   :  { %v10366_v34 = vpop.f32.mrf.mxu1 }
 0x703   :  { %10630 = vst.msk [vmem:[%s19706_s6 + $0x1c8] sm:$0xff] %vm226_vm0, %v10566_v39  ;;  %v10571_v22 = vadd.f32 %v10507_v29, %v10443_v55  ;;  %v10441_v50 = vadd.f32 %v10366_v34, %v9888_v18 }
 0x704   :  { %v13400_v30 = vpop.f32.mrf.mxu1 }
 0x705   :  { %10635 = vst.msk [vmem:[%s19706_s6 + $0x1f0] sm:$0xff] %vm226_vm0, %v10571_v22  ;;  %v10569_v0 = vadd.f32 %v10505_v44, %v10441_v50  ;;  %v10444_v36 = vadd.f32 %v13400_v30, %v9891_v12 }
 0x706   :  { %v10369_v38 = vpop.f32.mrf.mxu1 }
 0x707   :  { %10633 = vst.msk [vmem:[%s19706_s6 + $0x1e0] sm:$0xff] %vm226_vm0, %v10569_v0  ;;  %v10572_v13 = vadd.f32 %v10508_v20, %v10444_v36  ;;  %v10442_v41 = vadd.f32 %v10369_v38, %v9889_v24 }
 0x709   :  { %10636 = vst.msk [vmem:[%s19706_s6 + $0x1f8] sm:$0xff] %vm226_vm0, %v10572_v13  ;;  %v10570_v45 = vadd.f32 %v10506_v59, %v10442_v41 }
 0x70b   :  { %10634 = vst.msk [vmem:[%s19706_s6 + $0x1e8] sm:$0xff] %vm226_vm0, %v10570_v45 }

</bundles_post_ra>
